<compile_context>
chip_gen: v6e
topology: v6e:2x2x1
jax: 0.10.0
libtpu: 0.0.40
codegen_flags: <defaults>
</compile_context>

<pallas_src>
import functools
import numpy as np
import jax
import jax.numpy as jnp
from jax.experimental import pallas as pl
from jax.experimental.pallas import tpu as pltpu

LEAKY_SLOPE = 0.01
BN_EPS = 1e-5
LANE = 128                           # lane-dense channel padding
VMEM_LIMIT_BYTES = 48 * 1024 * 1024  # under v7x's 64 MiB physical VMEM


def _lrelu(x):
    return jnp.where(x >= 0, x, LEAKY_SLOPE * x)


def _conv_im2col(ap, w_ref, H, W, sz, C):
    """ap: (H+sz-1, W+sz-1, C) f32 zero-halo activation (VMEM value).
    w_ref: (sz*sz*C, C) bf16 packed weights, row blocks ordered (dx major, dy minor).
    Single long-K MXU contraction (chained accumulation, no per-tap VPU adds)."""
    cols = []
    for dx in range(sz):                         # only sz-1 sublane-unaligned shifts
        a_dx = ap[:, dx:dx + W, :]               # (Hp, W, C)
        for dy in range(sz):                     # outer-dim slices: cheap
            cols.append(a_dx[dy:dy + H].reshape(H * W, C).astype(jnp.bfloat16))
    big = jnp.concatenate(cols, axis=-1)         # (H*W, sz*sz*C) bf16
    return jnp.dot(big, w_ref[...], preferred_element_type=jnp.float32)


def _partial_stats(v):
    """Per-image (sum, sum-of-squares) rows -> (2, C)."""
    return jnp.concatenate([jnp.sum(v, axis=0, keepdims=True),
                            jnp.sum(v * v, axis=0, keepdims=True)], axis=0)


# --------------------------- Pallas kernels ---------------------------------

def make_stage_a_kernel(H, W, pad, sz, C):
    """[BN0->LReLU->conv_sz] + [folded-BN 1x1 proj] + fused per-image bias (b0 +
    folded proj bias + SN-Linear(style)); emits compact bf16 output + BN partials."""
    def kernel(x_ref, sc0_ref, sh0_ref, w0_ref, wpr_ref, bias_ref,
               o_ref, stat_ref, pad_scr):
        x = x_ref[0]                                              # (H, W, C) bf16
        # conv0 branch: BN0 -> LReLU in f32, zero-halo rebuilt in VMEM scratch
        a0 = _lrelu(x.astype(jnp.float32) * sc0_ref[...] + sh0_ref[...])
        pad_scr[...] = jnp.zeros_like(pad_scr)                    # VMEM-only zero fill
        pad_scr[pad:pad + H, pad:pad + W, :] = a0
        acc = _conv_im2col(pad_scr[...], w0_ref, H, W, sz, C)
        # proj branch: BNp folded into wproj' in the wrapper -> raw x @ wproj'
        acc = acc + jnp.dot(x.reshape(H * W, C), wpr_ref[...],
                            preferred_element_type=jnp.float32)
        # one fused bias row per image: b0 + folded proj bias + style Linear
        x2 = acc + bias_ref[0]
        # partial BN stats of this stage's output (two-pass BN; batch axis stays parallel)
        stat_ref[0] = _partial_stats(x2)
        o_ref[0] = x2.reshape(H, W, C).astype(o_ref.dtype)        # compact, unmasked
    return kernel


def make_stage_b_kernel(H, W, pad, sz, C):
    """BN1 -> LReLU -> conv_sz; compact bf16 output + BN partial stats."""
    def kernel(x_ref, sc_ref, sh_ref, w_ref, b_ref, o_ref, stat_ref, pad_scr):
        a = _lrelu(x_ref[0].astype(jnp.float32) * sc_ref[...] + sh_ref[...])
        pad_scr[...] = jnp.zeros_like(pad_scr)
        pad_scr[pad:pad + H, pad:pad + W, :] = a
        y = _conv_im2col(pad_scr[...], w_ref, H, W, sz, C) + b_ref[...]
        stat_ref[0] = _partial_stats(y)
        o_ref[0] = y.reshape(H, W, C).astype(o_ref.dtype)
    return kernel


def make_upsample_kernel(H, W, C):
    """BNu -> LReLU -> ConvTranspose2d(3, stride=2, padding=1, output_padding=1).
    Sub-pixel decomposition into 4 parity planes, each one matmul against a
    row-packed per-parity weight slab; 4 contiguous unmasked slab stores."""
    def kernel(y_ref, sc_ref, sh_ref, wt_ref, bt_ref, o_ref, pad_scr):
        a = _lrelu(y_ref[0].astype(jnp.float32) * sc_ref[...] + sh_ref[...])
        pad_scr[...] = jnp.zeros_like(pad_scr)
        pad_scr[1:1 + H, 1:1 + W, :] = a
        aq = pad_scr[...]
        a0 = aq[:, 1:1 + W, :]            # center column (no horizontal shift)
        a1 = aq[:, 2:2 + W, :]            # +1 horizontal shift (one sublane relayout)
        cast = lambda v: v.reshape(H * W, C).astype(jnp.bfloat16)
        c00 = cast(a0[1:1 + H]); c10 = cast(a0[2:2 + H])
        c01 = cast(a1[1:1 + H]); c11 = cast(a1[2:2 + H])
        b = bt_ref[...]
        dot = lambda u, w: jnp.dot(u, w, preferred_element_type=jnp.float32)
        ee = dot(c00, wt_ref[0:C]) + b
        eo = dot(jnp.concatenate([c00, c01], -1), wt_ref[C:3 * C]) + b
        oe = dot(jnp.concatenate([c00, c10], -1), wt_ref[3 * C:5 * C]) + b
        oo = dot(jnp.concatenate([c00, c01, c10, c11], -1), wt_ref[5 * C:9 * C]) + b
        o_ref[0, 0 * H:1 * H] = ee.reshape(H, W, C)
        o_ref[0, 1 * H:2 * H] = eo.reshape(H, W, C)
        o_ref[0, 2 * H:3 * H] = oe.reshape(H, W, C)
        o_ref[0, 3 * H:4 * H] = oo.reshape(H, W, C)
    return kernel


# --------------------------- wrapper ------------------------------------------

def _finalize_stats(partial, count):
    tot = jnp.sum(partial, axis=0)                      # (2, C)
    mean = tot[0] / count
    # NOTE: E[x^2]-E[x]^2 in f32; clamp guards small negative values from cancellation.
    var = jnp.maximum(tot[1] / count - mean * mean, 0.0)
    return mean, var


def _bn_scale_shift(gamma, beta, mean, var):
    scale = gamma * jax.lax.rsqrt(var + BN_EPS)
    return scale[None, :], (beta - mean * scale)[None, :]


def up_style_block_forward(x_nchw, style, p, *, sz):
    pad = sz // 2
    N, Cin, H, W = x_nchw.shape
    Cout = p["w0"].shape[-1]
    S = p["wl"].shape[1]
    C = LANE
    assert max(Cin, Cout, S) <= C and sz % 2 == 1 and sz >= 3
    # TODO(synk): add channel (K) tiling for >128 channels and a spatial row-block
    # 'parallel' grid axis (overlapping-halo index_map) for large H*W so that
    # single-image blocks stay within v7x's 64 MiB VMEM and pipeline on v6e.
    count = float(N * H * W)
    Hp, Wp = H + 2 * pad, W + 2 * pad

    xf = x_nchw.astype(jnp.float32)

    # ---- pass-1 input BN stats: plain XLA reductions on the small un-padded input
    mean_x = jnp.mean(xf, axis=(0, 2, 3))
    var_x = jnp.mean(jnp.square(xf - mean_x[None, :, None, None]), axis=(0, 2, 3))

    # NCHW -> NHWC, channels zero-padded to 128 lanes, bf16, compact (no halo in HBM)
    x = jnp.transpose(xf, (0, 2, 3, 1))
    x = jnp.pad(x, ((0, 0), (0, 0), (0, 0), (0, C - Cin))).astype(jnp.bfloat16)

    padvec = lambda v: jnp.pad(v.astype(jnp.float32), (0, C - v.shape[0]))  # (c,)->(C,)
    padrow = lambda v: padvec(v)[None, :]                                   # (c,)->(1,C)

    def pack_conv_weight(w_hwio):
        kh, kw, ci, co = w_hwio.shape
        wpd = jnp.pad(w_hwio.astype(jnp.float32),
                      ((0, 0), (0, 0), (0, C - ci), (0, C - co)))
        # kernel builds im2col columns (dx major, dy minor) -> transpose kh/kw
        return wpd.transpose(1, 0, 2, 3).reshape(kh * kw * C, C).astype(jnp.bfloat16)

    # BN scale/shift for the two branches reading x
    mean_xp, var_xp = padvec(mean_x), padvec(var_x)
    sc0, sh0 = _bn_scale_shift(padvec(p["g_bn0"]), padvec(p["b_bn0"]), mean_xp, var_xp)
    scp, shp = _bn_scale_shift(padvec(p["g_bnp"]), padvec(p["b_bnp"]), mean_xp, var_xp)

    # Fold BNp into the 1x1 proj conv (tiny (C,C) wrapper-side op)
    wproj_full = jnp.pad(p["wproj"].astype(jnp.float32)[0, 0],
                         ((0, C - Cin), (0, C - Cout)))                     # (C, C)
    wpr = (scp[0][:, None] * wproj_full).astype(jnp.bfloat16)
    bproj_fold = shp[0] @ wproj_full + padvec(p["bproj"])                   # (C,)

    # Hoist the SN-Linear style projection; fold with b0 + folded proj bias
    styp = style.astype(jnp.float32) @ p["wl"].T.astype(jnp.float32) + p["bl"]
    styp = jnp.pad(styp, ((0, 0), (0, C - Cout)))                           # (N, C)
    bias_img = (styp + padvec(p["b0"]) + bproj_fold)[:, None, :]            # (N, 1, C)

    w0 = pack_conv_weight(p["w0"])
    w1 = pack_conv_weight(p["w1"])
    b1 = padrow(p["b1"])

    # ConvTranspose weights row-packed per output parity: [ee | eo | oe | oo]
    wt_pad = jnp.pad(p["wt"].astype(jnp.float32),
                     ((0, 0), (0, 0), (0, C - Cout), (0, C - Cout)))
    wt_parity = jnp.concatenate(
        [wt_pad[1, 1],
         wt_pad[1, 2], wt_pad[1, 0],
         wt_pad[2, 1], wt_pad[0, 1],
         wt_pad[2, 2], wt_pad[2, 0], wt_pad[0, 2], wt_pad[0, 0]],
        axis=0).astype(jnp.bfloat16)                                        # (9C, C)
    bt = padrow(p["bt"])

    cparams = pltpu.CompilerParams(
        dimension_semantics=("parallel",),            # batch axis -> both TCs on v7x
        vmem_limit_bytes=VMEM_LIMIT_BYTES)

    img = lambda i: (i, 0, 0, 0)
    bcast2 = lambda i: (0, 0)
    vec_spec = pl.BlockSpec((1, C), bcast2)
    stat_spec = pl.BlockSpec((1, 2, C), lambda i: (i, 0, 0))
    img_spec = pl.BlockSpec((1, H, W, C), img)

    # ---- stage A: [BN0->LReLU->conv_sz] + folded 1x1 proj + fused bias/style
    x2, part2 = pl.pallas_call(
        make_stage_a_kernel(H, W, pad, sz, C),
        out_shape=(jax.ShapeDtypeStruct((N, H, W, C), jnp.bfloat16),
                   jax.ShapeDtypeStruct((N, 2, C), jnp.float32)),
        grid=(N,),
        in_specs=[img_spec, vec_spec, vec_spec,
                  pl.BlockSpec((sz * sz * C, C), bcast2),       # packed w0
                  pl.BlockSpec((C, C), bcast2),                 # folded wproj
                  pl.BlockSpec((1, 1, C), lambda i: (i, 0, 0))],  # per-image bias
        out_specs=(img_spec, stat_spec),
        scratch_shapes=[pltpu.VMEM((Hp, Wp, C), jnp.float32)],
        compiler_params=cparams,
    )(x, sc0, sh0, w0, wpr, bias_img)

    mean2, var2 = _finalize_stats(part2, count)
    sc1, sh1 = _bn_scale_shift(padvec(p["g_bn1"]), padvec(p["b_bn1"]), mean2, var2)

    # ---- stage B: BN1 -> LReLU -> conv_sz
    y2, part3 = pl.pallas_call(
        make_stage_b_kernel(H, W, pad, sz, C),
        out_shape=(jax.ShapeDtypeStruct((N, H, W, C), jnp.bfloat16),
                   jax.ShapeDtypeStruct((N, 2, C), jnp.float32)),
        grid=(N,),
        in_specs=[img_spec, vec_spec, vec_spec,
                  pl.BlockSpec((sz * sz * C, C), bcast2), vec_spec],
        out_specs=(img_spec, stat_spec),
        scratch_shapes=[pltpu.VMEM((Hp, Wp, C), jnp.float32)],
        compiler_params=cparams,
    )(x2, sc1, sh1, w1, b1)

    mean3, var3 = _finalize_stats(part3, count)
    scu, shu = _bn_scale_shift(padvec(p["g_bnu"]), padvec(p["b_bnu"]), mean3, var3)

    # ---- stage C: BNu -> LReLU -> ConvTranspose2d(3, s=2, p=1, op=1) parity planes
    planes = pl.pallas_call(
        make_upsample_kernel(H, W, C),
        out_shape=jax.ShapeDtypeStruct((N, 4 * H, W, C), jnp.float32),
        grid=(N,),
        in_specs=[img_spec, vec_spec, vec_spec,
                  pl.BlockSpec((9 * C, C), bcast2), vec_spec],
        out_specs=pl.BlockSpec((1, 4 * H, W, C), img),
        scratch_shapes=[pltpu.VMEM((H + 2, W + 2, C), jnp.float32)],
        compiler_params=cparams,
    )(y2, scu, shu, wt_parity, bt)

    # crop channels BEFORE the interleave transpose (moves Cout lanes, not 128)
    planes = planes[..., :Cout]
    out = planes.reshape(N, 2, 2, H, W, Cout)
    out = out.transpose(0, 3, 1, 4, 2, 5).reshape(N, 2 * H, 2 * W, Cout)
    # NCHW only because the PyTorch module emits NCHW; keep NHWC if the consumer allows.
    return jnp.transpose(out, (0, 3, 1, 2)), style


# --------------------------- parameter init ----------------------------------

def _spectral_normalize(w):
    """Exact spectral normalization at init (PyTorch power-iterates the same matrix)."""
    w_np = np.asarray(w, np.float64)
    sigma = np.linalg.svd(w_np.reshape(-1, w_np.shape[-1]), compute_uv=False)[0]
    return jnp.asarray(w_np / sigma, jnp.float32)


def init_params(key, in_ch, out_ch, style_ch, sz):
    ks = jax.random.split(key, 18)
    s = 0.2
    nrm = lambda k, shape: s * jax.random.normal(k, shape, jnp.float32)
    return {
        # resup_style_block.conv0 : BN(in) -> LReLU -> SN Conv(in->out, sz, pad=sz//2)
        "g_bn0": 1.0 + nrm(ks[0], (in_ch,)), "b_bn0": nrm(ks[1], (in_ch,)),
        "w0": _spectral_normalize(nrm(ks[2], (sz, sz, in_ch, out_ch))),
        "b0": nrm(ks[3], (out_ch,)),
        # resup_style_block.proj : BN(in) -> SN Conv(in->out, 1)
        "g_bnp": 1.0 + nrm(ks[4], (in_ch,)), "b_bnp": nrm(ks[5], (in_ch,)),
        "wproj": _spectral_normalize(nrm(ks[6], (1, 1, in_ch, out_ch))),
        "bproj": nrm(ks[7], (out_ch,)),
        # bnconv_style.project_style : SN Linear(style -> out), torch layout (out, in)
        "wl": _spectral_normalize(nrm(ks[8], (out_ch, style_ch))),
        "bl": nrm(ks[9], (out_ch,)),
        # bnconv_style.conv : BN(out) -> LReLU -> SN Conv(out->out, sz)
        "g_bn1": 1.0 + nrm(ks[10], (out_ch,)), "b_bn1": nrm(ks[11], (out_ch,)),
        "w1": _spectral_normalize(nrm(ks[12], (sz, sz, out_ch, out_ch))),
        "b1": nrm(ks[13], (out_ch,)),
        # upsample : BN(out) -> LReLU -> SN ConvTranspose2d(out->out, 3, s=2, p=1, op=1)
        "g_bnu": 1.0 + nrm(ks[14], (out_ch,)), "b_bnu": nrm(ks[15], (out_ch,)),
        "wt": _spectral_normalize(nrm(ks[16], (3, 3, out_ch, out_ch))),
        "bt": nrm(ks[17], (out_ch,)),
    }


# --------------------------- pure-JAX reference -------------------------------

def ref_forward(x_nchw, style, p, sz):
    pad = sz // 2
    x = jnp.transpose(x_nchw, (0, 2, 3, 1)).astype(jnp.float32)

    def bn(y, g, b):
        m = jnp.mean(y, axis=(0, 1, 2), keepdims=True)
        v = jnp.mean((y - m) ** 2, axis=(0, 1, 2), keepdims=True)
        return (y - m) * jax.lax.rsqrt(v + BN_EPS) * g + b

    def lrelu(y):
        return jnp.where(y >= 0, y, LEAKY_SLOPE * y)

    def conv(xx, w, b, padc):
        y = jax.lax.conv_general_dilated(
            xx, w, (1, 1), [(padc, padc), (padc, padc)],
            dimension_numbers=("NHWC", "HWIO", "NHWC"))
        return y + b

    y0 = conv(lrelu(bn(x, p["g_bn0"], p["b_bn0"])), p["w0"], p["b0"], pad)
    yp = conv(bn(x, p["g_bnp"], p["b_bnp"]), p["wproj"], p["bproj"], 0)
    y1 = y0 + yp + (style @ p["wl"].T + p["bl"])[:, None, None, :]
    y2 = conv(lrelu(bn(y1, p["g_bn1"], p["b_bn1"])), p["w1"], p["b1"], pad)
    a = lrelu(bn(y2, p["g_bnu"], p["b_bnu"]))
    # ConvTranspose2d(3, s=2, p=1, op=1) == dilated conv with flipped kernel, pad (1,2)
    y3 = jax.lax.conv_general_dilated(
        a, p["wt"][::-1, ::-1, :, :], (1, 1), [(1, 2), (1, 2)], lhs_dilation=(2, 2),
        dimension_numbers=("NHWC", "HWIO", "NHWC")) + p["bt"]
    return jnp.transpose(y3, (0, 3, 1, 2)), style


# --------------------------- main ---------------------------------------------

if __name__ == "__main__":
    in_ch, out_ch, style_ch, sz = 4, 8, 8, 3
    N, H, W = 2, 16, 16

    key = jax.random.PRNGKey(0)
    k_x, k_s, k_p = jax.random.split(key, 3)
    x = jax.random.normal(k_x, (N, in_ch, H, W), jnp.float32)     # NCHW like PyTorch
    style = jax.random.normal(k_s, (N, style_ch), jnp.float32)
    params = init_params(k_p, in_ch, out_ch, style_ch, sz)

    fwd = jax.jit(functools.partial(up_style_block_forward, sz=sz))
    out, style_out = fwd(x, style, params)
    out = jax.block_until_ready(out)
    assert out.shape == (N, out_ch, 2 * H, 2 * W), out.shape

    ref, _ = ref_forward(x, style, params, sz)
    ref = jax.block_until_ready(ref)
    # bf16 MXU operands + bf16 HBM intermediates -> slightly wider tolerance than
    # the all-f32 build; BN stats / scale-shift remain f32.
    np.testing.assert_allclose(np.asarray(out), np.asarray(ref), rtol=3e-2, atol=3e-2)

    print("KERNEL_OK")
</pallas_src>

<mosaic_0001>
module attributes {stable_mosaic.version = 11 : i64} {
  func.func @kernel(%arg0: i32, %arg1: memref<1x16x16x128xbf16, #tpu.memory_space<vmem>>, %arg2: memref<1x128xf32, #tpu.memory_space<vmem>>, %arg3: memref<1x128xf32, #tpu.memory_space<vmem>>, %arg4: memref<1152x128xbf16, #tpu.memory_space<vmem>>, %arg5: memref<128x128xbf16, #tpu.memory_space<vmem>>, %arg6: memref<1x1x128xf32, #tpu.memory_space<vmem>>, %arg7: memref<1x16x16x128xbf16, #tpu.memory_space<vmem>>, %arg8: memref<1x2x128xf32, #tpu.memory_space<vmem>>, %arg9: memref<18x18x128xf32, #tpu.memory_space<vmem>>) attributes {dimension_semantics = [#tpu.dimension_semantics<parallel>], iteration_bounds = array<i64: 2>, scalar_prefetch = 0 : i64, scratch_operands = 1 : i64, tpu.core_type = #tpu.core_type<tc>, window_params = [{transform_indices = @transform_0, window_bounds = array<i64: 1, 16, 16, 128>}, {pipeline_mode = #tpu.pipeline_mode<synchronous>, transform_indices = @transform_1, window_bounds = array<i64: 1, 128>}, {pipeline_mode = #tpu.pipeline_mode<synchronous>, transform_indices = @transform_2, window_bounds = array<i64: 1, 128>}, {pipeline_mode = #tpu.pipeline_mode<synchronous>, transform_indices = @transform_3, window_bounds = array<i64: 1152, 128>}, {pipeline_mode = #tpu.pipeline_mode<synchronous>, transform_indices = @transform_4, window_bounds = array<i64: 128, 128>}, {transform_indices = @transform_5, window_bounds = array<i64: 1, 1, 128>}, {transform_indices = @transform_6, window_bounds = array<i64: 1, 16, 16, 128>}, {transform_indices = @transform_7, window_bounds = array<i64: 1, 2, 128>}]} {
    %c0 = arith.constant 0 : index
    %c0_0 = arith.constant 0 : index
    %c0_1 = arith.constant 0 : index
    %c0_2 = arith.constant 0 : index
    %0 = vector.load %arg1[%c0, %c0_0, %c0_1, %c0_2] : memref<1x16x16x128xbf16, #tpu.memory_space<vmem>>, vector<1x16x16x128xbf16>
    %1 = vector.shape_cast %0 : vector<1x16x16x128xbf16> to vector<16x16x128xbf16>
    %2 = arith.extf %1 : vector<16x16x128xbf16> to vector<16x16x128xf32>
    %c0_3 = arith.constant 0 : index
    %c0_4 = arith.constant 0 : index
    %3 = vector.load %arg2[%c0_3, %c0_4] : memref<1x128xf32, #tpu.memory_space<vmem>>, vector<1x128xf32>
    %4 = vector.shape_cast %3 : vector<1x128xf32> to vector<1x1x128xf32>
    %5 = vector.broadcast %4 : vector<1x1x128xf32> to vector<16x16x128xf32>
    %6 = arith.mulf %2, %5 : vector<16x16x128xf32>
    %c0_5 = arith.constant 0 : index
    %c0_6 = arith.constant 0 : index
    %7 = vector.load %arg3[%c0_5, %c0_6] : memref<1x128xf32, #tpu.memory_space<vmem>>, vector<1x128xf32>
    %8 = vector.shape_cast %7 : vector<1x128xf32> to vector<1x1x128xf32>
    %9 = vector.broadcast %8 : vector<1x1x128xf32> to vector<16x16x128xf32>
    %10 = arith.addf %6, %9 : vector<16x16x128xf32>
    %cst = arith.constant 0.000000e+00 : f32
    %11 = vector.broadcast %cst : f32 to vector<16x16x128xf32>
    %12 = arith.cmpf oge, %10, %11 : vector<16x16x128xf32>
    %cst_7 = arith.constant 0.00999999977 : f32
    %13 = vector.broadcast %cst_7 : f32 to vector<16x16x128xf32>
    %14 = arith.mulf %13, %10 : vector<16x16x128xf32>
    %15 = arith.select %12, %10, %14 : vector<16x16x128xi1>, vector<16x16x128xf32>
    %cst_8 = arith.constant 0.000000e+00 : f32
    %16 = vector.broadcast %cst_8 : f32 to vector<18x18x128xf32>
    %c0_9 = arith.constant 0 : index
    %c0_10 = arith.constant 0 : index
    %c0_11 = arith.constant 0 : index
    %17 = vector.load %arg9[%c0_9, %c0_10, %c0_11] : memref<18x18x128xf32, #tpu.memory_space<vmem>>, vector<18x18x128xf32>
    tpu.vector_store %arg9[%c0_9, %c0_10, %c0_11], %16 {strides = array<i32>} : memref<18x18x128xf32, #tpu.memory_space<vmem>>, vector<18x18x128xf32>,
    %c1 = arith.constant 1 : index
    %c1_12 = arith.constant 1 : index
    %c0_13 = arith.constant 0 : index
    %18 = vector.load %arg9[%c1, %c1_12, %c0_13] : memref<18x18x128xf32, #tpu.memory_space<vmem>>, vector<16x16x128xf32>
    tpu.vector_store %arg9[%c1, %c1_12, %c0_13], %15 {strides = array<i32>} : memref<18x18x128xf32, #tpu.memory_space<vmem>>, vector<16x16x128xf32>,
    %c0_14 = arith.constant 0 : index
    %c0_15 = arith.constant 0 : index
    %c0_16 = arith.constant 0 : index
    %19 = vector.load %arg9[%c0_14, %c0_15, %c0_16] : memref<18x18x128xf32, #tpu.memory_space<vmem>>, vector<18x18x128xf32>
    %20 = vector.extract_strided_slice %19 {offsets = [0, 0, 0], sizes = [18, 16, 128], strides = [1, 1, 1]} : vector<18x18x128xf32> to vector<18x16x128xf32>
    %21 = vector.extract_strided_slice %20 {offsets = [0, 0, 0], sizes = [16, 16, 128], strides = [1, 1, 1]} : vector<18x16x128xf32> to vector<16x16x128xf32>
    %22 = vector.shape_cast %21 : vector<16x16x128xf32> to vector<256x128xf32>
    %23 = arith.truncf %22 : vector<256x128xf32> to vector<256x128xbf16>
    %24 = vector.extract_strided_slice %20 {offsets = [1, 0, 0], sizes = [16, 16, 128], strides = [1, 1, 1]} : vector<18x16x128xf32> to vector<16x16x128xf32>
    %25 = vector.shape_cast %24 : vector<16x16x128xf32> to vector<256x128xf32>
    %26 = arith.truncf %25 : vector<256x128xf32> to vector<256x128xbf16>
    %27 = vector.extract_strided_slice %20 {offsets = [2, 0, 0], sizes = [16, 16, 128], strides = [1, 1, 1]} : vector<18x16x128xf32> to vector<16x16x128xf32>
    %28 = vector.shape_cast %27 : vector<16x16x128xf32> to vector<256x128xf32>
    %29 = arith.truncf %28 : vector<256x128xf32> to vector<256x128xbf16>
    %30 = vector.extract_strided_slice %19 {offsets = [0, 1, 0], sizes = [18, 16, 128], strides = [1, 1, 1]} : vector<18x18x128xf32> to vector<18x16x128xf32>
    %31 = vector.extract_strided_slice %30 {offsets = [0, 0, 0], sizes = [16, 16, 128], strides = [1, 1, 1]} : vector<18x16x128xf32> to vector<16x16x128xf32>
    %32 = vector.shape_cast %31 : vector<16x16x128xf32> to vector<256x128xf32>
    %33 = arith.truncf %32 : vector<256x128xf32> to vector<256x128xbf16>
    %34 = vector.extract_strided_slice %30 {offsets = [1, 0, 0], sizes = [16, 16, 128], strides = [1, 1, 1]} : vector<18x16x128xf32> to vector<16x16x128xf32>
    %35 = vector.shape_cast %34 : vector<16x16x128xf32> to vector<256x128xf32>
    %36 = arith.truncf %35 : vector<256x128xf32> to vector<256x128xbf16>
    %37 = vector.extract_strided_slice %30 {offsets = [2, 0, 0], sizes = [16, 16, 128], strides = [1, 1, 1]} : vector<18x16x128xf32> to vector<16x16x128xf32>
    %38 = vector.shape_cast %37 : vector<16x16x128xf32> to vector<256x128xf32>
    %39 = arith.truncf %38 : vector<256x128xf32> to vector<256x128xbf16>
    %40 = vector.extract_strided_slice %19 {offsets = [0, 2, 0], sizes = [18, 16, 128], strides = [1, 1, 1]} : vector<18x18x128xf32> to vector<18x16x128xf32>
    %41 = vector.extract_strided_slice %40 {offsets = [0, 0, 0], sizes = [16, 16, 128], strides = [1, 1, 1]} : vector<18x16x128xf32> to vector<16x16x128xf32>
    %42 = vector.shape_cast %41 : vector<16x16x128xf32> to vector<256x128xf32>
    %43 = arith.truncf %42 : vector<256x128xf32> to vector<256x128xbf16>
    %44 = vector.extract_strided_slice %40 {offsets = [1, 0, 0], sizes = [16, 16, 128], strides = [1, 1, 1]} : vector<18x16x128xf32> to vector<16x16x128xf32>
    %45 = vector.shape_cast %44 : vector<16x16x128xf32> to vector<256x128xf32>
    %46 = arith.truncf %45 : vector<256x128xf32> to vector<256x128xbf16>
    %47 = vector.extract_strided_slice %40 {offsets = [2, 0, 0], sizes = [16, 16, 128], strides = [1, 1, 1]} : vector<18x16x128xf32> to vector<16x16x128xf32>
    %48 = vector.shape_cast %47 : vector<16x16x128xf32> to vector<256x128xf32>
    %49 = arith.truncf %48 : vector<256x128xf32> to vector<256x128xbf16>
    %50 = tpu.concatenate %23, %26, %29, %33, %36, %39, %43, %46, %49 in 1 : vector<256x128xbf16>, vector<256x128xbf16>, vector<256x128xbf16>, vector<256x128xbf16>, vector<256x128xbf16>, vector<256x128xbf16>, vector<256x128xbf16>, vector<256x128xbf16>, vector<256x128xbf16> -> vector<256x1152xbf16>
    %c0_17 = arith.constant 0 : index
    %c0_18 = arith.constant 0 : index
    %51 = vector.load %arg4[%c0_17, %c0_18] : memref<1152x128xbf16, #tpu.memory_space<vmem>>, vector<1152x128xbf16>
    %cst_19 = arith.constant dense<0.000000e+00> : vector<256x128xf32>
    %52 = tpu.matmul %50, %51, %cst_19 {dimension_numbers = #tpu.dot_dimension_numbers<[1], [0], [0], [1], [0, 0, 1, 1], [], []>} : vector<256x1152xbf16>, vector<1152x128xbf16>, vector<256x128xf32> -> vector<256x128xf32>
    %53 = vector.shape_cast %1 : vector<16x16x128xbf16> to vector<256x128xbf16>
    %c0_20 = arith.constant 0 : index
    %c0_21 = arith.constant 0 : index
    %54 = vector.load %arg5[%c0_20, %c0_21] : memref<128x128xbf16, #tpu.memory_space<vmem>>, vector<128x128xbf16>
    %cst_22 = arith.constant dense<0.000000e+00> : vector<256x128xf32>
    %55 = tpu.matmul %53, %54, %cst_22 {dimension_numbers = #tpu.dot_dimension_numbers<[1], [0], [0], [1], [0, 0, 1, 1], [], []>} : vector<256x128xbf16>, vector<128x128xbf16>, vector<256x128xf32> -> vector<256x128xf32>
    %56 = arith.addf %52, %55 : vector<256x128xf32>
    %c0_23 = arith.constant 0 : index
    %c0_24 = arith.constant 0 : index
    %c0_25 = arith.constant 0 : index
    %57 = vector.load %arg6[%c0_23, %c0_24, %c0_25] : memref<1x1x128xf32, #tpu.memory_space<vmem>>, vector<1x1x128xf32>
    %58 = vector.shape_cast %57 : vector<1x1x128xf32> to vector<1x128xf32>
    %59 = vector.broadcast %58 : vector<1x128xf32> to vector<256x128xf32>
    %60 = arith.addf %56, %59 : vector<256x128xf32>
    %cst_26 = arith.constant dense<0.000000e+00> : vector<128xf32>
    %61 = vector.multi_reduction <add>, %60, %cst_26 [0] : vector<256x128xf32> to vector<128xf32>
    %62 = vector.shape_cast %61 : vector<128xf32> to vector<1x128xf32>
    %63 = arith.mulf %60, %60 : vector<256x128xf32>
    %cst_27 = arith.constant dense<0.000000e+00> : vector<128xf32>
    %64 = vector.multi_reduction <add>, %63, %cst_27 [0] : vector<256x128xf32> to vector<128xf32>
    %65 = vector.shape_cast %64 : vector<128xf32> to vector<1x128xf32>
    %66 = tpu.concatenate %62, %65 in 0 : vector<1x128xf32>, vector<1x128xf32> -> vector<2x128xf32>
    %c0_28 = arith.constant 0 : index
    %c0_29 = arith.constant 0 : index
    %c0_30 = arith.constant 0 : index
    %67 = vector.load %arg8[%c0_28, %c0_29, %c0_30] : memref<1x2x128xf32, #tpu.memory_space<vmem>>, vector<1x2x128xf32>
    %68 = vector.shape_cast %67 : vector<1x2x128xf32> to vector<2x128xf32>
    %69 = vector.shape_cast %66 : vector<2x128xf32> to vector<1x2x128xf32>
    tpu.vector_store %arg8[%c0_28, %c0_29, %c0_30], %69 {strides = array<i32>} : memref<1x2x128xf32, #tpu.memory_space<vmem>>, vector<1x2x128xf32>,
    %70 = vector.shape_cast %60 : vector<256x128xf32> to vector<16x16x128xf32>
    %71 = arith.truncf %70 : vector<16x16x128xf32> to vector<16x16x128xbf16>
    %c0_31 = arith.constant 0 : index
    %c0_32 = arith.constant 0 : index
    %c0_33 = arith.constant 0 : index
    %c0_34 = arith.constant 0 : index
    %72 = vector.load %arg7[%c0_31, %c0_32, %c0_33, %c0_34] : memref<1x16x16x128xbf16, #tpu.memory_space<vmem>>, vector<1x16x16x128xbf16>
    %73 = vector.shape_cast %72 : vector<1x16x16x128xbf16> to vector<16x16x128xbf16>
    %74 = vector.shape_cast %71 : vector<16x16x128xbf16> to vector<1x16x16x128xbf16>
    tpu.vector_store %arg7[%c0_31, %c0_32, %c0_33, %c0_34], %74 {strides = array<i32>} : memref<1x16x16x128xbf16, #tpu.memory_space<vmem>>, vector<1x16x16x128xbf16>,
    return
  }
  func.func @transform_0(%arg0: i32) -> (i32, i32, i32, i32) {
    %c0_i32 = arith.constant 0 : i32
    %c0_i32_0 = arith.constant 0 : i32
    %c0_i32_1 = arith.constant 0 : i32
    %c0_i32_2 = arith.constant 0 : i32
    return %arg0, %c0_i32, %c0_i32_0, %c0_i32_1 : i32, i32, i32, i32
  }
  func.func @transform_1(%arg0: i32) -> (i32, i32) {
    %c0_i32 = arith.constant 0 : i32
    %c0_i32_0 = arith.constant 0 : i32
    %c0_i32_1 = arith.constant 0 : i32
    return %c0_i32, %c0_i32_0 : i32, i32
  }
  func.func @transform_2(%arg0: i32) -> (i32, i32) {
    %c0_i32 = arith.constant 0 : i32
    %c0_i32_0 = arith.constant 0 : i32
    %c0_i32_1 = arith.constant 0 : i32
    return %c0_i32, %c0_i32_0 : i32, i32
  }
  func.func @transform_3(%arg0: i32) -> (i32, i32) {
    %c0_i32 = arith.constant 0 : i32
    %c0_i32_0 = arith.constant 0 : i32
    %c0_i32_1 = arith.constant 0 : i32
    return %c0_i32, %c0_i32_0 : i32, i32
  }
  func.func @transform_4(%arg0: i32) -> (i32, i32) {
    %c0_i32 = arith.constant 0 : i32
    %c0_i32_0 = arith.constant 0 : i32
    %c0_i32_1 = arith.constant 0 : i32
    return %c0_i32, %c0_i32_0 : i32, i32
  }
  func.func @transform_5(%arg0: i32) -> (i32, i32, i32) {
    %c0_i32 = arith.constant 0 : i32
    %c0_i32_0 = arith.constant 0 : i32
    %c0_i32_1 = arith.constant 0 : i32
    return %arg0, %c0_i32, %c0_i32_0 : i32, i32, i32
  }
  func.func @transform_6(%arg0: i32) -> (i32, i32, i32, i32) {
    %c0_i32 = arith.constant 0 : i32
    %c0_i32_0 = arith.constant 0 : i32
    %c0_i32_1 = arith.constant 0 : i32
    %c0_i32_2 = arith.constant 0 : i32
    return %arg0, %c0_i32, %c0_i32_0, %c0_i32_1 : i32, i32, i32, i32
  }
  func.func @transform_7(%arg0: i32) -> (i32, i32, i32) {
    %c0_i32 = arith.constant 0 : i32
    %c0_i32_0 = arith.constant 0 : i32
    %c0_i32_1 = arith.constant 0 : i32
    return %arg0, %c0_i32, %c0_i32_0 : i32, i32, i32
  }
}

module attributes {stable_mosaic.version = 11 : i64} {
  func.func @kernel(%arg0: i32, %arg1: memref<1x16x16x128xbf16, #tpu.memory_space<vmem>>, %arg2: memref<1x128xf32, #tpu.memory_space<vmem>>, %arg3: memref<1x128xf32, #tpu.memory_space<vmem>>, %arg4: memref<1152x128xbf16, #tpu.memory_space<vmem>>, %arg5: memref<1x128xf32, #tpu.memory_space<vmem>>, %arg6: memref<1x16x16x128xbf16, #tpu.memory_space<vmem>>, %arg7: memref<1x2x128xf32, #tpu.memory_space<vmem>>, %arg8: memref<18x18x128xf32, #tpu.memory_space<vmem>>) attributes {dimension_semantics = [#tpu.dimension_semantics<parallel>], iteration_bounds = array<i64: 2>, scalar_prefetch = 0 : i64, scratch_operands = 1 : i64, tpu.core_type = #tpu.core_type<tc>, window_params = [{transform_indices = @transform_0, window_bounds = array<i64: 1, 16, 16, 128>}, {pipeline_mode = #tpu.pipeline_mode<synchronous>, transform_indices = @transform_1, window_bounds = array<i64: 1, 128>}, {pipeline_mode = #tpu.pipeline_mode<synchronous>, transform_indices = @transform_2, window_bounds = array<i64: 1, 128>}, {pipeline_mode = #tpu.pipeline_mode<synchronous>, transform_indices = @transform_3, window_bounds = array<i64: 1152, 128>}, {pipeline_mode = #tpu.pipeline_mode<synchronous>, transform_indices = @transform_4, window_bounds = array<i64: 1, 128>}, {transform_indices = @transform_5, window_bounds = array<i64: 1, 16, 16, 128>}, {transform_indices = @transform_6, window_bounds = array<i64: 1, 2, 128>}]} {
    %c0 = arith.constant 0 : index
    %c0_0 = arith.constant 0 : index
    %c0_1 = arith.constant 0 : index
    %c0_2 = arith.constant 0 : index
    %0 = vector.load %arg1[%c0, %c0_0, %c0_1, %c0_2] : memref<1x16x16x128xbf16, #tpu.memory_space<vmem>>, vector<1x16x16x128xbf16>
    %1 = vector.shape_cast %0 : vector<1x16x16x128xbf16> to vector<16x16x128xbf16>
    %2 = arith.extf %1 : vector<16x16x128xbf16> to vector<16x16x128xf32>
    %c0_3 = arith.constant 0 : index
    %c0_4 = arith.constant 0 : index
    %3 = vector.load %arg2[%c0_3, %c0_4] : memref<1x128xf32, #tpu.memory_space<vmem>>, vector<1x128xf32>
    %4 = vector.shape_cast %3 : vector<1x128xf32> to vector<1x1x128xf32>
    %5 = vector.broadcast %4 : vector<1x1x128xf32> to vector<16x16x128xf32>
    %6 = arith.mulf %2, %5 : vector<16x16x128xf32>
    %c0_5 = arith.constant 0 : index
    %c0_6 = arith.constant 0 : index
    %7 = vector.load %arg3[%c0_5, %c0_6] : memref<1x128xf32, #tpu.memory_space<vmem>>, vector<1x128xf32>
    %8 = vector.shape_cast %7 : vector<1x128xf32> to vector<1x1x128xf32>
    %9 = vector.broadcast %8 : vector<1x1x128xf32> to vector<16x16x128xf32>
    %10 = arith.addf %6, %9 : vector<16x16x128xf32>
    %cst = arith.constant 0.000000e+00 : f32
    %11 = vector.broadcast %cst : f32 to vector<16x16x128xf32>
    %12 = arith.cmpf oge, %10, %11 : vector<16x16x128xf32>
    %cst_7 = arith.constant 0.00999999977 : f32
    %13 = vector.broadcast %cst_7 : f32 to vector<16x16x128xf32>
    %14 = arith.mulf %13, %10 : vector<16x16x128xf32>
    %15 = arith.select %12, %10, %14 : vector<16x16x128xi1>, vector<16x16x128xf32>
    %cst_8 = arith.constant 0.000000e+00 : f32
    %16 = vector.broadcast %cst_8 : f32 to vector<18x18x128xf32>
    %c0_9 = arith.constant 0 : index
    %c0_10 = arith.constant 0 : index
    %c0_11 = arith.constant 0 : index
    %17 = vector.load %arg8[%c0_9, %c0_10, %c0_11] : memref<18x18x128xf32, #tpu.memory_space<vmem>>, vector<18x18x128xf32>
    tpu.vector_store %arg8[%c0_9, %c0_10, %c0_11], %16 {strides = array<i32>} : memref<18x18x128xf32, #tpu.memory_space<vmem>>, vector<18x18x128xf32>,
    %c1 = arith.constant 1 : index
    %c1_12 = arith.constant 1 : index
    %c0_13 = arith.constant 0 : index
    %18 = vector.load %arg8[%c1, %c1_12, %c0_13] : memref<18x18x128xf32, #tpu.memory_space<vmem>>, vector<16x16x128xf32>
    tpu.vector_store %arg8[%c1, %c1_12, %c0_13], %15 {strides = array<i32>} : memref<18x18x128xf32, #tpu.memory_space<vmem>>, vector<16x16x128xf32>,
    %c0_14 = arith.constant 0 : index
    %c0_15 = arith.constant 0 : index
    %c0_16 = arith.constant 0 : index
    %19 = vector.load %arg8[%c0_14, %c0_15, %c0_16] : memref<18x18x128xf32, #tpu.memory_space<vmem>>, vector<18x18x128xf32>
    %20 = vector.extract_strided_slice %19 {offsets = [0, 0, 0], sizes = [18, 16, 128], strides = [1, 1, 1]} : vector<18x18x128xf32> to vector<18x16x128xf32>
    %21 = vector.extract_strided_slice %20 {offsets = [0, 0, 0], sizes = [16, 16, 128], strides = [1, 1, 1]} : vector<18x16x128xf32> to vector<16x16x128xf32>
    %22 = vector.shape_cast %21 : vector<16x16x128xf32> to vector<256x128xf32>
    %23 = arith.truncf %22 : vector<256x128xf32> to vector<256x128xbf16>
    %24 = vector.extract_strided_slice %20 {offsets = [1, 0, 0], sizes = [16, 16, 128], strides = [1, 1, 1]} : vector<18x16x128xf32> to vector<16x16x128xf32>
    %25 = vector.shape_cast %24 : vector<16x16x128xf32> to vector<256x128xf32>
    %26 = arith.truncf %25 : vector<256x128xf32> to vector<256x128xbf16>
    %27 = vector.extract_strided_slice %20 {offsets = [2, 0, 0], sizes = [16, 16, 128], strides = [1, 1, 1]} : vector<18x16x128xf32> to vector<16x16x128xf32>
    %28 = vector.shape_cast %27 : vector<16x16x128xf32> to vector<256x128xf32>
    %29 = arith.truncf %28 : vector<256x128xf32> to vector<256x128xbf16>
    %30 = vector.extract_strided_slice %19 {offsets = [0, 1, 0], sizes = [18, 16, 128], strides = [1, 1, 1]} : vector<18x18x128xf32> to vector<18x16x128xf32>
    %31 = vector.extract_strided_slice %30 {offsets = [0, 0, 0], sizes = [16, 16, 128], strides = [1, 1, 1]} : vector<18x16x128xf32> to vector<16x16x128xf32>
    %32 = vector.shape_cast %31 : vector<16x16x128xf32> to vector<256x128xf32>
    %33 = arith.truncf %32 : vector<256x128xf32> to vector<256x128xbf16>
    %34 = vector.extract_strided_slice %30 {offsets = [1, 0, 0], sizes = [16, 16, 128], strides = [1, 1, 1]} : vector<18x16x128xf32> to vector<16x16x128xf32>
    %35 = vector.shape_cast %34 : vector<16x16x128xf32> to vector<256x128xf32>
    %36 = arith.truncf %35 : vector<256x128xf32> to vector<256x128xbf16>
    %37 = vector.extract_strided_slice %30 {offsets = [2, 0, 0], sizes = [16, 16, 128], strides = [1, 1, 1]} : vector<18x16x128xf32> to vector<16x16x128xf32>
    %38 = vector.shape_cast %37 : vector<16x16x128xf32> to vector<256x128xf32>
    %39 = arith.truncf %38 : vector<256x128xf32> to vector<256x128xbf16>
    %40 = vector.extract_strided_slice %19 {offsets = [0, 2, 0], sizes = [18, 16, 128], strides = [1, 1, 1]} : vector<18x18x128xf32> to vector<18x16x128xf32>
    %41 = vector.extract_strided_slice %40 {offsets = [0, 0, 0], sizes = [16, 16, 128], strides = [1, 1, 1]} : vector<18x16x128xf32> to vector<16x16x128xf32>
    %42 = vector.shape_cast %41 : vector<16x16x128xf32> to vector<256x128xf32>
    %43 = arith.truncf %42 : vector<256x128xf32> to vector<256x128xbf16>
    %44 = vector.extract_strided_slice %40 {offsets = [1, 0, 0], sizes = [16, 16, 128], strides = [1, 1, 1]} : vector<18x16x128xf32> to vector<16x16x128xf32>
    %45 = vector.shape_cast %44 : vector<16x16x128xf32> to vector<256x128xf32>
    %46 = arith.truncf %45 : vector<256x128xf32> to vector<256x128xbf16>
    %47 = vector.extract_strided_slice %40 {offsets = [2, 0, 0], sizes = [16, 16, 128], strides = [1, 1, 1]} : vector<18x16x128xf32> to vector<16x16x128xf32>
    %48 = vector.shape_cast %47 : vector<16x16x128xf32> to vector<256x128xf32>
    %49 = arith.truncf %48 : vector<256x128xf32> to vector<256x128xbf16>
    %50 = tpu.concatenate %23, %26, %29, %33, %36, %39, %43, %46, %49 in 1 : vector<256x128xbf16>, vector<256x128xbf16>, vector<256x128xbf16>, vector<256x128xbf16>, vector<256x128xbf16>, vector<256x128xbf16>, vector<256x128xbf16>, vector<256x128xbf16>, vector<256x128xbf16> -> vector<256x1152xbf16>
    %c0_17 = arith.constant 0 : index
    %c0_18 = arith.constant 0 : index
    %51 = vector.load %arg4[%c0_17, %c0_18] : memref<1152x128xbf16, #tpu.memory_space<vmem>>, vector<1152x128xbf16>
    %cst_19 = arith.constant dense<0.000000e+00> : vector<256x128xf32>
    %52 = tpu.matmul %50, %51, %cst_19 {dimension_numbers = #tpu.dot_dimension_numbers<[1], [0], [0], [1], [0, 0, 1, 1], [], []>} : vector<256x1152xbf16>, vector<1152x128xbf16>, vector<256x128xf32> -> vector<256x128xf32>
    %c0_20 = arith.constant 0 : index
    %c0_21 = arith.constant 0 : index
    %53 = vector.load %arg5[%c0_20, %c0_21] : memref<1x128xf32, #tpu.memory_space<vmem>>, vector<1x128xf32>
    %54 = vector.broadcast %53 : vector<1x128xf32> to vector<256x128xf32>
    %55 = arith.addf %52, %54 : vector<256x128xf32>
    %cst_22 = arith.constant dense<0.000000e+00> : vector<128xf32>
    %56 = vector.multi_reduction <add>, %55, %cst_22 [0] : vector<256x128xf32> to vector<128xf32>
    %57 = vector.shape_cast %56 : vector<128xf32> to vector<1x128xf32>
    %58 = arith.mulf %55, %55 : vector<256x128xf32>
    %cst_23 = arith.constant dense<0.000000e+00> : vector<128xf32>
    %59 = vector.multi_reduction <add>, %58, %cst_23 [0] : vector<256x128xf32> to vector<128xf32>
    %60 = vector.shape_cast %59 : vector<128xf32> to vector<1x128xf32>
    %61 = tpu.concatenate %57, %60 in 0 : vector<1x128xf32>, vector<1x128xf32> -> vector<2x128xf32>
    %c0_24 = arith.constant 0 : index
    %c0_25 = arith.constant 0 : index
    %c0_26 = arith.constant 0 : index
    %62 = vector.load %arg7[%c0_24, %c0_25, %c0_26] : memref<1x2x128xf32, #tpu.memory_space<vmem>>, vector<1x2x128xf32>
    %63 = vector.shape_cast %62 : vector<1x2x128xf32> to vector<2x128xf32>
    %64 = vector.shape_cast %61 : vector<2x128xf32> to vector<1x2x128xf32>
    tpu.vector_store %arg7[%c0_24, %c0_25, %c0_26], %64 {strides = array<i32>} : memref<1x2x128xf32, #tpu.memory_space<vmem>>, vector<1x2x128xf32>,
    %65 = vector.shape_cast %55 : vector<256x128xf32> to vector<16x16x128xf32>
    %66 = arith.truncf %65 : vector<16x16x128xf32> to vector<16x16x128xbf16>
    %c0_27 = arith.constant 0 : index
    %c0_28 = arith.constant 0 : index
    %c0_29 = arith.constant 0 : index
    %c0_30 = arith.constant 0 : index
    %67 = vector.load %arg6[%c0_27, %c0_28, %c0_29, %c0_30] : memref<1x16x16x128xbf16, #tpu.memory_space<vmem>>, vector<1x16x16x128xbf16>
    %68 = vector.shape_cast %67 : vector<1x16x16x128xbf16> to vector<16x16x128xbf16>
    %69 = vector.shape_cast %66 : vector<16x16x128xbf16> to vector<1x16x16x128xbf16>
    tpu.vector_store %arg6[%c0_27, %c0_28, %c0_29, %c0_30], %69 {strides = array<i32>} : memref<1x16x16x128xbf16, #tpu.memory_space<vmem>>, vector<1x16x16x128xbf16>,
    return
  }
  func.func @transform_0(%arg0: i32) -> (i32, i32, i32, i32) {
    %c0_i32 = arith.constant 0 : i32
    %c0_i32_0 = arith.constant 0 : i32
    %c0_i32_1 = arith.constant 0 : i32
    %c0_i32_2 = arith.constant 0 : i32
    return %arg0, %c0_i32, %c0_i32_0, %c0_i32_1 : i32, i32, i32, i32
  }
  func.func @transform_1(%arg0: i32) -> (i32, i32) {
    %c0_i32 = arith.constant 0 : i32
    %c0_i32_0 = arith.constant 0 : i32
    %c0_i32_1 = arith.constant 0 : i32
    return %c0_i32, %c0_i32_0 : i32, i32
  }
  func.func @transform_2(%arg0: i32) -> (i32, i32) {
    %c0_i32 = arith.constant 0 : i32
    %c0_i32_0 = arith.constant 0 : i32
    %c0_i32_1 = arith.constant 0 : i32
    return %c0_i32, %c0_i32_0 : i32, i32
  }
  func.func @transform_3(%arg0: i32) -> (i32, i32) {
    %c0_i32 = arith.constant 0 : i32
    %c0_i32_0 = arith.constant 0 : i32
    %c0_i32_1 = arith.constant 0 : i32
    return %c0_i32, %c0_i32_0 : i32, i32
  }
  func.func @transform_4(%arg0: i32) -> (i32, i32) {
    %c0_i32 = arith.constant 0 : i32
    %c0_i32_0 = arith.constant 0 : i32
    %c0_i32_1 = arith.constant 0 : i32
    return %c0_i32, %c0_i32_0 : i32, i32
  }
  func.func @transform_5(%arg0: i32) -> (i32, i32, i32, i32) {
    %c0_i32 = arith.constant 0 : i32
    %c0_i32_0 = arith.constant 0 : i32
    %c0_i32_1 = arith.constant 0 : i32
    %c0_i32_2 = arith.constant 0 : i32
    return %arg0, %c0_i32, %c0_i32_0, %c0_i32_1 : i32, i32, i32, i32
  }
  func.func @transform_6(%arg0: i32) -> (i32, i32, i32) {
    %c0_i32 = arith.constant 0 : i32
    %c0_i32_0 = arith.constant 0 : i32
    %c0_i32_1 = arith.constant 0 : i32
    return %arg0, %c0_i32, %c0_i32_0 : i32, i32, i32
  }
}

module attributes {stable_mosaic.version = 11 : i64} {
  func.func @kernel(%arg0: i32, %arg1: memref<1x16x16x128xbf16, #tpu.memory_space<vmem>>, %arg2: memref<1x128xf32, #tpu.memory_space<vmem>>, %arg3: memref<1x128xf32, #tpu.memory_space<vmem>>, %arg4: memref<1152x128xbf16, #tpu.memory_space<vmem>>, %arg5: memref<1x128xf32, #tpu.memory_space<vmem>>, %arg6: memref<1x64x16x128xf32, #tpu.memory_space<vmem>>, %arg7: memref<18x18x128xf32, #tpu.memory_space<vmem>>) attributes {dimension_semantics = [#tpu.dimension_semantics<parallel>], iteration_bounds = array<i64: 2>, scalar_prefetch = 0 : i64, scratch_operands = 1 : i64, tpu.core_type = #tpu.core_type<tc>, window_params = [{transform_indices = @transform_0, window_bounds = array<i64: 1, 16, 16, 128>}, {pipeline_mode = #tpu.pipeline_mode<synchronous>, transform_indices = @transform_1, window_bounds = array<i64: 1, 128>}, {pipeline_mode = #tpu.pipeline_mode<synchronous>, transform_indices = @transform_2, window_bounds = array<i64: 1, 128>}, {pipeline_mode = #tpu.pipeline_mode<synchronous>, transform_indices = @transform_3, window_bounds = array<i64: 1152, 128>}, {pipeline_mode = #tpu.pipeline_mode<synchronous>, transform_indices = @transform_4, window_bounds = array<i64: 1, 128>}, {transform_indices = @transform_5, window_bounds = array<i64: 1, 64, 16, 128>}]} {
    %c0 = arith.constant 0 : index
    %c0_0 = arith.constant 0 : index
    %c0_1 = arith.constant 0 : index
    %c0_2 = arith.constant 0 : index
    %0 = vector.load %arg1[%c0, %c0_0, %c0_1, %c0_2] : memref<1x16x16x128xbf16, #tpu.memory_space<vmem>>, vector<1x16x16x128xbf16>
    %1 = vector.shape_cast %0 : vector<1x16x16x128xbf16> to vector<16x16x128xbf16>
    %2 = arith.extf %1 : vector<16x16x128xbf16> to vector<16x16x128xf32>
    %c0_3 = arith.constant 0 : index
    %c0_4 = arith.constant 0 : index
    %3 = vector.load %arg2[%c0_3, %c0_4] : memref<1x128xf32, #tpu.memory_space<vmem>>, vector<1x128xf32>
    %4 = vector.shape_cast %3 : vector<1x128xf32> to vector<1x1x128xf32>
    %5 = vector.broadcast %4 : vector<1x1x128xf32> to vector<16x16x128xf32>
    %6 = arith.mulf %2, %5 : vector<16x16x128xf32>
    %c0_5 = arith.constant 0 : index
    %c0_6 = arith.constant 0 : index
    %7 = vector.load %arg3[%c0_5, %c0_6] : memref<1x128xf32, #tpu.memory_space<vmem>>, vector<1x128xf32>
    %8 = vector.shape_cast %7 : vector<1x128xf32> to vector<1x1x128xf32>
    %9 = vector.broadcast %8 : vector<1x1x128xf32> to vector<16x16x128xf32>
    %10 = arith.addf %6, %9 : vector<16x16x128xf32>
    %cst = arith.constant 0.000000e+00 : f32
    %11 = vector.broadcast %cst : f32 to vector<16x16x128xf32>
    %12 = arith.cmpf oge, %10, %11 : vector<16x16x128xf32>
    %cst_7 = arith.constant 0.00999999977 : f32
    %13 = vector.broadcast %cst_7 : f32 to vector<16x16x128xf32>
    %14 = arith.mulf %13, %10 : vector<16x16x128xf32>
    %15 = arith.select %12, %10, %14 : vector<16x16x128xi1>, vector<16x16x128xf32>
    %cst_8 = arith.constant 0.000000e+00 : f32
    %16 = vector.broadcast %cst_8 : f32 to vector<18x18x128xf32>
    %c0_9 = arith.constant 0 : index
    %c0_10 = arith.constant 0 : index
    %c0_11 = arith.constant 0 : index
    %17 = vector.load %arg7[%c0_9, %c0_10, %c0_11] : memref<18x18x128xf32, #tpu.memory_space<vmem>>, vector<18x18x128xf32>
    tpu.vector_store %arg7[%c0_9, %c0_10, %c0_11], %16 {strides = array<i32>} : memref<18x18x128xf32, #tpu.memory_space<vmem>>, vector<18x18x128xf32>,
    %c1 = arith.constant 1 : index
    %c1_12 = arith.constant 1 : index
    %c0_13 = arith.constant 0 : index
    %18 = vector.load %arg7[%c1, %c1_12, %c0_13] : memref<18x18x128xf32, #tpu.memory_space<vmem>>, vector<16x16x128xf32>
    tpu.vector_store %arg7[%c1, %c1_12, %c0_13], %15 {strides = array<i32>} : memref<18x18x128xf32, #tpu.memory_space<vmem>>, vector<16x16x128xf32>,
    %c0_14 = arith.constant 0 : index
    %c0_15 = arith.constant 0 : index
    %c0_16 = arith.constant 0 : index
    %19 = vector.load %arg7[%c0_14, %c0_15, %c0_16] : memref<18x18x128xf32, #tpu.memory_space<vmem>>, vector<18x18x128xf32>
    %20 = vector.extract_strided_slice %19 {offsets = [0, 1, 0], sizes = [18, 16, 128], strides = [1, 1, 1]} : vector<18x18x128xf32> to vector<18x16x128xf32>
    %21 = vector.extract_strided_slice %19 {offsets = [0, 2, 0], sizes = [18, 16, 128], strides = [1, 1, 1]} : vector<18x18x128xf32> to vector<18x16x128xf32>
    %22 = vector.extract_strided_slice %20 {offsets = [1, 0, 0], sizes = [16, 16, 128], strides = [1, 1, 1]} : vector<18x16x128xf32> to vector<16x16x128xf32>
    %23 = vector.shape_cast %22 : vector<16x16x128xf32> to vector<256x128xf32>
    %24 = arith.truncf %23 : vector<256x128xf32> to vector<256x128xbf16>
    %25 = vector.extract_strided_slice %20 {offsets = [2, 0, 0], sizes = [16, 16, 128], strides = [1, 1, 1]} : vector<18x16x128xf32> to vector<16x16x128xf32>
    %26 = vector.shape_cast %25 : vector<16x16x128xf32> to vector<256x128xf32>
    %27 = arith.truncf %26 : vector<256x128xf32> to vector<256x128xbf16>
    %28 = vector.extract_strided_slice %21 {offsets = [1, 0, 0], sizes = [16, 16, 128], strides = [1, 1, 1]} : vector<18x16x128xf32> to vector<16x16x128xf32>
    %29 = vector.shape_cast %28 : vector<16x16x128xf32> to vector<256x128xf32>
    %30 = arith.truncf %29 : vector<256x128xf32> to vector<256x128xbf16>
    %31 = vector.extract_strided_slice %21 {offsets = [2, 0, 0], sizes = [16, 16, 128], strides = [1, 1, 1]} : vector<18x16x128xf32> to vector<16x16x128xf32>
    %32 = vector.shape_cast %31 : vector<16x16x128xf32> to vector<256x128xf32>
    %33 = arith.truncf %32 : vector<256x128xf32> to vector<256x128xbf16>
    %c0_17 = arith.constant 0 : index
    %c0_18 = arith.constant 0 : index
    %34 = vector.load %arg5[%c0_17, %c0_18] : memref<1x128xf32, #tpu.memory_space<vmem>>, vector<1x128xf32>
    %c0_19 = arith.constant 0 : index
    %c0_20 = arith.constant 0 : index
    %35 = vector.load %arg4[%c0_19, %c0_20] : memref<1152x128xbf16, #tpu.memory_space<vmem>>, vector<128x128xbf16>
    %cst_21 = arith.constant dense<0.000000e+00> : vector<256x128xf32>
    %36 = tpu.matmul %24, %35, %cst_21 {dimension_numbers = #tpu.dot_dimension_numbers<[1], [0], [0], [1], [0, 0, 1, 1], [], []>} : vector<256x128xbf16>, vector<128x128xbf16>, vector<256x128xf32> -> vector<256x128xf32>
    %37 = vector.broadcast %34 : vector<1x128xf32> to vector<256x128xf32>
    %38 = arith.addf %36, %37 : vector<256x128xf32>
    %39 = tpu.concatenate %24, %30 in 1 : vector<256x128xbf16>, vector<256x128xbf16> -> vector<256x256xbf16>
    %c128 = arith.constant 128 : index
    %c0_22 = arith.constant 0 : index
    %40 = vector.load %arg4[%c128, %c0_22] : memref<1152x128xbf16, #tpu.memory_space<vmem>>, vector<256x128xbf16>
    %cst_23 = arith.constant dense<0.000000e+00> : vector<256x128xf32>
    %41 = tpu.matmul %39, %40, %cst_23 {dimension_numbers = #tpu.dot_dimension_numbers<[1], [0], [0], [1], [0, 0, 1, 1], [], []>} : vector<256x256xbf16>, vector<256x128xbf16>, vector<256x128xf32> -> vector<256x128xf32>
    %42 = vector.broadcast %34 : vector<1x128xf32> to vector<256x128xf32>
    %43 = arith.addf %41, %42 : vector<256x128xf32>
    %44 = tpu.concatenate %24, %27 in 1 : vector<256x128xbf16>, vector<256x128xbf16> -> vector<256x256xbf16>
    %c384 = arith.constant 384 : index
    %c0_24 = arith.constant 0 : index
    %45 = vector.load %arg4[%c384, %c0_24] : memref<1152x128xbf16, #tpu.memory_space<vmem>>, vector<256x128xbf16>
    %cst_25 = arith.constant dense<0.000000e+00> : vector<256x128xf32>
    %46 = tpu.matmul %44, %45, %cst_25 {dimension_numbers = #tpu.dot_dimension_numbers<[1], [0], [0], [1], [0, 0, 1, 1], [], []>} : vector<256x256xbf16>, vector<256x128xbf16>, vector<256x128xf32> -> vector<256x128xf32>
    %47 = vector.broadcast %34 : vector<1x128xf32> to vector<256x128xf32>
    %48 = arith.addf %46, %47 : vector<256x128xf32>
    %49 = tpu.concatenate %24, %30, %27, %33 in 1 : vector<256x128xbf16>, vector<256x128xbf16>, vector<256x128xbf16>, vector<256x128xbf16> -> vector<256x512xbf16>
    %c640 = arith.constant 640 : index
    %c0_26 = arith.constant 0 : index
    %50 = vector.load %arg4[%c640, %c0_26] : memref<1152x128xbf16, #tpu.memory_space<vmem>>, vector<512x128xbf16>
    %cst_27 = arith.constant dense<0.000000e+00> : vector<256x128xf32>
    %51 = tpu.matmul %49, %50, %cst_27 {dimension_numbers = #tpu.dot_dimension_numbers<[1], [0], [0], [1], [0, 0, 1, 1], [], []>} : vector<256x512xbf16>, vector<512x128xbf16>, vector<256x128xf32> -> vector<256x128xf32>
    %52 = vector.broadcast %34 : vector<1x128xf32> to vector<256x128xf32>
    %53 = arith.addf %51, %52 : vector<256x128xf32>
    %54 = vector.shape_cast %38 : vector<256x128xf32> to vector<16x16x128xf32>
    %c0_28 = arith.constant 0 : index
    %c0_29 = arith.constant 0 : index
    %c0_30 = arith.constant 0 : index
    %c0_31 = arith.constant 0 : index
    %55 = vector.load %arg6[%c0_28, %c0_29, %c0_30, %c0_31] : memref<1x64x16x128xf32, #tpu.memory_space<vmem>>, vector<1x16x16x128xf32>
    %56 = vector.shape_cast %55 : vector<1x16x16x128xf32> to vector<16x16x128xf32>
    %57 = vector.shape_cast %54 : vector<16x16x128xf32> to vector<1x16x16x128xf32>
    tpu.vector_store %arg6[%c0_28, %c0_29, %c0_30, %c0_31], %57 {strides = array<i32>} : memref<1x64x16x128xf32, #tpu.memory_space<vmem>>, vector<1x16x16x128xf32>,
    %58 = vector.shape_cast %43 : vector<256x128xf32> to vector<16x16x128xf32>
    %c0_32 = arith.constant 0 : index
    %c16 = arith.constant 16 : index
    %c0_33 = arith.constant 0 : index
    %c0_34 = arith.constant 0 : index
    %59 = vector.load %arg6[%c0_32, %c16, %c0_33, %c0_34] : memref<1x64x16x128xf32, #tpu.memory_space<vmem>>, vector<1x16x16x128xf32>
    %60 = vector.shape_cast %59 : vector<1x16x16x128xf32> to vector<16x16x128xf32>
    %61 = vector.shape_cast %58 : vector<16x16x128xf32> to vector<1x16x16x128xf32>
    tpu.vector_store %arg6[%c0_32, %c16, %c0_33, %c0_34], %61 {strides = array<i32>} : memref<1x64x16x128xf32, #tpu.memory_space<vmem>>, vector<1x16x16x128xf32>,
    %62 = vector.shape_cast %48 : vector<256x128xf32> to vector<16x16x128xf32>
    %c0_35 = arith.constant 0 : index
    %c32 = arith.constant 32 : index
    %c0_36 = arith.constant 0 : index
    %c0_37 = arith.constant 0 : index
    %63 = vector.load %arg6[%c0_35, %c32, %c0_36, %c0_37] : memref<1x64x16x128xf32, #tpu.memory_space<vmem>>, vector<1x16x16x128xf32>
    %64 = vector.shape_cast %63 : vector<1x16x16x128xf32> to vector<16x16x128xf32>
    %65 = vector.shape_cast %62 : vector<16x16x128xf32> to vector<1x16x16x128xf32>
    tpu.vector_store %arg6[%c0_35, %c32, %c0_36, %c0_37], %65 {strides = array<i32>} : memref<1x64x16x128xf32, #tpu.memory_space<vmem>>, vector<1x16x16x128xf32>,
    %66 = vector.shape_cast %53 : vector<256x128xf32> to vector<16x16x128xf32>
    %c0_38 = arith.constant 0 : index
    %c48 = arith.constant 48 : index
    %c0_39 = arith.constant 0 : index
    %c0_40 = arith.constant 0 : index
    %67 = vector.load %arg6[%c0_38, %c48, %c0_39, %c0_40] : memref<1x64x16x128xf32, #tpu.memory_space<vmem>>, vector<1x16x16x128xf32>
    %68 = vector.shape_cast %67 : vector<1x16x16x128xf32> to vector<16x16x128xf32>
    %69 = vector.shape_cast %66 : vector<16x16x128xf32> to vector<1x16x16x128xf32>
    tpu.vector_store %arg6[%c0_38, %c48, %c0_39, %c0_40], %69 {strides = array<i32>} : memref<1x64x16x128xf32, #tpu.memory_space<vmem>>, vector<1x16x16x128xf32>,
    return
  }
  func.func @transform_0(%arg0: i32) -> (i32, i32, i32, i32) {
    %c0_i32 = arith.constant 0 : i32
    %c0_i32_0 = arith.constant 0 : i32
    %c0_i32_1 = arith.constant 0 : i32
    %c0_i32_2 = arith.constant 0 : i32
    return %arg0, %c0_i32, %c0_i32_0, %c0_i32_1 : i32, i32, i32, i32
  }
  func.func @transform_1(%arg0: i32) -> (i32, i32) {
    %c0_i32 = arith.constant 0 : i32
    %c0_i32_0 = arith.constant 0 : i32
    %c0_i32_1 = arith.constant 0 : i32
    return %c0_i32, %c0_i32_0 : i32, i32
  }
  func.func @transform_2(%arg0: i32) -> (i32, i32) {
    %c0_i32 = arith.constant 0 : i32
    %c0_i32_0 = arith.constant 0 : i32
    %c0_i32_1 = arith.constant 0 : i32
    return %c0_i32, %c0_i32_0 : i32, i32
  }
  func.func @transform_3(%arg0: i32) -> (i32, i32) {
    %c0_i32 = arith.constant 0 : i32
    %c0_i32_0 = arith.constant 0 : i32
    %c0_i32_1 = arith.constant 0 : i32
    return %c0_i32, %c0_i32_0 : i32, i32
  }
  func.func @transform_4(%arg0: i32) -> (i32, i32) {
    %c0_i32 = arith.constant 0 : i32
    %c0_i32_0 = arith.constant 0 : i32
    %c0_i32_1 = arith.constant 0 : i32
    return %c0_i32, %c0_i32_0 : i32, i32
  }
  func.func @transform_5(%arg0: i32) -> (i32, i32, i32, i32) {
    %c0_i32 = arith.constant 0 : i32
    %c0_i32_0 = arith.constant 0 : i32
    %c0_i32_1 = arith.constant 0 : i32
    %c0_i32_2 = arith.constant 0 : i32
    return %arg0, %c0_i32, %c0_i32_0, %c0_i32_1 : i32, i32, i32, i32
  }
}

</mosaic_0001>

<bundles_post_ra>
// kernel: up_style_block_forward.3
= control target key start
LH: loop header
LB: loop body
LE: loop exit
PB: predicated region body
PF: predicated region fallthrough
CT: control target
= control target key end

     0   :  { %s4188_s24 = smov 0   ;;  %s5661_s0 = inlined_call_operand.vmem [shape: bf16[2,16,16,128], index: 0, kind: input, shape index: {}]   ;;  %s5662_s1 = inlined_call_operand.vmem [shape: f32[1,128], index: 1, kind: input, shape index: {}]   ;;  %s5663_s2 = inlined_call_operand.vmem [shape: f32[1,128], index: 2, kind: input, shape index: {}]   ;;  %s5664_s3 = inlined_call_operand.vmem [shape: bf16[1152,128], index: 3, kind: input, shape index: {}]   ;;  %s5665_s4 = inlined_call_operand.vmem [shape: bf16[128,128], index: 4, kind: input, shape index: {}]   ;;  %s5666_s5 = inlined_call_operand.vmem [shape: f32[2,1,128], index: 5, kind: input, shape index: {}]   ;;  %s5667_s6 = inlined_call_operand.vmem [shape: bf16[2,16,16,128], index: 6, kind: output, shape index: {0}]   ;;  %s5668_s7 = inlined_call_operand.vmem [shape: f32[2,2,128], index: 7, kind: output, shape index: {1}]  }
   0x1 LB: > { %s3151_s25 = sadd.s32 4294967295, %s4144_s24   ;;  %p3155_p0 = scmp.ge.s32.totalorder %s4144_s24, 1  ;;  %s4144_s24 = sphi %s4188_s24, %s18_s24  }
   0x2   : > { %p248_p1 = scmp.lt.s32.totalorder %s4144_s24, 3 }
   0x4   : > { %p249_p2 = pnand %p3155_p0, %p248_p1 }
   0x6   : > { %252 = sbr.rel (%p249_p2) target bundleno = 586 (0x24a), region = 44 }
   0xb   : > { %v4024_v0 = vld [vmem:[%s5665_s4 + $0x38] sm:$0xff]   ;;  %v4146_v3 = vmov 0.0   ;;  %v4027_v4 = vld [vmem:[%s5665_s4 + $0x30] sm:$0xff]   ;;  %v4030_v7 = vld [vmem:[%s5665_s4 + $0x28] sm:$0xff]   ;;  %p287_p3 = scmp.lt.s32.totalorder %s3151_s25, 1 }
   0xc   : > { %v4025_v1 = vld [vmem:[%s5664_s3 + $0x78] sm:$0xff]   ;;  %3919 = vmatprep.subr.bf16.mxu0 %v4024_v0  ;;  %546 = vst [vmem:[#allocation2 + $0x18] sm:$0xff] %v4146_v3  ;;  %547 = vst [vmem:[#allocation2 + $0x20] sm:$0xff] %v4146_v3  ;;  %v4028_v5 = vld [vmem:[%s5664_s3 + $0x70] sm:$0xff]  }
   0xd   : > { %v4026_v2 = vld [vmem:[%s5664_s3 + $0x38] sm:$0xff]   ;;  %548 = vst [vmem:[#allocation2 + $0x28] sm:$0x3] %v4146_v3  ;;  %543 = vst [vmem:[#allocation2] sm:$0xff] %v4146_v3  ;;  %3447 = vmatprep.subr.bf16.mxu1 %v4025_v1  ;;  %3920 = vmatpush3.bf16.msra.mxu0 %v4024_v0  ;;  %v4029_v6 = vld [vmem:[%s5664_s3 + $0x30] sm:$0xff]   ;;  %s5706_s25 = smov (!%p287_p3, %s3151_s25), 1 }
   0xe   : > { %545 = vst [vmem:[#allocation2 + $0x10] sm:$0x3] %v4146_v3  ;;  %549 = vst [vmem:[#allocation2 + $0x30] sm:$0xff] %v4146_v3  ;;  %3448 = vmatpush3.bf16.msra.mxu1 %v4026_v2  ;;  %3921 = vmatprep.subr.bf16.mxu0 %v4027_v4  ;;  %v4031_v8 = vld [vmem:[%s5664_s3 + $0x68] sm:$0xff]   ;;  %v4033_v10 = vld [vmem:[%s5665_s4 + $0x20] sm:$0xff]   ;;  %s3294_s16 = sshll.u32 %s5706_s25, 7  ;;  %s294_s14 = scalar_lea.vmem %s5666_s5, %s5706_s25 }
   0xf   : > { %550 = vst [vmem:[#allocation2 + $0x38] sm:$0xff] %v4146_v3  ;;  %551 = vst [vmem:[#allocation2 + $0x40] sm:$0x3] %v4146_v3  ;;  %3449 = vmatprep.subr.bf16.mxu1 %v4028_v5  ;;  %v4032_v9 = vld [vmem:[%s5664_s3 + $0x28] sm:$0xff]   ;;  %v4034_v11 = vld [vmem:[%s5664_s3 + $0x60] sm:$0xff]   ;;  %s4268_s27 = scalar_lea.vmem %s5661_s0, %s3294_s16  ;;  %s5501_s18 = scalar_lea.vmem %s5667_s6, %s3294_s16 }
  0x10   : > { %552 = vst [vmem:[#allocation2 + $0x48] sm:$0xff] %v4146_v3  ;;  %553 = vst [vmem:[#allocation2 + $0x50] sm:$0xff] %v4146_v3  ;;  %v4035_v12 = vld [vmem:[%s5664_s3 + $0x20] sm:$0xff]   ;;  %v4036_v13 = vld [vmem:[%s5665_s4 + $0x18] sm:$0xff]   ;;  %s3160_s16 = sshll.u32 %s5706_s25, 1 }
  0x11   : > { %554 = vst [vmem:[#allocation2 + $0x58] sm:$0x3] %v4146_v3  ;;  %555 = vst [vmem:[#allocation2 + $0x60] sm:$0xff] %v4146_v3  ;;  %3922 = vmatpush3.bf16.msra.mxu0 %v4027_v4  ;;  %v4037_v14 = vld [vmem:[%s5664_s3 + $0x58] sm:$0xff]   ;;  %v4039_v16 = vld [vmem:[%s5665_s4 + $0x10] sm:$0xff]  }
  0x12   : > { %556 = vst [vmem:[#allocation2 + $0x68] sm:$0xff] %v4146_v3  ;;  %557 = vst [vmem:[#allocation2 + $0x70] sm:$0x3] %v4146_v3  ;;  %3450 = vmatpush3.bf16.msra.mxu1 %v4029_v6  ;;  %3923 = vmatprep.subr.bf16.mxu0 %v4030_v7  ;;  %v4038_v15 = vld [vmem:[%s5664_s3 + $0x18] sm:$0xff]   ;;  %v4040_v17 = vld [vmem:[%s5664_s3 + $0x50] sm:$0xff]  }
  0x13   : > { %558 = vst [vmem:[#allocation2 + $0x78] sm:$0xff] %v4146_v3  ;;  %559 = vst [vmem:[#allocation2 + $0x80] sm:$0xff] %v4146_v3  ;;  %3451 = vmatprep.subr.bf16.mxu1 %v4031_v8  ;;  %v4041_v18 = vld [vmem:[%s5664_s3 + $0x10] sm:$0xff]   ;;  %v4042_v19 = vld [vmem:[%s5665_s4 + $0x8] sm:$0xff]  }
  0x14   : > { %560 = vst [vmem:[#allocation2 + $0x88] sm:$0x3] %v4146_v3  ;;  %561 = vst [vmem:[#allocation2 + $0x90] sm:$0xff] %v4146_v3  ;;  %v4043_v20 = vld [vmem:[%s5664_s3 + $0x48] sm:$0xff]   ;;  %v4045_v22 = vld [vmem:[%s5665_s4] sm:$0xff]  }
  0x15   : > { %562 = vst [vmem:[#allocation2 + $0x98] sm:$0xff] %v4146_v3  ;;  %563 = vst [vmem:[#allocation2 + $0xa0] sm:$0x3] %v4146_v3  ;;  %3924 = vmatpush3.bf16.msra.mxu0 %v4030_v7  ;;  %v4044_v21 = vld [vmem:[%s5664_s3 + $0x8] sm:$0xff]   ;;  %v4046_v23 = vld [vmem:[%s5664_s3 + $0x40] sm:$0xff]  }
  0x16   : > { %564 = vst [vmem:[#allocation2 + $0xa8] sm:$0xff] %v4146_v3  ;;  %565 = vst [vmem:[#allocation2 + $0xb0] sm:$0xff] %v4146_v3  ;;  %3452 = vmatpush3.bf16.msra.mxu1 %v4032_v9  ;;  %3925 = vmatprep.subr.bf16.mxu0 %v4033_v10  ;;  %v305_v24 = vld [vmem:[%s4268_s27] sm:$0xff]   ;;  %v307_v28 = vld [vmem:[%s4268_s27 + $0x8] sm:$0xff]  }
  0x17   : > { %566 = vst [vmem:[#allocation2 + $0xb8] sm:$0x3] %v4146_v3  ;;  %567 = vst [vmem:[#allocation2 + $0xc0] sm:$0xff] %v4146_v3  ;;  %3453 = vmatprep.subr.bf16.mxu1 %v4034_v11  ;;  %v4283_v25 = vld [vmem:[%s5662_s1] ss:$0 sm:$0xff]  ;;  %v337_v26 = vunpack.c.l.bf16 %v305_v24  ;;  %v338_v27 = vunpack.c.h.bf16 %v305_v24  ;;  %v339_v31 = vunpack.c.l.bf16 %v307_v28  ;;  %v340_v32 = vunpack.c.h.bf16 %v307_v28  ;;  %3935 = vmatprep.mubr.bf16.mxu0 %v305_v24  ;;  %v4050_v35 = vld [vmem:[%s5664_s3 + $0xf8] sm:$0xff]  }
  0x18   : > { %568 = vst [vmem:[#allocation2 + $0xc8] sm:$0xff] %v4146_v3  ;;  %569 = vst [vmem:[#allocation2 + $0xd0] sm:$0x3] %v4146_v3  ;;  %v4047_v29 = vld [vmem:[%s5664_s3] sm:$0xff]   ;;  %v4051_v38 = vld [vmem:[%s5664_s3 + $0x178] sm:$0xff]  }
  0x19   : > { %570 = vst [vmem:[#allocation2 + $0xd8] sm:$0xff] %v4146_v3  ;;  %571 = vst [vmem:[#allocation2 + $0xe0] sm:$0xff] %v4146_v3  ;;  %3926 = vmatpush3.bf16.msra.mxu0 %v4033_v10  ;;  %v4292_v30 = vld [vmem:[%s5663_s2] ss:$0 sm:$0xff]  ;;  %v376_v33 = vmul.f32 %v4283_v25, %v337_v26  ;;  %v377_v34 = vmul.f32 %v4283_v25, %v338_v27  ;;  %v378_v36 = vmul.f32 %v4283_v25, %v339_v31  ;;  %v4052_v41 = vld [vmem:[%s5664_s3 + $0xb8] sm:$0xff]  }
  0x1a   : > { %572 = vst [vmem:[#allocation2 + $0xe8] sm:$0x3] %v4146_v3  ;;  %573 = vst [vmem:[#allocation2 + $0xf0] sm:$0xff] %v4146_v3  ;;  %3454 = vmatpush3.bf16.msra.mxu1 %v4035_v12  ;;  %3927 = vmatprep.subr.bf16.mxu0 %v4036_v13  ;;  %v379_v37 = vmul.f32 %v4283_v25, %v340_v32  ;;  %v309_v42 = vld [vmem:[%s4268_s27 + $0x10] sm:$0xff]   ;;  %v4311_v43 = vld [vmem:[%s4268_s27 + $0x18] sm:$0xff]  }
  0x1b   : > { %574 = vst [vmem:[#allocation2 + $0xf8] sm:$0xff] %v4146_v3  ;;  %575 = vst [vmem:[#allocation2 + $0x100] sm:$0x3] %v4146_v3  ;;  %3455 = vmatprep.subr.bf16.mxu1 %v4037_v14  ;;  %v415_v39 = vadd.f32 %v4292_v30, %v376_v33  ;;  %v416_v40 = vadd.f32 %v4292_v30, %v377_v34  ;;  %v417_v44 = vadd.f32 %v4292_v30, %v378_v36  ;;  %v4056_v48 = vld [vmem:[%s5664_s3 + $0xf0] sm:$0xff]   ;;  %v313_v60 = vld [vmem:[%s4268_s27 + $0x20] sm:$0xff]  }
  0x1c   : > { %576 = vst [vmem:[#allocation2 + $0x108] sm:$0xff] %v4146_v3  ;;  %577 = vst [vmem:[#allocation2 + $0x110] sm:$0xff] %v4146_v3  ;;  %v418_v45 = vadd.f32 %v4292_v30, %v379_v37  ;;  %v341_v46 = vunpack.c.l.bf16 %v309_v42  ;;  %v342_v47 = vunpack.c.h.bf16 %v309_v42  ;;  %v343_v59 = vunpack.c.l.bf16 %v4311_v43  ;;  %v4057_v0 = vld [vmem:[%s5664_s3 + $0xb0] sm:$0xff]   ;;  %v4060_v4 = vld [vmem:[%s5664_s3 + $0xe8] sm:$0xff]  }
  0x1d   : > { %578 = vst [vmem:[#allocation2 + $0x118] sm:$0x3] %v4146_v3  ;;  %579 = vst [vmem:[#allocation2 + $0x120] sm:$0xff] %v4146_v3  ;;  %3928 = vmatpush3.bf16.msra.mxu0 %v4036_v13  ;;  %vm447_vm0 = vcmp.ge.f32.partialorder %v415_v39, 0.0  ;;  %vm448_vm1 = vcmp.ge.f32.partialorder %v416_v40, 0.0  ;;  %vm449_vm2 = vcmp.ge.f32.partialorder %v417_v44, 0.0  ;;  %v344_v63 = vunpack.c.h.bf16 %v4311_v43 }
  0x1e   : > { %580 = vst [vmem:[#allocation2 + $0x128] sm:$0xff] %v4146_v3  ;;  %581 = vst [vmem:[#allocation2 + $0x130] sm:$0x3] %v4146_v3  ;;  %3456 = vmatpush3.bf16.msra.mxu1 %v4038_v15  ;;  %3929 = vmatprep.subr.bf16.mxu0 %v4039_v16  ;;  %v479_v49 = vmul.f32 0.01, %v415_v39  ;;  %vm450_vm3 = vcmp.ge.f32.partialorder %v418_v45, 0.0  ;;  %v380_v55 = vmul.f32 %v4283_v25, %v341_v46  ;;  %v345_v2 = vunpack.c.l.bf16 %v313_v60 }
  0x1f   : > { %582 = vst [vmem:[#allocation2 + $0x138] sm:$0xff] %v4146_v3  ;;  %583 = vst [vmem:[#allocation2 + $0x140] sm:$0xff] %v4146_v3  ;;  %3457 = vmatprep.subr.bf16.mxu1 %v4040_v17  ;;  %v480_v50 = vmul.f32 0.01, %v416_v40  ;;  %v481_v51 = vmul.f32 0.01, %v417_v44  ;;  %v381_v56 = vmul.f32 %v4283_v25, %v342_v47  ;;  %v382_v1 = vmul.f32 %v4283_v25, %v343_v59 }
  0x20   : > { %584 = vst [vmem:[#allocation2 + $0x148] sm:$0x3] %v4146_v3  ;;  %585 = vst [vmem:[#allocation2 + $0x150] sm:$0xff] %v4146_v3  ;;  %v482_v52 = vmul.f32 0.01, %v418_v45  ;;  %v511_v53 = vsel %vm447_vm0, %v415_v39, %v479_v49  ;;  %v419_v61 = vadd.f32 %v4292_v30, %v380_v55  ;;  %v383_v7 = vmul.f32 %v4283_v25, %v344_v63  ;;  %v4337_v11 = vld [vmem:[%s4268_s27 + $0x28] sm:$0xff]  }
  0x21   : > { %586 = vst [vmem:[#allocation2 + $0x158] sm:$0xff] %v4146_v3  ;;  %587 = vst [vmem:[#allocation2 + $0x160] sm:$0x3] %v4146_v3  ;;  %3930 = vmatpush3.bf16.msra.mxu0 %v4039_v16  ;;  %v512_v54 = vsel %vm448_vm1, %v416_v40, %v480_v50  ;;  %v513_v57 = vsel %vm449_vm2, %v417_v44, %v481_v51  ;;  %v420_v62 = vadd.f32 %v4292_v30, %v381_v56  ;;  %v4062_v16 = vld [vmem:[%s5664_s3 + $0xa8] sm:$0xff]   ;;  %v4053_v17 = vld [vmem:[%s5664_s3 + $0x138] sm:$0xff]   ;;  %v4147_v37 = vmov 0.0|0.0  }
  0x22   : > { %588 = vst [vmem:[#allocation2 + $0x168] sm:$0xff] %v4146_v3  ;;  %589 = vst [vmem:[#allocation2 + $0x170] sm:$0xff] %v4146_v3  ;;  %3458 = vmatpush3.bf16.msra.mxu1 %v4041_v18  ;;  %3931 = vmatprep.subr.bf16.mxu0 %v4042_v19  ;;  %v514_v58 = vsel %vm450_vm3, %v418_v45, %v482_v52  ;;  %vm451_vm4 = vcmp.ge.f32.partialorder %v419_v61, 0.0  ;;  %v483_v5 = vmul.f32 0.01, %v419_v61  ;;  %v347_v14 = vunpack.c.l.bf16 %v4337_v11  ;;  %v4066_v31 = vld [vmem:[%s5664_s3 + $0xe0] sm:$0xff]  }
  0x23   : > { %590 = vst [vmem:[#allocation2 + $0x178] sm:$0x3] %v4146_v3  ;;  %591 = vst [vmem:[#allocation2 + $0x180] sm:$0xff] %v4146_v3  ;;  %3459 = vmatprep.subr.bf16.mxu1 %v4043_v20  ;;  %vm452_vm5 = vcmp.ge.f32.partialorder %v420_v62, 0.0  ;;  %v484_v6 = vmul.f32 0.01, %v420_v62  ;;  %v421_v8 = vadd.f32 %v4292_v30, %v382_v1  ;;  %v384_v9 = vmul.f32 %v4283_v25, %v345_v2 }
  0x24   : > { %592 = vst [vmem:[#allocation2 + $0x188] sm:$0xff] %v4146_v3  ;;  %593 = vst [vmem:[#allocation2 + $0x190] sm:$0x3] %v4146_v3  ;;  %v515_v12 = vsel %vm451_vm4, %v419_v61, %v483_v5  ;;  %v348_v15 = vunpack.c.h.bf16 %v4337_v11  ;;  %v422_v18 = vadd.f32 %v4292_v30, %v383_v7  ;;  %v4061_v33 = vld [vmem:[%s5664_s3 + $0x170] sm:$0xff]   ;;  %v4067_v34 = vld [vmem:[%s5664_s3 + $0xa0] sm:$0xff]  }
  0x25   : > { %596 = vst [vmem:[#allocation2 + $0x1a8] sm:$0x3] %v4146_v3  ;;  %3932 = vmatpush3.bf16.msra.mxu0 %v4042_v19  ;;  %598 = vst [vmem:[#allocation2 + $0x19] sm:$0xff] %v511_v53  ;;  %v346_v3 = vunpack.c.h.bf16 %v313_v60  ;;  %v516_v13 = vsel %vm452_vm5, %v420_v62, %v484_v6  ;;  %vm453_vm6 = vcmp.ge.f32.partialorder %v421_v8, 0.0  ;;  %v317_v36 = vld [vmem:[%s4268_s27 + $0x30] sm:$0xff]   ;;  %v4070_v45 = vld [vmem:[%s5664_s3 + $0xd8] sm:$0xff]  }
  0x26   : > { %3460 = vmatpush3.bf16.msra.mxu1 %v4044_v21  ;;  %3933 = vmatprep.subr.bf16.mxu0 %v4045_v22  ;;  %599 = vst [vmem:[#allocation2 + $0x21] sm:$0xff] %v512_v54  ;;  %600 = vst [vmem:[#allocation2 + $0x31] sm:$0xff] %v513_v57  ;;  %v485_v21 = vmul.f32 0.01, %v421_v8  ;;  %vm454_vm7 = vcmp.ge.f32.partialorder %v422_v18, 0.0  ;;  %v4063_v44 = vld [vmem:[%s5664_s3 + $0x130] sm:$0xff]   ;;  %v349_v49 = vunpack.c.l.bf16 %v317_v36  ;;  %v350_v50 = vunpack.c.h.bf16 %v317_v36 }
  0x27   : > { %3461 = vmatprep.subr.bf16.mxu1 %v4046_v23  ;;  %601 = vst [vmem:[#allocation2 + $0x39] sm:$0xff] %v514_v58  ;;  %v385_v10 = vmul.f32 %v4283_v25, %v346_v3  ;;  %602 = vst [vmem:[#allocation2 + $0x49] sm:$0xff] %v515_v12  ;;  %v319_v52 = vld [vmem:[%s4268_s27 + $0x38] sm:$0xff]   ;;  %v321_v54 = vld [vmem:[%s4268_s27 + $0x40] sm:$0xff]  }
  0x28   : > { %603 = vst [vmem:[#allocation2 + $0x51] sm:$0xff] %v516_v13  ;;  %v4071_v55 = vld [vmem:[%s5664_s3 + $0x168] sm:$0xff]   ;;  %v4072_v56 = vld [vmem:[%s5664_s3 + $0x98] sm:$0xff]   ;;  %v388_v59 = vmul.f32 %v4283_v25, %v349_v49  ;;  %v351_v61 = vunpack.c.l.bf16 %v319_v52  ;;  %v352_v62 = vunpack.c.h.bf16 %v319_v52  ;;  %v353_v63 = vunpack.c.l.bf16 %v321_v54 }
  0x29   : > { %3934 = vmatpush3.bf16.msra.mxu0 %v4045_v22  ;;  %v423_v22 = vadd.f32 %v4292_v30, %v384_v9  ;;  %v424_v23 = vadd.f32 %v4292_v30, %v385_v10 }
  0x2a   : > { %3462 = vmatpush3.bf16.msra.mxu1 %v4047_v29  ;;  %3559 = vmatprep.subr.bf16.mxu0 %v4050_v35  ;;  %v387_v29 = vmul.f32 %v4283_v25, %v348_v15  ;;  %v486_v35 = vmul.f32 0.01, %v422_v18  ;;  %v427_v2 = vadd.f32 %v4292_v30, %v388_v59  ;;  %v390_v6 = vmul.f32 %v4283_v25, %v351_v61  ;;  %v4076_v15 = vld [vmem:[%s5664_s3 + $0xd0] sm:$0xff]   ;;  %v327_v59 = vld [vmem:[%s4268_s27 + $0x58] sm:$0xff]  }
  0x2b   : > { %3671 = vmatprep.subr.bf16.mxu1 %v4051_v38  ;;  %v517_v38 = vsel %vm453_vm6, %v421_v8, %v485_v21  ;;  %vm455_vm8 = vcmp.ge.f32.partialorder %v423_v22, 0.0  ;;  %vm456_vm9 = vcmp.ge.f32.partialorder %v424_v23, 0.0  ;;  %v487_v39 = vmul.f32 0.01, %v423_v22 }
  0x2c   : > { %3936 = vmatmul.mubr.bf16.vlgmr.msra.gmra.mxu0 %v307_v28  ;;  %v4348_v19 = vld [vmem:[#allocation2 + $0x18] sm:$0xff]  ;;  %v386_v28 = vmul.f32 %v4283_v25, %v347_v14  ;;  %v518_v40 = vsel %vm454_vm7, %v422_v18, %v486_v35  ;;  %604 = vst [vmem:[#allocation2 + $0x61] sm:$0xff] %v517_v38  ;;  %v391_v7 = vmul.f32 %v4283_v25, %v352_v62  ;;  %v354_v8 = vunpack.c.h.bf16 %v321_v54  ;;  %v325_v38 = vld [vmem:[%s4268_s27 + $0x50] sm:$0xff]   ;;  %v4086_v62 = vld [vmem:[%s5664_s3 + $0xc0] sm:$0xff]  }
  0x2d   : > { %3560 = vmatpush3.bf16.msra.mxu0 %v4052_v41  ;;  %3939 = vmatprep.mubr.bf16.mxu0 %v309_v42  ;;  %v4350_v20 = vld [vmem:[#allocation2 + $0x20] sm:$0xff]  ;;  %v4358_v26 = vld [vmem:[#allocation2 + $0x30] sm:$0xff]  ;;  %v488_v41 = vmul.f32 0.01, %v424_v23  ;;  %605 = vst [vmem:[#allocation2 + $0x69] sm:$0xff] %v518_v40  ;;  %v519_v46 = vsel %vm455_vm8, %v423_v22, %v487_v39  ;;  %v392_v9 = vmul.f32 %v4283_v25, %v353_v63  ;;  %vm459_vm12 = vcmp.ge.f32.partialorder %v427_v2, 0.0 }
  0x2e   : > { %3561 = vmatprep.subr.bf16.mxu0 %v4056_v48  ;;  %v4356_v24 = vpack.c.bf16 %v4350_v20, %v4348_v19  ;;  %v4360_v27 = vld [vmem:[#allocation2 + $0x38] sm:$0xff]  ;;  %v425_v42 = vadd.f32 %v4292_v30, %v386_v28  ;;  %v4390_v47 = vld [vmem:[#allocation2 + $0x48] sm:$0xff]  ;;  %606 = vst [vmem:[#allocation2 + $0x79] sm:$0xff] %v519_v46  ;;  %v491_v10 = vmul.f32 0.01, %v427_v2  ;;  %v429_v13 = vadd.f32 %v4292_v30, %v390_v6  ;;  %v4077_v22 = vld [vmem:[%s5664_s3 + $0x90] sm:$0xff]  }
  0x2f   : > { %v4370_v32 = vpack.c.bf16 %v4360_v27, %v4358_v26  ;;  %v4392_v48 = vld [vmem:[#allocation2 + $0x50] sm:$0xff]  ;;  %v520_v51 = vsel %vm456_vm9, %v424_v23, %v488_v41  ;;  %v430_v14 = vadd.f32 %v4292_v30, %v391_v7  ;;  %v431_v28 = vadd.f32 %v4292_v30, %v392_v9  ;;  %v4082_v39 = vld [vmem:[%s5664_s3 + $0x88] sm:$0xff]   ;;  %v4083_v46 = vld [vmem:[%s5664_s3 + $0x120] sm:$0xff]  }
  0x30   : > { %1975 = vmatprep.mubr.bf16.mxu1 %v4356_v24  ;;  %607 = vst [vmem:[#allocation2 + $0x81] sm:$0xff] %v520_v51  ;;  %v4398_v53 = vpack.c.bf16 %v4392_v48, %v4390_v47  ;;  %vm457_vm10 = vcmp.ge.f32.partialorder %v425_v42, 0.0  ;;  %v489_v57 = vmul.f32 0.01, %v425_v42  ;;  %vm461_vm14 = vcmp.ge.f32.partialorder %v429_v13, 0.0  ;;  %v329_v6 = vld [vmem:[%s4268_s27 + $0x60] sm:$0xff]  }
  0x31   : > { %3562 = vmatpush3.bf16.msra.mxu0 %v4057_v0  ;;  %1976 = vmatmul.mubr.bf16.vlgmr.msra.gmra.mxu1 %v4147_v37  ;;  %vm462_vm15 = vcmp.ge.f32.partialorder %v430_v14, 0.0  ;;  %v493_v21 = vmul.f32 0.01, %v429_v13  ;;  %v494_v23 = vmul.f32 0.01, %v430_v14  ;;  %vm463_vm0 = vcmp.ge.f32.partialorder %v431_v28, 0.0 }
  0x32   : > { %3563 = vmatprep.subr.bf16.mxu0 %v4060_v4  ;;  %3672 = vmatpush3.bf16.msra.mxu1 %v4053_v17  ;;  %v521_v0 = vsel %vm457_vm10, %v425_v42, %v489_v57  ;;  %v4073_v4 = vld [vmem:[%s5664_s3 + $0x128] sm:$0xff]   ;;  %v495_v37 = vmul.f32 0.01, %v431_v28  ;;  %v357_v51 = vunpack.c.l.bf16 %v325_v38  ;;  %v359_v61 = vunpack.c.l.bf16 %v327_v59 }
  0x33   : > { %1983 = vmatprep.mubr.bf16.mxu1 %v4370_v32  ;;  %3673 = vmatprep.subr.bf16.mxu1 %v4061_v33  ;;  %608 = vst [vmem:[#allocation2 + $0x91] sm:$0xff] %v521_v0  ;;  %v4418_v5 = vld [vmem:[#allocation2 + $0x60] sm:$0xff]  ;;  %v4080_v33 = vld [vmem:[%s5664_s3 + $0xc8] sm:$0xff]   ;;  %v526_v35 = vsel %vm462_vm15, %v430_v14, %v494_v23  ;;  %v4088_v23 = vld [vmem:[%s5664_s3 + $0x158] sm:$0xff]   ;;  %vm750_vm10 = vcmask 1046528  }
  0x34   : > { %3940 = vmatmul.mubr.bf16.gmra.mxu0 %v4311_v43  ;;  %v426_v43 = vadd.f32 %v4292_v30, %v387_v29  ;;  %v4424_v12 = vld [vmem:[#allocation2 + $0x68] sm:$0xff]  ;;  %613 = vst [vmem:[#allocation2 + $0xc9] sm:$0xff] %v526_v35  ;;  %v396_v57 = vmul.f32 %v4283_v25, %v357_v51 }
  0x35   : > { %3943 = vmatprep.mubr.bf16.mxu0 %v313_v60  ;;  %3564 = vmatpush3.bf16.msra.mxu0 %v4062_v16  ;;  %v389_v60 = vmul.f32 %v4283_v25, %v350_v50  ;;  %v523_v16 = vsel %vm459_vm12, %v427_v2, %v491_v10  ;;  %v4433_v18 = vpack.c.bf16 %v4424_v12, %v4418_v5  ;;  %v323_v29 = vld [vmem:[%s4268_s27 + $0x48] sm:$0xff]   ;;  %v4453_v40 = vld [vmem:[#allocation2 + $0x78] sm:$0xff]  ;;  %v361_v10 = vunpack.c.l.bf16 %v329_v6 }
  0x36   : > { %3565 = vmatprep.subr.bf16.mxu0 %v4066_v31  ;;  %vm458_vm11 = vcmp.ge.f32.partialorder %v426_v43, 0.0  ;;  %v490_v58 = vmul.f32 0.01, %v426_v43  ;;  %3674 = vmatpush3.bf16.msra.mxu1 %v4063_v44  ;;  %610 = vst [vmem:[#allocation2 + $0xa9] sm:$0xff] %v523_v16  ;;  %v525_v31 = vsel %vm461_vm14, %v429_v13, %v493_v21  ;;  %v355_v42 = vunpack.c.l.bf16 %v323_v29 }
  0x37   : > { %3675 = vmatprep.subr.bf16.mxu1 %v4071_v55  ;;  %v428_v3 = vadd.f32 %v4292_v30, %v389_v60  ;;  %612 = vst [vmem:[#allocation2 + $0xc1] sm:$0xff] %v525_v31  ;;  %v4455_v41 = vld [vmem:[#allocation2 + $0x80] sm:$0xff]  ;;  %v362_v21 = vunpack.c.h.bf16 %v329_v6 }
  0x38   : > { %v522_v1 = vsel %vm458_vm11, %v426_v43, %v490_v58  ;;  %v356_v43 = vunpack.c.h.bf16 %v323_v29  ;;  %v394_v49 = vmul.f32 %v4283_v25, %v355_v42  ;;  %v4470_v60 = vpack.c.bf16 %v4455_v41, %v4453_v40 }
  0x39   : > { %3566 = vmatpush3.bf16.msra.mxu0 %v4067_v34  ;;  %1984 = vmatmul.mubr.bf16.gmra.mxu1 %v4356_v24  ;;  %609 = vst [vmem:[#allocation2 + $0x99] sm:$0xff] %v522_v1  ;;  %vm460_vm13 = vcmp.ge.f32.partialorder %v428_v3, 0.0  ;;  %v393_v24 = vmul.f32 %v4283_v25, %v354_v8  ;;  %v4081_v34 = vld [vmem:[%s5664_s3 + $0x160] sm:$0xff]   ;;  %v435_v1 = vadd.f32 %v4292_v30, %v396_v57 }
  0x3a   : > { %3567 = vmatprep.subr.bf16.mxu0 %v4070_v45  ;;  %1991 = vmatprep.mubr.bf16.mxu1 %v4398_v53  ;;  %v527_v45 = vsel %vm463_vm0, %v431_v28, %v495_v37  ;;  %v395_v50 = vmul.f32 %v4283_v25, %v356_v43  ;;  %v433_v55 = vadd.f32 %v4292_v30, %v394_v49  ;;  %v4480_v9 = vld [vmem:[#allocation2 + $0x90] sm:$0xff]  ;;  %v4090_v37 = vld [vmem:[%s5664_s3 + $0x118] sm:$0xff]   ;;  %v331_v43 = vld [vmem:[%s4268_s27 + $0x68] sm:$0xff]  }
  0x3b   : > { %3676 = vmatpush3.bf16.msra.mxu1 %v4073_v4  ;;  %614 = vst [vmem:[#allocation2 + $0xd9] sm:$0xff] %v527_v45  ;;  %v398_v4 = vmul.f32 %v4283_v25, %v359_v61  ;;  %vm467_vm4 = vcmp.ge.f32.partialorder %v435_v1, 0.0  ;;  %v499_v13 = vmul.f32 0.01, %v435_v1  ;;  %v363_v45 = vunpack.c.l.bf16 %v331_v43 }
  0x3c   : > { %3944 = vmatmul.mubr.bf16.gmra.mxu0 %v4337_v11  ;;  %v492_v11 = vmul.f32 0.01, %v428_v3  ;;  %3677 = vmatprep.subr.bf16.mxu1 %v4081_v34  ;;  %vm465_vm2 = vcmp.ge.f32.partialorder %v433_v55, 0.0  ;;  %v497_v63 = vmul.f32 0.01, %v433_v55  ;;  %v4089_v34 = vld [vmem:[%s5664_s3 + $0x1f8] sm:$0xff]   ;;  %v364_v51 = vunpack.c.h.bf16 %v331_v43 }
  0x3d   : > { %3947 = vmatprep.mubr.bf16.mxu0 %v317_v36  ;;  %3568 = vmatpush3.bf16.msra.mxu0 %v4072_v56  ;;  %v432_v36 = vadd.f32 %v4292_v30, %v393_v24  ;;  %v434_v56 = vadd.f32 %v4292_v30, %v395_v50  ;;  %v531_v24 = vsel %vm467_vm4, %v435_v1, %v499_v13  ;;  %v4523_v1 = vld [vmem:[#allocation2] sm:$0xff] }
  0x3e   : > { %v524_v17 = vsel %vm460_vm13, %v428_v3, %v492_v11  ;;  %3569 = vmatprep.subr.bf16.mxu0 %v4076_v15  ;;  %v360_v3 = vunpack.c.h.bf16 %v327_v59  ;;  %v529_v7 = vsel %vm465_vm2, %v433_v55, %v497_v63  ;;  %v4087_v11 = vld [vmem:[%s5664_s3 + $0x80] sm:$0xff]   ;;  %618 = vst [vmem:[#allocation2 + $0x109] sm:$0xff] %v531_v24  ;;  %v4515_v55 = vld [vmem:[#allocation2 + $0xa8] sm:$0xff]  ;;  %v402_v57 = vmul.f32 %v4283_v25, %v363_v45 }
  0x3f   : > { %611 = vst [vmem:[#allocation2 + $0xb1] sm:$0xff] %v524_v17  ;;  %vm464_vm1 = vcmp.ge.f32.partialorder %v432_v36, 0.0  ;;  %v496_v44 = vmul.f32 0.01, %v432_v36  ;;  %3678 = vmatpush3.bf16.msra.mxu1 %v4083_v46  ;;  %vm466_vm3 = vcmp.ge.f32.partialorder %v434_v56, 0.0  ;;  %616 = vst [vmem:[#allocation2 + $0xf1] sm:$0xff] %v529_v7  ;;  %v437_v17 = vadd.f32 %v4292_v30, %v398_v4 }
  0x40   : > { %v498_v0 = vmul.f32 0.01, %v434_v56  ;;  %v4486_v15 = vld [vmem:[#allocation2 + $0x98] sm:$0xff]  ;;  %v399_v16 = vmul.f32 %v4283_v25, %v360_v3  ;;  %3679 = vmatprep.subr.bf16.mxu1 %v4088_v23  ;;  %v333_v46 = vld [vmem:[%s4268_s27 + $0x70] sm:$0xff]   ;;  %v403_v61 = vmul.f32 %v4283_v25, %v364_v51  ;;  %v441_v63 = vadd.f32 %v4292_v30, %v402_v57  ;;  %v4096_v23 = vld [vmem:[%s5664_s3 + $0x148] sm:$0xff]  }
  0x41   : > { %3570 = vmatpush3.bf16.msra.mxu0 %v4077_v22  ;;  %1992 = vmatmul.mubr.bf16.gmra.mxu1 %v4370_v32  ;;  %v400_v22 = vmul.f32 %v4283_v25, %v361_v10  ;;  %vm469_vm6 = vcmp.ge.f32.partialorder %v437_v17, 0.0  ;;  %v501_v31 = vmul.f32 0.01, %v437_v17  ;;  %v4501_v35 = vpack.c.bf16 %v4486_v15, %v4480_v9  ;;  %v335_v10 = vld [vmem:[%s4268_s27 + $0x78] sm:$0xff]   ;;  %s303_s27 = scalar_lea.vmem %s5668_s7, %s3160_s16 }
  0x42   : > { %3571 = vmatprep.subr.bf16.mxu0 %v4080_v33  ;;  %1999 = vmatprep.mubr.bf16.mxu1 %v4433_v18  ;;  %v530_v8 = vsel %vm466_vm3, %v434_v56, %v498_v0  ;;  %v401_v33 = vmul.f32 %v4283_v25, %v362_v21  ;;  %v442_v3 = vadd.f32 %v4292_v30, %v403_v61  ;;  %vm473_vm11 = vcmp.ge.f32.partialorder %v441_v63, 0.0  ;;  %v4569_v61 = vld [vmem:[#allocation2 + $0x40] sm:$0x3] }
  0x43   : > { %617 = vst [vmem:[#allocation2 + $0xf9] sm:$0xff] %v530_v8  ;;  %3680 = vmatpush3.bf16.msra.mxu1 %v4090_v37  ;;  %v505_v7 = vmul.f32 0.01, %v441_v63  ;;  %v757_v37 = vrot.slane %v4350_v20, 1  ;;  %vm2893_vm2 = vcmask 1040384  }
  0x44   : > { %3948 = vmatmul.mubr.bf16.gmra.mxu0 %v319_v52  ;;  %v358_v52 = vunpack.c.h.bf16 %v325_v38  ;;  %v440_v42 = vadd.f32 %v4292_v30, %v401_v33  ;;  %vm474_vm12 = vcmp.ge.f32.partialorder %v442_v3, 0.0  ;;  %v506_v13 = vmul.f32 0.01, %v442_v3 }
  0x45   : > { %3951 = vmatprep.mubr.bf16.mxu0 %v321_v54  ;;  %3572 = vmatpush3.bf16.msra.mxu0 %v4082_v39  ;;  %v528_v54 = vsel %vm464_vm1, %v432_v36, %v496_v44  ;;  %v439_v36 = vadd.f32 %v4292_v30, %v400_v22  ;;  %v533_v39 = vsel %vm469_vm6, %v437_v17, %v501_v31  ;;  %v368_v22 = vunpack.c.h.bf16 %v335_v10  ;;  %v4543_v31 = vld [vmem:[#allocation2 + $0x10] sm:$0x3] }
  0x46   : > { %615 = vst [vmem:[#allocation2 + $0xe1] sm:$0xff] %v528_v54  ;;  %v397_v58 = vmul.f32 %v4283_v25, %v358_v52  ;;  %3573 = vmatprep.subr.bf16.mxu0 %v4086_v62  ;;  %620 = vst [vmem:[#allocation2 + $0x121] sm:$0xff] %v533_v39  ;;  %vm472_vm9 = vcmp.ge.f32.partialorder %v440_v42, 0.0  ;;  %v504_v50 = vmul.f32 0.01, %v440_v42  ;;  %v4092_v52 = vld [vmem:[%s5664_s3 + $0x150] sm:$0xff]   ;;  %v366_v62 = vunpack.c.h.bf16 %v333_v46 }
  0x47   : > { %vm471_vm8 = vcmp.ge.f32.partialorder %v439_v36, 0.0  ;;  %v503_v44 = vmul.f32 0.01, %v439_v36  ;;  %v4517_v56 = vld [vmem:[#allocation2 + $0xb0] sm:$0xff]  ;;  %3681 = vmatprep.subr.bf16.mxu1 %v4092_v52  ;;  %v537_v17 = vsel %vm473_vm11, %v441_v63, %v505_v7  ;;  %v538_v24 = vsel %vm474_vm12, %v442_v3, %v506_v13  ;;  %v4549_v39 = vld [vmem:[#allocation2 + $0xc0] sm:$0xff]  ;;  %v4091_v7 = vld [vmem:[%s5664_s3 + $0x1b8] sm:$0xff]  }
  0x48   : > { %v436_v2 = vadd.f32 %v4292_v30, %v397_v58  ;;  %v365_v58 = vunpack.c.l.bf16 %v333_v46  ;;  %v405_v4 = vmul.f32 %v4283_v25, %v366_v62  ;;  %624 = vst [vmem:[#allocation2 + $0x151] sm:$0xff] %v537_v17  ;;  %625 = vst [vmem:[#allocation2 + $0x159] sm:$0xff] %v538_v24  ;;  %v754_v45 = vrot.slane %v4543_v31, 1  ;;  %v4572_v62 = vld [vmem:[#allocation2 + $0xd8] sm:$0xff] }
  0x49   : > { %2000 = vmatmul.mubr.bf16.gmra.mxu1 %v4398_v53  ;;  %3574 = vmatpush3.bf16.msra.mxu0 %v4087_v11  ;;  %v535_v54 = vsel %vm471_vm8, %v439_v36, %v503_v44  ;;  %v4094_v11 = vld [vmem:[%s5664_s3 + $0x110] sm:$0xff]   ;;  %v756_v36 = vrot.slane %v4348_v19, 1  ;;  %v762_v3 = vrot.slane %v4360_v27, 1  ;;  %v766_v24 = vrot.slane %v4390_v47, 1 }
  0x4a   : > { %2007 = vmatprep.mubr.bf16.mxu1 %v4470_v60  ;;  %vm468_vm5 = vcmp.ge.f32.partialorder %v436_v2, 0.0  ;;  %v500_v14 = vmul.f32 0.01, %v436_v2  ;;  %3783 = vmatprep.subr.bf16.mxu0 %v4089_v34  ;;  %622 = vst [vmem:[#allocation2 + $0x139] sm:$0xff] %v535_v54  ;;  %v404_v0 = vmul.f32 %v4283_v25, %v365_v58  ;;  %v407_v34 = vmul.f32 %v4283_v25, %v368_v22  ;;  %v4609_v22 = vld [vmem:[#allocation2 + $0xf0] sm:$0xff] }
  0x4b   : > { %3682 = vmatpush3.bf16.msra.mxu1 %v4094_v11  ;;  %v758_v58 = vsel %vm750_vm10, %v756_v36, %v757_v37  ;;  %v4093_v11 = vld [vmem:[%s5664_s3 + $0x1f0] sm:$0xff]   ;;  %v4099_v36 = vld [vmem:[%s5664_s3 + $0x1a8] sm:$0xff]   ;;  %vm901_vm1 = vcmask 1045504  }
  0x4c   : > { %3952 = vmatmul.mubr.bf16.gmra.mxu0 %v323_v29  ;;  %v532_v28 = vsel %vm468_vm5, %v436_v2, %v500_v14  ;;  %v438_v29 = vadd.f32 %v4292_v30, %v399_v16  ;;  %v751_v2 = vrot.slane %v4523_v1, 1  ;;  %v443_v8 = vadd.f32 %v4292_v30, %v404_v0  ;;  %3683 = vmatprep.subr.bf16.mxu1 %v4096_v23  ;;  %v4100_v0 = vld [vmem:[%s5664_s3 + $0x140] sm:$0xff]   ;;  %v4611_v23 = vld [vmem:[#allocation2 + $0x58] sm:$0x3] }
  0x4d   : > { %3955 = vmatprep.mubr.bf16.mxu0 %v325_v38  ;;  %619 = vst [vmem:[#allocation2 + $0x111] sm:$0xff] %v532_v28  ;;  %v444_v14 = vadd.f32 %v4292_v30, %v405_v4  ;;  %v367_v16 = vunpack.c.l.bf16 %v335_v10  ;;  %v446_v44 = vadd.f32 %v4292_v30, %v407_v34  ;;  %v4580_v4 = vld [vmem:[#allocation2 + $0xe0] sm:$0xff] }
  0x4e   : > { %vm470_vm7 = vcmp.ge.f32.partialorder %v438_v29, 0.0  ;;  %v502_v38 = vmul.f32 0.01, %v438_v29  ;;  %vm475_vm13 = vcmp.ge.f32.partialorder %v443_v8, 0.0  ;;  %v507_v21 = vmul.f32 0.01, %v443_v8 }
  0x4f   : > { %vm476_vm14 = vcmp.ge.f32.partialorder %v444_v14, 0.0  ;;  %v508_v28 = vmul.f32 0.01, %v444_v14  ;;  %vm478_vm0 = vcmp.ge.f32.partialorder %v446_v44, 0.0  ;;  %v510_v51 = vmul.f32 0.01, %v446_v44 }
  0x50   : > { %v534_v49 = vsel %vm470_vm7, %v438_v29, %v502_v38  ;;  %v406_v29 = vmul.f32 %v4283_v25, %v367_v16  ;;  %v539_v33 = vsel %vm475_vm13, %v443_v8, %v507_v21  ;;  %v4098_v25 = vld [vmem:[%s5664_s3 + $0x108] sm:$0xff]   ;;  %v755_v52 = vsel %vm750_vm10, %v751_v2, %v754_v45  ;;  %v4095_v16 = vld [vmem:[%s5664_s3 + $0x1b0] sm:$0xff]   ;;  %v4103_v45 = vld [vmem:[%s5664_s3 + $0x1a0] sm:$0xff]  }
  0x51   : > { %2008 = vmatmul.mubr.bf16.gmra.mxu1 %v4433_v18  ;;  %621 = vst [vmem:[#allocation2 + $0x129] sm:$0xff] %v534_v49  ;;  %v540_v38 = vsel %vm476_vm14, %v444_v14, %v508_v28  ;;  %626 = vst [vmem:[#allocation2 + $0x169] sm:$0xff] %v539_v33  ;;  %v863_v54 = vpack.c.bf16 %v755_v52, %v751_v2  ;;  %v542_v57 = vsel %vm478_vm0, %v446_v44, %v510_v51  ;;  %v4102_v14 = vld [vmem:[%s5664_s3 + $0x100] sm:$0xff]   ;;  %v4615_v28 = vld [vmem:[#allocation2 + $0xf8] sm:$0xff] }
  0x52   : > { %2015 = vmatprep.mubr.bf16.mxu1 %v4501_v35  ;;  %627 = vst [vmem:[#allocation2 + $0x171] sm:$0xff] %v540_v38  ;;  %3684 = vmatpush3.bf16.msra.mxu1 %v4098_v25  ;;  %629 = vst [vmem:[#allocation2 + $0x189] sm:$0xff] %v542_v57  ;;  %v761_v2 = vrot.slane %v4358_v26, 1  ;;  %v4593_v13 = vpack.c.bf16 %v4580_v4, %v4572_v62  ;;  %v767_v33 = vrot.slane %v4392_v48, 1  ;;  %v4101_v38 = vld [vmem:[%s5664_s3 + $0x1e0] sm:$0xff]   ;;  %v4104_v51 = vld [vmem:[%s5664_s3 + $0x1d8] sm:$0xff]  }
  0x53   : > { %3685 = vmatprep.subr.bf16.mxu1 %v4100_v0  ;;  %v4638_v44 = vld [vmem:[#allocation2 + $0x70] sm:$0x3]  ;;  %v4652_v52 = vld [vmem:[#allocation2 + $0x108] sm:$0xff]  ;;  %v907_v0 = vrot.slane %v4348_v19, 2  ;;  %v917_v19 = vrot.slane %v4390_v47, 2  ;;  %v4691_v47 = vld [vmem:[#allocation2 + $0x120] sm:$0xff] }
  0x54   : > { %3956 = vmatmul.mubr.bf16.gmra.mxu0 %v327_v59  ;;  %v536_v59 = vsel %vm472_vm9, %v440_v42, %v504_v50  ;;  %v4551_v42 = vld [vmem:[#allocation2 + $0xc8] sm:$0xff]  ;;  %v763_v17 = vsel %vm750_vm10, %v761_v2, %v762_v3  ;;  %v768_v25 = vsel %vm750_vm10, %v766_v24, %v767_v33  ;;  %v908_v2 = vrot.slane %v4350_v20, 2 }
  0x55   : > { %3959 = vmatprep.mubr.bf16.mxu0 %v329_v6  ;;  %623 = vst [vmem:[#allocation2 + $0x141] sm:$0xff] %v536_v59  ;;  %v4530_v6 = vpack.c.bf16 %v4517_v56, %v4515_v55  ;;  %v4563_v50 = vpack.c.bf16 %v4551_v42, %v4549_v39  ;;  %v4110_v20 = vld [vmem:[%s5664_s3 + $0x1c8] sm:$0xff]  }
  0x56   : > { %3686 = vmatpush3.bf16.msra.mxu1 %v4102_v14  ;;  %v4109_v14 = vld [vmem:[%s5664_s3 + $0x190] sm:$0xff]   ;;  %v909_v24 = vsel %vm901_vm1, %v907_v0, %v908_v2 }
  0x59   : > { %2016 = vmatmul.mubr.bf16.gmra.mxu1 %v4470_v60 }
  0x5a   : > { %2023 = vmatprep.mubr.bf16.mxu1 %v4530_v6 }
  0x5c   : > { %3960 = vmatmul.mubr.bf16.gmra.mxu0 %v331_v43  ;;  %v445_v43 = vadd.f32 %v4292_v30, %v406_v29  ;;  %v4620_v29 = vld [vmem:[%s5664_s3 + $0x238] sm:$0xff]  }
  0x5d   : > { %3963 = vmatprep.mubr.bf16.mxu0 %v333_v46  ;;  %v4556_v46 = vld [vmem:[#allocation2 + $0x28] sm:$0x3]  ;;  %3967 = vmatprep.subr.bf16.mxu1 %v4620_v29 }
  0x5e   : > { %vm477_vm15 = vcmp.ge.f32.partialorder %v445_v43, 0.0  ;;  %v509_v49 = vmul.f32 0.01, %v445_v43  ;;  %v759_v59 = vrot.slane %v4556_v46, 1 }
  0x60   : > { %v541_v30 = vsel %vm477_vm15, %v445_v43, %v509_v49  ;;  %v760_v63 = vsel %vm750_vm10, %v757_v37, %v759_v59  ;;  %v769_v37 = vrot.slane %v4611_v23, 1  ;;  %v4635_v43 = vpack.c.bf16 %v4615_v28, %v4609_v22  ;;  %v4106_v59 = vld [vmem:[%s5664_s3 + $0x198] sm:$0xff]  }
  0x61   : > { %628 = vst [vmem:[#allocation2 + $0x181] sm:$0xff] %v541_v30  ;;  %2024 = vmatmul.mubr.bf16.gmra.mxu1 %v4501_v35  ;;  %v4585_v8 = vpack.c.bf16 %v760_v63, %v758_v58  ;;  %v4654_v30 = vld [vmem:[#allocation2 + $0x110] sm:$0xff]  ;;  %v774_v58 = vrot.slane %v4638_v44, 1 }
  0x62   : > { %2031 = vmatprep.mubr.bf16.mxu1 %v4563_v50  ;;  %v770_v49 = vsel %vm750_vm10, %v767_v33, %v769_v37  ;;  %v4107_v63 = vld [vmem:[%s5664_s3 + $0x1d0] sm:$0xff]   ;;  %v910_v33 = vrot.slane %v4556_v46, 2  ;;  %v920_v46 = vrot.slane %v4611_v23, 2  ;;  %v4115_v23 = vld [vmem:[%s5664_s3 + $0x180] sm:$0xff]  }
  0x63   : > { %v4657_v57 = vpack.c.bf16 %v770_v49, %v768_v25 }
  0x64   : > { %3964 = vmatmul.mubr.bf16.gmra.mxu0 %v335_v10  ;;  %v764_v10 = vrot.slane %v4569_v61, 1  ;;  %v911_v25 = vsel %vm901_vm1, %v908_v2, %v910_v33  ;;  %v923_v2 = vrot.slane %v4424_v12, 2  ;;  %v928_v33 = vrot.slane %v4455_v41, 2 }
  0x65   : > { %2136 = vmatprep.mubr.bf16.mxu0 %v863_v54  ;;  %v772_v54 = vrot.slane %v4424_v12, 1  ;;  %v4711_v49 = vpack.c.bf16 %v911_v25, %v909_v24  ;;  %v927_v24 = vrot.slane %v4453_v40, 2  ;;  %v786_v25 = vrot.slane %v4515_v55, 1 }
  0x66   : > { %v765_v21 = vsel %vm750_vm10, %v762_v3, %v764_v10  ;;  %v912_v3 = vrot.slane %v4358_v26, 2  ;;  %v4672_v10 = vpack.c.bf16 %v4654_v30, %v4652_v52 }
  0x67   : > { %v4623_v34 = vpack.c.bf16 %v765_v21, %v763_v17  ;;  %v777_v17 = vrot.slane %v4455_v41, 1  ;;  %v4693_v21 = vld [vmem:[#allocation2 + $0x128] sm:$0xff]  ;;  %v929_v41 = vsel %vm901_vm1, %v927_v24, %v928_v33 }
  0x69   : > { %2032 = vmatmul.mubr.bf16.gmra.mxu1 %v4530_v6 }
  0x6a   : > { %2039 = vmatprep.mubr.bf16.mxu1 %v4593_v13 }
  0x6c   : > { %2137 = vmatmul.mubr.bf16.vlgmr.msra.gmra.mxu0 %v4370_v32  ;;  %v4097_v32 = vld [vmem:[%s5664_s3 + $0x1e8] sm:$0xff]  }
  0x6d   : > { %3784 = vmatpush3.bf16.msra.mxu0 %v4091_v7  ;;  %2144 = vmatprep.mubr.bf16.mxu0 %v4585_v8  ;;  %v913_v7 = vrot.slane %v4360_v27, 2  ;;  %v775_v27 = vsel %vm750_vm10, %v772_v54, %v774_v58 }
  0x6e   : > { %3785 = vmatprep.subr.bf16.mxu0 %v4093_v11  ;;  %v4675_v11 = vld [vmem:[#allocation2 + $0x88] sm:$0x3] }
  0x6f   : > { %v914_v37 = vsel %vm901_vm1, %v912_v3, %v913_v7  ;;  %v650_v3 = vld [vmem:[#allocation2 + $0xa0] sm:$0x3] }
  0x71   : > { %3786 = vmatpush3.bf16.msra.mxu0 %v4095_v16  ;;  %2040 = vmatmul.mubr.bf16.gmra.mxu1 %v4563_v50  ;;  %v776_v16 = vrot.slane %v4453_v40, 1 }
  0x72   : > { %3787 = vmatprep.subr.bf16.mxu0 %v4097_v32  ;;  %2047 = vmatprep.mubr.bf16.mxu1 %v4635_v43  ;;  %v779_v32 = vrot.slane %v4675_v11, 1 }
  0x74   : > { %2145 = vmatmul.mubr.bf16.gmra.mxu0 %v4398_v53  ;;  %v771_v53 = vrot.slane %v4418_v5, 1  ;;  %v780_v0 = vsel %vm750_vm10, %v777_v17, %v779_v32 }
  0x75   : > { %2152 = vmatprep.mubr.bf16.mxu0 %v4623_v34  ;;  %3788 = vmatpush3.bf16.msra.mxu0 %v4099_v36  ;;  %v4112_v36 = vld [vmem:[%s5664_s3 + $0x188] sm:$0xff]  }
  0x76   : > { %3789 = vmatprep.subr.bf16.mxu0 %v4101_v38  ;;  %v773_v26 = vsel %vm750_vm10, %v771_v53, %v772_v54  ;;  %v915_v38 = vrot.slane %v4569_v61, 2  ;;  %v4717_v54 = vpack.c.bf16 %v4693_v21, %v4691_v47 }
  0x79   : > { %3790 = vmatpush3.bf16.msra.mxu0 %v4103_v45  ;;  %2048 = vmatmul.mubr.bf16.gmra.mxu1 %v4593_v13  ;;  %v4113_v45 = vld [vmem:[%s5664_s3 + $0x1c0] sm:$0xff]  }
  0x7a   : > { %3791 = vmatprep.subr.bf16.mxu0 %v4104_v51  ;;  %2055 = vmatprep.mubr.bf16.mxu1 %v4672_v10  ;;  %v916_v51 = vsel %vm901_vm1, %v913_v7, %v915_v38  ;;  %v4735_v7 = vld [vmem:[#allocation2 + $0x138] sm:$0xff] }
  0x7b   : > { %v4720_v61 = vpack.c.bf16 %v916_v51, %v914_v37  ;;  %v4760_v37 = vld [vmem:[#allocation2 + $0x150] sm:$0xff] }
  0x7c   : > { %2153 = vmatmul.mubr.bf16.gmra.mxu0 %v4433_v18  ;;  %v918_v18 = vrot.slane %v4392_v48, 2  ;;  %v4699_v48 = vpack.c.bf16 %v775_v27, %v773_v26  ;;  %v781_v26 = vrot.slane %v4480_v9, 1  ;;  %v784_v27 = vrot.slane %v650_v3, 1 }
  0x7d   : > { %2160 = vmatprep.mubr.bf16.mxu0 %v4657_v57  ;;  %3792 = vmatpush3.bf16.msra.mxu0 %v4106_v59 }
  0x7e   : > { %3793 = vmatprep.subr.bf16.mxu0 %v4107_v63  ;;  %v919_v53 = vsel %vm901_vm1, %v917_v19, %v918_v18  ;;  %v921_v58 = vsel %vm901_vm1, %v918_v18, %v920_v46  ;;  %v778_v63 = vsel %vm750_vm10, %v776_v16, %v777_v17  ;;  %v787_v46 = vrot.slane %v4517_v56, 1 }
  0x7f   : > { %v4727_v59 = vpack.c.bf16 %v921_v58, %v919_v53  ;;  %v4739_v19 = vpack.c.bf16 %v780_v0, %v778_v63  ;;  %v932_v63 = vrot.slane %v4480_v9, 2  ;;  %v933_v0 = vrot.slane %v4486_v15, 2 }
  0x81   : > { %3794 = vmatpush3.bf16.msra.mxu0 %v4109_v14  ;;  %2056 = vmatmul.mubr.bf16.gmra.mxu1 %v4635_v43  ;;  %v4737_v14 = vld [vmem:[#allocation2 + $0x140] sm:$0xff]  ;;  %v934_v9 = vsel %vm901_vm1, %v932_v63, %v933_v0 }
  0x82   : > { %3795 = vmatprep.subr.bf16.mxu0 %v4110_v20  ;;  %2063 = vmatprep.mubr.bf16.mxu1 %v4717_v54  ;;  %v925_v20 = vrot.slane %v4638_v44, 2  ;;  %v4748_v16 = vpack.c.bf16 %v4737_v14, %v4735_v7 }
  0x84   : > { %2161 = vmatmul.mubr.bf16.gmra.mxu0 %v4470_v60  ;;  %v922_v60 = vrot.slane %v4418_v5, 2  ;;  %v782_v5 = vrot.slane %v4486_v15, 1  ;;  %v926_v18 = vsel %vm901_vm1, %v923_v2, %v925_v20 }
  0x85   : > { %2168 = vmatprep.mubr.bf16.mxu0 %v4699_v48  ;;  %3796 = vmatpush3.bf16.msra.mxu0 %v4112_v36  ;;  %v653_v36 = vld [vmem:[#allocation2 + $0xb8] sm:$0x3] }
  0x86   : > { %3797 = vmatprep.subr.bf16.mxu0 %v4113_v45  ;;  %v924_v12 = vsel %vm901_vm1, %v922_v60, %v923_v2  ;;  %v783_v44 = vsel %vm750_vm10, %v781_v26, %v782_v5  ;;  %v785_v32 = vsel %vm750_vm10, %v782_v5, %v784_v27  ;;  %v930_v45 = vrot.slane %v4675_v11, 2  ;;  %v656_v60 = vld [vmem:[#allocation2 + $0xd0] sm:$0x3]  ;;  %v4785_v2 = vld [vmem:[#allocation2 + $0x168] sm:$0xff] }
  0x87   : > { %v4751_v17 = vpack.c.bf16 %v926_v18, %v924_v12  ;;  %v4764_v38 = vpack.c.bf16 %v785_v32, %v783_v44  ;;  %v789_v40 = vrot.slane %v653_v36, 1  ;;  %v788_v11 = vsel %vm750_vm10, %v786_v25, %v787_v46  ;;  %v4805_v32 = vld [vmem:[#allocation2 + $0x188] sm:$0xff] }
  0x88   : > { %v931_v51 = vsel %vm901_vm1, %v928_v33, %v930_v45  ;;  %v935_v26 = vrot.slane %v650_v3, 2  ;;  %v791_v5 = vrot.slane %v4549_v39, 1  ;;  %v792_v27 = vrot.slane %v4551_v42, 1  ;;  %v4803_v3 = vld [vmem:[#allocation2 + $0x180] sm:$0xff] }
  0x89   : > { %3798 = vmatpush3.bf16.msra.mxu0 %v4115_v23  ;;  %2064 = vmatmul.mubr.bf16.gmra.mxu1 %v4672_v10  ;;  %v4776_v58 = vpack.c.bf16 %v931_v51, %v929_v41  ;;  %v790_v23 = vsel %vm750_vm10, %v787_v46, %v789_v40  ;;  %v794_v12 = vrot.slane %v656_v60, 1  ;;  %v937_v45 = vrot.slane %v4515_v55, 2  ;;  %v659_v40 = vld [vmem:[#allocation2 + $0xe8] sm:$0x3]  ;;  %v4815_v41 = vld [vmem:[#allocation2 + $0x190] sm:$0x3] }
  0x8a   : > { %2071 = vmatprep.mubr.bf16.mxu1 %v4748_v16  ;;  %v4789_v20 = vpack.c.bf16 %v790_v23, %v788_v11  ;;  %v936_v15 = vsel %vm901_vm1, %v933_v0, %v935_v26  ;;  %v793_v24 = vsel %vm750_vm10, %v791_v5, %v792_v27  ;;  %v938_v25 = vrot.slane %v4517_v56, 2 }
  0x8b   : > { %v4800_v44 = vpack.c.bf16 %v936_v15, %v934_v9  ;;  %v795_v33 = vsel %vm750_vm10, %v792_v27, %v794_v12  ;;  %v883_v46 = vrot.slane %v4805_v32, 1  ;;  %v885_v11 = vrot.slane %v4815_v41, 1 }
  0x8c   : > { %2169 = vmatmul.mubr.bf16.gmra.mxu0 %v4501_v35  ;;  %v4762_v35 = vld [vmem:[#allocation2 + $0x158] sm:$0xff]  ;;  %v4817_v51 = vpack.c.bf16 %v795_v33, %v793_v24  ;;  %v940_v23 = vrot.slane %v653_v36, 2  ;;  %v796_v55 = vrot.slane %v4572_v62, 1  ;;  %v797_v56 = vrot.slane %v4580_v4, 1 }
  0x8d   : > { %2176 = vmatprep.mubr.bf16.mxu0 %v4739_v19  ;;  %v4773_v53 = vpack.c.bf16 %v4762_v35, %v4760_v37  ;;  %v799_v63 = vrot.slane %v659_v40, 1  ;;  %v886_v26 = vsel %vm750_vm10, %v883_v46, %v885_v11  ;;  %v939_v5 = vsel %vm901_vm1, %v937_v45, %v938_v25 }
  0x8e   : > { %v941_v27 = vsel %vm901_vm1, %v938_v25, %v940_v23  ;;  %v4828_v12 = vpack.c.bf16 %v4805_v32, %v4803_v3  ;;  %v798_v15 = vsel %vm750_vm10, %v796_v55, %v797_v56  ;;  %v942_v33 = vrot.slane %v4549_v39, 2  ;;  %v662_v25 = vld [vmem:[#allocation2 + $0x100] sm:$0x3] }
  0x8f   : > { %v4833_v9 = vpack.c.bf16 %v941_v27, %v939_v5  ;;  %v800_v24 = vsel %vm750_vm10, %v797_v56, %v799_v63  ;;  %v943_v45 = vrot.slane %v4551_v42, 2  ;;  %v802_v11 = vrot.slane %v4615_v28, 1 }
  0x90   : > { %v804_v23 = vrot.slane %v662_v25, 1  ;;  %v806_v27 = vrot.slane %v4652_v52, 1 }
  0x91   : > { %2072 = vmatmul.mubr.bf16.gmra.mxu1 %v4717_v54  ;;  %v944_v55 = vsel %vm901_vm1, %v942_v33, %v943_v45 }
  0x92   : > { %2079 = vmatprep.mubr.bf16.mxu1 %v4773_v53  ;;  %v805_v63 = vsel %vm750_vm10, %v802_v11, %v804_v23  ;;  %v668_v23 = vld [vmem:[#allocation2 + $0x130] sm:$0x3] }
  0x94   : > { %2177 = vmatmul.mubr.bf16.gmra.mxu0 %v4530_v6  ;;  %v4787_v6 = vld [vmem:[#allocation2 + $0x170] sm:$0xff] }
  0x95   : > { %2184 = vmatprep.mubr.bf16.mxu0 %v4764_v38  ;;  %v4797_v18 = vpack.c.bf16 %v4787_v6, %v4785_v2 }
  0x99   : > { %2080 = vmatmul.mubr.bf16.gmra.mxu1 %v4748_v16 }
  0x9a   : > { %2087 = vmatprep.mubr.bf16.mxu1 %v4797_v18 }
  0x9c   : > { %2185 = vmatmul.mubr.bf16.gmra.mxu0 %v4563_v50  ;;  %v882_v50 = vrot.slane %v4803_v3, 1 }
  0x9d   : > { %2192 = vmatprep.mubr.bf16.mxu0 %v4789_v20 }
  0x9e   : > { %v884_v0 = vsel %vm750_vm10, %v882_v50, %v883_v46  ;;  %v945_v50 = vrot.slane %v656_v60, 2  ;;  %v801_v46 = vrot.slane %v4609_v22, 1  ;;  %v947_v60 = vrot.slane %v4572_v62, 2 }
  0x9f   : > { %v4831_v36 = vpack.c.bf16 %v886_v26, %v884_v0  ;;  %v948_v0 = vrot.slane %v4580_v4, 2  ;;  %v665_v26 = vld [vmem:[#allocation2 + $0x118] sm:$0x3]  ;;  %v4108_v4 = vld [vmem:[%s5664_s3 + $0x230] sm:$0xff]  }
  0xa0   : > { %v946_v56 = vsel %vm901_vm1, %v943_v45, %v945_v50  ;;  %v803_v42 = vsel %vm750_vm10, %v801_v46, %v802_v11  ;;  %v952_v46 = vrot.slane %v4609_v22, 2  ;;  %v953_v11 = vrot.slane %v4615_v28, 2 }
  0xa1   : > { %2088 = vmatmul.mubr.bf16.gmra.mxu1 %v4773_v53  ;;  %v4849_v39 = vpack.c.bf16 %v946_v56, %v944_v55  ;;  %v4858_v5 = vpack.c.bf16 %v805_v63, %v803_v42  ;;  %v949_v33 = vsel %vm901_vm1, %v947_v60, %v948_v0  ;;  %v4111_v55 = vld [vmem:[%s5664_s3 + $0x228] sm:$0xff]   ;;  %v955_v56 = vrot.slane %v662_v25, 2  ;;  %v4114_v25 = vld [vmem:[%s5664_s3 + $0x220] sm:$0xff]  }
  0xa2   : > { %2095 = vmatprep.mubr.bf16.mxu1 %v4828_v12  ;;  %v811_v42 = vrot.slane %v4691_v47, 1  ;;  %v812_v22 = vrot.slane %v4693_v21, 1  ;;  %v814_v28 = vrot.slane %v668_v23, 1 }
  0xa3   : > { %v956_v63 = vsel %vm901_vm1, %v953_v11, %v955_v56 }
  0xa4   : > { %2193 = vmatmul.mubr.bf16.gmra.mxu0 %v4593_v13  ;;  %v4842_v13 = vpack.c.bf16 %v800_v24, %v798_v15  ;;  %v807_v15 = vrot.slane %v4654_v30, 1  ;;  %v809_v24 = vrot.slane %v665_v26, 1  ;;  %v813_v60 = vsel %vm750_vm10, %v811_v42, %v812_v22  ;;  %v4118_v42 = vld [vmem:[%s5664_s3 + $0x208] sm:$0xff]  }
  0xa5   : > { %2200 = vmatprep.mubr.bf16.mxu0 %v4817_v51 }
  0xa6   : > { %v810_v50 = vsel %vm750_vm10, %v807_v15, %v809_v24  ;;  %v4116_v24 = vld [vmem:[%s5664_s3 + $0x218] sm:$0xff]  }
  0xa9   : > { %2096 = vmatmul.mubr.bf16.gmra.mxu1 %v4797_v18 }
  0xaa   : > { %2297 = vmatprep.mubr.bf16.mxu1 %v4623_v34 }
  0xac   : > { %2201 = vmatmul.mubr.bf16.gmra.mxu0 %v4635_v43  ;;  %v950_v43 = vrot.slane %v659_v40, 2  ;;  %v808_v40 = vsel %vm750_vm10, %v806_v27, %v807_v15  ;;  %v958_v27 = vrot.slane %v4654_v30, 2 }
  0xad   : > { %2208 = vmatprep.mubr.bf16.mxu0 %v4842_v13 }
  0xae   : > { %v951_v45 = vsel %vm901_vm1, %v948_v0, %v950_v43  ;;  %v815_v0 = vsel %vm750_vm10, %v812_v22, %v814_v28  ;;  %v957_v43 = vrot.slane %v4652_v52, 2  ;;  %v817_v52 = vrot.slane %v4737_v14, 1 }
  0xaf   : > { %v4865_v62 = vpack.c.bf16 %v951_v45, %v949_v33  ;;  %v4900_v15 = vpack.c.bf16 %v815_v0, %v813_v60  ;;  %v960_v33 = vrot.slane %v665_v26, 2  ;;  %v816_v45 = vrot.slane %v4735_v7, 1  ;;  %v4117_v26 = vld [vmem:[%s5664_s3 + $0x210] sm:$0xff]  }
  0xb0   : > { %v959_v30 = vsel %vm901_vm1, %v957_v43, %v958_v27  ;;  %v965_v22 = vrot.slane %v668_v23, 2  ;;  %v821_v28 = vrot.slane %v4760_v37, 1  ;;  %v4119_v23 = vld [vmem:[%s5664_s3 + $0x200] sm:$0xff]   ;;  %v967_v0 = vrot.slane %v4735_v7, 2 }
  0xb1   : > { %2298 = vmatmul.mubr.bf16.vlgmr.msra.gmra.mxu1 %v4585_v8  ;;  %v954_v8 = vsel %vm901_vm1, %v952_v46, %v953_v11  ;;  %v962_v11 = vrot.slane %v4691_v47, 2  ;;  %v822_v47 = vrot.slane %v4762_v35, 1  ;;  %v968_v43 = vrot.slane %v4737_v14, 2 }
  0xb2   : > { %3968 = vmatpush3.bf16.msra.mxu1 %v4620_v29  ;;  %2305 = vmatprep.mubr.bf16.mxu1 %v4657_v57  ;;  %v4888_v29 = vpack.c.bf16 %v956_v63, %v954_v8 }
  0xb3   : > { %3969 = vmatprep.subr.bf16.mxu1 %v4108_v4 }
  0xb4   : > { %2209 = vmatmul.mubr.bf16.gmra.mxu0 %v4672_v10  ;;  %v4878_v10 = vpack.c.bf16 %v810_v50, %v808_v40  ;;  %v818_v50 = vsel %vm750_vm10, %v816_v45, %v817_v52  ;;  %v827_v45 = vrot.slane %v4787_v6, 1 }
  0xb5   : > { %2216 = vmatprep.mubr.bf16.mxu0 %v4858_v5 }
  0xb6   : > { %3970 = vmatpush3.bf16.msra.mxu1 %v4108_v4 }
  0xb7   : > { %3971 = vmatprep.subr.bf16.mxu1 %v4111_v55 }
  0xb9   : > { %2306 = vmatmul.mubr.bf16.gmra.mxu1 %v4623_v34  ;;  %v961_v34 = vsel %vm901_vm1, %v958_v27, %v960_v33  ;;  %v826_v33 = vrot.slane %v4785_v2, 1 }
  0xba   : > { %2313 = vmatprep.mubr.bf16.mxu1 %v4699_v48  ;;  %3972 = vmatpush3.bf16.msra.mxu1 %v4111_v55  ;;  %v4910_v40 = vpack.c.bf16 %v961_v34, %v959_v30  ;;  %v963_v55 = vrot.slane %v4693_v21, 2  ;;  %v972_v30 = vrot.slane %v4760_v37, 2  ;;  %v973_v34 = vrot.slane %v4762_v35, 2 }
  0xbb   : > { %3973 = vmatprep.subr.bf16.mxu1 %v4114_v25  ;;  %v828_v14 = vsel %vm750_vm10, %v826_v33, %v827_v45  ;;  %v977_v37 = vrot.slane %v4785_v2, 2  ;;  %v978_v35 = vrot.slane %v4787_v6, 2  ;;  %v1030_v6 = vrot.slane %v4803_v3, 2 }
  0xbc   : > { %2217 = vmatmul.mubr.bf16.gmra.mxu0 %v4717_v54  ;;  %v671_v54 = vld [vmem:[#allocation2 + $0x148] sm:$0x3]  ;;  %v964_v21 = vsel %vm901_vm1, %v962_v11, %v963_v55 }
  0xbd   : > { %2224 = vmatprep.mubr.bf16.mxu0 %v4878_v10  ;;  %v819_v4 = vrot.slane %v671_v54, 1 }
  0xbe   : > { %3974 = vmatpush3.bf16.msra.mxu1 %v4114_v25  ;;  %v823_v25 = vsel %vm750_vm10, %v821_v28, %v822_v47  ;;  %v1031_v28 = vrot.slane %v4805_v32, 2 }
  0xbf   : > { %3975 = vmatprep.subr.bf16.mxu1 %v4116_v24  ;;  %v820_v46 = vsel %vm750_vm10, %v817_v52, %v819_v4  ;;  %v969_v4 = vsel %vm901_vm1, %v967_v0, %v968_v43 }
  0xc0   : > { %v4922_v56 = vpack.c.bf16 %v820_v46, %v818_v50  ;;  %v974_v50 = vsel %vm901_vm1, %v972_v30, %v973_v34 }
  0xc1   : > { %2314 = vmatmul.mubr.bf16.gmra.mxu1 %v4657_v57  ;;  %v966_v57 = vsel %vm901_vm1, %v963_v55, %v965_v22  ;;  %v902_v55 = vrot.slane %v4523_v1, 2 }
  0xc2   : > { %2321 = vmatprep.mubr.bf16.mxu1 %v4739_v19  ;;  %3976 = vmatpush3.bf16.msra.mxu1 %v4116_v24  ;;  %v4932_v63 = vpack.c.bf16 %v966_v57, %v964_v21  ;;  %v970_v24 = vrot.slane %v671_v54, 2 }
  0xc3   : > { %3977 = vmatprep.subr.bf16.mxu1 %v4117_v26 }
  0xc4   : > { %2225 = vmatmul.mubr.bf16.gmra.mxu0 %v4748_v16  ;;  %v674_v16 = vld [vmem:[#allocation2 + $0x160] sm:$0x3]  ;;  %v971_v7 = vsel %vm901_vm1, %v968_v43, %v970_v24 }
  0xc5   : > { %2232 = vmatprep.mubr.bf16.mxu0 %v4900_v15  ;;  %v824_v8 = vrot.slane %v674_v16, 1 }
  0xc6   : > { %3978 = vmatpush3.bf16.msra.mxu1 %v4117_v26 }
  0xc7   : > { %3979 = vmatprep.subr.bf16.mxu1 %v4118_v42  ;;  %v825_v60 = vsel %vm750_vm10, %v822_v47, %v824_v8  ;;  %v1032_v47 = vsel %vm901_vm1, %v1030_v6, %v1031_v28 }
  0xc8   : > { %v4944_v27 = vpack.c.bf16 %v825_v60, %v823_v25 }
  0xc9   : > { %2322 = vmatmul.mubr.bf16.gmra.mxu1 %v4699_v48  ;;  %v4951_v48 = vpack.c.bf16 %v971_v7, %v969_v4 }
  0xca   : > { %2329 = vmatprep.mubr.bf16.mxu1 %v4764_v38  ;;  %3980 = vmatpush3.bf16.msra.mxu1 %v4118_v42  ;;  %v979_v42 = vsel %vm901_vm1, %v977_v37, %v978_v35 }
  0xcb   : > { %3981 = vmatprep.subr.bf16.mxu1 %v4119_v23 }
  0xcc   : > { %2233 = vmatmul.mubr.bf16.gmra.mxu0 %v4773_v53  ;;  %v677_v53 = vld [vmem:[#allocation2 + $0x178] sm:$0x3] }
  0xcd   : > { %2240 = vmatprep.mubr.bf16.mxu0 %v4922_v56  ;;  %v829_v52 = vrot.slane %v677_v53, 1 }
  0xce   : > { %3982 = vmatpush3.bf16.msra.mxu1 %v4119_v23 }
  0xcf   : > { %v830_v54 = vsel %vm750_vm10, %v827_v45, %v829_v52 }
  0xd0   : > { %v4960_v26 = vpack.c.bf16 %v830_v54, %v828_v14 }
  0xd1   : > { %2330 = vmatmul.mubr.bf16.gmra.mxu1 %v4739_v19  ;;  %v701_v19 = vpack.c.bf16 %v4523_v1, %v4523_v1 }
  0xd2   : > { %2337 = vmatprep.mubr.bf16.mxu1 %v4789_v20 }
  0xd4   : > { %2241 = vmatmul.mubr.bf16.gmra.mxu0 %v4797_v18  ;;  %v975_v18 = vrot.slane %v674_v16, 2  ;;  %v905_v16 = vrot.slane %v4543_v31, 2  ;;  %v1033_v31 = vrot.slane %v4815_v41, 2 }
  0xd5   : > { %2248 = vmatprep.mubr.bf16.mxu0 %v4944_v27 }
  0xd6   : > { %v976_v46 = vsel %vm901_vm1, %v973_v34, %v975_v18  ;;  %v1034_v8 = vsel %vm901_vm1, %v1031_v28, %v1033_v31 }
  0xd7   : > { %v4965_v11 = vpack.c.bf16 %v976_v46, %v974_v50  ;;  %v4989_v57 = vpack.c.bf16 %v1034_v8, %v1032_v47 }
  0xd9   : > { %2338 = vmatmul.mubr.bf16.gmra.mxu1 %v4764_v38  ;;  %v906_v38 = vsel %vm901_vm1, %v902_v55, %v905_v16 }
  0xda   : > { %2345 = vmatprep.mubr.bf16.mxu1 %v4817_v51  ;;  %v1014_v1 = vpack.c.bf16 %v906_v38, %v902_v55 }
  0xdc   : > { %2249 = vmatmul.mubr.bf16.gmra.mxu0 %v4828_v12  ;;  %v980_v12 = vrot.slane %v677_v53, 2 }
  0xdd   : > { %2256 = vmatprep.mubr.bf16.mxu0 %v4960_v26 }
  0xde   : > { %v981_v22 = vsel %vm901_vm1, %v978_v35, %v980_v12 }
  0xdf   : > { %v4978_v2 = vpack.c.bf16 %v981_v22, %v979_v42 }
  0xe1   : > { %2346 = vmatmul.mubr.bf16.gmra.mxu1 %v4789_v20 }
  0xe2   : > { %2353 = vmatprep.mubr.bf16.mxu1 %v4842_v13 }
  0xe4   : > { %2257 = vmatmul.mubr.bf16.gmra.mxu0 %v701_v19 }
  0xe5   : > { %2458 = vmatprep.mubr.bf16.mxu0 %v4711_v49 }
  0xe9   : > { %2354 = vmatmul.mubr.bf16.gmra.mxu1 %v4817_v51 }
  0xea   : > { %2361 = vmatprep.mubr.bf16.mxu1 %v4858_v5 }
  0xec   : > { %v3937_v21 = vpop.f32.mrf.mxu0  ;;  %2459 = vmatmul.mubr.bf16.vlgmr.msra.gmra.mxu0 %v1014_v1 }
  0xed   : > { %2466 = vmatprep.mubr.bf16.mxu0 %v4720_v61 }
  0xee   : > { %v1384_v3 = vpop.f32.mrf.mxu0 }
  0xf0   : > { %v3938_v20 = vpop.f32.mrf.mxu0 }
  0xf1   : > { %v3463_v25 = vpop.f32.mrf.mxu1  ;;  %2362 = vmatmul.mubr.bf16.gmra.mxu1 %v4842_v13 }
  0xf2   : > { %v1387_v32 = vpop.f32.mrf.mxu0  ;;  %2369 = vmatprep.mubr.bf16.mxu1 %v4878_v10 }
  0xf3   : > { %v3464_v0 = vpop.f32.mrf.mxu1 }
  0xf4   : > { %v3941_v23 = vpop.f32.mrf.mxu0  ;;  %2467 = vmatmul.mubr.bf16.gmra.mxu0 %v4711_v49  ;;  %v3465_v43 = vadd.f32 %v3464_v0, %v3463_v25 }
  0xf5   : > { %2474 = vmatprep.mubr.bf16.mxu0 %v4727_v59  ;;  %v3466_v51 = vpop.f32.mrf.mxu1 }
  0xf6   : > { %v1400_v41 = vpop.f32.mrf.mxu0  ;;  %v4998_v24 = vadd.f32 %v3465_v43, %v1384_v3 }
  0xf7   : > { %v3467_v49 = vpop.f32.mrf.mxu1 }
  0xf8   : > { %v3942_v60 = vpop.f32.mrf.mxu0  ;;  %v3468_v45 = vadd.f32 %v3467_v49, %v3466_v51 }
  0xf9   : > { %v3469_v4 = vpop.f32.mrf.mxu1  ;;  %2370 = vmatmul.mubr.bf16.gmra.mxu1 %v4858_v5 }
  0xfa   : > { %v1403_v53 = vpop.f32.mrf.mxu0  ;;  %v5005_v13 = vadd.f32 %v3468_v45, %v1387_v32  ;;  %2377 = vmatprep.mubr.bf16.mxu1 %v4900_v15 }
  0xfb   : > { %v3470_v14 = vpop.f32.mrf.mxu1 }
  0xfc   : > { %v5000_v33 = vpop.f32.mrf.mxu0  ;;  %2475 = vmatmul.mubr.bf16.gmra.mxu0 %v4720_v61  ;;  %v3471_v54 = vadd.f32 %v3470_v14, %v3469_v4  ;;  %v5060_v14 = vld [vmem:[#allocation2 + $0x1a8] sm:$0x3] }
  0xfd   : > { %2482 = vmatprep.mubr.bf16.mxu0 %v4751_v17  ;;  %v3472_v34 = vpop.f32.mrf.mxu1 }
  0xfe   : > { %v1416_v52 = vpop.f32.mrf.mxu0  ;;  %v5012_v18 = vadd.f32 %v3937_v21, %v3471_v54 }
  0xff   : > { %v3473_v46 = vpop.f32.mrf.mxu1 }
 0x100   : > { %v5008_v7 = vpop.f32.mrf.mxu0  ;;  %v3474_v5 = vadd.f32 %v3473_v46, %v3472_v34 }
 0x101   : > { %v3475_v35 = vpop.f32.mrf.mxu1  ;;  %2378 = vmatmul.mubr.bf16.gmra.mxu1 %v4878_v10 }
 0x102   : > { %v5010_v30 = vpop.f32.mrf.mxu0  ;;  %v5021_v19 = vadd.f32 %v3938_v20, %v3474_v5  ;;  %2385 = vmatprep.mubr.bf16.mxu1 %v4922_v56 }
 0x103   : > { %v3476_v16 = vpop.f32.mrf.mxu1 }
 0x104   : > { %v5014_v50 = vpop.f32.mrf.mxu0  ;;  %2483 = vmatmul.mubr.bf16.gmra.mxu0 %v4727_v59  ;;  %v3477_v12 = vadd.f32 %v3476_v16, %v3475_v35  ;;  %v896_v35 = vrot.slane %v5060_v14, 1 }
 0x105   : > { %2490 = vmatprep.mubr.bf16.mxu0 %v4776_v58  ;;  %v3478_v22 = vpop.f32.mrf.mxu1 }
 0x106   : > { %v5018_v37 = vpop.f32.mrf.mxu0  ;;  %v5028_v38 = vadd.f32 %v3477_v12, %v1400_v41 }
 0x107   : > { %v3479_v28 = vpop.f32.mrf.mxu1 }
 0x108   : > { %v5024_v55 = vpop.f32.mrf.mxu0  ;;  %v3480_v10 = vadd.f32 %v3479_v28, %v3478_v22 }
 0x109   : > { %v3481_v31 = vpop.f32.mrf.mxu1  ;;  %2386 = vmatmul.mubr.bf16.gmra.mxu1 %v4900_v15 }
 0x10a   : > { %v5026_v42 = vpop.f32.mrf.mxu0  ;;  %v5037_v47 = vadd.f32 %v3480_v10, %v1403_v53  ;;  %2393 = vmatprep.mubr.bf16.mxu1 %v4944_v27 }
 0x10b   : > { %v3482_v21 = vpop.f32.mrf.mxu1 }
 0x10c   : > { %v5030_v6 = vpop.f32.mrf.mxu0  ;;  %2491 = vmatmul.mubr.bf16.gmra.mxu0 %v4751_v17  ;;  %v3483_v3 = vadd.f32 %v3482_v21, %v3481_v31 }
 0x10d   : > { %2498 = vmatprep.mubr.bf16.mxu0 %v4800_v44  ;;  %v3484_v32 = vpop.f32.mrf.mxu1 }
 0x10e   : > { %v5034_v1 = vpop.f32.mrf.mxu0  ;;  %v5044_v41 = vadd.f32 %v3941_v23, %v3483_v3 }
 0x10f   : > { %v3485_v0 = vpop.f32.mrf.mxu1 }
 0x110   : > { %v5040_v8 = vpop.f32.mrf.mxu0  ;;  %v3486_v15 = vadd.f32 %v3485_v0, %v3484_v32 }
 0x111   : > { %v3487_v53 = vpop.f32.mrf.mxu1  ;;  %2394 = vmatmul.mubr.bf16.gmra.mxu1 %v4922_v56  ;;  %v5067_v56 = vld [vmem:[#allocation2] sm:$0xff] }
 0x112   : > { %v5042_v20 = vpop.f32.mrf.mxu0  ;;  %v5053_v51 = vadd.f32 %v3942_v60, %v3486_v15  ;;  %2401 = vmatprep.mubr.bf16.mxu1 %v4960_v26  ;;  %v893_v60 = vrot.slane %v5067_v56, 1 }
 0x113   : > { %v3488_v23 = vpop.f32.mrf.mxu1 }
 0x114   : > { %v5046_v25 = vpop.f32.mrf.mxu0  ;;  %2499 = vmatmul.mubr.bf16.gmra.mxu0 %v4776_v58  ;;  %v3489_v45 = vadd.f32 %v3488_v23, %v3487_v53  ;;  %v897_v31 = vsel %vm750_vm10, %v893_v60, %v896_v35 }
 0x115   : > { %2506 = vmatprep.mubr.bf16.mxu0 %v4833_v9  ;;  %v3490_v54 = vpop.f32.mrf.mxu1  ;;  %v900_v15 = vpack.c.bf16 %v897_v31, %v893_v60 }
 0x116   : > { %v5050_v43 = vpop.f32.mrf.mxu0  ;;  %v5062_v34 = vadd.f32 %v3489_v45, %v1416_v52 }
 0x117   : > { %v3491_v5 = vpop.f32.mrf.mxu1 }
 0x118   : > { %v5056_v49 = vpop.f32.mrf.mxu0  ;;  %v3492_v16 = vadd.f32 %v3491_v5, %v3490_v54 }
 0x119   : > { %v3493_v22 = vpop.f32.mrf.mxu1  ;;  %2402 = vmatmul.mubr.bf16.gmra.mxu1 %v4944_v27 }
 0x11a   : > { %v5058_v4 = vpop.f32.mrf.mxu0  ;;  %v5076_v52 = vadd.f32 %v3492_v16, %v5010_v30  ;;  %2409 = vmatprep.mubr.bf16.mxu1 %v4831_v36 }
 0x11b   : > { %v3494_v10 = vpop.f32.mrf.mxu1 }
 0x11c   : > { %v5064_v46 = vpop.f32.mrf.mxu0  ;;  %2507 = vmatmul.mubr.bf16.gmra.mxu0 %v4800_v44  ;;  %v3495_v21 = vadd.f32 %v3494_v10, %v3493_v22 }
 0x11d   : > { %2514 = vmatprep.mubr.bf16.mxu0 %v4849_v39  ;;  %v3496_v32 = vpop.f32.mrf.mxu1 }
 0x11e   : > { %v5072_v12 = vpop.f32.mrf.mxu0  ;;  %v5085_v0 = vadd.f32 %v5000_v33, %v3495_v21 }
 0x11f   : > { %v3497_v27 = vpop.f32.mrf.mxu1 }
 0x120   : > { %v5079_v28 = vpop.f32.mrf.mxu0  ;;  %v3498_v30 = vadd.f32 %v3497_v27, %v3496_v32 }
 0x121   : > { %v3499_v45 = vpop.f32.mrf.mxu1  ;;  %2410 = vmatmul.mubr.bf16.gmra.mxu1 %v4960_v26 }
 0x122   : > { %v5082_v3 = vpop.f32.mrf.mxu0  ;;  %v5095_v54 = vadd.f32 %v5008_v7, %v3498_v30  ;;  %2417 = vmatprep.mubr.bf16.mxu1 %v900_v15 }
 0x123   : > { %v3500_v60 = vpop.f32.mrf.mxu1 }
 0x124   : > { %v5087_v53 = vpop.f32.mrf.mxu0  ;;  %2515 = vmatmul.mubr.bf16.gmra.mxu0 %v4833_v9  ;;  %v3501_v5 = vadd.f32 %v3500_v60, %v3499_v45 }
 0x125   : > { %2522 = vmatprep.mubr.bf16.mxu0 %v4865_v62  ;;  %v3502_v16 = vpop.f32.mrf.mxu1 }
 0x126   : > { %v5091_v23 = vpop.f32.mrf.mxu0  ;;  %v5102_v22 = vadd.f32 %v3501_v5, %v5018_v37 }
 0x127   : > { %v3503_v31 = vpop.f32.mrf.mxu1 }
 0x128   : > { %v5097_v33 = vpop.f32.mrf.mxu0  ;;  %v3504_v26 = vadd.f32 %v3503_v31, %v3502_v16 }
 0x129   : > { %5669 = vst [vmem:[#allocation3_spill] sm:$0xff] %v5097_v33  ;;  %v3505_v21 = vpop.f32.mrf.mxu1  ;;  %2418 = vmatmul.mubr.bf16.gmra.mxu1 %v4831_v36 }
 0x12a   : > { %v5099_v35 = vpop.f32.mrf.mxu0  ;;  %v5108_v15 = vadd.f32 %v3504_v26, %v5026_v42  ;;  %3983 = vmatprep.mubr.bf16.mxu1 %v4720_v61 }
 0x12b   : > { %v3506_v37 = vpop.f32.mrf.mxu1 }
 0x12c   : > { %v3575_v10 = vpop.f32.mrf.mxu0  ;;  %2523 = vmatmul.mubr.bf16.gmra.mxu0 %v4849_v39  ;;  %v3507_v45 = vadd.f32 %v3506_v37, %v3505_v21 }
 0x12d   : > { %2530 = vmatprep.mubr.bf16.mxu0 %v4888_v29  ;;  %v3508_v5 = vpop.f32.mrf.mxu1 }
 0x12e   : > { %v3576_v7 = vpop.f32.mrf.mxu0  ;;  %v5115_v16 = vadd.f32 %v5014_v50, %v3507_v45 }
 0x12f   : > { %v3577_v32 = vadd.f32 %v3576_v7, %v3575_v10  ;;  %v3509_v36 = vpop.f32.mrf.mxu1 }
 0x130   : > { %v3578_v27 = vpop.f32.mrf.mxu0  ;;  %v3510_v61 = vadd.f32 %v3509_v36, %v3508_v5 }
 0x131   : > { %v5112_v30 = vadd.f32 %v3577_v32, %v4998_v24  ;;  %v3511_v24 = vpop.f32.mrf.mxu1  ;;  %3984 = vmatmul.mubr.bf16.vlgmr.msra.gmra.mxu1 %v4727_v59 }
 0x132   : > { %v3579_v60 = vpop.f32.mrf.mxu0  ;;  %v5124_v7 = vadd.f32 %v5024_v55, %v3510_v61  ;;  %3987 = vmatprep.mubr.bf16.mxu1 %v4751_v17 }
 0x133   : > { %v3580_v33 = vadd.f32 %v3579_v60, %v3578_v27  ;;  %v3512_v21 = vpop.f32.mrf.mxu1 }
 0x134   : > { %v3581_v31 = vpop.f32.mrf.mxu0  ;;  %2531 = vmatmul.mubr.bf16.gmra.mxu0 %v4865_v62 }
 0x135   : > { %v5119_v42 = vadd.f32 %v3580_v33, %v5005_v13  ;;  %2538 = vmatprep.mubr.bf16.mxu0 %v4910_v40  ;;  %v3513_v13 = vadd.f32 %v3512_v21, %v3511_v24  ;;  %v3514_v27 = vpop.f32.mrf.mxu1 }
 0x136   : > { %v3582_v10 = vpop.f32.mrf.mxu0 }
 0x137   : > { %v3583_v26 = vadd.f32 %v3582_v10, %v3581_v31  ;;  %v5131_v45 = vadd.f32 %v3513_v13, %v5034_v1  ;;  %v3515_v59 = vpop.f32.mrf.mxu1 }
 0x138   : > { %v3584_v50 = vpop.f32.mrf.mxu0  ;;  %v3516_v17 = vadd.f32 %v3515_v59, %v3514_v27 }
 0x139   : > { %v5128_v32 = vadd.f32 %v3583_v26, %v5012_v18  ;;  %v3517_v18 = vpop.f32.mrf.mxu1  ;;  %3988 = vmatmul.mubr.bf16.gmra.mxu1 %v4776_v58 }
 0x13a   : > { %v3585_v33 = vpop.f32.mrf.mxu0  ;;  %v5140_v36 = vadd.f32 %v3516_v17, %v5042_v20  ;;  %3991 = vmatprep.mubr.bf16.mxu1 %v4800_v44 }
 0x13b   : > { %v3586_v37 = vadd.f32 %v3585_v33, %v3584_v50  ;;  %v3518_v61 = vpop.f32.mrf.mxu1 }
 0x13c   : > { %v3587_v60 = vpop.f32.mrf.mxu0  ;;  %2539 = vmatmul.mubr.bf16.gmra.mxu0 %v4888_v29 }
 0x13d   : > { %v5135_v55 = vadd.f32 %v3586_v37, %v5021_v19  ;;  %2546 = vmatprep.mubr.bf16.mxu0 %v4932_v63  ;;  %v3519_v19 = vadd.f32 %v3518_v61, %v3517_v18  ;;  %v3520_v26 = vpop.f32.mrf.mxu1 }
 0x13e   : > { %v3588_v5 = vpop.f32.mrf.mxu0 }
 0x13f   : > { %v3589_v31 = vadd.f32 %v3588_v5, %v3587_v60  ;;  %v5147_v21 = vadd.f32 %v5030_v6, %v3519_v19  ;;  %v3521_v58 = vpop.f32.mrf.mxu1 }
 0x140   : > { %v3590_v1 = vpop.f32.mrf.mxu0  ;;  %v3522_v44 = vadd.f32 %v3521_v58, %v3520_v26 }
 0x141   : > { %v5144_v10 = vadd.f32 %v3589_v31, %v5028_v38  ;;  %v3523_v38 = vpop.f32.mrf.mxu1  ;;  %3992 = vmatmul.mubr.bf16.gmra.mxu1 %v4833_v9 }
 0x142   : > { %v3591_v24 = vpop.f32.mrf.mxu0  ;;  %v5156_v37 = vadd.f32 %v5040_v8, %v3522_v44  ;;  %3995 = vmatprep.mubr.bf16.mxu1 %v4849_v39 }
 0x143   : > { %v3592_v50 = vadd.f32 %v3591_v24, %v3590_v1  ;;  %v3524_v60 = vpop.f32.mrf.mxu1 }
 0x144   : > { %v3593_v13 = vpop.f32.mrf.mxu0  ;;  %2547 = vmatmul.mubr.bf16.gmra.mxu0 %v4910_v40 }
 0x145   : > { %v5151_v20 = vadd.f32 %v3592_v50, %v5037_v47  ;;  %2554 = vmatprep.mubr.bf16.mxu0 %v4951_v48  ;;  %v3525_v47 = vadd.f32 %v3524_v60, %v3523_v38  ;;  %v3526_v5 = vpop.f32.mrf.mxu1 }
 0x146   : > { %v3594_v33 = vpop.f32.mrf.mxu0 }
 0x147   : > { %v3595_v27 = vadd.f32 %v3594_v33, %v3593_v13  ;;  %v5163_v31 = vadd.f32 %v3525_v47, %v5050_v43  ;;  %v3527_v9 = vpop.f32.mrf.mxu1 }
 0x148   : > { %v3596_v6 = vpop.f32.mrf.mxu0  ;;  %v3528_v39 = vadd.f32 %v3527_v9, %v3526_v5 }
 0x149   : > { %v5160_v59 = vadd.f32 %v3595_v27, %v5044_v41  ;;  %v3529_v41 = vpop.f32.mrf.mxu1  ;;  %3996 = vmatmul.mubr.bf16.gmra.mxu1 %v4865_v62 }
 0x14a   : > { %v3597_v17 = vpop.f32.mrf.mxu0  ;;  %v5172_v24 = vadd.f32 %v3528_v39, %v5058_v4  ;;  %3999 = vmatprep.mubr.bf16.mxu1 %v4888_v29 }
 0x14b   : > { %v3598_v18 = vadd.f32 %v3597_v17, %v3596_v6  ;;  %v3530_v26 = vpop.f32.mrf.mxu1 }
 0x14c   : > { %v3599_v1 = vpop.f32.mrf.mxu0  ;;  %2555 = vmatmul.mubr.bf16.gmra.mxu0 %v4932_v63 }
 0x14d   : > { %v5167_v8 = vadd.f32 %v3598_v18, %v5053_v51  ;;  %2562 = vmatprep.mubr.bf16.mxu0 %v4965_v11  ;;  %v3531_v51 = vadd.f32 %v3530_v26, %v3529_v41  ;;  %v3532_v58 = vpop.f32.mrf.mxu1 }
 0x14e   : > { %v3600_v61 = vpop.f32.mrf.mxu0 }
 0x14f   : > { %v3601_v19 = vadd.f32 %v3600_v61, %v3599_v1  ;;  %v5179_v33 = vadd.f32 %v5046_v25, %v3531_v51  ;;  %v3533_v62 = vpop.f32.mrf.mxu1 }
 0x150   : > { %v3602_v43 = vpop.f32.mrf.mxu0  ;;  %v3534_v29 = vadd.f32 %v3533_v62, %v3532_v58 }
 0x151   : > { %v5176_v50 = vadd.f32 %v3601_v19, %v5062_v34  ;;  %v3535_v34 = vpop.f32.mrf.mxu1  ;;  %4000 = vmatmul.mubr.bf16.gmra.mxu1 %v4910_v40 }
 0x152   : > { %v3603_v13 = vpop.f32.mrf.mxu0  ;;  %v5188_v60 = vadd.f32 %v5056_v49, %v3534_v29  ;;  %4003 = vmatprep.mubr.bf16.mxu1 %v4932_v63 }
 0x153   : > { %v3604_v44 = vadd.f32 %v3603_v13, %v3602_v43  ;;  %v3536_v47 = vpop.f32.mrf.mxu1 }
 0x154   : > { %v3605_v38 = vpop.f32.mrf.mxu0  ;;  %2563 = vmatmul.mubr.bf16.gmra.mxu0 %v4951_v48 }
 0x155   : > { %v5183_v4 = vadd.f32 %v3604_v44, %v5076_v52  ;;  %2570 = vmatprep.mubr.bf16.mxu0 %v4978_v2  ;;  %v3537_v52 = vadd.f32 %v3536_v47, %v3535_v34  ;;  %v3538_v18 = vpop.f32.mrf.mxu1  ;;  %v1038_v44 = vrot.slane %v5067_v56, 2 }
 0x156   : > { %v3606_v27 = vpop.f32.mrf.mxu0 }
 0x157   : > { %v3607_v6 = vadd.f32 %v3606_v27, %v3605_v38  ;;  %v5195_v9 = vadd.f32 %v3537_v52, %v5072_v12  ;;  %v3539_v40 = vpop.f32.mrf.mxu1 }
 0x158   : > { %v3608_v25 = vpop.f32.mrf.mxu0  ;;  %v3540_v63 = vadd.f32 %v3539_v40, %v3538_v18 }
 0x159   : > { %v5192_v17 = vadd.f32 %v3607_v6, %v5085_v0  ;;  %v3541_v0 = vpop.f32.mrf.mxu1  ;;  %4004 = vmatmul.mubr.bf16.gmra.mxu1 %v4951_v48  ;;  %v1041_v48 = vrot.slane %v5060_v14, 2 }
 0x15a   : > { %v3609_v5 = vpop.f32.mrf.mxu0  ;;  %v5204_v19 = vadd.f32 %v3540_v63, %v5082_v3  ;;  %4007 = vmatprep.mubr.bf16.mxu1 %v4965_v11 }
 0x15b   : > { %v3610_v1 = vadd.f32 %v3609_v5, %v3608_v25  ;;  %v3542_v43 = vpop.f32.mrf.mxu1  ;;  %v1042_v56 = vsel %vm901_vm1, %v1038_v44, %v1041_v48 }
 0x15c   : > { %v3611_v39 = vpop.f32.mrf.mxu0  ;;  %2571 = vmatmul.mubr.bf16.gmra.mxu0 %v4965_v11  ;;  %v1045_v52 = vpack.c.bf16 %v1042_v56, %v1038_v44 }
 0x15d   : > { %v5199_v49 = vadd.f32 %v3610_v1, %v5095_v54  ;;  %2578 = vmatprep.mubr.bf16.mxu0 %v4989_v57  ;;  %v5210_v54 = vadd.f32 %v3542_v43, %v3541_v0  ;;  %v3544_v13 = vpop.f32.mrf.mxu1 }
 0x15e   : > { %v3612_v61 = vpop.f32.mrf.mxu0 }
 0x15f   : > { %v3613_v41 = vadd.f32 %v3612_v61, %v3611_v39  ;;  %v3545_v3 = vpop.f32.mrf.mxu1 }
 0x160   : > { %v3614_v12 = vpop.f32.mrf.mxu0  ;;  %v5218_v62 = vadd.f32 %v3545_v3, %v3544_v13 }
 0x161   : > { %v5208_v26 = vadd.f32 %v3613_v41, %v5102_v22  ;;  %v3547_v29 = vpop.f32.mrf.mxu1  ;;  %4008 = vmatmul.mubr.bf16.gmra.mxu1 %v4978_v2 }
 0x162   : > { %v3615_v51 = vpop.f32.mrf.mxu0  ;;  %4011 = vmatprep.mubr.bf16.mxu1 %v4989_v57 }
 0x163   : > { %v3616_v58 = vadd.f32 %v3615_v51, %v3614_v12  ;;  %v3548_v14 = vpop.f32.mrf.mxu1 }
 0x164   : > { %v3617_v38 = vpop.f32.mrf.mxu0  ;;  %2579 = vmatmul.mubr.bf16.gmra.mxu0 %v4978_v2  ;;  %v5226_v25 = vadd.f32 %v3548_v14, %v3547_v29 }
 0x165   : > { %v5216_v11 = vadd.f32 %v3616_v58, %v5108_v15  ;;  %v3550_v47 = vpop.f32.mrf.mxu1 }
 0x166   : > { %v3618_v22 = vpop.f32.mrf.mxu0 }
 0x167   : > { %v3619_v27 = vadd.f32 %v3618_v22, %v3617_v38  ;;  %v3551_v1 = vpop.f32.mrf.mxu1 }
 0x168   : > { %v3620_v34 = vpop.f32.mrf.mxu0  ;;  %v5231_v39 = vadd.f32 %v3551_v1, %v3550_v47 }
 0x169   : > { %v5224_v6 = vadd.f32 %v3619_v27, %v5115_v16  ;;  %v3553_v40 = vpop.f32.mrf.mxu1  ;;  %4012 = vmatmul.mubr.bf16.gmra.mxu1 %v1045_v52 }
 0x16a   : > { %v3621_v15 = vpop.f32.mrf.mxu0 }
 0x16b   : > { %v3622_v5 = vadd.f32 %v3621_v15, %v3620_v34  ;;  %v3554_v16 = vpop.f32.mrf.mxu1 }
 0x16c   : > { %v3623_v18 = vpop.f32.mrf.mxu0  ;;  %v5236_v41 = vadd.f32 %v3554_v16, %v3553_v40 }
 0x16d   : > { %v5229_v2 = vadd.f32 %v3622_v5, %v5124_v7  ;;  %v3556_v43 = vpop.f32.mrf.mxu1 }
 0x16e   : > { %v3624_v57 = vpop.f32.mrf.mxu0 }
 0x16f   : > { %v3625_v63 = vadd.f32 %v3624_v57, %v3623_v18  ;;  %v3557_v58 = vpop.f32.mrf.mxu1 }
 0x170   : > { %v3626_v61 = vpop.f32.mrf.mxu0  ;;  %v5241_v44 = vadd.f32 %v3557_v58, %v3556_v43 }
 0x171   : > { %v5234_v0 = vadd.f32 %v3625_v63, %v5131_v45  ;;  %v3687_v38 = vpop.f32.mrf.mxu1 }
 0x172   : > { %v3627_v12 = vpop.f32.mrf.mxu0 }
 0x173   : > { %v3628_v51 = vadd.f32 %v3627_v12, %v3626_v61  ;;  %v3688_v29 = vpop.f32.mrf.mxu1 }
 0x174   : > { %v3629_v13 = vpop.f32.mrf.mxu0  ;;  %v3689_v27 = vadd.f32 %v3688_v29, %v3687_v38 }
 0x175   : > { %v5239_v7 = vadd.f32 %v3628_v51, %v5140_v36  ;;  %v3690_v34 = vpop.f32.mrf.mxu1 }
 0x176   : > { %v3630_v48 = vpop.f32.mrf.mxu0  ;;  %v5247_v15 = vadd.f32 %v3689_v27, %v5112_v30 }
 0x177   : > { %v3631_v3 = vadd.f32 %v3630_v48, %v3629_v13  ;;  %v3691_v36 = vpop.f32.mrf.mxu1 }
 0x178   : > { %v3632_v22 = vpop.f32.mrf.mxu0  ;;  %v3692_v5 = vadd.f32 %v3691_v36, %v3690_v34 }
 0x179   : > { %v5244_v45 = vadd.f32 %v3631_v3, %v5147_v21  ;;  %v3693_v1 = vpop.f32.mrf.mxu1 }
 0x17a   : > { %v3633_v56 = vpop.f32.mrf.mxu0  ;;  %v5253_v40 = vadd.f32 %v3692_v5, %v5119_v42 }
 0x17b   : > { %v3634_v14 = vadd.f32 %v3633_v56, %v3632_v22  ;;  %v3694_v63 = vpop.f32.mrf.mxu1 }
 0x17c   : > { %v3635_v47 = vpop.f32.mrf.mxu0  ;;  %v3695_v16 = vadd.f32 %v3694_v63, %v3693_v1 }
 0x17d   : > { %v5250_v52 = vadd.f32 %v3634_v14, %v5156_v37  ;;  %v3696_v12 = vpop.f32.mrf.mxu1 }
 0x17e   : > { %v3636_v18 = vpop.f32.mrf.mxu0  ;;  %v5259_v51 = vadd.f32 %v3695_v16, %v5128_v32 }
 0x17f   : > { %v3637_v57 = vadd.f32 %v3636_v18, %v3635_v47  ;;  %v3697_v13 = vpop.f32.mrf.mxu1 }
 0x180   : > { %v3638_v21 = vpop.f32.mrf.mxu0  ;;  %v3698_v48 = vadd.f32 %v3697_v13, %v3696_v12 }
 0x181   : > { %v5256_v61 = vadd.f32 %v3637_v57, %v5163_v31  ;;  %v3699_v38 = vpop.f32.mrf.mxu1 }
 0x182   : > { %v3639_v30 = vpop.f32.mrf.mxu0  ;;  %v5265_v22 = vadd.f32 %v3698_v48, %v5135_v55 }
 0x183   : > { %v3640_v43 = vadd.f32 %v3639_v30, %v3638_v21  ;;  %v3700_v29 = vpop.f32.mrf.mxu1 }
 0x184   : > { %v3641_v37 = vpop.f32.mrf.mxu0  ;;  %v3701_v56 = vadd.f32 %v3700_v29, %v3699_v38  ;;  %v2082_v38 = vadd.f32 %v5064_v46, %v5210_v54 }
 0x185   : > { %v5262_v58 = vadd.f32 %v3640_v43, %v5172_v24  ;;  %v3702_v34 = vpop.f32.mrf.mxu1 }
 0x186   : > { %v3642_v42 = vpop.f32.mrf.mxu0  ;;  %v5271_v47 = vadd.f32 %v3701_v56, %v5144_v10 }
 0x187   : > { %v3643_v3 = vadd.f32 %v3642_v42, %v3641_v37  ;;  %v3703_v36 = vpop.f32.mrf.mxu1 }
 0x188   : > { %v3644_v31 = vpop.f32.mrf.mxu0  ;;  %v3704_v18 = vadd.f32 %v3703_v36, %v3702_v34 }
 0x189   : > { %v5268_v27 = vadd.f32 %v3643_v3, %v5179_v33  ;;  %v3705_v1 = vpop.f32.mrf.mxu1 }
 0x18a   : > { %v3645_v32 = vpop.f32.mrf.mxu0  ;;  %v5277_v21 = vadd.f32 %v3704_v18, %v5151_v20 }
 0x18b   : > { %v3646_v14 = vadd.f32 %v3645_v32, %v3644_v31  ;;  %v3706_v63 = vpop.f32.mrf.mxu1 }
 0x18c   : > { %v3647_v24 = vpop.f32.mrf.mxu0  ;;  %v3707_v30 = vadd.f32 %v3706_v63, %v3705_v1  ;;  %v2090_v1 = vadd.f32 %v5226_v25, %v5091_v23 }
 0x18d   : > { %v5274_v5 = vadd.f32 %v3646_v14, %v5188_v60  ;;  %v3708_v12 = vpop.f32.mrf.mxu1 }
 0x18e   : > { %v3648_v55 = vpop.f32.mrf.mxu0  ;;  %v5283_v37 = vadd.f32 %v3707_v30, %v5160_v59 }
 0x18f   : > { %v3649_v57 = vadd.f32 %v3648_v55, %v3647_v24  ;;  %v3709_v13 = vpop.f32.mrf.mxu1 }
 0x190   : > { %v3650_v33 = vpop.f32.mrf.mxu0  ;;  %v3710_v42 = vadd.f32 %v3709_v13, %v3708_v12  ;;  %v2093_v12 = vadd.f32 %v5231_v39, %v5099_v35 }
 0x191   : > { %v5280_v16 = vadd.f32 %v3649_v57, %v5195_v9  ;;  %v3711_v3 = vpop.f32.mrf.mxu1 }
 0x192   : > { %v3651_v10 = vpop.f32.mrf.mxu0  ;;  %v5291_v31 = vadd.f32 %v3710_v42, %v5167_v8 }
 0x193   : > { %v3652_v43 = vadd.f32 %v3651_v10, %v3650_v33  ;;  %v3712_v56 = vpop.f32.mrf.mxu1 }
 0x194   : > { %v3653_v60 = vpop.f32.mrf.mxu0  ;;  %v3713_v59 = vadd.f32 %v3712_v56, %v3711_v3 }
 0x195   : > { %v5286_v48 = vadd.f32 %v3652_v43, %v5204_v19  ;;  %v2085_v19 = vadd.f32 %v5079_v28, %v5218_v62  ;;  %v3714_v14 = vpop.f32.mrf.mxu1 }
 0x196   : > { %v3654_v20 = vpop.f32.mrf.mxu0  ;;  %v5298_v36 = vadd.f32 %v3713_v59, %v5176_v50 }
 0x197   : > { %v3655_v9 = vadd.f32 %v3654_v20, %v3653_v60  ;;  %v3715_v54 = vpop.f32.mrf.mxu1 }
 0x198   : > { %v3656_v29 = vpop.f32.mrf.mxu0  ;;  %v3716_v8 = vadd.f32 %v3715_v54, %v3714_v14 }
 0x199   : > { %v5293_v32 = vadd.f32 %v3655_v9, %v2082_v38  ;;  %v3717_v57 = vpop.f32.mrf.mxu1  ;;  %v2098_v38 = vadd.f32 %v5087_v53, %v5236_v41 }
 0x19a   : > { %v3657_v34 = vpop.f32.mrf.mxu0  ;;  %v5305_v63 = vadd.f32 %v3716_v8, %v5183_v4 }
 0x19b   : > { %v3658_v24 = vadd.f32 %v3657_v34, %v3656_v29  ;;  %v3718_v62 = vpop.f32.mrf.mxu1  ;;  %v5671_v34 = vld [vmem:[#allocation3_spill] sm:$0xff] }
 0x19c   : > { %v3659_v46 = vpop.f32.mrf.mxu0  ;;  %v3719_v50 = vadd.f32 %v3718_v62, %v3717_v57 }
 0x19d   : > { %v5300_v18 = vadd.f32 %v3658_v24, %v2085_v19  ;;  %v3720_v43 = vpop.f32.mrf.mxu1  ;;  %v2101_v19 = vadd.f32 %v5671_v34, %v5241_v44 }
 0x19e   : > { %v3660_v55 = vpop.f32.mrf.mxu0  ;;  %v5312_v13 = vadd.f32 %v3719_v50, %v5192_v17 }
 0x19f   : > { %v3661_v33 = vadd.f32 %v3660_v55, %v3659_v46  ;;  %v3721_v25 = vpop.f32.mrf.mxu1 }
 0x1a0   : > { %v3662_v28 = vpop.f32.mrf.mxu0  ;;  %v3722_v4 = vadd.f32 %v3721_v25, %v3720_v43 }
 0x1a1   : > { %v5307_v30 = vadd.f32 %v3661_v33, %v2090_v1  ;;  %v3723_v3 = vpop.f32.mrf.mxu1 }
 0x1a2   : > { %v3663_v10 = vpop.f32.mrf.mxu0  ;;  %v5319_v29 = vadd.f32 %v3722_v4, %v5199_v49 }
 0x1a3   : > { %v3664_v60 = vadd.f32 %v3663_v10, %v3662_v28  ;;  %v3724_v39 = vpop.f32.mrf.mxu1 }
 0x1a4   : > { %v3665_v23 = vpop.f32.mrf.mxu0  ;;  %v3725_v17 = vadd.f32 %v3724_v39, %v3723_v3 }
 0x1a5   : > { %v5314_v42 = vadd.f32 %v3664_v60, %v2093_v12  ;;  %v3726_v14 = vpop.f32.mrf.mxu1 }
 0x1a6   : > { %v3666_v20 = vpop.f32.mrf.mxu0  ;;  %v5326_v46 = vadd.f32 %v3725_v17, %v5208_v26 }
 0x1a7   : > { %v3667_v9 = vadd.f32 %v3666_v20, %v3665_v23  ;;  %v3727_v41 = vpop.f32.mrf.mxu1 }
 0x1a8   : > { %v3668_v35 = vpop.f32.mrf.mxu0  ;;  %v3728_v49 = vadd.f32 %v3727_v41, %v3726_v14 }
 0x1a9   : > { %v5321_v56 = vadd.f32 %v3667_v9, %v2098_v38  ;;  %v3729_v55 = vpop.f32.mrf.mxu1 }
 0x1aa   : > { %v3669_v59 = vpop.f32.mrf.mxu0  ;;  %v5331_v57 = vadd.f32 %v3728_v49, %v5216_v11 }
 0x1ab   : > { %5670 = vst [vmem:[#allocation4_spill] sm:$0xff] %v5321_v56  ;;  %v3670_v24 = vadd.f32 %v3669_v59, %v3668_v35  ;;  %v3730_v28 = vpop.f32.mrf.mxu1 }
 0x1ac   : > { %v3799_v53 = vpop.f32.mrf.mxu0  ;;  %v3731_v62 = vadd.f32 %v3730_v28, %v3729_v55 }
 0x1ad   : > { %v5328_v54 = vadd.f32 %v3670_v24, %v2101_v19  ;;  %v3732_v26 = vpop.f32.mrf.mxu1 }
 0x1ae   : > { %v3800_v8 = vpop.f32.mrf.mxu0  ;;  %v5337_v12 = vadd.f32 %v3731_v62, %v5224_v6 }
 0x1af   : > { %5672 = vst [vmem:[#allocation3_spill] sm:$0xff] %v5328_v54  ;;  %v3801_v1 = vadd.f32 %v3800_v8, %v3799_v53  ;;  %v3733_v60 = vpop.f32.mrf.mxu1 }
 0x1b0   : > { %v3802_v33 = vpop.f32.mrf.mxu0  ;;  %v3734_v11 = vadd.f32 %v3733_v60, %v3732_v26 }
 0x1b1   : > { %v5334_v44 = vadd.f32 %v3801_v1, %v5247_v15  ;;  %v3735_v4 = vpop.f32.mrf.mxu1 }
 0x1b2   : > { %v3803_v50 = vpop.f32.mrf.mxu0  ;;  %v5347_v15 = vadd.f32 %v3734_v11, %v5229_v2 }
 0x1b3   : > { %v3804_v10 = vadd.f32 %v3803_v50, %v3802_v33  ;;  %v3736_v38 = vpop.f32.mrf.mxu1 }
 0x1b4   : > { %v5339_v43 = vpop.f32.mrf.mxu0  ;;  %v3737_v3 = vadd.f32 %v3736_v38, %v3735_v4 }
 0x1b5   : > { %v5342_v23 = vadd.f32 %v3804_v10, %v5253_v40  ;;  %v3738_v6 = vpop.f32.mrf.mxu1 }
 0x1b6   : > { %v5344_v25 = vpop.f32.mrf.mxu0  ;;  %v5354_v35 = vadd.f32 %v3737_v3, %v5234_v0 }
 0x1b7   : > { %v3739_v40 = vpop.f32.mrf.mxu1 }
 0x1b8   : > { %v5349_v20 = vpop.f32.mrf.mxu0  ;;  %v3740_v17 = vadd.f32 %v3739_v40, %v3738_v6 }
 0x1b9   : > { %v3741_v34 = vpop.f32.mrf.mxu1 }
 0x1ba   : > { %v5351_v9 = vpop.f32.mrf.mxu0  ;;  %v5361_v2 = vadd.f32 %v3740_v17, %v5239_v7 }
 0x1bb   : > { %v3742_v14 = vpop.f32.mrf.mxu1 }
 0x1bc   : > { %v5356_v39 = vpop.f32.mrf.mxu0  ;;  %5673 = vst [vmem:[#allocation5_spill] sm:$0xff] %v5361_v2  ;;  %v3743_v24 = vadd.f32 %v3742_v14, %v3741_v34 }
 0x1bd   : > { %v3744_v41 = vpop.f32.mrf.mxu1 }
 0x1be   : > { %v5358_v59 = vpop.f32.mrf.mxu0  ;;  %v5368_v0 = vadd.f32 %v3743_v24, %v5244_v45 }
 0x1bf   : > { %v3745_v8 = vpop.f32.mrf.mxu1 }
 0x1c0   : > { %v5363_v19 = vpop.f32.mrf.mxu0  ;;  %v3746_v55 = vadd.f32 %v3745_v8, %v3744_v41 }
 0x1c1   : > { %v3747_v33 = vpop.f32.mrf.mxu1 }
 0x1c2   : > { %v5365_v53 = vpop.f32.mrf.mxu0  ;;  %v5375_v7 = vadd.f32 %v3746_v55, %v5250_v52 }
 0x1c3   : > { %v3748_v62 = vpop.f32.mrf.mxu1 }
 0x1c4   : > { %v5370_v49 = vpop.f32.mrf.mxu0  ;;  %v3749_v50 = vadd.f32 %v3748_v62, %v3747_v33 }
 0x1c5   : > { %v3750_v10 = vpop.f32.mrf.mxu1 }
 0x1c6   : > { %v5372_v1 = vpop.f32.mrf.mxu0  ;;  %v5382_v45 = vadd.f32 %v3749_v50, %v5256_v61 }
 0x1c7   : > { %v3751_v11 = vpop.f32.mrf.mxu1 }
 0x1c8   : > { %v5377_v28 = vpop.f32.mrf.mxu0  ;;  %5674 = vst [vmem:[#allocation6_spill] sm:$0xff] %v5382_v45  ;;  %v3752_v4 = vadd.f32 %v3751_v11, %v3750_v10 }
 0x1c9   : > { %v3753_v3 = vpop.f32.mrf.mxu1 }
 0x1ca   : > { %v5379_v26 = vpop.f32.mrf.mxu0  ;;  %v5389_v52 = vadd.f32 %v3752_v4, %v5262_v58 }
 0x1cb   : > { %v3754_v40 = vpop.f32.mrf.mxu1 }
 0x1cc   : > { %v5384_v60 = vpop.f32.mrf.mxu0  ;;  %5675 = vst [vmem:[#allocation7_spill] sm:$0xff] %v5389_v52  ;;  %v3755_v17 = vadd.f32 %v3754_v40, %v3753_v3 }
 0x1cd   : > { %v3756_v14 = vpop.f32.mrf.mxu1 }
 0x1ce   : > { %v5386_v38 = vpop.f32.mrf.mxu0  ;;  %v5396_v61 = vadd.f32 %v3755_v17, %v5268_v27 }
 0x1cf   : > { %v3757_v41 = vpop.f32.mrf.mxu1 }
 0x1d0   : > { %v5391_v6 = vpop.f32.mrf.mxu0  ;;  %5676 = vst [vmem:[#allocation8_spill] sm:$0xff] %v5396_v61  ;;  %v3758_v8 = vadd.f32 %v3757_v41, %v3756_v14 }
 0x1d1   : > { %v3759_v33 = vpop.f32.mrf.mxu1 }
 0x1d2   : > { %v5393_v34 = vpop.f32.mrf.mxu0  ;;  %v5403_v58 = vadd.f32 %v3758_v8, %v5274_v5 }
 0x1d3   : > { %v3760_v50 = vpop.f32.mrf.mxu1 }
 0x1d4   : > { %v5398_v24 = vpop.f32.mrf.mxu0  ;;  %5677 = vst [vmem:[#allocation9_spill] sm:$0xff] %v5403_v58  ;;  %v3761_v10 = vadd.f32 %v3760_v50, %v3759_v33 }
 0x1d5   : > { %v3762_v4 = vpop.f32.mrf.mxu1 }
 0x1d6   : > { %v5400_v55 = vpop.f32.mrf.mxu0  ;;  %v5410_v27 = vadd.f32 %v3761_v10, %v5280_v16 }
 0x1d7   : > { %v3763_v40 = vpop.f32.mrf.mxu1 }
 0x1d8   : > { %v5405_v62 = vpop.f32.mrf.mxu0  ;;  %5678 = vst [vmem:[#allocation10_spill] sm:$0xff] %v5410_v27  ;;  %v3764_v17 = vadd.f32 %v3763_v40, %v3762_v4 }
 0x1d9   : > { %v3765_v41 = vpop.f32.mrf.mxu1 }
 0x1da   : > { %v5407_v11 = vpop.f32.mrf.mxu0  ;;  %v5417_v5 = vadd.f32 %v3764_v17, %v5286_v48 }
 0x1db   : > { %v3766_v54 = vpop.f32.mrf.mxu1 }
 0x1dc   : > { %v5412_v3 = vpop.f32.mrf.mxu0  ;;  %5679 = vst [vmem:[#allocation11_spill] sm:$0xff] %v5417_v5  ;;  %v3767_v33 = vadd.f32 %v3766_v54, %v3765_v41 }
 0x1dd   : > { %v3768_v56 = vpop.f32.mrf.mxu1 }
 0x1de   : > { %v5414_v14 = vpop.f32.mrf.mxu0  ;;  %v5424_v16 = vadd.f32 %v3767_v33, %v5293_v32 }
 0x1df   : > { %v3769_v27 = vpop.f32.mrf.mxu1 }
 0x1e0   : > { %v5419_v8 = vpop.f32.mrf.mxu0  ;;  %5680 = vst [vmem:[#allocation12_spill] sm:$0xff] %v5424_v16  ;;  %v3770_v4 = vadd.f32 %v3769_v27, %v3768_v56 }
 0x1e1   : > { %v3771_v52 = vpop.f32.mrf.mxu1 }
 0x1e2   : > { %v5421_v50 = vpop.f32.mrf.mxu0  ;;  %v5431_v48 = vadd.f32 %v3770_v4, %v5300_v18 }
 0x1e3   : > { %v3772_v5 = vpop.f32.mrf.mxu1 }
 0x1e4   : > { %v5426_v10 = vpop.f32.mrf.mxu0  ;;  %5681 = vst [vmem:[#allocation13_spill] sm:$0xff] %v5431_v48  ;;  %v3773_v54 = vadd.f32 %v3772_v5, %v3771_v52 }
 0x1e5   : > { %v3774_v58 = vpop.f32.mrf.mxu1 }
 0x1e6   : > { %v5428_v40 = vpop.f32.mrf.mxu0  ;;  %v5438_v32 = vadd.f32 %v3773_v54, %v5307_v30  ;;  %v3807_v54 = vadd.f32 %v5344_v25, %v5339_v43 }
 0x1e7   : > { %v3775_v56 = vpop.f32.mrf.mxu1 }
 0x1e8   : > { %v5433_v17 = vpop.f32.mrf.mxu0  ;;  %5682 = vst [vmem:[#allocation14_spill] sm:$0xff] %v5438_v32  ;;  %v3776_v27 = vadd.f32 %v3775_v56, %v3774_v58  ;;  %v3810_v56 = vadd.f32 %v5351_v9, %v5349_v20  ;;  %v3819_v20 = vadd.f32 %v5372_v1, %v5370_v49  ;;  %v5480_v9 = vld [vmem:[%s294_s14] ss:$0 sm:$0xff] }
 0x1e9   : > { %v5444_v61 = vpop.f32.mrf.mxu1 }
 0x1ea   : > { %v5435_v41 = vpop.f32.mrf.mxu0  ;;  %5683 = vst [vmem:[#allocation15_spill] sm:$0xff] %v5444_v61  ;;  %v5447_v18 = vadd.f32 %v3776_v27, %v5314_v42 }
 0x1eb   : > { %v5451_v52 = vpop.f32.mrf.mxu1 }
 0x1ec   : > { %v5440_v33 = vpop.f32.mrf.mxu0  ;;  %5684 = vst [vmem:[#allocation16_spill] sm:$0xff] %v5447_v18  ;;  %5685 = vst [vmem:[#allocation17_spill] sm:$0xff] %v5451_v52  ;;  %v2469_v18 = vadd.f32 %v3807_v54, %v5259_v51  ;;  %v3813_v51 = vadd.f32 %v5358_v59, %v5356_v39  ;;  %v2485_v39 = vadd.f32 %v3819_v20, %v5283_v37 }
 0x1ed   : > { %v5455_v30 = vpop.f32.mrf.mxu1  ;;  %v3825_v37 = vadd.f32 %v5386_v38, %v5384_v60  ;;  %v3831_v20 = vadd.f32 %v5400_v55, %v5398_v24 }
 0x1ee   : > { %v5442_v16 = vpop.f32.mrf.mxu0  ;;  %5686 = vst [vmem:[#allocation18_spill] sm:$0xff] %v5455_v30 }
 0x1ef   : > { %v5461_v58 = vpop.f32.mrf.mxu1 }
 0x1f0   : > { %v5449_v4 = vpop.f32.mrf.mxu0  ;;  %5687 = vst [vmem:[#allocation19_spill] sm:$0xff] %v5461_v58  ;;  %v2472_v58 = vadd.f32 %v3810_v56, %v5265_v22 }
 0x1f1   : > { %v3985_v27 = vpop.f32.mrf.mxu1 }
 0x1f2   : > { %v5453_v5 = vpop.f32.mrf.mxu0  ;;  %v2630_v43 = vadd.f32 %v3985_v27, %v2469_v18 }
 0x1f3   : > { %v2621_v30 = vpop.f32.mrf.mxu1 }
 0x1f4   : > { %v5459_v32 = vpop.f32.mrf.mxu0  ;;  %v2622_v25 = vadd.f32 %v2621_v30, %v5334_v44  ;;  %v3822_v44 = vadd.f32 %v5379_v26, %v5377_v28  ;;  %v2757_v22 = vadd.f32 %v5480_v9, %v2630_v43 }
 0x1f5   : > { %v3986_v61 = vpop.f32.mrf.mxu1 }
 0x1f6   : > { %v5465_v42 = vpop.f32.mrf.mxu0  ;;  %v2633_v45 = vadd.f32 %v3986_v61, %v2472_v58  ;;  %v2755_v30 = vadd.f32 %v5480_v9, %v2622_v25  ;;  %v3816_v61 = vadd.f32 %v5365_v53, %v5363_v19  ;;  %v2477_v58 = vadd.f32 %v3813_v51, %v5271_v47 }
 0x1f7   : > { %v2624_v18 = vpop.f32.mrf.mxu1  ;;  %v2488_v19 = vadd.f32 %v3822_v44, %v5291_v31  ;;  %v2826_v51 = vmul.f32 %v2757_v22, %v2757_v22 }
 0x1f8   : > { %v5472_v48 = vpop.f32.mrf.mxu0  ;;  %v2758_v54 = vadd.f32 %v5480_v9, %v2633_v45  ;;  %v2625_v49 = vadd.f32 %v2624_v18, %v5342_v23  ;;  %v2824_v53 = vmul.f32 %v2755_v30, %v2755_v30  ;;  %v2480_v47 = vadd.f32 %v3816_v61, %v5277_v21 }
 0x1f9   : > { %v3989_v59 = vpop.f32.mrf.mxu1 }
 0x1fa   : > { %v5476_v52 = vpop.f32.mrf.mxu0  ;;  %v3336_v28 = vpack.c.bf16 %v2758_v54, %v2757_v22  ;;  %v2756_v26 = vadd.f32 %v5480_v9, %v2625_v49  ;;  %v2646_v23 = vadd.f32 %v3989_v59, %v2485_v39 }
 0x1fb   : > { %v2637_v56 = vpop.f32.mrf.mxu1 }
 0x1fc   : > { %v5482_v2 = vpop.f32.mrf.mxu0  ;;  %3408 = vst [vmem:[%s5501_s18 + $0x8] sm:$0xff] %v3336_v28   ;;  %v2787_v27 = vadd.f32 %v2756_v26, %v2755_v30  ;;  %v2825_v43 = vmul.f32 %v2756_v26, %v2756_v26  ;;  %v3331_v25 = vpack.c.bf16 %v2756_v26, %v2755_v30  ;;  %v2638_v49 = vadd.f32 %v2637_v56, %v2477_v58 }
 0x1fd   : > { %v3990_v39 = vpop.f32.mrf.mxu1  ;;  %v3834_v30 = vadd.f32 %v5407_v11, %v5405_v62  ;;  %v2827_v26 = vmul.f32 %v2758_v54, %v2758_v54  ;;  %v2761_v60 = vadd.f32 %v5480_v9, %v2646_v23  ;;  %v3828_v56 = vadd.f32 %v5393_v34, %v5391_v6 }
 0x1fe   : > { %v5492_v1 = vpop.f32.mrf.mxu0  ;;  %v2788_v59 = vadd.f32 %v2787_v27, %v2757_v22  ;;  %v2856_v31 = vadd.f32 %v2825_v43, %v2824_v53  ;;  %3332 = vst [vmem:[%s5501_s18] sm:$0xff] %v3331_v25   ;;  %v2649_v44 = vadd.f32 %v3990_v39, %v2488_v19  ;;  %v2759_v38 = vadd.f32 %v5480_v9, %v2638_v49 }
 0x1ff   : > { %v2640_v24 = vpop.f32.mrf.mxu1  ;;  %v2501_v19 = vadd.f32 %v3831_v20, %v5312_v13  ;;  %v2493_v11 = vadd.f32 %v3825_v37, %v5298_v36  ;;  %v2504_v39 = vadd.f32 %v3834_v30, %v5319_v29  ;;  %v3846_v29 = vadd.f32 %v5435_v41, %v5433_v17 }
 0x200   : > { %v5505_v45 = vpop.f32.mrf.mxu0  ;;  %v2857_v55 = vadd.f32 %v2856_v31, %v2826_v51  ;;  %v2789_v58 = vadd.f32 %v2788_v59, %v2758_v54  ;;  %v2762_v21 = vadd.f32 %v5480_v9, %v2649_v44  ;;  %v2641_v61 = vadd.f32 %v2640_v24, %v2480_v47 }
 0x201   : > { %v3993_v62 = vpop.f32.mrf.mxu1  ;;  %v2828_v53 = vmul.f32 %v2759_v38, %v2759_v38  ;;  %v3837_v47 = vadd.f32 %v5414_v14, %v5412_v3  ;;  %v3843_v31 = vadd.f32 %v5428_v40, %v5426_v10  ;;  %v2496_v3 = vadd.f32 %v3828_v56, %v5305_v63 }
 0x202   : > { %v5510_v18 = vpop.f32.mrf.mxu0  ;;  %v2790_v23 = vadd.f32 %v2789_v58, %v2759_v38  ;;  %v2858_v27 = vadd.f32 %v2857_v55, %v2827_v26  ;;  %v3346_v43 = vpack.c.bf16 %v2762_v21, %v2761_v60  ;;  %v2760_v54 = vadd.f32 %v5480_v9, %v2641_v61 }
 0x203   : > { %v2653_v49 = vpop.f32.mrf.mxu1  ;;  %v2662_v13 = vadd.f32 %v3993_v62, %v2501_v19  ;;  %v2830_v30 = vmul.f32 %v2761_v60, %v2761_v60  ;;  %v2509_v40 = vadd.f32 %v3837_v47, %v5326_v46  ;;  %v3840_v63 = vadd.f32 %v5421_v50, %v5419_v8 }
 0x204   : > { %v5518_v28 = vpop.f32.mrf.mxu0  ;;  %v2859_v6 = vadd.f32 %v2858_v27, %v2828_v53  ;;  %3410 = vst [vmem:[%s5501_s18 + $0x18] sm:$0xff] %v3346_v43   ;;  %v2654_v34 = vadd.f32 %v2653_v49, %v2493_v11  ;;  %v2791_v37 = vadd.f32 %v2790_v23, %v2760_v54  ;;  %v2829_v20 = vmul.f32 %v2760_v54, %v2760_v54 }
 0x205   : > { %v3341_v51 = vpack.c.bf16 %v2760_v54, %v2759_v38  ;;  %v3994_v59 = vpop.f32.mrf.mxu1  ;;  %v2765_v38 = vadd.f32 %v5480_v9, %v2662_v13  ;;  %v2831_v41 = vmul.f32 %v2762_v21, %v2762_v21  ;;  %v2517_v23 = vadd.f32 %v3843_v31, %v5337_v12 }
 0x206   : > { %v5525_v22 = vpop.f32.mrf.mxu0  ;;  %v2665_v44 = vadd.f32 %v3994_v59, %v2504_v39  ;;  %v2792_v26 = vadd.f32 %v2791_v37, %v2761_v60  ;;  %v2860_v24 = vadd.f32 %v2859_v6, %v2829_v20  ;;  %v2763_v55 = vadd.f32 %v5480_v9, %v2654_v34 }
 0x207   : > { %3409 = vst [vmem:[%s5501_s18 + $0x10] sm:$0xff] %v3341_v51   ;;  %v2656_v58 = vpop.f32.mrf.mxu1  ;;  %v2520_v53 = vadd.f32 %v3846_v29, %v5347_v15  ;;  %v3849_v46 = vadd.f32 %v5442_v16, %v5440_v33  ;;  %v3855_v34 = vadd.f32 %v5465_v42, %v5459_v32  ;;  %v3858_v16 = vadd.f32 %v5476_v52, %v5472_v48 }
 0x208   : > { %v5531_v25 = vpop.f32.mrf.mxu0  ;;  %v2766_v61 = vadd.f32 %v5480_v9, %v2665_v44  ;;  %v2657_v10 = vadd.f32 %v2656_v58, %v2496_v3  ;;  %v2861_v60 = vadd.f32 %v2860_v24, %v2830_v30  ;;  %v2793_v56 = vadd.f32 %v2792_v26, %v2762_v21 }
 0x209   : > { %v3997_v19 = vpop.f32.mrf.mxu1  ;;  %v2832_v54 = vmul.f32 %v2763_v55, %v2763_v55  ;;  %v2512_v37 = vadd.f32 %v3840_v63, %v5331_v57  ;;  %v2834_v51 = vmul.f32 %v2765_v38, %v2765_v38  ;;  %v2525_v42 = vadd.f32 %v3849_v46, %v5354_v35  ;;  %v5688_v46 = vld [vmem:[#allocation5_spill] sm:$0xff] }
 0x20a   : > { %v5538_v36 = vpop.f32.mrf.mxu0  ;;  %v3356_v62 = vpack.c.bf16 %v2766_v61, %v2765_v38  ;;  %v2764_v11 = vadd.f32 %v5480_v9, %v2657_v10  ;;  %v2794_v43 = vadd.f32 %v2793_v56, %v2763_v55  ;;  %v2862_v8 = vadd.f32 %v2861_v60, %v2831_v41 }
 0x20b   : > { %v2669_v50 = vpop.f32.mrf.mxu1  ;;  %v2678_v39 = vadd.f32 %v3997_v19, %v2517_v23  ;;  %v3852_v57 = vadd.f32 %v5453_v5, %v5449_v4  ;;  %v2835_v52 = vmul.f32 %v2766_v61, %v2766_v61  ;;  %v2533_v10 = vadd.f32 %v3855_v34, %v5368_v0 }
 0x20c   : > { %v5545_v14 = vpop.f32.mrf.mxu0  ;;  %3412 = vst [vmem:[%s5501_s18 + $0x28] sm:$0xff] %v3356_v62   ;;  %v2833_v21 = vmul.f32 %v2764_v11, %v2764_v11  ;;  %v3351_v49 = vpack.c.bf16 %v2764_v11, %v2763_v55  ;;  %v2670_v47 = vadd.f32 %v2669_v50, %v2509_v40  ;;  %v2863_v12 = vadd.f32 %v2862_v8, %v2832_v54 }
 0x20d   : > { %v2795_v13 = vadd.f32 %v2794_v43, %v2764_v11  ;;  %v3998_v15 = vpop.f32.mrf.mxu1  ;;  %v2769_v3 = vadd.f32 %v5480_v9, %v2678_v39  ;;  %v2536_v40 = vadd.f32 %v3858_v16, %v5375_v7  ;;  %v3861_v35 = vadd.f32 %v5492_v1, %v5482_v2 }
 0x20e   : > { %v5552_v17 = vpop.f32.mrf.mxu0  ;;  %3411 = vst [vmem:[%s5501_s18 + $0x20] sm:$0xff] %v3351_v49   ;;  %v2681_v33 = vadd.f32 %v3998_v15, %v2520_v53  ;;  %v2864_v31 = vadd.f32 %v2863_v12, %v2833_v21  ;;  %v2767_v29 = vadd.f32 %v5480_v9, %v2670_v47  ;;  %v3867_v7 = vadd.f32 %v5525_v22, %v5518_v28  ;;  %v5689_v22 = vld [vmem:[#allocation6_spill] sm:$0xff] }
 0x20f   : > { %v2796_v59 = vadd.f32 %v2795_v13, %v2765_v38  ;;  %v2672_v44 = vpop.f32.mrf.mxu1  ;;  %v3870_v2 = vadd.f32 %v5538_v36, %v5531_v25  ;;  %v2528_v43 = vadd.f32 %v3852_v57, %v5688_v46  ;;  %v2838_v8 = vmul.f32 %v2769_v3, %v2769_v3 }
 0x210   : > { %v5559_v27 = vpop.f32.mrf.mxu0  ;;  %v2770_v30 = vadd.f32 %v5480_v9, %v2681_v33  ;;  %v2673_v32 = vadd.f32 %v2672_v44, %v2512_v37  ;;  %v2865_v26 = vadd.f32 %v2864_v31, %v2834_v51  ;;  %v2836_v60 = vmul.f32 %v2767_v29, %v2767_v29 }
 0x211   : > { %v2797_v24 = vadd.f32 %v2796_v59, %v2766_v61  ;;  %v4001_v55 = vpop.f32.mrf.mxu1  ;;  %v2541_v13 = vadd.f32 %v3861_v35, %v5689_v22  ;;  %v3864_v36 = vadd.f32 %v5510_v18, %v5505_v45  ;;  %v5690_v59 = vld [vmem:[#allocation8_spill] sm:$0xff]  ;;  %v5695_v35 = vld [vmem:[#allocation19_spill] sm:$0xff] }
 0x212   : > { %v5564_v6 = vpop.f32.mrf.mxu0  ;;  %v3366_v58 = vpack.c.bf16 %v2770_v30, %v2769_v3  ;;  %v2768_v38 = vadd.f32 %v5480_v9, %v2673_v32  ;;  %v2866_v56 = vadd.f32 %v2865_v26, %v2835_v52  ;;  %v2694_v19 = vadd.f32 %v4001_v55, %v2533_v10 }
 0x213   : > { %v2798_v41 = vadd.f32 %v2797_v24, %v2767_v29  ;;  %v2685_v4 = vpop.f32.mrf.mxu1  ;;  %v2839_v15 = vmul.f32 %v2770_v30, %v2770_v30  ;;  %v2549_v31 = vadd.f32 %v3867_v7, %v5690_v59  ;;  %v3873_v32 = vadd.f32 %v5552_v17, %v5545_v14 }
 0x214   : > { %v5572_v20 = vpop.f32.mrf.mxu0  ;;  %3414 = vst [vmem:[%s5501_s18 + $0x38] sm:$0xff] %v3366_v58   ;;  %v2837_v5 = vmul.f32 %v2768_v38, %v2768_v38  ;;  %v3361_v61 = vpack.c.bf16 %v2768_v38, %v2767_v29  ;;  %v2686_v62 = vadd.f32 %v2685_v4, %v2525_v42  ;;  %v2867_v23 = vadd.f32 %v2866_v56, %v2836_v60  ;;  %v5691_v29 = vld [vmem:[#allocation9_spill] sm:$0xff]  ;;  %v5692_v58 = vld [vmem:[#allocation15_spill] sm:$0xff] }
 0x215   : > { %v2799_v53 = vadd.f32 %v2798_v41, %v2768_v38  ;;  %v4002_v0 = vpop.f32.mrf.mxu1  ;;  %v2773_v47 = vadd.f32 %v5480_v9, %v2694_v19  ;;  %v2552_v44 = vadd.f32 %v3870_v2, %v5691_v29  ;;  %v5693_v38 = vld [vmem:[#allocation17_spill] sm:$0xff]  ;;  %v5700_v29 = vld [vmem:[#allocation4_spill] sm:$0xff] }
 0x216   : > { %v5578_v48 = vpop.f32.mrf.mxu0  ;;  %3413 = vst [vmem:[%s5501_s18 + $0x30] sm:$0xff] %v3361_v61   ;;  %v2697_v1 = vadd.f32 %v4002_v0, %v2536_v40  ;;  %v2868_v21 = vadd.f32 %v2867_v23, %v2837_v5  ;;  %v2771_v49 = vadd.f32 %v5480_v9, %v2686_v62  ;;  %v3779_v10 = vadd.f32 %v5693_v38, %v5692_v58  ;;  %v5694_v40 = vld [vmem:[#allocation18_spill] sm:$0xff]  ;;  %v5696_v61 = vld [vmem:[#allocation7_spill] sm:$0xff] }
 0x217   : > { %v2800_v50 = vadd.f32 %v2799_v53, %v2769_v3  ;;  %v2688_v39 = vpop.f32.mrf.mxu1  ;;  %v3782_v41 = vadd.f32 %v5695_v35, %v5694_v40  ;;  %v3879_v56 = vadd.f32 %v5578_v48, %v5572_v20  ;;  %v2544_v19 = vadd.f32 %v3864_v36, %v5696_v61  ;;  %v5703_v61 = vld [vmem:[#allocation14_spill] sm:$0xff] }
 0x218   : > { %v3880_v63 = vpop.f32.mrf.mxu0  ;;  %v2774_v12 = vadd.f32 %v5480_v9, %v2697_v1  ;;  %v2689_v28 = vadd.f32 %v2688_v39, %v2528_v43  ;;  %v2869_v34 = vadd.f32 %v2868_v21, %v2838_v8  ;;  %v2840_v57 = vmul.f32 %v2771_v49, %v2771_v49  ;;  %v5697_v8 = vld [vmem:[#allocation10_spill] sm:$0xff] }
 0x219   : > { %v2801_v16 = vadd.f32 %v2800_v50, %v2770_v30  ;;  %v4005_v33 = vpop.f32.mrf.mxu1  ;;  %v2842_v23 = vmul.f32 %v2773_v47, %v2773_v47  ;;  %v2557_v50 = vadd.f32 %v3873_v32, %v5697_v8  ;;  %v3876_v48 = vadd.f32 %v5564_v6, %v5559_v27 }
 0x21a   : > { %v3881_v11 = vpop.f32.mrf.mxu0  ;;  %v3376_v37 = vpack.c.bf16 %v2774_v12, %v2773_v47  ;;  %v2772_v51 = vadd.f32 %v5480_v9, %v2689_v28  ;;  %v2870_v45 = vadd.f32 %v2869_v34, %v2839_v15  ;;  %v2710_v26 = vadd.f32 %v4005_v33, %v2549_v31  ;;  %v5698_v28 = vld [vmem:[#allocation12_spill] sm:$0xff] }
 0x21b   : > { %v2802_v42 = vadd.f32 %v2801_v16, %v2771_v49  ;;  %v2701_v18 = vpop.f32.mrf.mxu1  ;;  %v3882_v5 = vadd.f32 %v3881_v11, %v3880_v63  ;;  %v2843_v20 = vmul.f32 %v2774_v12, %v2774_v12  ;;  %v2565_v22 = vadd.f32 %v3879_v56, %v5698_v28 }
 0x21c   : > { %v5594_v54 = vpop.f32.mrf.mxu0  ;;  %3416 = vst [vmem:[%s5501_s18 + $0x48] sm:$0xff] %v3376_v37   ;;  %v2841_v30 = vmul.f32 %v2772_v51, %v2772_v51  ;;  %v3371_v52 = vpack.c.bf16 %v2772_v51, %v2771_v49  ;;  %v2702_v24 = vadd.f32 %v2701_v18, %v2541_v13  ;;  %v2871_v60 = vadd.f32 %v2870_v45, %v2840_v57  ;;  %v5699_v13 = vld [vmem:[#allocation13_spill] sm:$0xff]  ;;  %v5701_v18 = vld [vmem:[#allocation3_spill] sm:$0xff] }
 0x21d   : > { %v2803_v14 = vadd.f32 %v2802_v42, %v2772_v51  ;;  %v4006_v17 = vpop.f32.mrf.mxu1  ;;  %v2777_v1 = vadd.f32 %v5480_v9, %v2710_v26  ;;  %v2568_v36 = vadd.f32 %v3882_v5, %v5699_v13  ;;  %v5702_v26 = vld [vmem:[#allocation11_spill] sm:$0xff] }
 0x21e   : > { %v5600_v25 = vpop.f32.mrf.mxu0  ;;  %3415 = vst [vmem:[%s5501_s18 + $0x40] sm:$0xff] %v3371_v52   ;;  %v2713_v4 = vadd.f32 %v4006_v17, %v2552_v44  ;;  %v2872_v0 = vadd.f32 %v2871_v60, %v2841_v30  ;;  %v2775_v7 = vadd.f32 %v5480_v9, %v2702_v24  ;;  %v2420_v44 = vadd.f32 %v3779_v10, %v5700_v29 }
 0x21f   : > { %v2804_v53 = vadd.f32 %v2803_v14, %v2773_v47  ;;  %v2704_v2 = vpop.f32.mrf.mxu1  ;;  %v3885_v57 = vadd.f32 %v5600_v25, %v5594_v54  ;;  %v2423_v30 = vadd.f32 %v3782_v41, %v5701_v18  ;;  %v2560_v24 = vadd.f32 %v3876_v48, %v5702_v26 }
 0x220   : > { %v5607_v3 = vpop.f32.mrf.mxu0  ;;  %v2778_v46 = vadd.f32 %v5480_v9, %v2713_v4  ;;  %v2705_v43 = vadd.f32 %v2704_v2, %v2544_v19  ;;  %v2873_v63 = vadd.f32 %v2872_v0, %v2842_v23  ;;  %v2844_v16 = vmul.f32 %v2775_v7, %v2775_v7 }
 0x221   : > { %v2805_v11 = vadd.f32 %v2804_v53, %v2774_v12  ;;  %v4009_v49 = vpop.f32.mrf.mxu1  ;;  %v2846_v38 = vmul.f32 %v2777_v1, %v2777_v1  ;;  %v2573_v19 = vadd.f32 %v3885_v57, %v5703_v61 }
 0x222   : > { %v5612_v55 = vpop.f32.mrf.mxu0  ;;  %v3386_v39 = vpack.c.bf16 %v2778_v46, %v2777_v1  ;;  %v2776_v47 = vadd.f32 %v5480_v9, %v2705_v43  ;;  %v2874_v33 = vadd.f32 %v2873_v63, %v2843_v20  ;;  %v2726_v6 = vadd.f32 %v4009_v49, %v2565_v22  ;;  %v5704_v49 = vld [vmem:[#allocation16_spill] sm:$0xff] }
 0x223   : > { %v2806_v34 = vadd.f32 %v2805_v11, %v2775_v7  ;;  %v2717_v37 = vpop.f32.mrf.mxu1  ;;  %v2847_v56 = vmul.f32 %v2778_v46, %v2778_v46  ;;  %v3888_v23 = vadd.f32 %v5612_v55, %v5607_v3 }
 0x224   : > { %v3889_v62 = vpop.f32.mrf.mxu0  ;;  %3418 = vst [vmem:[%s5501_s18 + $0x58] sm:$0xff] %v3386_v39   ;;  %v2845_v59 = vmul.f32 %v2776_v47, %v2776_v47  ;;  %v3381_v27 = vpack.c.bf16 %v2776_v47, %v2775_v7  ;;  %v2718_v12 = vadd.f32 %v2717_v37, %v2557_v50  ;;  %v2875_v32 = vadd.f32 %v2874_v33, %v2844_v16 }
 0x225   : > { %v2807_v42 = vadd.f32 %v2806_v34, %v2776_v47  ;;  %v4010_v45 = vpop.f32.mrf.mxu1  ;;  %v2781_v10 = vadd.f32 %v5480_v9, %v2726_v6  ;;  %v2576_v39 = vadd.f32 %v3888_v23, %v5704_v49 }
 0x226   : > { %v3890_v21 = vpop.f32.mrf.mxu0  ;;  %3417 = vst [vmem:[%s5501_s18 + $0x50] sm:$0xff] %v3381_v27   ;;  %v2729_v52 = vadd.f32 %v4010_v45, %v2568_v36  ;;  %v2876_v35 = vadd.f32 %v2875_v32, %v2845_v59  ;;  %v2779_v60 = vadd.f32 %v5480_v9, %v2718_v12 }
 0x227   : > { %v3891_v51 = vadd.f32 %v3890_v21, %v3889_v62  ;;  %v2808_v40 = vadd.f32 %v2807_v42, %v2777_v1  ;;  %v2720_v14 = vpop.f32.mrf.mxu1  ;;  %v2850_v3 = vmul.f32 %v2781_v10, %v2781_v10 }
 0x228   : > { %v3892_v15 = vpop.f32.mrf.mxu0  ;;  %v2782_v17 = vadd.f32 %v5480_v9, %v2729_v52  ;;  %v2721_v54 = vadd.f32 %v2720_v14, %v2560_v24  ;;  %v2877_v41 = vadd.f32 %v2876_v35, %v2846_v38  ;;  %v2848_v2 = vmul.f32 %v2779_v60, %v2779_v60 }
 0x229   : > { %v2581_v25 = vadd.f32 %v3891_v51, %v2420_v44  ;;  %v2809_v4 = vadd.f32 %v2808_v40, %v2778_v46  ;;  %v4013_v5 = vpop.f32.mrf.mxu1 }
 0x22a   : > { %v3893_v31 = vpop.f32.mrf.mxu0  ;;  %v3396_v62 = vpack.c.bf16 %v2782_v17, %v2781_v10  ;;  %v2780_v53 = vadd.f32 %v5480_v9, %v2721_v54  ;;  %v2878_v1 = vadd.f32 %v2877_v41, %v2847_v56  ;;  %v2851_v34 = vmul.f32 %v2782_v17, %v2782_v17 }
 0x22b   : > { %v3894_v58 = vadd.f32 %v3893_v31, %v3892_v15  ;;  %v2810_v7 = vadd.f32 %v2809_v4, %v2779_v60  ;;  %v2733_v43 = vpop.f32.mrf.mxu1  ;;  %v2742_v21 = vadd.f32 %v4013_v5, %v2581_v25 }
 0x22c   : > { %3420 = vst [vmem:[%s5501_s18 + $0x68] sm:$0xff] %v3396_v62   ;;  %v2849_v8 = vmul.f32 %v2780_v53, %v2780_v53  ;;  %v3391_v50 = vpack.c.bf16 %v2780_v53, %v2779_v60  ;;  %v2734_v46 = vadd.f32 %v2733_v43, %v2573_v19  ;;  %v2879_v20 = vadd.f32 %v2878_v1, %v2848_v2 }
 0x22d   : > { %v2584_v0 = vadd.f32 %v3894_v58, %v2423_v30  ;;  %v2811_v48 = vadd.f32 %v2810_v7, %v2780_v53  ;;  %v4014_v63 = vpop.f32.mrf.mxu1  ;;  %v2785_v13 = vadd.f32 %v5480_v9, %v2742_v21 }
 0x22e   : > { %3419 = vst [vmem:[%s5501_s18 + $0x60] sm:$0xff] %v3391_v50   ;;  %v2880_v47 = vadd.f32 %v2879_v20, %v2849_v8  ;;  %v2783_v28 = vadd.f32 %v5480_v9, %v2734_v46 }
 0x22f   : > { %v2745_v11 = vadd.f32 %v4014_v63, %v2584_v0  ;;  %v2812_v55 = vadd.f32 %v2811_v48, %v2781_v10  ;;  %v2736_v22 = vpop.f32.mrf.mxu1  ;;  %v2854_v32 = vmul.f32 %v2785_v13, %v2785_v13 }
 0x230   : > { %v2737_v15 = vadd.f32 %v2736_v22, %v2576_v39  ;;  %v2881_v16 = vadd.f32 %v2880_v47, %v2850_v3  ;;  %v2852_v27 = vmul.f32 %v2783_v28, %v2783_v28 }
 0x231   : > { %v2786_v36 = vadd.f32 %v5480_v9, %v2745_v11  ;;  %v2813_v33 = vadd.f32 %v2812_v55, %v2782_v17 }
 0x232   : > { %v2784_v51 = vadd.f32 %v5480_v9, %v2737_v15  ;;  %v2882_v6 = vadd.f32 %v2881_v16, %v2851_v34 }
 0x233   : > { %v3406_v37 = vpack.c.bf16 %v2786_v36, %v2785_v13  ;;  %v2814_v59 = vadd.f32 %v2813_v33, %v2783_v28  ;;  %v2855_v42 = vmul.f32 %v2786_v36, %v2786_v36 }
 0x234   : > { %v2853_v12 = vmul.f32 %v2784_v51, %v2784_v51  ;;  %v3401_v31 = vpack.c.bf16 %v2784_v51, %v2783_v28  ;;  %v2883_v29 = vadd.f32 %v2882_v6, %v2852_v27 }
 0x235   : > { %3422 = vst [vmem:[%s5501_s18 + $0x78] sm:$0xff] %v3406_v37   ;;  %v2815_v44 = vadd.f32 %v2814_v59, %v2784_v51 }
 0x236   : > { %3421 = vst [vmem:[%s5501_s18 + $0x70] sm:$0xff] %v3401_v31   ;;  %v2884_v45 = vadd.f32 %v2883_v29, %v2853_v12 }
 0x237   : > { %v2816_v57 = vadd.f32 %v2815_v44, %v2785_v13 }
 0x238   : > { %v2885_v30 = vadd.f32 %v2884_v45, %v2854_v32 }
 0x239   : > { %v2817_v18 = vadd.f32 %v2816_v57, %v2786_v36 }
 0x23a   : > { %v2886_v26 = vadd.f32 %v2885_v30, %v2855_v42 }
 0x23b   : > { %v2818_v52 = vrot.slane %v2817_v18, 4 }
 0x23c   : > { %v2887_v9 = vrot.slane %v2886_v26, 4 }
 0x23d   : > { %v2819_v24 = vadd.f32 %v2818_v52, %v2817_v18 }
 0x23e   : > { %v2888_v38 = vadd.f32 %v2887_v9, %v2886_v26 }
 0x23f   : > { %v2820_v58 = vrot.slane %v2819_v24, 2 }
 0x240   : > { %v2889_v35 = vrot.slane %v2888_v38, 2 }
 0x241   : > { %v2821_v40 = vadd.f32 %v2820_v58, %v2819_v24 }
 0x242   : > { %v2890_v14 = vadd.f32 %v2889_v35, %v2888_v38 }
 0x243   : > { %v2822_v60 = vrot.slane %v2821_v40, 1 }
 0x244   : > { %v2891_v10 = vrot.slane %v2890_v14, 1 }
 0x245   : > { %v2823_v17 = vadd.f32 %v2822_v60, %v2821_v40 }
 0x246   : > { %v2892_v54 = vadd.f32 %v2891_v10, %v2890_v14 }
 0x248   : > { %v2894_v25 = vsel %vm2893_vm2, %v2823_v17, %v2892_v54 }
 0x249   : > { %2895 = vst [vmem:[%s303_s27] sm:$0x3] %v2894_v25 }
 0x24a PF: > { %s18_s24 = sadd.s32 1, %s4144_s24  }
 0x24b   : > { %p15_p4 = scmp.ge.s32.totalorder %s18_s24, 4  }
 0x24d   :  { %17 = sbr.rel (!%p15_p4) target bundleno = 1 (0x1), region = 90 }

// kernel: up_style_block_forward.5
= control target key start
LH: loop header
LB: loop body
LE: loop exit
PB: predicated region body
PF: predicated region fallthrough
CT: control target
= control target key end

     0   :  { %s3429_s18 = smov 0   ;;  %s4521_s0 = inlined_call_operand.vmem [shape: bf16[2,16,16,128], index: 0, kind: input, shape index: {}]   ;;  %s4522_s1 = inlined_call_operand.vmem [shape: f32[1,128], index: 1, kind: input, shape index: {}]   ;;  %s4523_s2 = inlined_call_operand.vmem [shape: f32[1,128], index: 2, kind: input, shape index: {}]   ;;  %s4524_s3 = inlined_call_operand.vmem [shape: bf16[1152,128], index: 3, kind: input, shape index: {}]   ;;  %s4525_s4 = inlined_call_operand.vmem [shape: f32[1,128], index: 4, kind: input, shape index: {}]   ;;  %s4526_s5 = inlined_call_operand.vmem [shape: f32[2,64,16,128], index: 5, kind: output, shape index: {}]  }
   0x1 LB: > { %s2501_s19 = sadd.s32 4294967295, %s3396_s18   ;;  %p2505_p0 = scmp.ge.s32.totalorder %s3396_s18, 1  ;;  %s3396_s18 = sphi %s3429_s18, %s15_s18  }
   0x2   : > { %p187_p1 = scmp.lt.s32.totalorder %s3396_s18, 3 }
   0x4   : > { %p188_p2 = pnand %p2505_p0, %p187_p1 }
   0x6   : > { %191 = sbr.rel (%p188_p2) target bundleno = 570 (0x23a), region = 40 }
   0xb   : > { %v3309_v0 = vld [vmem:[%s4524_s3 + $0x38] sm:$0xff]   ;;  %p215_p3 = scmp.lt.s32.totalorder %s2501_s19, 1  ;;  %v3310_v1 = vld [vmem:[%s4524_s3 + $0x30] sm:$0xff]   ;;  %v3398_v2 = vmov 0.0   ;;  %v3311_v3 = vld [vmem:[%s4524_s3 + $0x28] sm:$0xff]   ;;  %vm650_vm5 = vcmask 1046528  }
   0xc   : > { %3236 = vmatprep.subr.bf16.mxu0 %v3309_v0  ;;  %3284 = vmatprep.subr.bf16.mxu1 %v3309_v0  ;;  %464 = vst [vmem:[#allocation2] sm:$0xff] %v3398_v2  ;;  %467 = vst [vmem:[#allocation2 + $0x18] sm:$0xff] %v3398_v2  ;;  %v3312_v4 = vld [vmem:[%s4524_s3 + $0x20] sm:$0xff]   ;;  %v3313_v21 = vld [vmem:[%s4524_s3 + $0x18] sm:$0xff]  }
   0xd   : > { %s4536_s19 = smov (!%p215_p3, %s2501_s19), 1  ;;  %468 = vst [vmem:[#allocation2 + $0x20] sm:$0xff] %v3398_v2  ;;  %469 = vst [vmem:[#allocation2 + $0x28] sm:$0x3] %v3398_v2  ;;  %3237 = vmatpush3.bf16.msra.mxu0 %v3309_v0  ;;  %3292 = vmatpush3.bf16.msra.mxu1 %v3309_v0  ;;  %v3461_v6 = vld [vmem:[%s4522_s1] ss:$0 sm:$0xff] }
   0xe   : > { %470 = vst [vmem:[#allocation2 + $0x30] sm:$0xff] %v3398_v2  ;;  %471 = vst [vmem:[#allocation2 + $0x38] sm:$0xff] %v3398_v2  ;;  %3238 = vmatprep.subr.bf16.mxu0 %v3310_v1  ;;  %3285 = vmatprep.subr.bf16.mxu1 %v3310_v1  ;;  %s2683_s26 = sshll.u32 %s4536_s19, 7  ;;  %v3469_v12 = vld [vmem:[%s4523_s2] ss:$0 sm:$0xff]  ;;  %v3314_v29 = vld [vmem:[%s4524_s3 + $0x10] sm:$0xff]  }
   0xf   : > { %472 = vst [vmem:[#allocation2 + $0x40] sm:$0x3] %v3398_v2  ;;  %473 = vst [vmem:[#allocation2 + $0x48] sm:$0xff] %v3398_v2  ;;  %s3452_s29 = scalar_lea.vmem %s4521_s0, %s2683_s26  ;;  %v3315_v47 = vld [vmem:[%s4524_s3 + $0x8] sm:$0xff]   ;;  %v3316_v0 = vld [vmem:[%s4524_s3] sm:$0xff]   ;;  %s2684_s13 = sshll.u32 %s4536_s19, 10 }
  0x10   : > { %474 = vst [vmem:[#allocation2 + $0x50] sm:$0xff] %v3398_v2  ;;  %475 = vst [vmem:[#allocation2 + $0x58] sm:$0x3] %v3398_v2  ;;  %v2686_v5 = vld [vmem:[%s3452_s29] sm:$0xff]   ;;  %v2749_v10 = vld [vmem:[%s3452_s29 + $0x8] sm:$0xff]   ;;  %s4194_s20 = scalar_lea.vmem %s4526_s5, %s2684_s13 }
  0x11   : > { %476 = vst [vmem:[#allocation2 + $0x60] sm:$0xff] %v3398_v2  ;;  %477 = vst [vmem:[#allocation2 + $0x68] sm:$0xff] %v3398_v2  ;;  %3239 = vmatpush3.bf16.msra.mxu0 %v3310_v1  ;;  %3293 = vmatpush3.bf16.msra.mxu1 %v3310_v1  ;;  %v2687_v7 = vunpack.c.l.bf16 %v2686_v5  ;;  %v2688_v8 = vunpack.c.h.bf16 %v2686_v5  ;;  %v2756_v9 = vld [vmem:[%s3452_s29 + $0x40] sm:$0xff]   ;;  %v2757_v11 = vld [vmem:[%s3452_s29 + $0x48] sm:$0xff]   ;;  %v2691_v15 = vunpack.c.l.bf16 %v2749_v10  ;;  %v2692_v16 = vunpack.c.h.bf16 %v2749_v10 }
  0x12   : > { %478 = vst [vmem:[#allocation2 + $0x70] sm:$0x3] %v3398_v2  ;;  %479 = vst [vmem:[#allocation2 + $0x78] sm:$0xff] %v3398_v2  ;;  %3240 = vmatprep.subr.bf16.mxu0 %v3311_v3  ;;  %3286 = vmatprep.subr.bf16.mxu1 %v3311_v3  ;;  %v2719_v13 = vunpack.c.l.bf16 %v2756_v9  ;;  %v2720_v14 = vunpack.c.h.bf16 %v2756_v9  ;;  %v2723_v19 = vunpack.c.l.bf16 %v2757_v11  ;;  %v2724_v20 = vunpack.c.h.bf16 %v2757_v11  ;;  %v2750_v52 = vld [vmem:[%s3452_s29 + $0x10] sm:$0xff]   ;;  %v2751_v54 = vld [vmem:[%s3452_s29 + $0x18] sm:$0xff]  }
  0x13   : > { %480 = vst [vmem:[#allocation2 + $0x80] sm:$0xff] %v3398_v2  ;;  %481 = vst [vmem:[#allocation2 + $0x88] sm:$0x3] %v3398_v2  ;;  %v297_v17 = vmul.f32 %v2687_v7, %v3461_v6  ;;  %v298_v18 = vmul.f32 %v2688_v8, %v3461_v6  ;;  %v299_v24 = vmul.f32 %v2691_v15, %v3461_v6  ;;  %v2758_v53 = vld [vmem:[%s3452_s29 + $0x50] sm:$0xff]   ;;  %v2695_v56 = vunpack.c.l.bf16 %v2750_v52  ;;  %v3501_v59 = vld [vmem:[%s3452_s29 + $0x58] sm:$0xff]  }
  0x14   : > { %482 = vst [vmem:[#allocation2 + $0x90] sm:$0xff] %v3398_v2  ;;  %483 = vst [vmem:[#allocation2 + $0x98] sm:$0xff] %v3398_v2  ;;  %v313_v22 = vmul.f32 %v2719_v13, %v3461_v6  ;;  %v314_v23 = vmul.f32 %v2720_v14, %v3461_v6  ;;  %v300_v27 = vmul.f32 %v2692_v16, %v3461_v6  ;;  %v2696_v57 = vunpack.c.h.bf16 %v2750_v52  ;;  %v3319_v52 = vld [vmem:[%s4524_s3 + $0x78] sm:$0xff]  }
  0x15   : > { %484 = vst [vmem:[#allocation2 + $0xa0] sm:$0x3] %v3398_v2  ;;  %485 = vst [vmem:[#allocation2 + $0xa8] sm:$0xff] %v3398_v2  ;;  %3241 = vmatpush3.bf16.msra.mxu0 %v3311_v3  ;;  %3294 = vmatpush3.bf16.msra.mxu1 %v3311_v3  ;;  %v336_v25 = vadd.f32 %v3469_v12, %v297_v17  ;;  %v337_v26 = vadd.f32 %v3469_v12, %v298_v18  ;;  %v2727_v58 = vunpack.c.l.bf16 %v2758_v53 }
  0x16   : > { %486 = vst [vmem:[#allocation2 + $0xb0] sm:$0xff] %v3398_v2  ;;  %487 = vst [vmem:[#allocation2 + $0xb8] sm:$0x3] %v3398_v2  ;;  %3242 = vmatprep.subr.bf16.mxu0 %v3312_v4  ;;  %3287 = vmatprep.subr.bf16.mxu1 %v3312_v4  ;;  %v315_v28 = vmul.f32 %v2723_v19, %v3461_v6  ;;  %v352_v30 = vadd.f32 %v3469_v12, %v313_v22  ;;  %v2728_v61 = vunpack.c.h.bf16 %v2758_v53 }
  0x17   : > { %488 = vst [vmem:[#allocation2 + $0xc0] sm:$0xff] %v3398_v2  ;;  %489 = vst [vmem:[#allocation2 + $0xc8] sm:$0xff] %v3398_v2  ;;  %v353_v31 = vadd.f32 %v3469_v12, %v314_v23  ;;  %v338_v32 = vadd.f32 %v3469_v12, %v299_v24  ;;  %v316_v33 = vmul.f32 %v2724_v20, %v3461_v6  ;;  %vm368_vm0 = vcmp.ge.f32.partialorder %v336_v25, 0.0 }
  0x18   : > { %490 = vst [vmem:[#allocation2 + $0xd0] sm:$0x3] %v3398_v2  ;;  %491 = vst [vmem:[#allocation2 + $0xd8] sm:$0xff] %v3398_v2  ;;  %vm369_vm1 = vcmp.ge.f32.partialorder %v337_v26, 0.0  ;;  %v400_v34 = vmul.f32 0.01, %v336_v25  ;;  %v339_v40 = vadd.f32 %v3469_v12, %v300_v27  ;;  %v354_v44 = vadd.f32 %v3469_v12, %v315_v28 }
  0x19   : > { %492 = vst [vmem:[#allocation2 + $0xe0] sm:$0xff] %v3398_v2  ;;  %493 = vst [vmem:[#allocation2 + $0xe8] sm:$0x3] %v3398_v2  ;;  %3243 = vmatpush3.bf16.msra.mxu0 %v3312_v4  ;;  %3295 = vmatpush3.bf16.msra.mxu1 %v3312_v4  ;;  %v401_v35 = vmul.f32 0.01, %v337_v26  ;;  %vm384_vm2 = vcmp.ge.f32.partialorder %v352_v30, 0.0  ;;  %v355_v46 = vadd.f32 %v3469_v12, %v316_v33  ;;  %v2699_v62 = vunpack.c.l.bf16 %v2751_v54 }
  0x1a   : > { %494 = vst [vmem:[#allocation2 + $0xf0] sm:$0xff] %v3398_v2  ;;  %495 = vst [vmem:[#allocation2 + $0xf8] sm:$0xff] %v3398_v2  ;;  %3244 = vmatprep.subr.bf16.mxu0 %v3313_v21  ;;  %3288 = vmatprep.subr.bf16.mxu1 %v3313_v21  ;;  %vm385_vm3 = vcmp.ge.f32.partialorder %v353_v31, 0.0  ;;  %v416_v36 = vmul.f32 0.01, %v352_v30  ;;  %v432_v38 = vsel %vm368_vm0, %v336_v25, %v400_v34  ;;  %vm370_vm4 = vcmp.ge.f32.partialorder %v338_v32, 0.0 }
  0x1b   : > { %496 = vst [vmem:[#allocation2 + $0x100] sm:$0x3] %v3398_v2  ;;  %497 = vst [vmem:[#allocation2 + $0x108] sm:$0xff] %v3398_v2  ;;  %v417_v37 = vmul.f32 0.01, %v353_v31  ;;  %v433_v39 = vsel %vm369_vm1, %v337_v26, %v401_v35  ;;  %vm371_vm6 = vcmp.ge.f32.partialorder %v339_v40, 0.0  ;;  %v2700_v63 = vunpack.c.h.bf16 %v2751_v54 }
  0x1c   : > { %498 = vst [vmem:[#allocation2 + $0x110] sm:$0xff] %v3398_v2  ;;  %499 = vst [vmem:[#allocation2 + $0x118] sm:$0x3] %v3398_v2  ;;  %v448_v41 = vsel %vm384_vm2, %v352_v30, %v416_v36  ;;  %v402_v43 = vmul.f32 0.01, %v338_v32  ;;  %vm386_vm7 = vcmp.ge.f32.partialorder %v354_v44, 0.0  ;;  %v301_v1 = vmul.f32 %v2695_v56, %v3461_v6 }
  0x1d   : > { %500 = vst [vmem:[#allocation2 + $0x120] sm:$0xff] %v3398_v2  ;;  %501 = vst [vmem:[#allocation2 + $0x128] sm:$0xff] %v3398_v2  ;;  %v449_v42 = vsel %vm385_vm3, %v353_v31, %v417_v37  ;;  %3245 = vmatpush3.bf16.msra.mxu0 %v3313_v21  ;;  %3296 = vmatpush3.bf16.msra.mxu1 %v3313_v21  ;;  %v403_v45 = vmul.f32 0.01, %v339_v40  ;;  %v418_v49 = vmul.f32 0.01, %v354_v44  ;;  %v2731_v4 = vunpack.c.l.bf16 %v3501_v59 }
  0x1e   : > { %502 = vst [vmem:[#allocation2 + $0x130] sm:$0x3] %v3398_v2  ;;  %503 = vst [vmem:[#allocation2 + $0x138] sm:$0xff] %v3398_v2  ;;  %3246 = vmatprep.subr.bf16.mxu0 %v3314_v29  ;;  %3289 = vmatprep.subr.bf16.mxu1 %v3314_v29  ;;  %v434_v48 = vsel %vm370_vm4, %v338_v32, %v402_v43  ;;  %vm387_vm8 = vcmp.ge.f32.partialorder %v355_v46, 0.0  ;;  %v419_v51 = vmul.f32 0.01, %v355_v46  ;;  %v2732_v13 = vunpack.c.h.bf16 %v3501_v59 }
  0x1f   : > { %504 = vst [vmem:[#allocation2 + $0x140] sm:$0xff] %v3398_v2  ;;  %505 = vst [vmem:[#allocation2 + $0x148] sm:$0x3] %v3398_v2  ;;  %v435_v50 = vsel %vm371_vm6, %v339_v40, %v403_v45  ;;  %v450_v55 = vsel %vm386_vm7, %v354_v44, %v418_v49  ;;  %v317_v3 = vmul.f32 %v2727_v58, %v3461_v6  ;;  %v3318_v35 = vld [vmem:[%s4524_s3 + $0x138] sm:$0xff]   ;;  %v3321_v54 = vld [vmem:[%s4524_s3 + $0xb0] sm:$0xff]  }
  0x20   : > { %506 = vst [vmem:[#allocation2 + $0x150] sm:$0xff] %v3398_v2  ;;  %507 = vst [vmem:[#allocation2 + $0x158] sm:$0xff] %v3398_v2  ;;  %v451_v60 = vsel %vm387_vm8, %v355_v46, %v419_v51  ;;  %v318_v9 = vmul.f32 %v2728_v61, %v3461_v6  ;;  %v3518_v10 = vmul.f32 %v2699_v62, %v3461_v6  ;;  %v3320_v40 = vld [vmem:[%s4524_s3 + $0xf8] sm:$0xff]   ;;  %v3324_v61 = vld [vmem:[%s4524_s3 + $0xf0] sm:$0xff]  }
  0x21   : > { %508 = vst [vmem:[#allocation2 + $0x160] sm:$0x3] %v3398_v2  ;;  %509 = vst [vmem:[#allocation2 + $0x168] sm:$0xff] %v3398_v2  ;;  %3247 = vmatpush3.bf16.msra.mxu0 %v3314_v29  ;;  %3297 = vmatpush3.bf16.msra.mxu1 %v3314_v29  ;;  %v3521_v11 = vmul.f32 %v2700_v63, %v3461_v6  ;;  %v340_v19 = vadd.f32 %v3469_v12, %v301_v1  ;;  %v3317_v29 = vld [vmem:[%s4524_s3 + $0xb8] sm:$0xff]   ;;  %v3326_v59 = vld [vmem:[%s4524_s3 + $0x128] sm:$0xff]  }
  0x22   : > { %510 = vst [vmem:[#allocation2 + $0x170] sm:$0xff] %v3398_v2  ;;  %511 = vst [vmem:[#allocation2 + $0x178] sm:$0x3] %v3398_v2  ;;  %3248 = vmatprep.subr.bf16.mxu0 %v3315_v47  ;;  %3290 = vmatprep.subr.bf16.mxu1 %v3315_v47  ;;  %v356_v24 = vadd.f32 %v3469_v12, %v317_v3  ;;  %v342_v1 = vadd.f32 %v3469_v12, %v3518_v10  ;;  %v3323_v3 = vld [vmem:[%s4524_s3 + $0x70] sm:$0xff]  }
  0x23   : > { %512 = vst [vmem:[#allocation2 + $0x180] sm:$0xff] %v3398_v2  ;;  %513 = vst [vmem:[#allocation2 + $0x188] sm:$0xff] %v3398_v2  ;;  %vm372_vm9 = vcmp.ge.f32.partialorder %v340_v19, 0.0 }
  0x24   : > { %514 = vst [vmem:[#allocation2 + $0x190] sm:$0x3] %v3398_v2  ;;  %517 = vst [vmem:[#allocation2 + $0x1a8] sm:$0x3] %v3398_v2  ;;  %v302_v2 = vmul.f32 %v2696_v57, %v3461_v6  ;;  %vm388_vm11 = vcmp.ge.f32.partialorder %v356_v24, 0.0  ;;  %vm374_vm13 = vcmp.ge.f32.partialorder %v342_v1, 0.0 }
  0x25   : > { %519 = vst [vmem:[#allocation2 + $0x19] sm:$0xff] %v432_v38  ;;  %520 = vst [vmem:[#allocation2 + $0x21] sm:$0xff] %v433_v39  ;;  %3249 = vmatpush3.bf16.msra.mxu0 %v3315_v47  ;;  %3298 = vmatpush3.bf16.msra.mxu1 %v3315_v47  ;;  %v357_v47 = vadd.f32 %v3469_v12, %v318_v9  ;;  %v420_v62 = vmul.f32 0.01, %v356_v24 }
  0x26   : > { %535 = vst [vmem:[#allocation2 + $0xd9] sm:$0xff] %v448_v41  ;;  %536 = vst [vmem:[#allocation2 + $0xe1] sm:$0xff] %v449_v42  ;;  %v341_v23 = vadd.f32 %v3469_v12, %v302_v2  ;;  %3250 = vmatprep.subr.bf16.mxu0 %v3316_v0  ;;  %3291 = vmatprep.subr.bf16.mxu1 %v3316_v0  ;;  %v404_v41 = vmul.f32 0.01, %v340_v19  ;;  %v343_v2 = vadd.f32 %v3469_v12, %v3521_v11 }
  0x27   : > { %521 = vst [vmem:[#allocation2 + $0x31] sm:$0xff] %v434_v48  ;;  %522 = vst [vmem:[#allocation2 + $0x39] sm:$0xff] %v435_v50  ;;  %vm389_vm12 = vcmp.ge.f32.partialorder %v357_v47, 0.0  ;;  %v452_v9 = vsel %vm388_vm11, %v356_v24, %v420_v62  ;;  %v406_v11 = vmul.f32 0.01, %v342_v1 }
  0x28   : > { %537 = vst [vmem:[#allocation2 + $0xf1] sm:$0xff] %v450_v55  ;;  %538 = vst [vmem:[#allocation2 + $0xf9] sm:$0xff] %v451_v60  ;;  %vm373_vm10 = vcmp.ge.f32.partialorder %v341_v23, 0.0  ;;  %v405_v46 = vmul.f32 0.01, %v341_v23  ;;  %v3322_v55 = vld [vmem:[%s4524_s3 + $0x130] sm:$0xff]   ;;  %v436_v56 = vsel %vm372_vm9, %v340_v19, %v404_v41 }
  0x29   : > { %3251 = vmatpush3.bf16.msra.mxu0 %v3316_v0  ;;  %3299 = vmatpush3.bf16.msra.mxu1 %v3316_v0  ;;  %523 = vst [vmem:[#allocation2 + $0x49] sm:$0xff] %v436_v56  ;;  %v421_v0 = vmul.f32 0.01, %v357_v47  ;;  %539 = vst [vmem:[#allocation2 + $0x109] sm:$0xff] %v452_v9  ;;  %vm375_vm14 = vcmp.ge.f32.partialorder %v343_v2, 0.0 }
  0x2a   : > { %2788 = vmatprep.subr.bf16.mxu1 %v3317_v29  ;;  %2900 = vmatprep.subr.bf16.mxu0 %v3318_v35  ;;  %v437_v57 = vsel %vm373_vm10, %v341_v23, %v405_v46  ;;  %v3327_v29 = vld [vmem:[%s4524_s3 + $0x68] sm:$0xff]  }
  0x2b   : > { %524 = vst [vmem:[#allocation2 + $0x51] sm:$0xff] %v437_v57  ;;  %v453_v10 = vsel %vm389_vm12, %v357_v47, %v421_v0 }
  0x2c   : > { %v3510_v5 = vld [vmem:[#allocation2 + $0x18] sm:$0xff]  ;;  %v3512_v7 = vld [vmem:[#allocation2 + $0x20] sm:$0xff]  ;;  %v3514_v8 = vld [vmem:[#allocation2 + $0x28] sm:$0x3]  ;;  %540 = vst [vmem:[#allocation2 + $0x111] sm:$0xff] %v453_v10 }
  0x2d   : > { %v651_v14 = vrot.slane %v3510_v5, 1  ;;  %v652_v15 = vrot.slane %v3512_v7, 1  ;;  %v654_v16 = vrot.slane %v3514_v8, 1  ;;  %v575_v17 = vld [vmem:[#allocation2 + $0xd8] sm:$0xff]  ;;  %v576_v18 = vld [vmem:[#allocation2 + $0xe0] sm:$0xff] }
  0x2e   : > { %v577_v20 = vld [vmem:[#allocation2 + $0xe8] sm:$0x3]  ;;  %v691_v21 = vrot.slane %v575_v17, 1  ;;  %v692_v22 = vrot.slane %v576_v18, 1  ;;  %v3532_v28 = vld [vmem:[#allocation2 + $0x30] sm:$0xff]  ;;  %v3540_v32 = vld [vmem:[#allocation2 + $0x38] sm:$0xff] }
  0x2f   : > { %v653_v25 = vsel %vm650_vm5, %v651_v14, %v652_v15  ;;  %v655_v26 = vsel %vm650_vm5, %v652_v15, %v654_v16  ;;  %v694_v27 = vrot.slane %v577_v20, 1  ;;  %v3542_v33 = vld [vmem:[#allocation2 + $0x40] sm:$0x3]  ;;  %v656_v34 = vrot.slane %v3532_v28, 1  ;;  %v578_v39 = vld [vmem:[#allocation2 + $0xf0] sm:$0xff]  ;;  %v579_v43 = vld [vmem:[#allocation2 + $0xf8] sm:$0xff] }
  0x30   : > { %v3537_v30 = vpack.c.bf16 %v655_v26, %v653_v25  ;;  %v693_v31 = vsel %vm650_vm5, %v691_v21, %v692_v22  ;;  %v657_v37 = vrot.slane %v3540_v32, 1  ;;  %v659_v38 = vrot.slane %v3542_v33, 1  ;;  %v580_v44 = vld [vmem:[#allocation2 + $0x100] sm:$0x3]  ;;  %v3325_v18 = vld [vmem:[%s4524_s3 + $0xa8] sm:$0xff]  }
  0x31   : > { %v695_v36 = vsel %vm650_vm5, %v692_v22, %v694_v27  ;;  %v696_v45 = vrot.slane %v578_v39, 1  ;;  %v697_v50 = vrot.slane %v579_v43, 1  ;;  %v699_v51 = vrot.slane %v580_v44, 1  ;;  %v2752_v16 = vld [vmem:[%s3452_s29 + $0x20] sm:$0xff]   ;;  %v3328_v22 = vld [vmem:[%s4524_s3 + $0xe8] sm:$0xff]  }
  0x32   : > { %v3554_v42 = vpack.c.bf16 %v695_v36, %v693_v31  ;;  %3252 = vmatprep.mubr.bf16.mxu0 %v3537_v30  ;;  %v658_v48 = vsel %vm650_vm5, %v656_v34, %v657_v37  ;;  %v660_v49 = vsel %vm650_vm5, %v657_v37, %v659_v38  ;;  %v319_v14 = vmul.f32 %v2731_v4, %v3461_v6  ;;  %v2760_v17 = vld [vmem:[%s3452_s29 + $0x60] sm:$0xff]   ;;  %v3618_v34 = vld [vmem:[%s3452_s29 + $0x28] sm:$0xff]   ;;  %v3622_v36 = vld [vmem:[#allocation2 + $0x50] sm:$0xff] }
  0x33   : > { %v3564_v53 = vpack.c.bf16 %v660_v49, %v658_v48  ;;  %v698_v58 = vsel %vm650_vm5, %v696_v45, %v697_v50  ;;  %v700_v60 = vsel %vm650_vm5, %v697_v50, %v699_v51  ;;  %v320_v15 = vmul.f32 %v2732_v13, %v3461_v6  ;;  %v3330_v31 = vld [vmem:[%s4524_s3 + $0x120] sm:$0xff]   ;;  %v3620_v35 = vld [vmem:[#allocation2 + $0x48] sm:$0xff]  ;;  %v3624_v37 = vld [vmem:[#allocation2 + $0x58] sm:$0x3] }
  0x34   : > { %3268 = vmatprep.mubr.bf16.mxu1 %v3554_v42  ;;  %v3580_v63 = vpack.c.bf16 %v700_v60, %v698_v58  ;;  %v407_v4 = vmul.f32 0.01, %v343_v2  ;;  %v358_v13 = vadd.f32 %v3469_v12, %v319_v14  ;;  %v2703_v20 = vunpack.c.l.bf16 %v2752_v16  ;;  %v3329_v39 = vld [vmem:[%s4524_s3 + $0xa0] sm:$0xff]   ;;  %v3648_v57 = vld [vmem:[#allocation2 + $0x108] sm:$0xff]  ;;  %v3657_v0 = vld [vmem:[#allocation2 + $0x110] sm:$0xff] }
  0x35   : > { %3253 = vmatmul.mubr.bf16.vlgmr.msra.gmra.mxu0 %v3564_v53  ;;  %v359_v19 = vadd.f32 %v3469_v12, %v320_v15  ;;  %v438_v21 = vsel %vm374_vm13, %v342_v1, %v406_v11  ;;  %v2704_v23 = vunpack.c.h.bf16 %v2752_v16  ;;  %v2735_v24 = vunpack.c.l.bf16 %v2760_v17  ;;  %v3332_v48 = vld [vmem:[%s4524_s3 + $0xe0] sm:$0xff]   ;;  %v3659_v1 = vld [vmem:[#allocation2 + $0x118] sm:$0x3] }
  0x36   : > { %2901 = vmatpush3.bf16.msra.mxu0 %v3320_v40  ;;  %3269 = vmatmul.mubr.bf16.vlgmr.msra.gmra.mxu1 %v3580_v63  ;;  %v2736_v25 = vunpack.c.h.bf16 %v2760_v17  ;;  %v439_v26 = vsel %vm375_vm14, %v343_v2, %v407_v4  ;;  %525 = vst [vmem:[#allocation2 + $0x61] sm:$0xff] %v438_v21  ;;  %vm390_vm15 = vcmp.ge.f32.partialorder %v358_v13, 0.0  ;;  %v422_v27 = vmul.f32 0.01, %v358_v13  ;;  %v3331_v58 = vld [vmem:[%s4524_s3 + $0x60] sm:$0xff]   ;;  %v3338_v4 = vld [vmem:[%s4524_s3 + $0x110] sm:$0xff]  }
  0x37   : > { %2902 = vmatprep.subr.bf16.mxu0 %v3322_v55  ;;  %2789 = vmatpush3.bf16.msra.mxu1 %v3319_v52  ;;  %vm391_vm0 = vcmp.ge.f32.partialorder %v359_v19, 0.0  ;;  %526 = vst [vmem:[#allocation2 + $0x69] sm:$0xff] %v439_v26  ;;  %v423_v38 = vmul.f32 0.01, %v359_v19  ;;  %v305_v40 = vmul.f32 %v2703_v20, %v3461_v6  ;;  %v306_v41 = vmul.f32 %v2704_v23, %v3461_v6 }
  0x38   : > { %2790 = vmatprep.subr.bf16.mxu1 %v3321_v54  ;;  %v321_v43 = vmul.f32 %v2735_v24, %v3461_v6  ;;  %v661_v44 = vrot.slane %v3620_v35, 1  ;;  %v662_v45 = vrot.slane %v3622_v36, 1  ;;  %v664_v46 = vrot.slane %v3624_v37, 1  ;;  %v3334_v54 = vld [vmem:[%s4524_s3 + $0x118] sm:$0xff]   ;;  %v2761_v24 = vld [vmem:[%s3452_s29 + $0x68] sm:$0xff]  }
  0x39   : > { %v454_v47 = vsel %vm390_vm15, %v358_v13, %v422_v27  ;;  %v455_v49 = vsel %vm391_vm0, %v359_v19, %v423_v38  ;;  %v344_v50 = vadd.f32 %v3469_v12, %v305_v40  ;;  %v345_v51 = vadd.f32 %v3469_v12, %v306_v41 }
  0x3a   : > { %2903 = vmatpush3.bf16.msra.mxu0 %v3324_v61  ;;  %541 = vst [vmem:[#allocation2 + $0x121] sm:$0xff] %v454_v47  ;;  %v322_v52 = vmul.f32 %v2736_v25, %v3461_v6  ;;  %v663_v55 = vsel %vm650_vm5, %v661_v44, %v662_v45  ;;  %v665_v56 = vsel %vm650_vm5, %v662_v45, %v664_v46  ;;  %542 = vst [vmem:[#allocation2 + $0x129] sm:$0xff] %v455_v49  ;;  %v3335_v25 = vld [vmem:[%s4524_s3 + $0x58] sm:$0xff]  }
  0x3b   : > { %2904 = vmatprep.subr.bf16.mxu0 %v3326_v59  ;;  %2791 = vmatpush3.bf16.msra.mxu1 %v3323_v3  ;;  %v360_v60 = vadd.f32 %v3469_v12, %v321_v43  ;;  %v2707_v61 = vunpack.c.l.bf16 %v3618_v34  ;;  %v3655_v62 = vpack.c.bf16 %v665_v56, %v663_v55  ;;  %v701_v2 = vrot.slane %v3648_v57, 1  ;;  %v3333_v3 = vld [vmem:[%s4524_s3 + $0x98] sm:$0xff]  }
  0x3c   : > { %2792 = vmatprep.subr.bf16.mxu1 %v3325_v18  ;;  %vm376_vm1 = vcmp.ge.f32.partialorder %v344_v50, 0.0  ;;  %vm377_vm2 = vcmp.ge.f32.partialorder %v345_v51, 0.0  ;;  %v702_v9 = vrot.slane %v3657_v0, 1  ;;  %v704_v14 = vrot.slane %v3659_v1, 1  ;;  %v3336_v59 = vld [vmem:[%s4524_s3 + $0xd8] sm:$0xff]  }
  0x3d   : > { %v408_v15 = vmul.f32 0.01, %v344_v50  ;;  %v409_v16 = vmul.f32 0.01, %v345_v51  ;;  %3256 = vmatprep.mubr.bf16.mxu0 %v3655_v62  ;;  %v3668_v17 = vld [vmem:[#allocation2 + $0x60] sm:$0xff]  ;;  %v361_v10 = vadd.f32 %v3469_v12, %v322_v52  ;;  %vm392_vm3 = vcmp.ge.f32.partialorder %v360_v60, 0.0 }
  0x3e   : > { %2905 = vmatpush3.bf16.msra.mxu0 %v3328_v22  ;;  %v424_v11 = vmul.f32 0.01, %v360_v60  ;;  %v2708_v18 = vunpack.c.h.bf16 %v3618_v34  ;;  %v703_v13 = vsel %vm650_vm5, %v701_v2, %v702_v9  ;;  %v705_v19 = vsel %vm650_vm5, %v702_v9, %v704_v14  ;;  %v3680_v20 = vld [vmem:[#allocation2 + $0x68] sm:$0xff]  ;;  %v3682_v21 = vld [vmem:[#allocation2 + $0x70] sm:$0x3] }
  0x3f   : > { %2906 = vmatprep.subr.bf16.mxu0 %v3330_v31  ;;  %2793 = vmatpush3.bf16.msra.mxu1 %v3327_v29  ;;  %v666_v22 = vrot.slane %v3668_v17, 1  ;;  %v440_v23 = vsel %vm376_vm1, %v344_v50, %v408_v15  ;;  %v3690_v26 = vpack.c.bf16 %v705_v19, %v703_v13  ;;  %v667_v27 = vrot.slane %v3680_v20, 1  ;;  %v3339_v9 = vld [vmem:[%s4524_s3 + $0x50] sm:$0xff]  }
  0x40   : > { %2794 = vmatprep.subr.bf16.mxu1 %v3329_v39  ;;  %v669_v29 = vrot.slane %v3682_v21, 1  ;;  %v441_v31 = vsel %vm377_vm2, %v345_v51, %v409_v16  ;;  %527 = vst [vmem:[#allocation2 + $0x79] sm:$0xff] %v440_v23  ;;  %vm393_vm4 = vcmp.ge.f32.partialorder %v361_v10, 0.0  ;;  %v425_v38 = vmul.f32 0.01, %v361_v10  ;;  %v3729_v16 = vld [vmem:[%s3452_s29 + $0x70] sm:$0xff]  }
  0x41   : > { %v3695_v34 = vld [vmem:[#allocation2 + $0x120] sm:$0xff]  ;;  %528 = vst [vmem:[#allocation2 + $0x81] sm:$0xff] %v441_v31  ;;  %v456_v39 = vsel %vm392_vm3, %v360_v60, %v424_v11  ;;  %v307_v40 = vmul.f32 %v2707_v61, %v3461_v6  ;;  %3272 = vmatprep.mubr.bf16.mxu1 %v3690_v26  ;;  %v668_v41 = vsel %vm650_vm5, %v666_v22, %v667_v27  ;;  %v3702_v44 = vld [vmem:[#allocation2 + $0x128] sm:$0xff]  ;;  %v3704_v45 = vld [vmem:[#allocation2 + $0x130] sm:$0x3]  ;;  %v2739_v56 = vunpack.c.l.bf16 %v2761_v24 }
  0x42   : > { %2907 = vmatpush3.bf16.msra.mxu0 %v3332_v48  ;;  %v670_v43 = vsel %vm650_vm5, %v667_v27, %v669_v29  ;;  %v706_v46 = vrot.slane %v3695_v34, 1  ;;  %543 = vst [vmem:[#allocation2 + $0x139] sm:$0xff] %v456_v39  ;;  %v308_v47 = vmul.f32 %v2708_v18, %v3461_v6  ;;  %v3337_v48 = vld [vmem:[%s4524_s3 + $0x90] sm:$0xff]   ;;  %v707_v50 = vrot.slane %v3702_v44, 1  ;;  %v3341_v22 = vld [vmem:[%s4524_s3 + $0x88] sm:$0xff]  }
  0x43   : > { %2908 = vmatprep.subr.bf16.mxu0 %v3334_v54  ;;  %2795 = vmatpush3.bf16.msra.mxu1 %v3331_v58  ;;  %v3711_v49 = vpack.c.bf16 %v670_v43, %v668_v41  ;;  %v709_v51 = vrot.slane %v3704_v45, 1  ;;  %v457_v52 = vsel %vm393_vm4, %v361_v10, %v425_v38  ;;  %v346_v54 = vadd.f32 %v3469_v12, %v307_v40  ;;  %v3340_v60 = vld [vmem:[%s4524_s3 + $0xd0] sm:$0xff]  }
  0x44   : > { %2796 = vmatprep.subr.bf16.mxu1 %v3333_v3  ;;  %544 = vst [vmem:[#allocation2 + $0x141] sm:$0xff] %v457_v52  ;;  %v347_v55 = vadd.f32 %v3469_v12, %v308_v47  ;;  %v2740_v58 = vunpack.c.h.bf16 %v2761_v24  ;;  %v2754_v61 = vld [vmem:[%s3452_s29 + $0x30] sm:$0xff]   ;;  %v708_v2 = vsel %vm650_vm5, %v706_v46, %v707_v50  ;;  %v2743_v31 = vunpack.c.l.bf16 %v3729_v16  ;;  %v3342_v46 = vld [vmem:[%s4524_s3 + $0x108] sm:$0xff]  }
  0x45   : > { %3257 = vmatmul.mubr.bf16.gmra.mxu0 %v3711_v49  ;;  %v710_v3 = vsel %vm650_vm5, %v707_v50, %v709_v51  ;;  %v2711_v14 = vunpack.c.l.bf16 %v2754_v61  ;;  %v2712_v15 = vunpack.c.h.bf16 %v2754_v61  ;;  %vm378_vm6 = vcmp.ge.f32.partialorder %v346_v54, 0.0  ;;  %v3343_v52 = vld [vmem:[%s4524_s3 + $0x48] sm:$0xff]   ;;  %v2755_v61 = vld [vmem:[%s3452_s29 + $0x38] sm:$0xff]  }
  0x46   : > { %2909 = vmatpush3.bf16.msra.mxu0 %v3336_v59  ;;  %v3731_v10 = vpack.c.bf16 %v710_v3, %v708_v2  ;;  %vm379_vm7 = vcmp.ge.f32.partialorder %v347_v55, 0.0  ;;  %v410_v11 = vmul.f32 0.01, %v346_v54  ;;  %v411_v59 = vmul.f32 0.01, %v347_v55 }
  0x47   : > { %2910 = vmatprep.subr.bf16.mxu0 %v3338_v4  ;;  %2797 = vmatpush3.bf16.msra.mxu1 %v3335_v25  ;;  %v3733_v18 = vld [vmem:[#allocation2 + $0x78] sm:$0xff]  ;;  %v323_v4 = vmul.f32 %v2739_v56, %v3461_v6  ;;  %v324_v13 = vmul.f32 %v2740_v58, %v3461_v6  ;;  %v309_v19 = vmul.f32 %v2711_v14, %v3461_v6  ;;  %vm790_vm2 = vcmask 1045504  }
  0x48   : > { %2798 = vmatprep.subr.bf16.mxu1 %v3337_v48  ;;  %3273 = vmatmul.mubr.bf16.gmra.mxu1 %v3731_v10  ;;  %v3742_v23 = vld [vmem:[#allocation2 + $0x80] sm:$0xff]  ;;  %v3744_v24 = vld [vmem:[#allocation2 + $0x88] sm:$0x3]  ;;  %v671_v25 = vrot.slane %v3733_v18, 1  ;;  %v442_v27 = vsel %vm378_vm6, %v346_v54, %v410_v11  ;;  %v310_v29 = vmul.f32 %v2712_v15, %v3461_v6  ;;  %v443_v41 = vsel %vm379_vm7, %v347_v55, %v411_v59  ;;  %v3777_v14 = vld [vmem:[%s3452_s29 + $0x78] sm:$0xff]  }
  0x49   : > { %v672_v38 = vrot.slane %v3742_v23, 1  ;;  %v674_v39 = vrot.slane %v3744_v24, 1  ;;  %v3751_v40 = vld [vmem:[#allocation2 + $0x138] sm:$0xff]  ;;  %529 = vst [vmem:[#allocation2 + $0x91] sm:$0xff] %v442_v27  ;;  %v362_v43 = vadd.f32 %v3469_v12, %v323_v4  ;;  %530 = vst [vmem:[#allocation2 + $0x99] sm:$0xff] %v443_v41  ;;  %v363_v48 = vadd.f32 %v3469_v12, %v324_v13  ;;  %v3344_v15 = vld [vmem:[%s4524_s3 + $0xc8] sm:$0xff]  }
  0x4a   : > { %2911 = vmatpush3.bf16.msra.mxu0 %v3340_v60  ;;  %v711_v47 = vrot.slane %v3751_v40, 1  ;;  %v348_v50 = vadd.f32 %v3469_v12, %v309_v19  ;;  %v349_v51 = vadd.f32 %v3469_v12, %v310_v29  ;;  %v2744_v29 = vunpack.c.h.bf16 %v3729_v16 }
  0x4b   : > { %2799 = vmatpush3.bf16.msra.mxu1 %v3339_v9  ;;  %v673_v54 = vsel %vm650_vm5, %v671_v25, %v672_v38  ;;  %v675_v55 = vsel %vm650_vm5, %v672_v38, %v674_v39  ;;  %v3767_v56 = vld [vmem:[#allocation2 + $0x140] sm:$0xff]  ;;  %v3769_v58 = vld [vmem:[#allocation2 + $0x148] sm:$0x3]  ;;  %vm394_vm8 = vcmp.ge.f32.partialorder %v362_v43, 0.0  ;;  %v426_v60 = vmul.f32 0.01, %v362_v43  ;;  %2912 = vmatprep.subr.bf16.mxu0 %v3342_v46 }
  0x4c   : > { %2800 = vmatprep.subr.bf16.mxu1 %v3341_v22  ;;  %v3772_v2 = vpack.c.bf16 %v675_v55, %v673_v54  ;;  %v712_v3 = vrot.slane %v3767_v56, 1  ;;  %v714_v9 = vrot.slane %v3769_v58, 1  ;;  %vm395_vm9 = vcmp.ge.f32.partialorder %v363_v48, 0.0  ;;  %v3345_v39 = vld [vmem:[%s4524_s3 + $0x80] sm:$0xff]  }
  0x4d   : > { %v427_v11 = vmul.f32 0.01, %v363_v48  ;;  %v458_v59 = vsel %vm394_vm8, %v362_v43, %v426_v60  ;;  %vm380_vm10 = vcmp.ge.f32.partialorder %v348_v50, 0.0  ;;  %vm381_vm11 = vcmp.ge.f32.partialorder %v349_v51, 0.0 }
  0x4e   : > { %3260 = vmatprep.mubr.bf16.mxu0 %v3772_v2  ;;  %v713_v4 = vsel %vm650_vm5, %v711_v47, %v712_v3  ;;  %v715_v13 = vsel %vm650_vm5, %v712_v3, %v714_v9  ;;  %545 = vst [vmem:[#allocation2 + $0x151] sm:$0xff] %v458_v59  ;;  %v412_v19 = vmul.f32 0.01, %v348_v50  ;;  %v413_v22 = vmul.f32 0.01, %v349_v51  ;;  %2913 = vmatpush3.bf16.msra.mxu0 %v3344_v15  ;;  %v3347_v15 = vld [vmem:[%s4524_s3 + $0x40] sm:$0xff]  }
  0x4f   : > { %2801 = vmatpush3.bf16.msra.mxu1 %v3343_v52  ;;  %v3785_v25 = vpack.c.bf16 %v715_v13, %v713_v4  ;;  %v459_v27 = vsel %vm395_vm9, %v363_v48, %v427_v11  ;;  %v325_v38 = vmul.f32 %v2743_v31, %v3461_v6  ;;  %v2715_v47 = vunpack.c.l.bf16 %v2755_v61  ;;  %v3346_v48 = vld [vmem:[%s4524_s3 + $0x100] sm:$0xff]  }
  0x50   : > { %v3793_v41 = vld [vmem:[#allocation2 + $0x90] sm:$0xff]  ;;  %546 = vst [vmem:[#allocation2 + $0x159] sm:$0xff] %v459_v27  ;;  %v444_v43 = vsel %vm380_vm10, %v348_v50, %v412_v19  ;;  %v445_v46 = vsel %vm381_vm11, %v349_v51, %v413_v22  ;;  %v2716_v52 = vunpack.c.h.bf16 %v2755_v61  ;;  %v3801_v16 = vld [vmem:[#allocation2 + $0x98] sm:$0xff]  ;;  %v3803_v31 = vld [vmem:[#allocation2 + $0xa0] sm:$0x3]  ;;  %v326_v50 = vmul.f32 %v2744_v29, %v3461_v6  ;;  %2802 = vmatprep.subr.bf16.mxu1 %v3345_v39 }
  0x51   : > { %4531 = vst [vmem:[#allocation3_spill] sm:$0xff] %v3785_v25  ;;  %3276 = vmatprep.mubr.bf16.mxu1 %v3785_v25  ;;  %v676_v54 = vrot.slane %v3793_v41, 1  ;;  %531 = vst [vmem:[#allocation2 + $0xa9] sm:$0xff] %v444_v43  ;;  %v364_v51 = vadd.f32 %v3469_v12, %v325_v38  ;;  %v2747_v55 = vunpack.c.l.bf16 %v3777_v14  ;;  %v677_v60 = vrot.slane %v3801_v16, 1  ;;  %2914 = vmatprep.subr.bf16.mxu0 %v3346_v48  ;;  %v3348_v11 = vld [vmem:[%s4524_s3 + $0xc0] sm:$0xff]   ;;  %v3349_v19 = vld [vmem:[%s4524_s3 + $0x1b8] sm:$0xff]  }
  0x52   : > { %532 = vst [vmem:[#allocation2 + $0xb1] sm:$0xff] %v445_v46  ;;  %v679_v61 = vrot.slane %v3803_v31, 1  ;;  %v311_v3 = vmul.f32 %v2715_v47, %v3461_v6  ;;  %v312_v9 = vmul.f32 %v2716_v52, %v3461_v6  ;;  %v365_v59 = vadd.f32 %v3469_v12, %v326_v50  ;;  %2915 = vmatpush3.bf16.msra.mxu0 %v3348_v11 }
  0x53   : > { %vm396_vm12 = vcmp.ge.f32.partialorder %v364_v51, 0.0  ;;  %v428_v4 = vmul.f32 0.01, %v364_v51  ;;  %v2748_v13 = vunpack.c.h.bf16 %v3777_v14  ;;  %v678_v22 = vsel %vm650_vm5, %v676_v54, %v677_v60  ;;  %2803 = vmatpush3.bf16.msra.mxu1 %v3347_v15 }
  0x54   : > { %v680_v27 = vsel %vm650_vm5, %v677_v60, %v679_v61  ;;  %v350_v29 = vadd.f32 %v3469_v12, %v311_v3  ;;  %v351_v38 = vadd.f32 %v3469_v12, %v312_v9  ;;  %vm397_vm13 = vcmp.ge.f32.partialorder %v365_v59, 0.0  ;;  %3012 = vmatprep.subr.bf16.mxu1 %v3349_v19  ;;  %v3351_v61 = vld [vmem:[%s4524_s3 + $0x238] sm:$0xff]  }
  0x55   : > { %v3828_v39 = vpack.c.bf16 %v680_v27, %v678_v22  ;;  %v3830_v43 = vld [vmem:[#allocation2 + $0x150] sm:$0xff]  ;;  %v429_v46 = vmul.f32 0.01, %v365_v59  ;;  %v460_v14 = vsel %vm396_vm12, %v364_v51, %v428_v4  ;;  %v327_v60 = vmul.f32 %v2747_v55, %v3461_v6  ;;  %3124 = vmatprep.subr.bf16.mxu0 %v3351_v61 }
  0x56   : > { %v716_v47 = vrot.slane %v3830_v43, 1  ;;  %547 = vst [vmem:[#allocation2 + $0x169] sm:$0xff] %v460_v14  ;;  %vm382_vm14 = vcmp.ge.f32.partialorder %v350_v29, 0.0  ;;  %vm383_vm15 = vcmp.ge.f32.partialorder %v351_v38, 0.0  ;;  %v414_v52 = vmul.f32 0.01, %v350_v29 }
  0x57   : > { %3261 = vmatmul.mubr.bf16.gmra.mxu0 %v3828_v39  ;;  %v3834_v48 = vld [vmem:[#allocation2 + $0x158] sm:$0xff]  ;;  %v3836_v12 = vld [vmem:[#allocation2 + $0x160] sm:$0x3]  ;;  %v461_v54 = vsel %vm397_vm13, %v365_v59, %v429_v46  ;;  %v415_v50 = vmul.f32 0.01, %v351_v38  ;;  %v328_v51 = vmul.f32 %v2748_v13, %v3461_v6 }
  0x58   : > { %v717_v3 = vrot.slane %v3834_v48, 1  ;;  %v719_v9 = vrot.slane %v3836_v12, 1  ;;  %v3845_v15 = vld [vmem:[#allocation2 + $0xa8] sm:$0xff]  ;;  %548 = vst [vmem:[#allocation2 + $0x171] sm:$0xff] %v461_v54  ;;  %v446_v59 = vsel %vm382_vm14, %v350_v29, %v414_v52  ;;  %v3381_v46 = vld [vmem:[%s4523_s2] ss:$0 sm:$0xff] }
  0x59   : > { %v3847_v11 = vld [vmem:[#allocation2 + $0xb0] sm:$0xff]  ;;  %v3849_v4 = vld [vmem:[#allocation2 + $0xb8] sm:$0x3]  ;;  %v681_v55 = vrot.slane %v3845_v15, 1  ;;  %v447_v19 = vsel %vm383_vm15, %v351_v38, %v415_v50  ;;  %533 = vst [vmem:[#allocation2 + $0xc1] sm:$0xff] %v446_v59  ;;  %v366_v29 = vadd.f32 %v3381_v46, %v327_v60  ;;  %v367_v14 = vadd.f32 %v3381_v46, %v328_v51 }
  0x5a   : > { %v682_v6 = vrot.slane %v3847_v11, 1  ;;  %v684_v13 = vrot.slane %v3849_v4, 1  ;;  %v718_v22 = vsel %vm650_vm5, %v716_v47, %v717_v3  ;;  %v720_v27 = vsel %vm650_vm5, %v717_v3, %v719_v9  ;;  %534 = vst [vmem:[#allocation2 + $0xc9] sm:$0xff] %v447_v19 }
  0x5b   : > { %v3861_v52 = vpack.c.bf16 %v720_v27, %v718_v22  ;;  %vm398_vm0 = vcmp.ge.f32.partialorder %v366_v29, 0.0  ;;  %vm399_vm1 = vcmp.ge.f32.partialorder %v367_v14, 0.0  ;;  %v430_v47 = vmul.f32 0.01, %v366_v29 }
  0x5c   : > { %v683_v54 = vsel %vm650_vm5, %v681_v55, %v682_v6  ;;  %v685_v25 = vsel %vm650_vm5, %v682_v6, %v684_v13  ;;  %v431_v61 = vmul.f32 0.01, %v367_v14  ;;  %v791_v60 = vrot.slane %v3510_v5, 2 }
  0x5d   : > { %4532 = vst [vmem:[#allocation4_spill] sm:$0xff] %v3861_v52  ;;  %v3865_v38 = vpack.c.bf16 %v685_v25, %v683_v54  ;;  %3277 = vmatmul.mubr.bf16.gmra.mxu1 %v3861_v52  ;;  %v3868_v50 = vld [vmem:[#allocation2 + $0x168] sm:$0xff]  ;;  %v796_v51 = vrot.slane %v3532_v28, 2  ;;  %v462_v9 = vsel %vm398_vm0, %v366_v29, %v430_v47  ;;  %v797_v25 = vrot.slane %v3540_v32, 2 }
  0x5e   : > { %v721_v3 = vrot.slane %v3868_v50, 1  ;;  %v799_v59 = vrot.slane %v3542_v33, 2  ;;  %v463_v13 = vsel %vm399_vm1, %v367_v14, %v431_v61  ;;  %549 = vst [vmem:[#allocation2 + $0x181] sm:$0xff] %v462_v9  ;;  %v792_v19 = vrot.slane %v3512_v7, 2 }
  0x5f   : > { %3264 = vmatprep.mubr.bf16.mxu0 %v3865_v38  ;;  %v3876_v55 = vld [vmem:[#allocation2 + $0x170] sm:$0xff]  ;;  %v3878_v6 = vld [vmem:[#allocation2 + $0x178] sm:$0x3]  ;;  %v801_v5 = vrot.slane %v3620_v35, 2  ;;  %v802_v28 = vrot.slane %v3622_v36, 2  ;;  %550 = vst [vmem:[#allocation2 + $0x189] sm:$0xff] %v463_v13  ;;  %v798_v33 = vsel %vm790_vm2, %v796_v51, %v797_v25 }
  0x60   : > { %v722_v22 = vrot.slane %v3876_v55, 1  ;;  %v724_v27 = vrot.slane %v3878_v6, 1  ;;  %v3885_v46 = vld [vmem:[#allocation2 + $0xc0] sm:$0xff]  ;;  %v794_v32 = vrot.slane %v3514_v8, 2  ;;  %v800_v35 = vsel %vm790_vm2, %v797_v25, %v799_v59 }
  0x61   : > { %v3889_v29 = vld [vmem:[#allocation2 + $0xc8] sm:$0xff]  ;;  %v3891_v14 = vld [vmem:[#allocation2 + $0xd0] sm:$0x3]  ;;  %v686_v7 = vrot.slane %v3885_v46, 1  ;;  %v803_v36 = vsel %vm790_vm2, %v801_v5, %v802_v28  ;;  %v804_v54 = vrot.slane %v3624_v37, 2  ;;  %v3903_v13 = vpack.c.bf16 %v800_v35, %v798_v33 }
  0x62   : > { %v723_v47 = vsel %vm650_vm5, %v721_v3, %v722_v22  ;;  %v725_v61 = vsel %vm650_vm5, %v722_v22, %v724_v27  ;;  %v687_v8 = vrot.slane %v3889_v29, 1  ;;  %v689_v51 = vrot.slane %v3891_v14, 1 }
  0x63   : > { %v3901_v9 = vpack.c.bf16 %v725_v61, %v723_v47  ;;  %v805_v52 = vsel %vm790_vm2, %v802_v28, %v804_v54  ;;  %v806_v25 = vrot.slane %v3668_v17, 2  ;;  %v807_v3 = vrot.slane %v3680_v20, 2 }
  0x64   : > { %v688_v59 = vsel %vm650_vm5, %v686_v7, %v687_v8  ;;  %v690_v37 = vsel %vm650_vm5, %v687_v8, %v689_v51  ;;  %v3909_v5 = vpack.c.bf16 %v805_v52, %v803_v36  ;;  %v809_v27 = vrot.slane %v3682_v21, 2 }
  0x65   : > { %3280 = vmatprep.mubr.bf16.mxu1 %v3901_v9  ;;  %v3913_v22 = vpack.c.bf16 %v690_v37, %v688_v59  ;;  %v811_v33 = vrot.slane %v3733_v18, 2  ;;  %v812_v28 = vrot.slane %v3742_v23, 2  ;;  %v3918_v35 = vld [vmem:[#allocation2 + $0x180] sm:$0xff]  ;;  %v793_v17 = vsel %vm790_vm2, %v791_v60, %v792_v19 }
  0x66   : > { %v795_v7 = vsel %vm790_vm2, %v792_v19, %v794_v32  ;;  %v808_v52 = vsel %vm790_vm2, %v806_v25, %v807_v3  ;;  %v814_v20 = vrot.slane %v3744_v24, 2  ;;  %v3925_v36 = vld [vmem:[#allocation2 + $0x188] sm:$0xff]  ;;  %v3927_v54 = vld [vmem:[#allocation2 + $0x190] sm:$0x3]  ;;  %v726_v21 = vrot.slane %v3918_v35, 1 }
  0x67   : > { %3265 = vmatmul.mubr.bf16.gmra.mxu0 %v3913_v22  ;;  %v810_v18 = vsel %vm790_vm2, %v807_v3, %v809_v27  ;;  %v813_v23 = vsel %vm790_vm2, %v811_v33, %v812_v28  ;;  %v727_v60 = vrot.slane %v3925_v36, 1  ;;  %v729_v19 = vrot.slane %v3927_v54, 1  ;;  %v3352_v27 = vld [vmem:[%s4524_s3 + $0x1f8] sm:$0xff]  }
  0x68   : > { %1608 = vmatprep.mubr.bf16.mxu0 %v3564_v53  ;;  %v3935_v32 = vpack.c.bf16 %v810_v18, %v808_v52  ;;  %v815_v24 = vsel %vm790_vm2, %v812_v28, %v814_v20  ;;  %v3938_v47 = vpack.c.bf16 %v795_v7, %v793_v17  ;;  %v821_v25 = vrot.slane %v3845_v15, 2  ;;  %v3355_v28 = vld [vmem:[%s4524_s3 + $0x230] sm:$0xff]   ;;  %v3359_v17 = vld [vmem:[%s4524_s3 + $0x228] sm:$0xff]   ;;  %v3350_v20 = vld [vmem:[%s4524_s3 + $0x178] sm:$0xff]  }
  0x69   : > { %v3940_v61 = vpack.c.bf16 %v815_v24, %v813_v23  ;;  %v728_v8 = vsel %vm650_vm5, %v726_v21, %v727_v60  ;;  %v730_v51 = vsel %vm650_vm5, %v727_v60, %v729_v19  ;;  %v822_v59 = vrot.slane %v3847_v11, 2  ;;  %v3353_v18 = vld [vmem:[%s4524_s3 + $0x1b0] sm:$0xff]  }
  0x6a   : > { %v3946_v37 = vpack.c.bf16 %v730_v51, %v728_v8  ;;  %v824_v3 = vrot.slane %v3849_v4, 2  ;;  %v3356_v4 = vld [vmem:[%s4524_s3 + $0x1f0] sm:$0xff]   ;;  %v841_v7 = vrot.slane %v3648_v57, 2  ;;  %v842_v52 = vrot.slane %v3657_v0, 2  ;;  %v3360_v0 = vld [vmem:[%s4524_s3 + $0x1e8] sm:$0xff]  }
  0x6b   : > { %v823_v33 = vsel %vm790_vm2, %v821_v25, %v822_v59  ;;  %v844_v21 = vrot.slane %v3659_v1, 2  ;;  %v846_v60 = vrot.slane %v3695_v34, 2  ;;  %v3354_v57 = vld [vmem:[%s4524_s3 + $0x170] sm:$0xff]   ;;  %v847_v1 = vrot.slane %v3702_v44, 2  ;;  %v3363_v34 = vld [vmem:[%s4524_s3 + $0x220] sm:$0xff]   ;;  %v3357_v51 = vld [vmem:[%s4524_s3 + $0x1a8] sm:$0xff]  }
  0x6c   : > { %3281 = vmatmul.mubr.bf16.gmra.mxu1 %v3946_v37  ;;  %v825_v15 = vsel %vm790_vm2, %v822_v59, %v824_v3  ;;  %v843_v23 = vsel %vm790_vm2, %v841_v7, %v842_v52  ;;  %v849_v8 = vrot.slane %v3704_v45, 2  ;;  %v851_v25 = vrot.slane %v3751_v40, 2  ;;  %v3361_v7 = vld [vmem:[%s4524_s3 + $0x1a0] sm:$0xff]  }
  0x6d   : > { %1319 = vmatprep.mubr.bf16.mxu1 %v3938_v47  ;;  %v3959_v11 = vpack.c.bf16 %v825_v15, %v823_v33  ;;  %v845_v19 = vsel %vm790_vm2, %v842_v52, %v844_v21  ;;  %v848_v44 = vsel %vm790_vm2, %v846_v60, %v847_v1  ;;  %v852_v59 = vrot.slane %v3767_v56, 2 }
  0x6e   : > { %v3992_v24 = vpack.c.bf16 %v845_v19, %v843_v23  ;;  %v854_v3 = vrot.slane %v3769_v58, 2  ;;  %v850_v45 = vsel %vm790_vm2, %v847_v1, %v849_v8  ;;  %v856_v58 = vrot.slane %v3830_v43, 2  ;;  %v3365_v1 = vld [vmem:[%s4524_s3 + $0x198] sm:$0xff]  }
  0x6f   : > { %1609 = vmatmul.mubr.bf16.vlgmr.msra.gmra.mxu0 %v3537_v30  ;;  %v4009_v33 = vpack.c.bf16 %v850_v45, %v848_v44  ;;  %v853_v40 = vsel %vm790_vm2, %v851_v25, %v852_v59  ;;  %v859_v43 = vrot.slane %v3836_v12, 2  ;;  %v861_v52 = vrot.slane %v3868_v50, 2  ;;  %v3366_v44 = vld [vmem:[%s4524_s3 + $0x158] sm:$0xff]   ;;  %v3369_v25 = vld [vmem:[%s4524_s3 + $0x190] sm:$0xff]  }
  0x70   : > { %3125 = vmatpush3.bf16.msra.mxu0 %v3352_v27  ;;  %1616 = vmatprep.mubr.bf16.mxu0 %v3655_v62  ;;  %v3364_v27 = vld [vmem:[%s4524_s3 + $0x1e0] sm:$0xff]   ;;  %v855_v56 = vsel %vm790_vm2, %v852_v59, %v854_v3  ;;  %v864_v21 = vrot.slane %v3878_v6, 2  ;;  %v866_v50 = vrot.slane %v3918_v35, 2  ;;  %v869_v19 = vrot.slane %v3927_v54, 2  ;;  %v3375_v54 = vld [vmem:[%s4524_s3 + $0x208] sm:$0xff]   ;;  %v3370_v45 = vld [vmem:[%s4524_s3 + $0x150] sm:$0xff]  }
  0x71   : > { %3126 = vmatprep.subr.bf16.mxu0 %v3355_v28  ;;  %v3367_v28 = vld [vmem:[%s4524_s3 + $0x218] sm:$0xff]   ;;  %v4017_v15 = vpack.c.bf16 %v855_v56, %v853_v40  ;;  %v3362_v35 = vld [vmem:[%s4524_s3 + $0x160] sm:$0xff]   ;;  %v3376_v59 = vld [vmem:[%s4524_s3 + $0x1c8] sm:$0xff]  }
  0x72   : > { %v3379_v3 = vld [vmem:[%s4524_s3 + $0x200] sm:$0xff]   ;;  %v3374_v56 = vld [vmem:[%s4524_s3 + $0x148] sm:$0xff]  }
  0x73   : > { %v3380_v40 = vld [vmem:[%s4524_s3 + $0x1c0] sm:$0xff]  }
  0x74   : > { %3127 = vmatpush3.bf16.msra.mxu0 %v3356_v4  ;;  %1320 = vmatmul.mubr.bf16.vlgmr.msra.gmra.mxu1 %v3537_v30  ;;  %v857_v4 = vrot.slane %v3834_v48, 2 }
  0x75   : > { %3128 = vmatprep.subr.bf16.mxu0 %v3359_v17  ;;  %3013 = vmatpush3.bf16.msra.mxu1 %v3350_v20  ;;  %v3358_v17 = vld [vmem:[%s4524_s3 + $0x168] sm:$0xff]   ;;  %v862_v20 = vrot.slane %v3876_v55, 2  ;;  %v3371_v55 = vld [vmem:[%s4524_s3 + $0x210] sm:$0xff]  }
  0x76   : > { %1327 = vmatprep.mubr.bf16.mxu1 %v3903_v13  ;;  %3014 = vmatprep.subr.bf16.mxu1 %v3353_v18  ;;  %v858_v48 = vsel %vm790_vm2, %v856_v58, %v857_v4  ;;  %v3368_v18 = vld [vmem:[%s4524_s3 + $0x1d8] sm:$0xff]   ;;  %v860_v23 = vsel %vm790_vm2, %v857_v4, %v859_v43  ;;  %v816_v58 = vrot.slane %v3793_v41, 2  ;;  %v819_v4 = vrot.slane %v3803_v31, 2 }
  0x77   : > { %1617 = vmatmul.mubr.bf16.gmra.mxu0 %v3564_v53  ;;  %v863_v60 = vsel %vm790_vm2, %v861_v52, %v862_v20  ;;  %v865_v12 = vsel %vm790_vm2, %v862_v20, %v864_v21  ;;  %v4042_v6 = vpack.c.bf16 %v860_v23, %v858_v48  ;;  %v826_v43 = vrot.slane %v3885_v46, 2  ;;  %v3382_v23 = vld [vmem:[#allocation2 + $0xd8] sm:$0xff] }
  0x78   : > { %1624 = vmatprep.mubr.bf16.mxu0 %v3711_v49  ;;  %3129 = vmatpush3.bf16.msra.mxu0 %v3360_v0  ;;  %v867_v0 = vrot.slane %v3925_v36, 2  ;;  %v3372_v36 = vld [vmem:[%s4524_s3 + $0x1d0] sm:$0xff]   ;;  %v827_v52 = vrot.slane %v3889_v29, 2  ;;  %v829_v20 = vrot.slane %v3891_v14, 2  ;;  %v831_v46 = vrot.slane %v3382_v23, 2 }
  0x79   : > { %3130 = vmatprep.subr.bf16.mxu0 %v3363_v34  ;;  %3015 = vmatpush3.bf16.msra.mxu1 %v3354_v57  ;;  %v4044_v57 = vpack.c.bf16 %v865_v12, %v863_v60  ;;  %v3383_v60 = vld [vmem:[#allocation2 + $0xe0] sm:$0xff]  ;;  %v3384_v12 = vld [vmem:[#allocation2 + $0xe8] sm:$0x3] }
  0x7a   : > { %3016 = vmatprep.subr.bf16.mxu1 %v3357_v51  ;;  %v868_v34 = vsel %vm790_vm2, %v866_v50, %v867_v0  ;;  %v870_v8 = vsel %vm790_vm2, %v867_v0, %v869_v19  ;;  %v828_v21 = vsel %vm790_vm2, %v826_v43, %v827_v52  ;;  %v830_v48 = vsel %vm790_vm2, %v827_v52, %v829_v20 }
  0x7b   : > { %v4065_v51 = vpack.c.bf16 %v870_v8, %v868_v34  ;;  %v832_v29 = vrot.slane %v3383_v60, 2  ;;  %v834_v14 = vrot.slane %v3384_v12, 2 }
  0x7c   : > { %3131 = vmatpush3.bf16.msra.mxu0 %v3364_v27  ;;  %1328 = vmatmul.mubr.bf16.gmra.mxu1 %v3564_v53  ;;  %v3373_v27 = vld [vmem:[%s4524_s3 + $0x188] sm:$0xff]  }
  0x7d   : > { %3132 = vmatprep.subr.bf16.mxu0 %v3367_v28  ;;  %1335 = vmatprep.mubr.bf16.mxu1 %v3909_v5  ;;  %v817_v28 = vrot.slane %v3801_v16, 2  ;;  %v833_v50 = vsel %vm790_vm2, %v831_v46, %v832_v29 }
  0x7e   : > { %3017 = vmatpush3.bf16.msra.mxu1 %v3358_v17  ;;  %v3377_v17 = vld [vmem:[%s4524_s3 + $0x180] sm:$0xff]  }
  0x7f   : > { %1625 = vmatmul.mubr.bf16.gmra.mxu0 %v3655_v62  ;;  %3018 = vmatprep.subr.bf16.mxu1 %v3361_v7  ;;  %v3378_v7 = vld [vmem:[%s4524_s3 + $0x140] sm:$0xff]   ;;  %v818_v41 = vsel %vm790_vm2, %v816_v58, %v817_v28  ;;  %v820_v16 = vsel %vm790_vm2, %v817_v28, %v819_v4 }
  0x80   : > { %1632 = vmatprep.mubr.bf16.mxu0 %v3772_v2  ;;  %3133 = vmatpush3.bf16.msra.mxu0 %v3368_v18  ;;  %v4110_v31 = vpack.c.bf16 %v820_v16, %v818_v41  ;;  %v4125_v18 = vpack.c.bf16 %v830_v48, %v828_v21 }
  0x81   : > { %3134 = vmatprep.subr.bf16.mxu0 %v3371_v55  ;;  %v835_v55 = vsel %vm790_vm2, %v832_v29, %v834_v14 }
  0x82   : > { %3019 = vmatpush3.bf16.msra.mxu1 %v3362_v35  ;;  %v4133_v0 = vpack.c.bf16 %v835_v55, %v833_v50  ;;  %v3385_v35 = vld [vmem:[#allocation2 + $0xf0] sm:$0xff] }
  0x83   : > { %3020 = vmatprep.subr.bf16.mxu1 %v3365_v1  ;;  %v836_v19 = vrot.slane %v3385_v35, 2  ;;  %v3386_v1 = vld [vmem:[#allocation2 + $0xf8] sm:$0xff] }
  0x84   : > { %3135 = vmatpush3.bf16.msra.mxu0 %v3372_v36  ;;  %1336 = vmatmul.mubr.bf16.gmra.mxu1 %v3655_v62  ;;  %v837_v34 = vrot.slane %v3386_v1, 2  ;;  %v3387_v36 = vld [vmem:[#allocation2 + $0x100] sm:$0x3] }
  0x85   : > { %3136 = vmatprep.subr.bf16.mxu0 %v3375_v54  ;;  %1343 = vmatprep.mubr.bf16.mxu1 %v3935_v32  ;;  %v839_v8 = vrot.slane %v3387_v36, 2 }
  0x86   : > { %3021 = vmatpush3.bf16.msra.mxu1 %v3366_v44  ;;  %v838_v54 = vsel %vm790_vm2, %v836_v19, %v837_v34 }
  0x87   : > { %1633 = vmatmul.mubr.bf16.gmra.mxu0 %v3711_v49  ;;  %3022 = vmatprep.subr.bf16.mxu1 %v3369_v25  ;;  %v840_v44 = vsel %vm790_vm2, %v837_v34, %v839_v8 }
  0x88   : > { %1640 = vmatprep.mubr.bf16.mxu0 %v3828_v39  ;;  %3137 = vmatpush3.bf16.msra.mxu0 %v3376_v59  ;;  %v4141_v25 = vpack.c.bf16 %v840_v44, %v838_v54  ;;  %v4533_v59 = vld [vmem:[#allocation3_spill] sm:$0xff] }
  0x89   : > { %3138 = vmatprep.subr.bf16.mxu0 %v3379_v3  ;;  %v4534_v3 = vld [vmem:[#allocation4_spill] sm:$0xff] }
  0x8a   : > { %3023 = vmatpush3.bf16.msra.mxu1 %v3370_v45  ;;  %v4159_v45 = vld [vmem:[#allocation2 + $0x1a8] sm:$0x3] }
  0x8b   : > { %3024 = vmatprep.subr.bf16.mxu1 %v3373_v27  ;;  %v4162_v27 = vld [vmem:[#allocation2] sm:$0xff] }
  0x8c   : > { %3139 = vmatpush3.bf16.msra.mxu0 %v3380_v40  ;;  %1344 = vmatmul.mubr.bf16.gmra.mxu1 %v3711_v49  ;;  %v782_v40 = vrot.slane %v4162_v27, 1 }
  0x8d   : > { %1351 = vmatprep.mubr.bf16.mxu1 %v3940_v61 }
  0x8e   : > { %3025 = vmatpush3.bf16.msra.mxu1 %v3374_v56  ;;  %v785_v56 = vrot.slane %v4159_v45, 1 }
  0x8f   : > { %1641 = vmatmul.mubr.bf16.gmra.mxu0 %v3772_v2  ;;  %3026 = vmatprep.subr.bf16.mxu1 %v3377_v17  ;;  %v4188_v17 = vld [vmem:[%s4525_s4] ss:$0 sm:$0xff] }
  0x90   : > { %1648 = vmatprep.mubr.bf16.mxu0 %v3865_v38  ;;  %v786_v58 = vsel %vm650_vm5, %v782_v40, %v785_v56 }
  0x91   : > { %v4170_v28 = vpack.c.bf16 %v786_v58, %v782_v40 }
  0x92   : > { %3027 = vmatpush3.bf16.msra.mxu1 %v3378_v7 }
  0x94   : > { %1352 = vmatmul.mubr.bf16.gmra.mxu1 %v3772_v2 }
  0x95   : > { %1359 = vmatprep.mubr.bf16.mxu1 %v4110_v31 }
  0x97   : > { %1649 = vmatmul.mubr.bf16.gmra.mxu0 %v3828_v39 }
  0x98   : > { %1656 = vmatprep.mubr.bf16.mxu0 %v3913_v22 }
  0x9c   : > { %1360 = vmatmul.mubr.bf16.gmra.mxu1 %v3828_v39 }
  0x9d   : > { %1367 = vmatprep.mubr.bf16.mxu1 %v3959_v11 }
  0x9f   : > { %1657 = vmatmul.mubr.bf16.gmra.mxu0 %v3865_v38 }
  0xa0   : > { %1664 = vmatprep.mubr.bf16.mxu0 %v3554_v42 }
  0xa4   : > { %1368 = vmatmul.mubr.bf16.gmra.mxu1 %v3865_v38 }
  0xa5   : > { %1375 = vmatprep.mubr.bf16.mxu1 %v4125_v18 }
  0xa7   : > { %1665 = vmatmul.mubr.bf16.gmra.mxu0 %v3913_v22 }
  0xa8   : > { %1672 = vmatprep.mubr.bf16.mxu0 %v3580_v63 }
  0xac   : > { %1376 = vmatmul.mubr.bf16.gmra.mxu1 %v3913_v22 }
  0xad   : > { %1383 = vmatprep.mubr.bf16.mxu1 %v4133_v0 }
  0xaf   : > { %1673 = vmatmul.mubr.bf16.gmra.mxu0 %v3554_v42 }
  0xb0   : > { %1680 = vmatprep.mubr.bf16.mxu0 %v3690_v26 }
  0xb4   : > { %1384 = vmatmul.mubr.bf16.gmra.mxu1 %v3554_v42 }
  0xb5   : > { %1391 = vmatprep.mubr.bf16.mxu1 %v4141_v25 }
  0xb7   : > { %1681 = vmatmul.mubr.bf16.gmra.mxu0 %v3580_v63 }
  0xb8   : > { %1688 = vmatprep.mubr.bf16.mxu0 %v3731_v10 }
  0xbc   : > { %1392 = vmatmul.mubr.bf16.gmra.mxu1 %v3580_v63 }
  0xbd   : > { %1399 = vmatprep.mubr.bf16.mxu1 %v3992_v24 }
  0xbf   : > { %1689 = vmatmul.mubr.bf16.gmra.mxu0 %v3690_v26 }
  0xc0   : > { %1696 = vmatprep.mubr.bf16.mxu0 %v4533_v59 }
  0xc4   : > { %1400 = vmatmul.mubr.bf16.gmra.mxu1 %v3690_v26 }
  0xc5   : > { %1407 = vmatprep.mubr.bf16.mxu1 %v4009_v33 }
  0xc7   : > { %1697 = vmatmul.mubr.bf16.gmra.mxu0 %v3731_v10 }
  0xc8   : > { %1704 = vmatprep.mubr.bf16.mxu0 %v4534_v3 }
  0xcc   : > { %1408 = vmatmul.mubr.bf16.gmra.mxu1 %v3731_v10 }
  0xcd   : > { %1415 = vmatprep.mubr.bf16.mxu1 %v4017_v15 }
  0xcf   : > { %1705 = vmatmul.mubr.bf16.gmra.mxu0 %v4533_v59 }
  0xd0   : > { %1712 = vmatprep.mubr.bf16.mxu0 %v3901_v9 }
  0xd4   : > { %1416 = vmatmul.mubr.bf16.gmra.mxu1 %v4533_v59 }
  0xd5   : > { %1423 = vmatprep.mubr.bf16.mxu1 %v4042_v6 }
  0xd7   : > { %1713 = vmatmul.mubr.bf16.gmra.mxu0 %v4534_v3 }
  0xd8   : > { %1720 = vmatprep.mubr.bf16.mxu0 %v3946_v37 }
  0xdc   : > { %1424 = vmatmul.mubr.bf16.gmra.mxu1 %v4534_v3 }
  0xdd   : > { %1431 = vmatprep.mubr.bf16.mxu1 %v4044_v57 }
  0xdf   : > { %1721 = vmatmul.mubr.bf16.gmra.mxu0 %v3901_v9 }
  0xe0   : > { %1728 = vmatprep.mubr.bf16.mxu0 %v4170_v28 }
  0xe4   : > { %1432 = vmatmul.mubr.bf16.gmra.mxu1 %v3901_v9 }
  0xe5   : > { %1439 = vmatprep.mubr.bf16.mxu1 %v4065_v51 }
  0xe7   : > { %1729 = vmatmul.mubr.bf16.gmra.mxu0 %v3946_v37 }
  0xe8   : > { %2186 = vmatprep.mubr.bf16.mxu0 %v3903_v13 }
  0xec   : > { %1440 = vmatmul.mubr.bf16.gmra.mxu1 %v3946_v37 }
  0xed   : > { %2025 = vmatprep.mubr.bf16.mxu1 %v3938_v47 }
  0xef   : > { %2187 = vmatmul.mubr.bf16.vlgmr.msra.gmra.mxu0 %v3564_v53 }
  0xf0   : > { %2194 = vmatprep.mubr.bf16.mxu0 %v3909_v5 }
  0xf4   : > { %2026 = vmatmul.mubr.bf16.vlgmr.msra.gmra.mxu1 %v3537_v30 }
  0xf5   : > { %v3254_v4 = vpop.f32.mrf.mxu0  ;;  %2033 = vmatprep.mubr.bf16.mxu1 %v3903_v13 }
  0xf6   : > { %v1041_v7 = vadd.f32 %v3254_v4, %v4188_v17  ;;  %v3270_v47 = vpop.f32.mrf.mxu1 }
  0xf7   : > { %v1032_v41 = vpop.f32.mrf.mxu0  ;;  %v1105_v16 = vadd.f32 %v3270_v47, %v4188_v17  ;;  %2195 = vmatmul.mubr.bf16.gmra.mxu0 %v3655_v62 }
  0xf8   : > { %2317 = vst [vmem:[%s4194_s20 + $0x10] sm:$0xff] %v1041_v7  ;;  %v1033_v43 = vadd.f32 %v4188_v17, %v1032_v41  ;;  %v1096_v52 = vpop.f32.mrf.mxu1  ;;  %2202 = vmatprep.mubr.bf16.mxu0 %v3935_v32 }
  0xf9   : > { %v3255_v20 = vpop.f32.mrf.mxu0  ;;  %2333 = vst [vmem:[%s4194_s20 + $0x90] sm:$0xff] %v1105_v16  ;;  %v1097_v21 = vadd.f32 %v4188_v17, %v1096_v52 }
  0xfa   : > { %2315 = vst [vmem:[%s4194_s20] sm:$0xff] %v1033_v43  ;;  %v1044_v30 = vadd.f32 %v3255_v20, %v4188_v17  ;;  %v3271_v48 = vpop.f32.mrf.mxu1 }
  0xfb   : > { %v1035_v23 = vpop.f32.mrf.mxu0  ;;  %2331 = vst [vmem:[%s4194_s20 + $0x80] sm:$0xff] %v1097_v21  ;;  %v1108_v13 = vadd.f32 %v3271_v48, %v4188_v17 }
  0xfc   : > { %2318 = vst [vmem:[%s4194_s20 + $0x18] sm:$0xff] %v1044_v30  ;;  %v1036_v46 = vadd.f32 %v4188_v17, %v1035_v23  ;;  %v1099_v60 = vpop.f32.mrf.mxu1  ;;  %2034 = vmatmul.mubr.bf16.gmra.mxu1 %v3564_v53 }
  0xfd   : > { %2334 = vst [vmem:[%s4194_s20 + $0x98] sm:$0xff] %v1108_v13  ;;  %v1100_v29 = vadd.f32 %v4188_v17, %v1099_v60  ;;  %2041 = vmatprep.mubr.bf16.mxu1 %v3909_v5 }
  0xfe   : > { %2316 = vst [vmem:[%s4194_s20 + $0x8] sm:$0xff] %v1036_v46 }
  0xff   : > { %2332 = vst [vmem:[%s4194_s20 + $0x88] sm:$0xff] %v1100_v29  ;;  %2203 = vmatmul.mubr.bf16.gmra.mxu0 %v3711_v49 }
 0x100   : > { %2210 = vmatprep.mubr.bf16.mxu0 %v3940_v61 }
 0x104   : > { %2042 = vmatmul.mubr.bf16.gmra.mxu1 %v3655_v62 }
 0x105   : > { %v3258_v12 = vpop.f32.mrf.mxu0  ;;  %2049 = vmatprep.mubr.bf16.mxu1 %v3935_v32 }
 0x106   : > { %v1057_v14 = vadd.f32 %v3258_v12, %v4188_v17 }
 0x107   : > { %2211 = vmatmul.mubr.bf16.gmra.mxu0 %v3772_v2  ;;  %v1048_v53 = vpop.f32.mrf.mxu0 }
 0x108   : > { %2218 = vmatprep.mubr.bf16.mxu0 %v4110_v31  ;;  %2321 = vst [vmem:[%s4194_s20 + $0x30] sm:$0xff] %v1057_v14  ;;  %v3274_v5 = vpop.f32.mrf.mxu1  ;;  %v1049_v50 = vadd.f32 %v4188_v17, %v1048_v53 }
 0x109   : > { %v1121_v55 = vadd.f32 %v3274_v5, %v4188_v17  ;;  %v3259_v62 = vpop.f32.mrf.mxu0 }
 0x10a   : > { %2319 = vst [vmem:[%s4194_s20 + $0x20] sm:$0xff] %v1049_v50  ;;  %v1112_v32 = vpop.f32.mrf.mxu1  ;;  %v1060_v35 = vadd.f32 %v3259_v62, %v4188_v17 }
 0x10b   : > { %2337 = vst [vmem:[%s4194_s20 + $0xb0] sm:$0xff] %v1121_v55  ;;  %v1113_v19 = vadd.f32 %v4188_v17, %v1112_v32  ;;  %v1051_v1 = vpop.f32.mrf.mxu0 }
 0x10c   : > { %2322 = vst [vmem:[%s4194_s20 + $0x38] sm:$0xff] %v1060_v35  ;;  %v3275_v34 = vpop.f32.mrf.mxu1  ;;  %v1052_v36 = vadd.f32 %v4188_v17, %v1051_v1  ;;  %2050 = vmatmul.mubr.bf16.gmra.mxu1 %v3711_v49 }
 0x10d   : > { %2335 = vst [vmem:[%s4194_s20 + $0xa0] sm:$0xff] %v1113_v19  ;;  %v1124_v8 = vadd.f32 %v3275_v34, %v4188_v17  ;;  %2057 = vmatprep.mubr.bf16.mxu1 %v3940_v61 }
 0x10e   : > { %2320 = vst [vmem:[%s4194_s20 + $0x28] sm:$0xff] %v1052_v36  ;;  %v1115_v54 = vpop.f32.mrf.mxu1 }
 0x10f   : > { %2219 = vmatmul.mubr.bf16.gmra.mxu0 %v3828_v39  ;;  %2338 = vst [vmem:[%s4194_s20 + $0xb8] sm:$0xff] %v1124_v8  ;;  %v1116_v44 = vadd.f32 %v4188_v17, %v1115_v54 }
 0x110   : > { %2226 = vmatprep.mubr.bf16.mxu0 %v3959_v11 }
 0x111   : > { %2336 = vst [vmem:[%s4194_s20 + $0xa8] sm:$0xff] %v1116_v44 }
 0x114   : > { %2058 = vmatmul.mubr.bf16.gmra.mxu1 %v3772_v2 }
 0x115   : > { %2065 = vmatprep.mubr.bf16.mxu1 %v4110_v31 }
 0x117   : > { %2227 = vmatmul.mubr.bf16.gmra.mxu0 %v3865_v38  ;;  %v3262_v49 = vpop.f32.mrf.mxu0 }
 0x118   : > { %2234 = vmatprep.mubr.bf16.mxu0 %v4125_v18  ;;  %v1073_v61 = vadd.f32 %v3262_v49, %v4188_v17 }
 0x119   : > { %v1064_v40 = vpop.f32.mrf.mxu0 }
 0x11a   : > { %2325 = vst [vmem:[%s4194_s20 + $0x50] sm:$0xff] %v1073_v61  ;;  %v1065_v56 = vadd.f32 %v4188_v17, %v1064_v40 }
 0x11b   : > { %v3263_v58 = vpop.f32.mrf.mxu0 }
 0x11c   : > { %2323 = vst [vmem:[%s4194_s20 + $0x40] sm:$0xff] %v1065_v56  ;;  %v1076_v2 = vadd.f32 %v3263_v58, %v4188_v17  ;;  %2066 = vmatmul.mubr.bf16.gmra.mxu1 %v3828_v39 }
 0x11d   : > { %v3278_v31 = vpop.f32.mrf.mxu1  ;;  %v1067_v4 = vpop.f32.mrf.mxu0  ;;  %2073 = vmatprep.mubr.bf16.mxu1 %v3959_v11 }
 0x11e   : > { %v1137_v7 = vadd.f32 %v3278_v31, %v4188_v17  ;;  %2326 = vst [vmem:[%s4194_s20 + $0x58] sm:$0xff] %v1076_v2  ;;  %v1068_v47 = vadd.f32 %v4188_v17, %v1067_v4 }
 0x11f   : > { %2235 = vmatmul.mubr.bf16.gmra.mxu0 %v3913_v22  ;;  %v1128_v41 = vpop.f32.mrf.mxu1 }
 0x120   : > { %2341 = vst [vmem:[%s4194_s20 + $0xd0] sm:$0xff] %v1137_v7  ;;  %v1129_v16 = vadd.f32 %v4188_v17, %v1128_v41  ;;  %2324 = vst [vmem:[%s4194_s20 + $0x48] sm:$0xff] %v1068_v47  ;;  %2242 = vmatprep.mubr.bf16.mxu0 %v4133_v0 }
 0x121   : > { %v3279_v39 = vpop.f32.mrf.mxu1 }
 0x122   : > { %2339 = vst [vmem:[%s4194_s20 + $0xc0] sm:$0xff] %v1129_v16  ;;  %v1140_v11 = vadd.f32 %v3279_v39, %v4188_v17 }
 0x123   : > { %v1131_v43 = vpop.f32.mrf.mxu1 }
 0x124   : > { %2342 = vst [vmem:[%s4194_s20 + $0xd8] sm:$0xff] %v1140_v11  ;;  %v1132_v52 = vadd.f32 %v4188_v17, %v1131_v43  ;;  %2074 = vmatmul.mubr.bf16.gmra.mxu1 %v3865_v38 }
 0x125   : > { %2081 = vmatprep.mubr.bf16.mxu1 %v4125_v18 }
 0x126   : > { %2340 = vst [vmem:[%s4194_s20 + $0xc8] sm:$0xff] %v1132_v52 }
 0x127   : > { %v3266_v20 = vpop.f32.mrf.mxu0  ;;  %2243 = vmatmul.mubr.bf16.gmra.mxu0 %v3554_v42 }
 0x128   : > { %v1089_v21 = vadd.f32 %v3266_v20, %v4188_v17  ;;  %2250 = vmatprep.mubr.bf16.mxu0 %v4141_v25 }
 0x129   : > { %v1080_v30 = vpop.f32.mrf.mxu0 }
 0x12a   : > { %2329 = vst [vmem:[%s4194_s20 + $0x70] sm:$0xff] %v1089_v21  ;;  %v1081_v48 = vadd.f32 %v4188_v17, %v1080_v30 }
 0x12b   : > { %v3267_v23 = vpop.f32.mrf.mxu0 }
 0x12c   : > { %2327 = vst [vmem:[%s4194_s20 + $0x60] sm:$0xff] %v1081_v48  ;;  %v1092_v38 = vadd.f32 %v3267_v23, %v4188_v17  ;;  %v3282_v13 = vpop.f32.mrf.mxu1  ;;  %2082 = vmatmul.mubr.bf16.gmra.mxu1 %v3913_v22 }
 0x12d   : > { %v1083_v18 = vpop.f32.mrf.mxu0  ;;  %v1153_v46 = vadd.f32 %v3282_v13, %v4188_v17  ;;  %2089 = vmatprep.mubr.bf16.mxu1 %v4133_v0 }
 0x12e   : > { %2330 = vst [vmem:[%s4194_s20 + $0x78] sm:$0xff] %v1092_v38  ;;  %v1084_v60 = vadd.f32 %v4188_v17, %v1083_v18  ;;  %v1144_v29 = vpop.f32.mrf.mxu1 }
 0x12f   : > { %v2916_v12 = vpop.f32.mrf.mxu0  ;;  %2251 = vmatmul.mubr.bf16.gmra.mxu0 %v3580_v63  ;;  %2345 = vst [vmem:[%s4194_s20 + $0xf0] sm:$0xff] %v1153_v46  ;;  %v1145_v14 = vadd.f32 %v4188_v17, %v1144_v29 }
 0x130   : > { %2328 = vst [vmem:[%s4194_s20 + $0x68] sm:$0xff] %v1084_v60  ;;  %2258 = vmatprep.mubr.bf16.mxu0 %v3992_v24  ;;  %v3283_v22 = vpop.f32.mrf.mxu1 }
 0x131   : > { %v2917_v53 = vpop.f32.mrf.mxu0  ;;  %2343 = vst [vmem:[%s4194_s20 + $0xe0] sm:$0xff] %v1145_v14  ;;  %v1156_v5 = vadd.f32 %v3283_v22, %v4188_v17 }
 0x132   : > { %v2918_v50 = vadd.f32 %v2917_v53, %v2916_v12  ;;  %v1147_v55 = vpop.f32.mrf.mxu1 }
 0x133   : > { %v2919_v0 = vpop.f32.mrf.mxu0  ;;  %2346 = vst [vmem:[%s4194_s20 + $0xf8] sm:$0xff] %v1156_v5  ;;  %v1148_v62 = vadd.f32 %v4188_v17, %v1147_v55 }
 0x134   : > { %v1611_v32 = vadd.f32 %v2918_v50, %v4188_v17  ;;  %v2804_v35 = vpop.f32.mrf.mxu1  ;;  %2090 = vmatmul.mubr.bf16.gmra.mxu1 %v3554_v42 }
 0x135   : > { %v2920_v19 = vpop.f32.mrf.mxu0  ;;  %2344 = vst [vmem:[%s4194_s20 + $0xe8] sm:$0xff] %v1148_v62  ;;  %2097 = vmatprep.mubr.bf16.mxu1 %v4141_v25 }
 0x136   : > { %2617 = vst [vmem:[%s4194_s20 + $0x200] sm:$0xff] %v1611_v32  ;;  %v2921_v1 = vadd.f32 %v2920_v19, %v2919_v0  ;;  %v2805_v34 = vpop.f32.mrf.mxu1 }
 0x137   : > { %v2922_v36 = vpop.f32.mrf.mxu0  ;;  %2259 = vmatmul.mubr.bf16.gmra.mxu0 %v3690_v26  ;;  %v2806_v8 = vadd.f32 %v2805_v34, %v2804_v35 }
 0x138   : > { %v1614_v54 = vadd.f32 %v2921_v1, %v4188_v17  ;;  %2266 = vmatprep.mubr.bf16.mxu0 %v4009_v33  ;;  %v2807_v44 = vpop.f32.mrf.mxu1 }
 0x139   : > { %v2923_v49 = vpop.f32.mrf.mxu0  ;;  %v1322_v42 = vadd.f32 %v2806_v8, %v4188_v17 }
 0x13a   : > { %2618 = vst [vmem:[%s4194_s20 + $0x208] sm:$0xff] %v1614_v54  ;;  %v2924_v61 = vadd.f32 %v2923_v49, %v2922_v36  ;;  %v2808_v40 = vpop.f32.mrf.mxu1 }
 0x13b   : > { %v2925_v56 = vpop.f32.mrf.mxu0  ;;  %2585 = vst [vmem:[%s4194_s20 + $0x100] sm:$0xff] %v1322_v42  ;;  %v2809_v25 = vadd.f32 %v2808_v40, %v2807_v44 }
 0x13c   : > { %v1619_v58 = vadd.f32 %v2924_v61, %v4188_v17  ;;  %v2810_v2 = vpop.f32.mrf.mxu1  ;;  %2098 = vmatmul.mubr.bf16.gmra.mxu1 %v3580_v63 }
 0x13d   : > { %v2926_v31 = vpop.f32.mrf.mxu0  ;;  %v1325_v4 = vadd.f32 %v2809_v25, %v4188_v17  ;;  %2105 = vmatprep.mubr.bf16.mxu1 %v3992_v24  ;;  %v922_v25 = vrot.slane %v4159_v45, 2 }
 0x13e   : > { %2619 = vst [vmem:[%s4194_s20 + $0x210] sm:$0xff] %v1619_v58  ;;  %v2927_v7 = vadd.f32 %v2926_v31, %v2925_v56  ;;  %v2811_v47 = vpop.f32.mrf.mxu1  ;;  %v919_v56 = vrot.slane %v4162_v27, 2 }
 0x13f   : > { %v2928_v41 = vpop.f32.mrf.mxu0  ;;  %2267 = vmatmul.mubr.bf16.gmra.mxu0 %v3731_v10  ;;  %2586 = vst [vmem:[%s4194_s20 + $0x108] sm:$0xff] %v1325_v4  ;;  %v2812_v16 = vadd.f32 %v2811_v47, %v2810_v2 }
 0x140   : > { %v1622_v39 = vadd.f32 %v2927_v7, %v4188_v17  ;;  %2274 = vmatprep.mubr.bf16.mxu0 %v4017_v15  ;;  %v2813_v63 = vpop.f32.mrf.mxu1  ;;  %v923_v47 = vsel %vm790_vm2, %v919_v56, %v922_v25 }
 0x141   : > { %v2929_v11 = vpop.f32.mrf.mxu0  ;;  %v1330_v43 = vadd.f32 %v2812_v16, %v4188_v17 }
 0x142   : > { %2620 = vst [vmem:[%s4194_s20 + $0x218] sm:$0xff] %v1622_v39  ;;  %v2930_v52 = vadd.f32 %v2929_v11, %v2928_v41  ;;  %v2814_v20 = vpop.f32.mrf.mxu1 }
 0x143   : > { %v2931_v24 = vpop.f32.mrf.mxu0  ;;  %2587 = vst [vmem:[%s4194_s20 + $0x110] sm:$0xff] %v1330_v43  ;;  %v2815_v21 = vadd.f32 %v2814_v20, %v2813_v63  ;;  %v926_v43 = vpack.c.bf16 %v923_v47, %v919_v56 }
 0x144   : > { %v1627_v30 = vadd.f32 %v2930_v52, %v4188_v17  ;;  %v2816_v48 = vpop.f32.mrf.mxu1  ;;  %2106 = vmatmul.mubr.bf16.gmra.mxu1 %v3690_v26 }
 0x145   : > { %v2932_v23 = vpop.f32.mrf.mxu0  ;;  %v1333_v38 = vadd.f32 %v2815_v21, %v4188_v17  ;;  %2113 = vmatprep.mubr.bf16.mxu1 %v4009_v33 }
 0x146   : > { %2621 = vst [vmem:[%s4194_s20 + $0x220] sm:$0xff] %v1627_v30  ;;  %v2933_v13 = vadd.f32 %v2932_v23, %v2931_v24  ;;  %v2817_v18 = vpop.f32.mrf.mxu1 }
 0x147   : > { %v2934_v46 = vpop.f32.mrf.mxu0  ;;  %2275 = vmatmul.mubr.bf16.gmra.mxu0 %v4533_v59  ;;  %2588 = vst [vmem:[%s4194_s20 + $0x118] sm:$0xff] %v1333_v38  ;;  %v2818_v60 = vadd.f32 %v2817_v18, %v2816_v48 }
 0x148   : > { %v1630_v29 = vadd.f32 %v2933_v13, %v4188_v17  ;;  %2282 = vmatprep.mubr.bf16.mxu0 %v4042_v6  ;;  %v2819_v26 = vpop.f32.mrf.mxu1 }
 0x149   : > { %v2935_v12 = vpop.f32.mrf.mxu0  ;;  %v1338_v14 = vadd.f32 %v2818_v60, %v4188_v17 }
 0x14a   : > { %2622 = vst [vmem:[%s4194_s20 + $0x228] sm:$0xff] %v1630_v29  ;;  %v2936_v22 = vadd.f32 %v2935_v12, %v2934_v46  ;;  %v2820_v53 = vpop.f32.mrf.mxu1 }
 0x14b   : > { %v2937_v33 = vpop.f32.mrf.mxu0  ;;  %2589 = vst [vmem:[%s4194_s20 + $0x120] sm:$0xff] %v1338_v14  ;;  %v2821_v5 = vadd.f32 %v2820_v53, %v2819_v26 }
 0x14c   : > { %v1635_v50 = vadd.f32 %v2936_v22, %v4188_v17  ;;  %v2822_v55 = vpop.f32.mrf.mxu1  ;;  %2114 = vmatmul.mubr.bf16.gmra.mxu1 %v3731_v10 }
 0x14d   : > { %v2938_v0 = vpop.f32.mrf.mxu0  ;;  %v1341_v62 = vadd.f32 %v2821_v5, %v4188_v17  ;;  %2121 = vmatprep.mubr.bf16.mxu1 %v4017_v15 }
 0x14e   : > { %2623 = vst [vmem:[%s4194_s20 + $0x230] sm:$0xff] %v1635_v50  ;;  %v2939_v32 = vadd.f32 %v2938_v0, %v2937_v33  ;;  %v2823_v35 = vpop.f32.mrf.mxu1 }
 0x14f   : > { %v2940_v19 = vpop.f32.mrf.mxu0  ;;  %2283 = vmatmul.mubr.bf16.gmra.mxu0 %v4534_v3  ;;  %2590 = vst [vmem:[%s4194_s20 + $0x128] sm:$0xff] %v1341_v62  ;;  %v2824_v1 = vadd.f32 %v2823_v35, %v2822_v55 }
 0x150   : > { %v1638_v34 = vadd.f32 %v2939_v32, %v4188_v17  ;;  %2290 = vmatprep.mubr.bf16.mxu0 %v4044_v57  ;;  %v2825_v10 = vpop.f32.mrf.mxu1 }
 0x151   : > { %v2941_v36 = vpop.f32.mrf.mxu0  ;;  %v1346_v8 = vadd.f32 %v2824_v1, %v4188_v17 }
 0x152   : > { %2624 = vst [vmem:[%s4194_s20 + $0x238] sm:$0xff] %v1638_v34  ;;  %v2942_v54 = vadd.f32 %v2941_v36, %v2940_v19  ;;  %v2826_v44 = vpop.f32.mrf.mxu1 }
 0x153   : > { %v2943_v49 = vpop.f32.mrf.mxu0  ;;  %2591 = vst [vmem:[%s4194_s20 + $0x130] sm:$0xff] %v1346_v8  ;;  %v2827_v15 = vadd.f32 %v2826_v44, %v2825_v10 }
 0x154   : > { %v1643_v42 = vadd.f32 %v2942_v54, %v4188_v17  ;;  %v2828_v61 = vpop.f32.mrf.mxu1  ;;  %2122 = vmatmul.mubr.bf16.gmra.mxu1 %v4533_v59 }
 0x155   : > { %v2944_v40 = vpop.f32.mrf.mxu0  ;;  %v1349_v58 = vadd.f32 %v2827_v15, %v4188_v17  ;;  %2129 = vmatprep.mubr.bf16.mxu1 %v4042_v6 }
 0x156   : > { %2625 = vst [vmem:[%s4194_s20 + $0x240] sm:$0xff] %v1643_v42  ;;  %v2945_v2 = vadd.f32 %v2944_v40, %v2943_v49  ;;  %v2829_v31 = vpop.f32.mrf.mxu1 }
 0x157   : > { %v2946_v4 = vpop.f32.mrf.mxu0  ;;  %2291 = vmatmul.mubr.bf16.gmra.mxu0 %v3901_v9  ;;  %2592 = vst [vmem:[%s4194_s20 + $0x138] sm:$0xff] %v1349_v58  ;;  %v2830_v7 = vadd.f32 %v2829_v31, %v2828_v61 }
 0x158   : > { %v1646_v59 = vadd.f32 %v2945_v2, %v4188_v17  ;;  %2298 = vmatprep.mubr.bf16.mxu0 %v4065_v51  ;;  %v2831_v27 = vpop.f32.mrf.mxu1 }
 0x159   : > { %v2947_v45 = vpop.f32.mrf.mxu0  ;;  %v1354_v41 = vadd.f32 %v2830_v7, %v4188_v17 }
 0x15a   : > { %2626 = vst [vmem:[%s4194_s20 + $0x248] sm:$0xff] %v1646_v59  ;;  %v2948_v6 = vadd.f32 %v2947_v45, %v2946_v4  ;;  %v2832_v16 = vpop.f32.mrf.mxu1 }
 0x15b   : > { %v2949_v39 = vpop.f32.mrf.mxu0  ;;  %2593 = vst [vmem:[%s4194_s20 + $0x140] sm:$0xff] %v1354_v41  ;;  %v2833_v63 = vadd.f32 %v2832_v16, %v2831_v27 }
 0x15c   : > { %v1651_v11 = vadd.f32 %v2948_v6, %v4188_v17  ;;  %v2834_v52 = vpop.f32.mrf.mxu1  ;;  %2130 = vmatmul.mubr.bf16.gmra.mxu1 %v4534_v3 }
 0x15d   : > { %v2950_v20 = vpop.f32.mrf.mxu0  ;;  %v1357_v24 = vadd.f32 %v2833_v63, %v4188_v17  ;;  %2137 = vmatprep.mubr.bf16.mxu1 %v4044_v57 }
 0x15e   : > { %2627 = vst [vmem:[%s4194_s20 + $0x250] sm:$0xff] %v1651_v11  ;;  %v2951_v21 = vadd.f32 %v2950_v20, %v2949_v39  ;;  %v2835_v30 = vpop.f32.mrf.mxu1 }
 0x15f   : > { %v2952_v48 = vpop.f32.mrf.mxu0  ;;  %2299 = vmatmul.mubr.bf16.gmra.mxu0 %v3946_v37  ;;  %2594 = vst [vmem:[%s4194_s20 + $0x148] sm:$0xff] %v1357_v24  ;;  %v2836_v23 = vadd.f32 %v2835_v30, %v2834_v52 }
 0x160   : > { %v1654_v38 = vadd.f32 %v2951_v21, %v4188_v17  ;;  %2306 = vmatprep.mubr.bf16.mxu0 %v926_v43  ;;  %v2837_v3 = vpop.f32.mrf.mxu1 }
 0x161   : > { %v2953_v13 = vpop.f32.mrf.mxu0  ;;  %v1362_v18 = vadd.f32 %v2836_v23, %v4188_v17 }
 0x162   : > { %2628 = vst [vmem:[%s4194_s20 + $0x258] sm:$0xff] %v1654_v38  ;;  %v2954_v46 = vadd.f32 %v2953_v13, %v2952_v48  ;;  %v2838_v60 = vpop.f32.mrf.mxu1 }
 0x163   : > { %v2955_v29 = vpop.f32.mrf.mxu0  ;;  %2595 = vst [vmem:[%s4194_s20 + $0x150] sm:$0xff] %v1362_v18  ;;  %v2839_v57 = vadd.f32 %v2838_v60, %v2837_v3 }
 0x164   : > { %v1659_v26 = vadd.f32 %v2954_v46, %v4188_v17  ;;  %v2840_v12 = vpop.f32.mrf.mxu1  ;;  %2138 = vmatmul.mubr.bf16.gmra.mxu1 %v3901_v9 }
 0x165   : > { %v2956_v14 = vpop.f32.mrf.mxu0  ;;  %v1365_v22 = vadd.f32 %v2839_v57, %v4188_v17  ;;  %2145 = vmatprep.mubr.bf16.mxu1 %v4065_v51 }
 0x166   : > { %2629 = vst [vmem:[%s4194_s20 + $0x260] sm:$0xff] %v1659_v26  ;;  %v2957_v53 = vadd.f32 %v2956_v14, %v2955_v29  ;;  %v2841_v33 = vpop.f32.mrf.mxu1 }
 0x167   : > { %v2958_v5 = vpop.f32.mrf.mxu0  ;;  %2307 = vmatmul.mubr.bf16.gmra.mxu0 %v4170_v28  ;;  %2596 = vst [vmem:[%s4194_s20 + $0x158] sm:$0xff] %v1365_v22  ;;  %v2842_v50 = vadd.f32 %v2841_v33, %v2840_v12 }
 0x168   : > { %v1662_v55 = vadd.f32 %v2957_v53, %v4188_v17  ;;  %v2843_v0 = vpop.f32.mrf.mxu1 }
 0x169   : > { %v2959_v62 = vpop.f32.mrf.mxu0  ;;  %v1370_v9 = vadd.f32 %v2842_v50, %v4188_v17 }
 0x16a   : > { %2630 = vst [vmem:[%s4194_s20 + $0x268] sm:$0xff] %v1662_v55  ;;  %v2960_v32 = vadd.f32 %v2959_v62, %v2958_v5  ;;  %v2844_v35 = vpop.f32.mrf.mxu1 }
 0x16b   : > { %v2961_v19 = vpop.f32.mrf.mxu0  ;;  %2597 = vst [vmem:[%s4194_s20 + $0x160] sm:$0xff] %v1370_v9  ;;  %v2845_v51 = vadd.f32 %v2844_v35, %v2843_v0 }
 0x16c   : > { %v1667_v1 = vadd.f32 %v2960_v32, %v4188_v17  ;;  %v2846_v28 = vpop.f32.mrf.mxu1  ;;  %2146 = vmatmul.mubr.bf16.gmra.mxu1 %v3946_v37 }
 0x16d   : > { %v2962_v34 = vpop.f32.mrf.mxu0  ;;  %v1373_v10 = vadd.f32 %v2845_v51, %v4188_v17 }
 0x16e   : > { %2631 = vst [vmem:[%s4194_s20 + $0x270] sm:$0xff] %v1667_v1  ;;  %v2963_v36 = vadd.f32 %v2962_v34, %v2961_v19  ;;  %v2847_v8 = vpop.f32.mrf.mxu1 }
 0x16f   : > { %v2964_v54 = vpop.f32.mrf.mxu0  ;;  %2598 = vst [vmem:[%s4194_s20 + $0x168] sm:$0xff] %v1373_v10  ;;  %v2848_v44 = vadd.f32 %v2847_v8, %v2846_v28 }
 0x170   : > { %v1670_v49 = vadd.f32 %v2963_v36, %v4188_v17  ;;  %v2849_v15 = vpop.f32.mrf.mxu1 }
 0x171   : > { %v2965_v42 = vpop.f32.mrf.mxu0  ;;  %v1378_v61 = vadd.f32 %v2848_v44, %v4188_v17 }
 0x172   : > { %2632 = vst [vmem:[%s4194_s20 + $0x278] sm:$0xff] %v1670_v49  ;;  %v2966_v37 = vadd.f32 %v2965_v42, %v2964_v54  ;;  %v2850_v40 = vpop.f32.mrf.mxu1 }
 0x173   : > { %v2967_v56 = vpop.f32.mrf.mxu0  ;;  %2599 = vst [vmem:[%s4194_s20 + $0x170] sm:$0xff] %v1378_v61  ;;  %v2851_v25 = vadd.f32 %v2850_v40, %v2849_v15 }
 0x174   : > { %v1675_v58 = vadd.f32 %v2966_v37, %v4188_v17  ;;  %v2852_v2 = vpop.f32.mrf.mxu1 }
 0x175   : > { %v2968_v31 = vpop.f32.mrf.mxu0  ;;  %v1381_v4 = vadd.f32 %v2851_v25, %v4188_v17 }
 0x176   : > { %2633 = vst [vmem:[%s4194_s20 + $0x280] sm:$0xff] %v1675_v58  ;;  %v2969_v7 = vadd.f32 %v2968_v31, %v2967_v56  ;;  %v2853_v59 = vpop.f32.mrf.mxu1 }
 0x177   : > { %v2970_v27 = vpop.f32.mrf.mxu0  ;;  %2600 = vst [vmem:[%s4194_s20 + $0x178] sm:$0xff] %v1381_v4  ;;  %v2854_v45 = vadd.f32 %v2853_v59, %v2852_v2 }
 0x178   : > { %v1678_v47 = vadd.f32 %v2969_v7, %v4188_v17  ;;  %v2855_v41 = vpop.f32.mrf.mxu1 }
 0x179   : > { %v2971_v6 = vpop.f32.mrf.mxu0  ;;  %v1386_v16 = vadd.f32 %v2854_v45, %v4188_v17 }
 0x17a   : > { %2634 = vst [vmem:[%s4194_s20 + $0x288] sm:$0xff] %v1678_v47  ;;  %v2972_v39 = vadd.f32 %v2971_v6, %v2970_v27  ;;  %v2856_v63 = vpop.f32.mrf.mxu1 }
 0x17b   : > { %v2973_v11 = vpop.f32.mrf.mxu0  ;;  %2601 = vst [vmem:[%s4194_s20 + $0x180] sm:$0xff] %v1386_v16  ;;  %v2857_v43 = vadd.f32 %v2856_v63, %v2855_v41 }
 0x17c   : > { %v1683_v52 = vadd.f32 %v2972_v39, %v4188_v17  ;;  %v2858_v20 = vpop.f32.mrf.mxu1 }
 0x17d   : > { %v2974_v24 = vpop.f32.mrf.mxu0  ;;  %v1389_v21 = vadd.f32 %v2857_v43, %v4188_v17 }
 0x17e   : > { %2635 = vst [vmem:[%s4194_s20 + $0x290] sm:$0xff] %v1683_v52  ;;  %v2975_v30 = vadd.f32 %v2974_v24, %v2973_v11  ;;  %v2859_v48 = vpop.f32.mrf.mxu1 }
 0x17f   : > { %v2976_v23 = vpop.f32.mrf.mxu0  ;;  %2602 = vst [vmem:[%s4194_s20 + $0x188] sm:$0xff] %v1389_v21  ;;  %v2860_v38 = vadd.f32 %v2859_v48, %v2858_v20 }
 0x180   : > { %v1686_v3 = vadd.f32 %v2975_v30, %v4188_v17  ;;  %v2861_v13 = vpop.f32.mrf.mxu1 }
 0x181   : > { %v2977_v18 = vpop.f32.mrf.mxu0  ;;  %v1394_v46 = vadd.f32 %v2860_v38, %v4188_v17 }
 0x182   : > { %2636 = vst [vmem:[%s4194_s20 + $0x298] sm:$0xff] %v1686_v3  ;;  %v2978_v60 = vadd.f32 %v2977_v18, %v2976_v23  ;;  %v2862_v29 = vpop.f32.mrf.mxu1 }
 0x183   : > { %v2979_v57 = vpop.f32.mrf.mxu0  ;;  %2603 = vst [vmem:[%s4194_s20 + $0x190] sm:$0xff] %v1394_v46  ;;  %v2863_v26 = vadd.f32 %v2862_v29, %v2861_v13 }
 0x184   : > { %v1691_v12 = vadd.f32 %v2978_v60, %v4188_v17  ;;  %v2864_v14 = vpop.f32.mrf.mxu1 }
 0x185   : > { %v2980_v22 = vpop.f32.mrf.mxu0  ;;  %v1397_v53 = vadd.f32 %v2863_v26, %v4188_v17 }
 0x186   : > { %2637 = vst [vmem:[%s4194_s20 + $0x2a0] sm:$0xff] %v1691_v12  ;;  %v2981_v33 = vadd.f32 %v2980_v22, %v2979_v57  ;;  %v2865_v5 = vpop.f32.mrf.mxu1 }
 0x187   : > { %v2982_v50 = vpop.f32.mrf.mxu0  ;;  %2604 = vst [vmem:[%s4194_s20 + $0x198] sm:$0xff] %v1397_v53  ;;  %v2866_v55 = vadd.f32 %v2865_v5, %v2864_v14 }
 0x188   : > { %v1694_v0 = vadd.f32 %v2981_v33, %v4188_v17  ;;  %v2867_v62 = vpop.f32.mrf.mxu1 }
 0x189   : > { %v2983_v9 = vpop.f32.mrf.mxu0  ;;  %v1402_v32 = vadd.f32 %v2866_v55, %v4188_v17 }
 0x18a   : > { %2638 = vst [vmem:[%s4194_s20 + $0x2a8] sm:$0xff] %v1694_v0  ;;  %v2984_v35 = vadd.f32 %v2983_v9, %v2982_v50  ;;  %v2868_v19 = vpop.f32.mrf.mxu1 }
 0x18b   : > { %v2985_v51 = vpop.f32.mrf.mxu0  ;;  %2605 = vst [vmem:[%s4194_s20 + $0x1a0] sm:$0xff] %v1402_v32  ;;  %v2869_v1 = vadd.f32 %v2868_v19, %v2867_v62 }
 0x18c   : > { %v1699_v28 = vadd.f32 %v2984_v35, %v4188_v17  ;;  %v2870_v34 = vpop.f32.mrf.mxu1 }
 0x18d   : > { %v2986_v10 = vpop.f32.mrf.mxu0  ;;  %v1405_v36 = vadd.f32 %v2869_v1, %v4188_v17 }
 0x18e   : > { %2639 = vst [vmem:[%s4194_s20 + $0x2b0] sm:$0xff] %v1699_v28  ;;  %v2987_v8 = vadd.f32 %v2986_v10, %v2985_v51  ;;  %v2871_v54 = vpop.f32.mrf.mxu1 }
 0x18f   : > { %v2988_v44 = vpop.f32.mrf.mxu0  ;;  %2606 = vst [vmem:[%s4194_s20 + $0x1a8] sm:$0xff] %v1405_v36  ;;  %v2872_v49 = vadd.f32 %v2871_v54, %v2870_v34 }
 0x190   : > { %v1702_v15 = vadd.f32 %v2987_v8, %v4188_v17  ;;  %v2873_v42 = vpop.f32.mrf.mxu1 }
 0x191   : > { %v2989_v61 = vpop.f32.mrf.mxu0  ;;  %v1410_v37 = vadd.f32 %v2872_v49, %v4188_v17 }
 0x192   : > { %2640 = vst [vmem:[%s4194_s20 + $0x2b8] sm:$0xff] %v1702_v15  ;;  %v2990_v40 = vadd.f32 %v2989_v61, %v2988_v44  ;;  %v2874_v56 = vpop.f32.mrf.mxu1 }
 0x193   : > { %v2991_v25 = vpop.f32.mrf.mxu0  ;;  %2607 = vst [vmem:[%s4194_s20 + $0x1b0] sm:$0xff] %v1410_v37  ;;  %v2875_v58 = vadd.f32 %v2874_v56, %v2873_v42 }
 0x194   : > { %v1707_v2 = vadd.f32 %v2990_v40, %v4188_v17  ;;  %v2876_v31 = vpop.f32.mrf.mxu1 }
 0x195   : > { %v2992_v4 = vpop.f32.mrf.mxu0  ;;  %v1413_v7 = vadd.f32 %v2875_v58, %v4188_v17 }
 0x196   : > { %2641 = vst [vmem:[%s4194_s20 + $0x2c0] sm:$0xff] %v1707_v2  ;;  %v2993_v59 = vadd.f32 %v2992_v4, %v2991_v25  ;;  %v2877_v27 = vpop.f32.mrf.mxu1 }
 0x197   : > { %v2994_v45 = vpop.f32.mrf.mxu0  ;;  %2608 = vst [vmem:[%s4194_s20 + $0x1b8] sm:$0xff] %v1413_v7  ;;  %v2878_v47 = vadd.f32 %v2877_v27, %v2876_v31 }
 0x198   : > { %v1710_v41 = vadd.f32 %v2993_v59, %v4188_v17  ;;  %v2879_v6 = vpop.f32.mrf.mxu1 }
 0x199   : > { %v2995_v16 = vpop.f32.mrf.mxu0  ;;  %v1418_v39 = vadd.f32 %v2878_v47, %v4188_v17 }
 0x19a   : > { %2642 = vst [vmem:[%s4194_s20 + $0x2c8] sm:$0xff] %v1710_v41  ;;  %v2996_v63 = vadd.f32 %v2995_v16, %v2994_v45  ;;  %v2880_v11 = vpop.f32.mrf.mxu1 }
 0x19b   : > { %v2997_v43 = vpop.f32.mrf.mxu0  ;;  %2609 = vst [vmem:[%s4194_s20 + $0x1c0] sm:$0xff] %v1418_v39  ;;  %v2881_v52 = vadd.f32 %v2880_v11, %v2879_v6 }
 0x19c   : > { %v1715_v20 = vadd.f32 %v2996_v63, %v4188_v17  ;;  %v2882_v24 = vpop.f32.mrf.mxu1 }
 0x19d   : > { %v2998_v21 = vpop.f32.mrf.mxu0  ;;  %v1421_v30 = vadd.f32 %v2881_v52, %v4188_v17 }
 0x19e   : > { %2643 = vst [vmem:[%s4194_s20 + $0x2d0] sm:$0xff] %v1715_v20  ;;  %v2999_v48 = vadd.f32 %v2998_v21, %v2997_v43  ;;  %v2883_v23 = vpop.f32.mrf.mxu1 }
 0x19f   : > { %v3000_v38 = vpop.f32.mrf.mxu0  ;;  %2610 = vst [vmem:[%s4194_s20 + $0x1c8] sm:$0xff] %v1421_v30  ;;  %v2884_v3 = vadd.f32 %v2883_v23, %v2882_v24 }
 0x1a0   : > { %v1718_v13 = vadd.f32 %v2999_v48, %v4188_v17  ;;  %v2885_v18 = vpop.f32.mrf.mxu1 }
 0x1a1   : > { %v3001_v46 = vpop.f32.mrf.mxu0  ;;  %v1426_v60 = vadd.f32 %v2884_v3, %v4188_v17 }
 0x1a2   : > { %2644 = vst [vmem:[%s4194_s20 + $0x2d8] sm:$0xff] %v1718_v13  ;;  %v3002_v29 = vadd.f32 %v3001_v46, %v3000_v38  ;;  %v2886_v57 = vpop.f32.mrf.mxu1 }
 0x1a3   : > { %v3003_v26 = vpop.f32.mrf.mxu0  ;;  %2611 = vst [vmem:[%s4194_s20 + $0x1d0] sm:$0xff] %v1426_v60  ;;  %v2887_v12 = vadd.f32 %v2886_v57, %v2885_v18 }
 0x1a4   : > { %v1723_v14 = vadd.f32 %v3002_v29, %v4188_v17  ;;  %v2888_v22 = vpop.f32.mrf.mxu1 }
 0x1a5   : > { %v3004_v53 = vpop.f32.mrf.mxu0  ;;  %v1429_v33 = vadd.f32 %v2887_v12, %v4188_v17 }
 0x1a6   : > { %2645 = vst [vmem:[%s4194_s20 + $0x2e0] sm:$0xff] %v1723_v14  ;;  %v3005_v5 = vadd.f32 %v3004_v53, %v3003_v26  ;;  %v2889_v50 = vpop.f32.mrf.mxu1  ;;  %v4458_v14 = vld [vmem:[%s4525_s4] ss:$0 sm:$0xff] }
 0x1a7   : > { %v3006_v55 = vpop.f32.mrf.mxu0  ;;  %2612 = vst [vmem:[%s4194_s20 + $0x1d8] sm:$0xff] %v1429_v33  ;;  %v2890_v0 = vadd.f32 %v2889_v50, %v2888_v22 }
 0x1a8   : > { %v1726_v62 = vadd.f32 %v3005_v5, %v4188_v17  ;;  %v2891_v9 = vpop.f32.mrf.mxu1 }
 0x1a9   : > { %v3007_v32 = vpop.f32.mrf.mxu0  ;;  %v1434_v35 = vadd.f32 %v2890_v0, %v4188_v17 }
 0x1aa   : > { %2646 = vst [vmem:[%s4194_s20 + $0x2e8] sm:$0xff] %v1726_v62  ;;  %v3008_v19 = vadd.f32 %v3007_v32, %v3006_v55  ;;  %v2892_v51 = vpop.f32.mrf.mxu1 }
 0x1ab   : > { %v3009_v1 = vpop.f32.mrf.mxu0  ;;  %2613 = vst [vmem:[%s4194_s20 + $0x1e0] sm:$0xff] %v1434_v35  ;;  %v2893_v28 = vadd.f32 %v2892_v51, %v2891_v9 }
 0x1ac   : > { %v1731_v34 = vadd.f32 %v3008_v19, %v4188_v17  ;;  %v2894_v10 = vpop.f32.mrf.mxu1 }
 0x1ad   : > { %v3010_v36 = vpop.f32.mrf.mxu0  ;;  %v1437_v8 = vadd.f32 %v2893_v28, %v4188_v17 }
 0x1ae   : > { %2647 = vst [vmem:[%s4194_s20 + $0x2f0] sm:$0xff] %v1731_v34  ;;  %v3011_v54 = vadd.f32 %v3010_v36, %v3009_v1  ;;  %v2895_v44 = vpop.f32.mrf.mxu1 }
 0x1af   : > { %v3140_v49 = vpop.f32.mrf.mxu0  ;;  %2614 = vst [vmem:[%s4194_s20 + $0x1e8] sm:$0xff] %v1437_v8  ;;  %v2896_v15 = vadd.f32 %v2895_v44, %v2894_v10 }
 0x1b0   : > { %v1734_v42 = vadd.f32 %v3011_v54, %v4188_v17  ;;  %v2897_v61 = vpop.f32.mrf.mxu1 }
 0x1b1   : > { %v3141_v37 = vpop.f32.mrf.mxu0  ;;  %v1442_v40 = vadd.f32 %v2896_v15, %v4188_v17 }
 0x1b2   : > { %2648 = vst [vmem:[%s4194_s20 + $0x2f8] sm:$0xff] %v1734_v42  ;;  %v2898_v56 = vpop.f32.mrf.mxu1  ;;  %v3142_v6 = vadd.f32 %v3141_v37, %v3140_v49 }
 0x1b3   : > { %v3143_v25 = vpop.f32.mrf.mxu0  ;;  %2615 = vst [vmem:[%s4194_s20 + $0x1f0] sm:$0xff] %v1442_v40  ;;  %v2899_v58 = vadd.f32 %v2898_v56, %v2897_v61 }
 0x1b4   : > { %v3028_v2 = vpop.f32.mrf.mxu1 }
 0x1b5   : > { %v3144_v31 = vpop.f32.mrf.mxu0  ;;  %v1445_v4 = vadd.f32 %v2899_v58, %v4188_v17 }
 0x1b6   : > { %v3029_v7 = vpop.f32.mrf.mxu1  ;;  %v3145_v24 = vadd.f32 %v3144_v31, %v3143_v25 }
 0x1b7   : > { %v3146_v59 = vpop.f32.mrf.mxu0  ;;  %2616 = vst [vmem:[%s4194_s20 + $0x1f8] sm:$0xff] %v1445_v4  ;;  %v3030_v27 = vadd.f32 %v3029_v7, %v3028_v2 }
 0x1b8   : > { %v3031_v45 = vpop.f32.mrf.mxu1 }
 0x1b9   : > { %v3147_v47 = vpop.f32.mrf.mxu0  ;;  %v2028_v41 = vadd.f32 %v3030_v27, %v4188_v17 }
 0x1ba   : > { %v3032_v16 = vpop.f32.mrf.mxu1  ;;  %v3148_v18 = vadd.f32 %v3147_v47, %v3146_v59 }
 0x1bb   : > { %v3149_v39 = vpop.f32.mrf.mxu0  ;;  %v2189_v63 = vadd.f32 %v3142_v6, %v2028_v41  ;;  %v3033_v11 = vadd.f32 %v3032_v16, %v3031_v45 }
 0x1bc   : > { %v3034_v43 = vpop.f32.mrf.mxu1 }
 0x1bd   : > { %v3150_v52 = vpop.f32.mrf.mxu0  ;;  %2649 = vst [vmem:[%s4194_s20 + $0x300] sm:$0xff] %v2189_v63  ;;  %v2031_v20 = vadd.f32 %v3033_v11, %v4188_v17 }
 0x1be   : > { %v3035_v21 = vpop.f32.mrf.mxu1  ;;  %v3151_v53 = vadd.f32 %v3150_v52, %v3149_v39 }
 0x1bf   : > { %v3152_v30 = vpop.f32.mrf.mxu0  ;;  %v2192_v48 = vadd.f32 %v3145_v24, %v2031_v20  ;;  %v3036_v23 = vadd.f32 %v3035_v21, %v3034_v43 }
 0x1c0   : > { %v3037_v38 = vpop.f32.mrf.mxu1 }
 0x1c1   : > { %v3153_v3 = vpop.f32.mrf.mxu0  ;;  %2650 = vst [vmem:[%s4194_s20 + $0x308] sm:$0xff] %v2192_v48  ;;  %v2036_v13 = vadd.f32 %v3036_v23, %v4188_v17 }
 0x1c2   : > { %v3038_v46 = vpop.f32.mrf.mxu1  ;;  %v3154_v9 = vadd.f32 %v3153_v3, %v3152_v30 }
 0x1c3   : > { %v3155_v60 = vpop.f32.mrf.mxu0  ;;  %v2197_v29 = vadd.f32 %v3148_v18, %v2036_v13  ;;  %v3039_v57 = vadd.f32 %v3038_v46, %v3037_v38 }
 0x1c4   : > { %v3040_v26 = vpop.f32.mrf.mxu1 }
 0x1c5   : > { %v3156_v12 = vpop.f32.mrf.mxu0  ;;  %2651 = vst [vmem:[%s4194_s20 + $0x310] sm:$0xff] %v2197_v29  ;;  %v2039_v22 = vadd.f32 %v4458_v14, %v3039_v57 }
 0x1c6   : > { %v3041_v33 = vpop.f32.mrf.mxu1  ;;  %v3157_v10 = vadd.f32 %v3156_v12, %v3155_v60 }
 0x1c7   : > { %v3158_v17 = vpop.f32.mrf.mxu0  ;;  %v2200_v5 = vadd.f32 %v3151_v53, %v2039_v22  ;;  %v3042_v50 = vadd.f32 %v3041_v33, %v3040_v26 }
 0x1c8   : > { %v3043_v55 = vpop.f32.mrf.mxu1 }
 0x1c9   : > { %v3159_v0 = vpop.f32.mrf.mxu0  ;;  %2652 = vst [vmem:[%s4194_s20 + $0x318] sm:$0xff] %v2200_v5  ;;  %v2044_v62 = vadd.f32 %v4458_v14, %v3042_v50 }
 0x1ca   : > { %v3044_v32 = vpop.f32.mrf.mxu1  ;;  %v3160_v61 = vadd.f32 %v3159_v0, %v3158_v17 }
 0x1cb   : > { %v3161_v35 = vpop.f32.mrf.mxu0  ;;  %v2205_v19 = vadd.f32 %v3154_v9, %v2044_v62  ;;  %v3045_v51 = vadd.f32 %v3044_v32, %v3043_v55 }
 0x1cc   : > { %v3046_v1 = vpop.f32.mrf.mxu1 }
 0x1cd   : > { %v3162_v28 = vpop.f32.mrf.mxu0  ;;  %2653 = vst [vmem:[%s4194_s20 + $0x320] sm:$0xff] %v2205_v19  ;;  %v2047_v34 = vadd.f32 %v4458_v14, %v3045_v51 }
 0x1ce   : > { %v3047_v36 = vpop.f32.mrf.mxu1  ;;  %v3163_v4 = vadd.f32 %v3162_v28, %v3161_v35 }
 0x1cf   : > { %v3164_v8 = vpop.f32.mrf.mxu0  ;;  %v2208_v54 = vadd.f32 %v3157_v10, %v2047_v34  ;;  %v3048_v44 = vadd.f32 %v3047_v36, %v3046_v1 }
 0x1d0   : > { %v3049_v49 = vpop.f32.mrf.mxu1 }
 0x1d1   : > { %v3165_v15 = vpop.f32.mrf.mxu0  ;;  %2654 = vst [vmem:[%s4194_s20 + $0x328] sm:$0xff] %v2208_v54  ;;  %v2052_v42 = vadd.f32 %v4458_v14, %v3048_v44 }
 0x1d2   : > { %v3050_v37 = vpop.f32.mrf.mxu1  ;;  %v3166_v16 = vadd.f32 %v3165_v15, %v3164_v8 }
 0x1d3   : > { %v3167_v40 = vpop.f32.mrf.mxu0  ;;  %v2213_v56 = vadd.f32 %v3160_v61, %v2052_v42  ;;  %v3051_v25 = vadd.f32 %v3050_v37, %v3049_v49 }
 0x1d4   : > { %v3052_v58 = vpop.f32.mrf.mxu1 }
 0x1d5   : > { %v3168_v2 = vpop.f32.mrf.mxu0  ;;  %2655 = vst [vmem:[%s4194_s20 + $0x330] sm:$0xff] %v2213_v56  ;;  %v2055_v31 = vadd.f32 %v4458_v14, %v3051_v25 }
 0x1d6   : > { %v3053_v7 = vpop.f32.mrf.mxu1  ;;  %v3169_v21 = vadd.f32 %v3168_v2, %v3167_v40 }
 0x1d7   : > { %v3170_v59 = vpop.f32.mrf.mxu0  ;;  %v2216_v27 = vadd.f32 %v3163_v4, %v2055_v31  ;;  %v3054_v45 = vadd.f32 %v3053_v7, %v3052_v58 }
 0x1d8   : > { %v3055_v47 = vpop.f32.mrf.mxu1 }
 0x1d9   : > { %v3171_v41 = vpop.f32.mrf.mxu0  ;;  %2656 = vst [vmem:[%s4194_s20 + $0x338] sm:$0xff] %v2216_v27  ;;  %v2060_v6 = vadd.f32 %v4458_v14, %v3054_v45 }
 0x1da   : > { %v3056_v39 = vpop.f32.mrf.mxu1  ;;  %v3172_v46 = vadd.f32 %v3171_v41, %v3170_v59 }
 0x1db   : > { %v3173_v63 = vpop.f32.mrf.mxu0  ;;  %v2221_v11 = vadd.f32 %v3166_v16, %v2060_v6  ;;  %v3057_v43 = vadd.f32 %v3056_v39, %v3055_v47 }
 0x1dc   : > { %v3058_v52 = vpop.f32.mrf.mxu1 }
 0x1dd   : > { %v3174_v20 = vpop.f32.mrf.mxu0  ;;  %2657 = vst [vmem:[%s4194_s20 + $0x340] sm:$0xff] %v2221_v11  ;;  %v2063_v24 = vadd.f32 %v4458_v14, %v3057_v43 }
 0x1de   : > { %v3059_v30 = vpop.f32.mrf.mxu1  ;;  %v3175_v33 = vadd.f32 %v3174_v20, %v3173_v63 }
 0x1df   : > { %v3176_v48 = vpop.f32.mrf.mxu0  ;;  %v2224_v23 = vadd.f32 %v3169_v21, %v2063_v24  ;;  %v3060_v38 = vadd.f32 %v3059_v30, %v3058_v52 }
 0x1e0   : > { %v3061_v3 = vpop.f32.mrf.mxu1 }
 0x1e1   : > { %v3177_v13 = vpop.f32.mrf.mxu0  ;;  %2658 = vst [vmem:[%s4194_s20 + $0x348] sm:$0xff] %v2224_v23  ;;  %v2068_v18 = vadd.f32 %v4458_v14, %v3060_v38 }
 0x1e2   : > { %v3062_v60 = vpop.f32.mrf.mxu1  ;;  %v3178_v32 = vadd.f32 %v3177_v13, %v3176_v48 }
 0x1e3   : > { %v3179_v29 = vpop.f32.mrf.mxu0  ;;  %v2229_v57 = vadd.f32 %v3172_v46, %v2068_v18  ;;  %v3063_v26 = vadd.f32 %v3062_v60, %v3061_v3 }
 0x1e4   : > { %v3064_v12 = vpop.f32.mrf.mxu1 }
 0x1e5   : > { %v3180_v22 = vpop.f32.mrf.mxu0  ;;  %2659 = vst [vmem:[%s4194_s20 + $0x350] sm:$0xff] %v2229_v57  ;;  %v2071_v53 = vadd.f32 %v4458_v14, %v3063_v26 }
 0x1e6   : > { %v3065_v17 = vpop.f32.mrf.mxu1  ;;  %v3181_v36 = vadd.f32 %v3180_v22, %v3179_v29 }
 0x1e7   : > { %v3182_v5 = vpop.f32.mrf.mxu0  ;;  %v2232_v50 = vadd.f32 %v3175_v33, %v2071_v53  ;;  %v3066_v55 = vadd.f32 %v3065_v17, %v3064_v12 }
 0x1e8   : > { %v3067_v0 = vpop.f32.mrf.mxu1 }
 0x1e9   : > { %v3183_v62 = vpop.f32.mrf.mxu0  ;;  %2660 = vst [vmem:[%s4194_s20 + $0x358] sm:$0xff] %v2232_v50  ;;  %v2076_v9 = vadd.f32 %v4458_v14, %v3066_v55 }
 0x1ea   : > { %v3068_v35 = vpop.f32.mrf.mxu1  ;;  %v3184_v37 = vadd.f32 %v3183_v62, %v3182_v5 }
 0x1eb   : > { %v3185_v19 = vpop.f32.mrf.mxu0  ;;  %v2237_v51 = vadd.f32 %v3178_v32, %v2076_v9  ;;  %v3069_v1 = vadd.f32 %v3068_v35, %v3067_v0 }
 0x1ec   : > { %v3070_v28 = vpop.f32.mrf.mxu1 }
 0x1ed   : > { %v3186_v34 = vpop.f32.mrf.mxu0  ;;  %2661 = vst [vmem:[%s4194_s20 + $0x360] sm:$0xff] %v2237_v51  ;;  %v2079_v10 = vadd.f32 %v4458_v14, %v3069_v1 }
 0x1ee   : > { %v3071_v8 = vpop.f32.mrf.mxu1  ;;  %v3187_v7 = vadd.f32 %v3186_v34, %v3185_v19 }
 0x1ef   : > { %v3188_v54 = vpop.f32.mrf.mxu0  ;;  %v2240_v44 = vadd.f32 %v3181_v36, %v2079_v10  ;;  %v3072_v49 = vadd.f32 %v3071_v8, %v3070_v28 }
 0x1f0   : > { %v3073_v15 = vpop.f32.mrf.mxu1 }
 0x1f1   : > { %v3189_v42 = vpop.f32.mrf.mxu0  ;;  %2662 = vst [vmem:[%s4194_s20 + $0x368] sm:$0xff] %v2240_v44  ;;  %v2084_v61 = vadd.f32 %v4458_v14, %v3072_v49 }
 0x1f2   : > { %v3074_v40 = vpop.f32.mrf.mxu1  ;;  %v3190_v39 = vadd.f32 %v3189_v42, %v3188_v54 }
 0x1f3   : > { %v3191_v56 = vpop.f32.mrf.mxu0  ;;  %v2245_v25 = vadd.f32 %v3184_v37, %v2084_v61  ;;  %v3075_v58 = vadd.f32 %v3074_v40, %v3073_v15 }
 0x1f4   : > { %v3076_v2 = vpop.f32.mrf.mxu1 }
 0x1f5   : > { %v3192_v31 = vpop.f32.mrf.mxu0  ;;  %2663 = vst [vmem:[%s4194_s20 + $0x370] sm:$0xff] %v2245_v25  ;;  %v2087_v4 = vadd.f32 %v4458_v14, %v3075_v58 }
 0x1f6   : > { %v3077_v59 = vpop.f32.mrf.mxu1  ;;  %v3193_v30 = vadd.f32 %v3192_v31, %v3191_v56 }
 0x1f7   : > { %v3194_v27 = vpop.f32.mrf.mxu0  ;;  %v2248_v45 = vadd.f32 %v3187_v7, %v2087_v4  ;;  %v3078_v47 = vadd.f32 %v3077_v59, %v3076_v2 }
 0x1f8   : > { %v3079_v41 = vpop.f32.mrf.mxu1 }
 0x1f9   : > { %v3195_v6 = vpop.f32.mrf.mxu0  ;;  %2664 = vst [vmem:[%s4194_s20 + $0x378] sm:$0xff] %v2248_v45  ;;  %v2092_v16 = vadd.f32 %v4458_v14, %v3078_v47 }
 0x1fa   : > { %v3080_v63 = vpop.f32.mrf.mxu1  ;;  %v3196_v60 = vadd.f32 %v3195_v6, %v3194_v27 }
 0x1fb   : > { %v3197_v11 = vpop.f32.mrf.mxu0  ;;  %v2253_v43 = vadd.f32 %v3190_v39, %v2092_v16  ;;  %v3081_v52 = vadd.f32 %v3080_v63, %v3079_v41 }
 0x1fc   : > { %v3082_v20 = vpop.f32.mrf.mxu1 }
 0x1fd   : > { %v3198_v24 = vpop.f32.mrf.mxu0  ;;  %2665 = vst [vmem:[%s4194_s20 + $0x380] sm:$0xff] %v2253_v43  ;;  %v2095_v21 = vadd.f32 %v4458_v14, %v3081_v52 }
 0x1fe   : > { %v3083_v48 = vpop.f32.mrf.mxu1  ;;  %v3199_v17 = vadd.f32 %v3198_v24, %v3197_v11 }
 0x1ff   : > { %v3200_v23 = vpop.f32.mrf.mxu0  ;;  %v2256_v38 = vadd.f32 %v3193_v30, %v2095_v21  ;;  %v3084_v3 = vadd.f32 %v3083_v48, %v3082_v20 }
 0x200   : > { %v3085_v13 = vpop.f32.mrf.mxu1 }
 0x201   : > { %v3201_v18 = vpop.f32.mrf.mxu0  ;;  %2666 = vst [vmem:[%s4194_s20 + $0x388] sm:$0xff] %v2256_v38  ;;  %v2100_v46 = vadd.f32 %v4458_v14, %v3084_v3 }
 0x202   : > { %v3086_v29 = vpop.f32.mrf.mxu1  ;;  %v3202_v35 = vadd.f32 %v3201_v18, %v3200_v23 }
 0x203   : > { %v3203_v57 = vpop.f32.mrf.mxu0  ;;  %v2261_v26 = vadd.f32 %v3196_v60, %v2100_v46  ;;  %v3087_v12 = vadd.f32 %v3086_v29, %v3085_v13 }
 0x204   : > { %v3088_v22 = vpop.f32.mrf.mxu1 }
 0x205   : > { %v3204_v53 = vpop.f32.mrf.mxu0  ;;  %2667 = vst [vmem:[%s4194_s20 + $0x390] sm:$0xff] %v2261_v26  ;;  %v2103_v33 = vadd.f32 %v4458_v14, %v3087_v12 }
 0x206   : > { %v3089_v5 = vpop.f32.mrf.mxu1  ;;  %v3205_v8 = vadd.f32 %v3204_v53, %v3203_v57 }
 0x207   : > { %v3206_v50 = vpop.f32.mrf.mxu0  ;;  %v2264_v55 = vadd.f32 %v3199_v17, %v2103_v33  ;;  %v3090_v0 = vadd.f32 %v3089_v5, %v3088_v22 }
 0x208   : > { %v3091_v62 = vpop.f32.mrf.mxu1 }
 0x209   : > { %v3207_v9 = vpop.f32.mrf.mxu0  ;;  %2668 = vst [vmem:[%s4194_s20 + $0x398] sm:$0xff] %v2264_v55  ;;  %v2108_v32 = vadd.f32 %v4458_v14, %v3090_v0 }
 0x20a   : > { %v3092_v19 = vpop.f32.mrf.mxu1  ;;  %v3208_v40 = vadd.f32 %v3207_v9, %v3206_v50 }
 0x20b   : > { %v3209_v51 = vpop.f32.mrf.mxu0  ;;  %v2269_v1 = vadd.f32 %v3202_v35, %v2108_v32  ;;  %v3093_v28 = vadd.f32 %v3092_v19, %v3091_v62 }
 0x20c   : > { %v3094_v34 = vpop.f32.mrf.mxu1 }
 0x20d   : > { %v3210_v10 = vpop.f32.mrf.mxu0  ;;  %2669 = vst [vmem:[%s4194_s20 + $0x3a0] sm:$0xff] %v2269_v1  ;;  %v2111_v36 = vadd.f32 %v4458_v14, %v3093_v28 }
 0x20e   : > { %v3095_v54 = vpop.f32.mrf.mxu1  ;;  %v3211_v59 = vadd.f32 %v3210_v10, %v3209_v51 }
 0x20f   : > { %v3212_v44 = vpop.f32.mrf.mxu0  ;;  %v2272_v49 = vadd.f32 %v3205_v8, %v2111_v36  ;;  %v3096_v15 = vadd.f32 %v3095_v54, %v3094_v34 }
 0x210   : > { %v3097_v42 = vpop.f32.mrf.mxu1 }
 0x211   : > { %v3213_v61 = vpop.f32.mrf.mxu0  ;;  %2670 = vst [vmem:[%s4194_s20 + $0x3a8] sm:$0xff] %v2272_v49  ;;  %v2116_v37 = vadd.f32 %v4458_v14, %v3096_v15 }
 0x212   : > { %v3098_v56 = vpop.f32.mrf.mxu1  ;;  %v3214_v63 = vadd.f32 %v3213_v61, %v3212_v44 }
 0x213   : > { %v3215_v25 = vpop.f32.mrf.mxu0  ;;  %v2277_v58 = vadd.f32 %v3208_v40, %v2116_v37  ;;  %v3099_v2 = vadd.f32 %v3098_v56, %v3097_v42 }
 0x214   : > { %v3100_v31 = vpop.f32.mrf.mxu1 }
 0x215   : > { %v3216_v4 = vpop.f32.mrf.mxu0  ;;  %2671 = vst [vmem:[%s4194_s20 + $0x3b0] sm:$0xff] %v2277_v58  ;;  %v2119_v7 = vadd.f32 %v4458_v14, %v3099_v2 }
 0x216   : > { %v3101_v27 = vpop.f32.mrf.mxu1  ;;  %v3217_v48 = vadd.f32 %v3216_v4, %v3215_v25 }
 0x217   : > { %v3218_v45 = vpop.f32.mrf.mxu0  ;;  %v2280_v47 = vadd.f32 %v3211_v59, %v2119_v7  ;;  %v3102_v41 = vadd.f32 %v3101_v27, %v3100_v31 }
 0x218   : > { %v3103_v6 = vpop.f32.mrf.mxu1 }
 0x219   : > { %v3219_v16 = vpop.f32.mrf.mxu0  ;;  %2672 = vst [vmem:[%s4194_s20 + $0x3b8] sm:$0xff] %v2280_v47  ;;  %v2124_v39 = vadd.f32 %v4458_v14, %v3102_v41 }
 0x21a   : > { %v3104_v11 = vpop.f32.mrf.mxu1  ;;  %v3220_v29 = vadd.f32 %v3219_v16, %v3218_v45 }
 0x21b   : > { %v3221_v43 = vpop.f32.mrf.mxu0  ;;  %v2285_v52 = vadd.f32 %v3214_v63, %v2124_v39  ;;  %v3105_v20 = vadd.f32 %v3104_v11, %v3103_v6 }
 0x21c   : > { %v3106_v24 = vpop.f32.mrf.mxu1 }
 0x21d   : > { %v3222_v21 = vpop.f32.mrf.mxu0  ;;  %2673 = vst [vmem:[%s4194_s20 + $0x3c0] sm:$0xff] %v2285_v52  ;;  %v2127_v30 = vadd.f32 %v4458_v14, %v3105_v20 }
 0x21e   : > { %v3107_v23 = vpop.f32.mrf.mxu1  ;;  %v3223_v5 = vadd.f32 %v3222_v21, %v3221_v43 }
 0x21f   : > { %v3224_v38 = vpop.f32.mrf.mxu0  ;;  %v2288_v3 = vadd.f32 %v3217_v48, %v2127_v30  ;;  %v3108_v13 = vadd.f32 %v3107_v23, %v3106_v24 }
 0x220   : > { %v3109_v18 = vpop.f32.mrf.mxu1 }
 0x221   : > { %v3225_v46 = vpop.f32.mrf.mxu0  ;;  %2674 = vst [vmem:[%s4194_s20 + $0x3c8] sm:$0xff] %v2288_v3  ;;  %v2132_v60 = vadd.f32 %v4458_v14, %v3108_v13 }
 0x222   : > { %v3110_v57 = vpop.f32.mrf.mxu1  ;;  %v3226_v35 = vadd.f32 %v3225_v46, %v3224_v38 }
 0x223   : > { %v3227_v26 = vpop.f32.mrf.mxu0  ;;  %v2293_v12 = vadd.f32 %v3220_v29, %v2132_v60  ;;  %v3111_v22 = vadd.f32 %v3110_v57, %v3109_v18 }
 0x224   : > { %v3112_v53 = vpop.f32.mrf.mxu1 }
 0x225   : > { %v3228_v33 = vpop.f32.mrf.mxu0  ;;  %2675 = vst [vmem:[%s4194_s20 + $0x3d0] sm:$0xff] %v2293_v12  ;;  %v2135_v17 = vadd.f32 %v4458_v14, %v3111_v22 }
 0x226   : > { %v3113_v50 = vpop.f32.mrf.mxu1  ;;  %v3229_v36 = vadd.f32 %v3228_v33, %v3227_v26 }
 0x227   : > { %v3230_v55 = vpop.f32.mrf.mxu0  ;;  %v2296_v0 = vadd.f32 %v3223_v5, %v2135_v17  ;;  %v3114_v62 = vadd.f32 %v3113_v50, %v3112_v53 }
 0x228   : > { %v3115_v9 = vpop.f32.mrf.mxu1 }
 0x229   : > { %2676 = vst [vmem:[%s4194_s20 + $0x3d8] sm:$0xff] %v2296_v0  ;;  %v2140_v32 = vadd.f32 %v4458_v14, %v3114_v62  ;;  %v3231_v51 = vpop.f32.mrf.mxu0 }
 0x22a   : > { %v3116_v19 = vpop.f32.mrf.mxu1  ;;  %v3232_v61 = vadd.f32 %v3231_v51, %v3230_v55 }
 0x22b   : > { %v2301_v1 = vadd.f32 %v3226_v35, %v2140_v32  ;;  %v3117_v28 = vadd.f32 %v3116_v19, %v3115_v9  ;;  %v3233_v54 = vpop.f32.mrf.mxu0 }
 0x22c   : > { %v3118_v34 = vpop.f32.mrf.mxu1 }
 0x22d   : > { %2677 = vst [vmem:[%s4194_s20 + $0x3e0] sm:$0xff] %v2301_v1  ;;  %v2143_v10 = vadd.f32 %v4458_v14, %v3117_v28  ;;  %v3234_v40 = vpop.f32.mrf.mxu0 }
 0x22e   : > { %v3119_v8 = vpop.f32.mrf.mxu1  ;;  %v3235_v2 = vadd.f32 %v3234_v40, %v3233_v54 }
 0x22f   : > { %v2304_v44 = vadd.f32 %v3229_v36, %v2143_v10  ;;  %v3120_v49 = vadd.f32 %v3119_v8, %v3118_v34 }
 0x230   : > { %v3121_v15 = vpop.f32.mrf.mxu1 }
 0x231   : > { %2678 = vst [vmem:[%s4194_s20 + $0x3e8] sm:$0xff] %v2304_v44  ;;  %v2148_v42 = vadd.f32 %v4458_v14, %v3120_v49 }
 0x232   : > { %v3122_v37 = vpop.f32.mrf.mxu1 }
 0x233   : > { %v2309_v56 = vadd.f32 %v3232_v61, %v2148_v42  ;;  %v3123_v25 = vadd.f32 %v3122_v37, %v3121_v15 }
 0x235   : > { %2679 = vst [vmem:[%s4194_s20 + $0x3f0] sm:$0xff] %v2309_v56  ;;  %v2151_v58 = vadd.f32 %v4458_v14, %v3123_v25 }
 0x237   : > { %v2312_v31 = vadd.f32 %v3235_v2, %v2151_v58 }
 0x239   : > { %2680 = vst [vmem:[%s4194_s20 + $0x3f8] sm:$0xff] %v2312_v31 }
 0x23a PF: > { %s15_s18 = sadd.s32 1, %s3396_s18  }
 0x23b   : > { %p12_p4 = scmp.ge.s32.totalorder %s15_s18, 4  }
 0x23d   :  { %14 = sbr.rel (!%p12_p4) target bundleno = 1 (0x1), region = 74 }

// kernel: up_style_block_forward.4
= control target key start
LH: loop header
LB: loop body
LE: loop exit
PB: predicated region body
PF: predicated region fallthrough
CT: control target
= control target key end

     0   :  { %s3747_s21 = smov 0   ;;  %s5205_s0 = inlined_call_operand.vmem [shape: bf16[2,16,16,128], index: 0, kind: input, shape index: {}]   ;;  %s5206_s1 = inlined_call_operand.vmem [shape: f32[1,128], index: 1, kind: input, shape index: {}]   ;;  %s5207_s2 = inlined_call_operand.vmem [shape: f32[1,128], index: 2, kind: input, shape index: {}]   ;;  %s5208_s3 = inlined_call_operand.vmem [shape: bf16[1152,128], index: 3, kind: input, shape index: {}]   ;;  %s5209_s4 = inlined_call_operand.vmem [shape: f32[1,128], index: 4, kind: input, shape index: {}]   ;;  %s5210_s5 = inlined_call_operand.vmem [shape: bf16[2,16,16,128], index: 5, kind: output, shape index: {0}]   ;;  %s5211_s6 = inlined_call_operand.vmem [shape: f32[2,2,128], index: 6, kind: output, shape index: {1}]  }
   0x1 LB: > { %s2748_s22 = sadd.s32 4294967295, %s3708_s21   ;;  %p2752_p0 = scmp.ge.s32.totalorder %s3708_s21, 1  ;;  %s3708_s21 = sphi %s3747_s21, %s17_s21  }
   0x2   : > { %p215_p1 = scmp.lt.s32.totalorder %s3708_s21, 3 }
   0x4   : > { %p216_p2 = pnand %p2752_p0, %p215_p1 }
   0x6   : > { %219 = sbr.rel (%p216_p2) target bundleno = 555 (0x22b), region = 40 }
   0xb   : > { %v3620_v0 = vld [vmem:[%s5208_s3 + $0x78] sm:$0xff]   ;;  %v3622_v2 = vld [vmem:[%s5208_s3 + $0x70] sm:$0xff]   ;;  %p3766_p3 = scmp.lt.s32.totalorder %s2748_s22, 1  ;;  %v3710_v3 = vmov 0.0   ;;  %v3624_v5 = vld [vmem:[%s5208_s3 + $0x68] sm:$0xff]   ;;  %vm709_vm9 = vcmask 1046528  }
   0xc   : > { %v3621_v1 = vld [vmem:[%s5208_s3 + $0x38] sm:$0xff]   ;;  %3075 = vmatprep.subr.bf16.mxu0 %v3620_v0  ;;  %3595 = vmatprep.subr.bf16.mxu1 %v3620_v0  ;;  %505 = vst [vmem:[#allocation2 + $0x18] sm:$0xff] %v3710_v3  ;;  %506 = vst [vmem:[#allocation2 + $0x20] sm:$0xff] %v3710_v3  ;;  %v3623_v4 = vld [vmem:[%s5208_s3 + $0x30] sm:$0xff]  }
   0xd   : > { %507 = vst [vmem:[#allocation2 + $0x28] sm:$0x3] %v3710_v3  ;;  %502 = vst [vmem:[#allocation2] sm:$0xff] %v3710_v3  ;;  %3076 = vmatpush3.bf16.msra.mxu0 %v3621_v1  ;;  %3603 = vmatpush3.bf16.msra.mxu1 %v3621_v1  ;;  %s5274_s22 = smov (!%p3766_p3, %s2748_s22), 1  ;;  %v3625_v6 = vld [vmem:[%s5208_s3 + $0x28] sm:$0xff]   ;;  %v3626_v7 = vld [vmem:[%s5208_s3 + $0x60] sm:$0xff]  }
   0xe   : > { %504 = vst [vmem:[#allocation2 + $0x10] sm:$0x3] %v3710_v3  ;;  %508 = vst [vmem:[#allocation2 + $0x30] sm:$0xff] %v3710_v3  ;;  %3077 = vmatprep.subr.bf16.mxu0 %v3622_v2  ;;  %3596 = vmatprep.subr.bf16.mxu1 %v3622_v2  ;;  %s2867_s14 = sshll.u32 %s5274_s22, 7  ;;  %v3627_v8 = vld [vmem:[%s5208_s3 + $0x20] sm:$0xff]   ;;  %v3628_v9 = vld [vmem:[%s5208_s3 + $0x58] sm:$0xff]  }
   0xf   : > { %509 = vst [vmem:[#allocation2 + $0x38] sm:$0xff] %v3710_v3  ;;  %510 = vst [vmem:[#allocation2 + $0x40] sm:$0x3] %v3710_v3  ;;  %s3851_s23 = scalar_lea.vmem %s5205_s0, %s2867_s14  ;;  %v3629_v10 = vld [vmem:[%s5208_s3 + $0x18] sm:$0xff]   ;;  %v3630_v11 = vld [vmem:[%s5208_s3 + $0x50] sm:$0xff]   ;;  %s5105_s11 = scalar_lea.vmem %s5210_s5, %s2867_s14 }
  0x10   : > { %511 = vst [vmem:[#allocation2 + $0x48] sm:$0xff] %v3710_v3  ;;  %512 = vst [vmem:[#allocation2 + $0x50] sm:$0xff] %v3710_v3  ;;  %v2902_v12 = vld [vmem:[%s3851_s23] sm:$0xff]   ;;  %v3055_v17 = vld [vmem:[%s3851_s23 + $0x58] sm:$0xff]   ;;  %s2757_s14 = sshll.u32 %s5274_s22, 1 }
  0x11   : > { %513 = vst [vmem:[#allocation2 + $0x58] sm:$0x3] %v3710_v3  ;;  %514 = vst [vmem:[#allocation2 + $0x60] sm:$0xff] %v3710_v3  ;;  %3078 = vmatpush3.bf16.msra.mxu0 %v3623_v4  ;;  %3604 = vmatpush3.bf16.msra.mxu1 %v3623_v4  ;;  %v3863_v13 = vld [vmem:[%s5206_s1] ss:$0 sm:$0xff]  ;;  %v2903_v14 = vunpack.c.l.bf16 %v2902_v12  ;;  %v2904_v15 = vunpack.c.h.bf16 %v2902_v12  ;;  %v2947_v21 = vunpack.c.l.bf16 %v3055_v17  ;;  %v2948_v22 = vunpack.c.h.bf16 %v3055_v17  ;;  %v3631_v23 = vld [vmem:[%s5208_s3 + $0x10] sm:$0xff]   ;;  %s262_s15 = scalar_lea.vmem %s5211_s6, %s2757_s14 }
  0x12   : > { %515 = vst [vmem:[#allocation2 + $0x68] sm:$0xff] %v3710_v3  ;;  %516 = vst [vmem:[#allocation2 + $0x70] sm:$0x3] %v3710_v3  ;;  %3079 = vmatprep.subr.bf16.mxu0 %v3624_v5  ;;  %3597 = vmatprep.subr.bf16.mxu1 %v3624_v5  ;;  %v3056_v16 = vld [vmem:[%s3851_s23 + $0x60] sm:$0xff]   ;;  %v3632_v26 = vld [vmem:[%s5208_s3 + $0x48] sm:$0xff]  }
  0x13   : > { %517 = vst [vmem:[#allocation2 + $0x78] sm:$0xff] %v3710_v3  ;;  %518 = vst [vmem:[#allocation2 + $0x80] sm:$0xff] %v3710_v3  ;;  %v3870_v18 = vld [vmem:[%s5207_s2] ss:$0 sm:$0xff]  ;;  %v2951_v19 = vunpack.c.l.bf16 %v3056_v16  ;;  %v2952_v20 = vunpack.c.h.bf16 %v3056_v16  ;;  %v335_v24 = vmul.f32 %v2903_v14, %v3863_v13  ;;  %v336_v25 = vmul.f32 %v2904_v15, %v3863_v13  ;;  %v3633_v30 = vld [vmem:[%s5208_s3 + $0x8] sm:$0xff]  }
  0x14   : > { %519 = vst [vmem:[#allocation2 + $0x88] sm:$0x3] %v3710_v3  ;;  %520 = vst [vmem:[#allocation2 + $0x90] sm:$0xff] %v3710_v3  ;;  %v357_v29 = vmul.f32 %v2947_v21, %v3863_v13  ;;  %v358_v33 = vmul.f32 %v2948_v22, %v3863_v13  ;;  %v3634_v34 = vld [vmem:[%s5208_s3 + $0x40] sm:$0xff]   ;;  %v3045_v46 = vld [vmem:[%s3851_s23 + $0x8] sm:$0xff]  }
  0x15   : > { %521 = vst [vmem:[#allocation2 + $0x98] sm:$0xff] %v3710_v3  ;;  %522 = vst [vmem:[#allocation2 + $0xa0] sm:$0x3] %v3710_v3  ;;  %3080 = vmatpush3.bf16.msra.mxu0 %v3625_v6  ;;  %3605 = vmatpush3.bf16.msra.mxu1 %v3625_v6  ;;  %v359_v27 = vmul.f32 %v2951_v19, %v3863_v13  ;;  %v360_v28 = vmul.f32 %v2952_v20, %v3863_v13  ;;  %v3635_v42 = vld [vmem:[%s5208_s3] sm:$0xff]   ;;  %v3636_v50 = vld [vmem:[%s5208_s3 + $0xf8] sm:$0xff]   ;;  %v2907_v51 = vunpack.c.l.bf16 %v3045_v46 }
  0x16   : > { %523 = vst [vmem:[#allocation2 + $0xa8] sm:$0xff] %v3710_v3  ;;  %524 = vst [vmem:[#allocation2 + $0xb0] sm:$0xff] %v3710_v3  ;;  %3081 = vmatprep.subr.bf16.mxu0 %v3626_v7  ;;  %3598 = vmatprep.subr.bf16.mxu1 %v3626_v7  ;;  %v374_v31 = vadd.f32 %v3870_v18, %v335_v24  ;;  %v375_v32 = vadd.f32 %v3870_v18, %v336_v25  ;;  %v3057_v52 = vld [vmem:[%s3851_s23 + $0x68] sm:$0xff]   ;;  %v3637_v54 = vld [vmem:[%s5208_s3 + $0x178] sm:$0xff]   ;;  %v2908_v55 = vunpack.c.h.bf16 %v3045_v46 }
  0x17   : > { %525 = vst [vmem:[#allocation2 + $0xb8] sm:$0x3] %v3710_v3  ;;  %526 = vst [vmem:[#allocation2 + $0xc0] sm:$0xff] %v3710_v3  ;;  %v398_v35 = vadd.f32 %v3870_v18, %v359_v27  ;;  %v399_v36 = vadd.f32 %v3870_v18, %v360_v28  ;;  %v396_v37 = vadd.f32 %v3870_v18, %v357_v29  ;;  %v2955_v56 = vunpack.c.l.bf16 %v3057_v52  ;;  %v3639_v12 = vld [vmem:[%s5208_s3 + $0x138] sm:$0xff]   ;;  %v3645_v16 = vld [vmem:[%s5208_s3 + $0x170] sm:$0xff]  }
  0x18   : > { %527 = vst [vmem:[#allocation2 + $0xc8] sm:$0xff] %v3710_v3  ;;  %528 = vst [vmem:[#allocation2 + $0xd0] sm:$0x3] %v3710_v3  ;;  %vm406_vm0 = vcmp.ge.f32.partialorder %v374_v31, 0.0  ;;  %vm407_vm1 = vcmp.ge.f32.partialorder %v375_v32, 0.0  ;;  %v397_v45 = vadd.f32 %v3870_v18, %v358_v33  ;;  %v337_v58 = vmul.f32 %v2907_v51, %v3863_v13  ;;  %v3638_v15 = vld [vmem:[%s5208_s3 + $0xb8] sm:$0xff]  }
  0x19   : > { %529 = vst [vmem:[#allocation2 + $0xd8] sm:$0xff] %v3710_v3  ;;  %530 = vst [vmem:[#allocation2 + $0xe0] sm:$0xff] %v3710_v3  ;;  %3082 = vmatpush3.bf16.msra.mxu0 %v3627_v8  ;;  %3606 = vmatpush3.bf16.msra.mxu1 %v3627_v8  ;;  %v438_v38 = vmul.f32 0.01, %v374_v31  ;;  %v439_v39 = vmul.f32 0.01, %v375_v32  ;;  %v2956_v59 = vunpack.c.h.bf16 %v3057_v52  ;;  %v338_v61 = vmul.f32 %v2908_v55, %v3863_v13 }
  0x1a   : > { %531 = vst [vmem:[#allocation2 + $0xe8] sm:$0x3] %v3710_v3  ;;  %532 = vst [vmem:[#allocation2 + $0xf0] sm:$0xff] %v3710_v3  ;;  %3083 = vmatprep.subr.bf16.mxu0 %v3628_v9  ;;  %3599 = vmatprep.subr.bf16.mxu1 %v3628_v9  ;;  %vm430_vm2 = vcmp.ge.f32.partialorder %v398_v35, 0.0  ;;  %vm431_vm3 = vcmp.ge.f32.partialorder %v399_v36, 0.0  ;;  %vm428_vm4 = vcmp.ge.f32.partialorder %v396_v37, 0.0  ;;  %v361_v62 = vmul.f32 %v2955_v56, %v3863_v13 }
  0x1b   : > { %533 = vst [vmem:[#allocation2 + $0xf8] sm:$0xff] %v3710_v3  ;;  %534 = vst [vmem:[#allocation2 + $0x100] sm:$0x3] %v3710_v3  ;;  %v462_v40 = vmul.f32 0.01, %v398_v35  ;;  %v470_v43 = vsel %vm406_vm0, %v374_v31, %v438_v38  ;;  %v471_v44 = vsel %vm407_vm1, %v375_v32, %v439_v39  ;;  %vm429_vm5 = vcmp.ge.f32.partialorder %v397_v45, 0.0 }
  0x1c   : > { %535 = vst [vmem:[#allocation2 + $0x108] sm:$0xff] %v3710_v3  ;;  %536 = vst [vmem:[#allocation2 + $0x110] sm:$0xff] %v3710_v3  ;;  %v463_v41 = vmul.f32 0.01, %v399_v36  ;;  %v460_v49 = vmul.f32 0.01, %v396_v37  ;;  %v376_v63 = vadd.f32 %v3870_v18, %v337_v58  ;;  %v362_v0 = vmul.f32 %v2956_v59, %v3863_v13 }
  0x1d   : > { %537 = vst [vmem:[#allocation2 + $0x118] sm:$0x3] %v3710_v3  ;;  %538 = vst [vmem:[#allocation2 + $0x120] sm:$0xff] %v3710_v3  ;;  %3084 = vmatpush3.bf16.msra.mxu0 %v3629_v10  ;;  %3607 = vmatpush3.bf16.msra.mxu1 %v3629_v10  ;;  %v494_v47 = vsel %vm430_vm2, %v398_v35, %v462_v40  ;;  %v461_v53 = vmul.f32 0.01, %v397_v45  ;;  %v377_v1 = vadd.f32 %v3870_v18, %v338_v61  ;;  %v3046_v17 = vld [vmem:[%s3851_s23 + $0x10] sm:$0xff]  }
  0x1e   : > { %539 = vst [vmem:[#allocation2 + $0x128] sm:$0xff] %v3710_v3  ;;  %540 = vst [vmem:[#allocation2 + $0x130] sm:$0x3] %v3710_v3  ;;  %3085 = vmatprep.subr.bf16.mxu0 %v3630_v11  ;;  %3600 = vmatprep.subr.bf16.mxu1 %v3630_v11  ;;  %v495_v48 = vsel %vm431_vm3, %v399_v36, %v463_v41  ;;  %v492_v57 = vsel %vm428_vm4, %v396_v37, %v460_v49  ;;  %v440_v2 = vmul.f32 0.01, %v376_v63  ;;  %v3058_v22 = vld [vmem:[%s3851_s23 + $0x70] sm:$0xff]  }
  0x1f   : > { %541 = vst [vmem:[#allocation2 + $0x138] sm:$0xff] %v3710_v3  ;;  %542 = vst [vmem:[#allocation2 + $0x140] sm:$0xff] %v3710_v3  ;;  %v493_v60 = vsel %vm429_vm5, %v397_v45, %v461_v53  ;;  %v400_v4 = vadd.f32 %v3870_v18, %v361_v62  ;;  %vm408_vm6 = vcmp.ge.f32.partialorder %v376_v63, 0.0  ;;  %vm409_vm7 = vcmp.ge.f32.partialorder %v377_v1, 0.0  ;;  %v3647_v31 = vld [vmem:[%s5208_s3 + $0x130] sm:$0xff]   ;;  %v3642_v40 = vld [vmem:[%s5208_s3 + $0xe8] sm:$0xff]  }
  0x20   : > { %543 = vst [vmem:[#allocation2 + $0x148] sm:$0x3] %v3710_v3  ;;  %544 = vst [vmem:[#allocation2 + $0x150] sm:$0xff] %v3710_v3  ;;  %v441_v7 = vmul.f32 0.01, %v377_v1  ;;  %v401_v8 = vadd.f32 %v3870_v18, %v362_v0  ;;  %v472_v20 = vsel %vm408_vm6, %v376_v63, %v440_v2  ;;  %v2911_v33 = vunpack.c.l.bf16 %v3046_v17  ;;  %v3641_v36 = vld [vmem:[%s5208_s3 + $0xb0] sm:$0xff]  }
  0x21   : > { %545 = vst [vmem:[#allocation2 + $0x158] sm:$0xff] %v3710_v3  ;;  %546 = vst [vmem:[#allocation2 + $0x160] sm:$0x3] %v3710_v3  ;;  %3086 = vmatpush3.bf16.msra.mxu0 %v3631_v23  ;;  %3608 = vmatpush3.bf16.msra.mxu1 %v3631_v23  ;;  %vm432_vm8 = vcmp.ge.f32.partialorder %v400_v4, 0.0  ;;  %v3711_v23 = vmov 0.0|0.0   ;;  %v2959_v35 = vunpack.c.l.bf16 %v3058_v22  ;;  %v2960_v38 = vunpack.c.h.bf16 %v3058_v22  ;;  %v3653_v55 = vld [vmem:[%s5208_s3 + $0x168] sm:$0xff]  }
  0x22   : > { %547 = vst [vmem:[#allocation2 + $0x168] sm:$0xff] %v3710_v3  ;;  %548 = vst [vmem:[#allocation2 + $0x170] sm:$0xff] %v3710_v3  ;;  %3087 = vmatprep.subr.bf16.mxu0 %v3632_v26  ;;  %3601 = vmatprep.subr.bf16.mxu1 %v3632_v26  ;;  %v473_v21 = vsel %vm409_vm7, %v377_v1, %v441_v7  ;;  %v3640_v26 = vld [vmem:[%s5208_s3 + $0xf0] sm:$0xff]   ;;  %vm433_vm10 = vcmp.ge.f32.partialorder %v401_v8, 0.0  ;;  %v464_v27 = vmul.f32 0.01, %v400_v4 }
  0x23   : > { %549 = vst [vmem:[#allocation2 + $0x178] sm:$0x3] %v3710_v3  ;;  %550 = vst [vmem:[#allocation2 + $0x180] sm:$0xff] %v3710_v3  ;;  %v339_v41 = vmul.f32 %v2911_v33, %v3863_v13  ;;  %v364_v45 = vmul.f32 %v2960_v38, %v3863_v13  ;;  %v3655_v63 = vld [vmem:[%s5208_s3 + $0x128] sm:$0xff]   ;;  %v3048_v22 = vld [vmem:[%s3851_s23 + $0x20] sm:$0xff]  }
  0x24   : > { %551 = vst [vmem:[#allocation2 + $0x188] sm:$0xff] %v3710_v3  ;;  %552 = vst [vmem:[#allocation2 + $0x190] sm:$0x3] %v3710_v3  ;;  %v496_v32 = vsel %vm432_vm8, %v400_v4, %v464_v27  ;;  %v2919_v27 = vunpack.c.l.bf16 %v3048_v22  ;;  %v3649_v33 = vld [vmem:[%s5208_s3 + $0x98] sm:$0xff]   ;;  %v3650_v38 = vld [vmem:[%s5208_s3 + $0xd0] sm:$0xff]  }
  0x25   : > { %555 = vst [vmem:[#allocation2 + $0x1a8] sm:$0x3] %v3710_v3  ;;  %557 = vst [vmem:[#allocation2 + $0x19] sm:$0xff] %v470_v43  ;;  %3088 = vmatpush3.bf16.msra.mxu0 %v3633_v30  ;;  %3609 = vmatpush3.bf16.msra.mxu1 %v3633_v30  ;;  %v465_v30 = vmul.f32 0.01, %v401_v8  ;;  %v363_v43 = vmul.f32 %v2959_v35, %v3863_v13  ;;  %v378_v49 = vadd.f32 %v3870_v18, %v339_v41 }
  0x26   : > { %558 = vst [vmem:[#allocation2 + $0x21] sm:$0xff] %v471_v44  ;;  %581 = vst [vmem:[#allocation2 + $0x139] sm:$0xff] %v494_v47  ;;  %3089 = vmatprep.subr.bf16.mxu0 %v3634_v34  ;;  %3602 = vmatprep.subr.bf16.mxu1 %v3634_v34  ;;  %v2912_v34 = vunpack.c.h.bf16 %v3046_v17  ;;  %v3047_v44 = vld [vmem:[%s3851_s23 + $0x18] sm:$0xff]   ;;  %v403_v58 = vadd.f32 %v3870_v18, %v364_v45 }
  0x27   : > { %582 = vst [vmem:[#allocation2 + $0x141] sm:$0xff] %v495_v48  ;;  %579 = vst [vmem:[#allocation2 + $0x121] sm:$0xff] %v492_v57  ;;  %v497_v37 = vsel %vm433_vm10, %v401_v8, %v465_v30  ;;  %v2915_v46 = vunpack.c.l.bf16 %v3047_v44  ;;  %v2916_v47 = vunpack.c.h.bf16 %v3047_v44  ;;  %v3059_v48 = vld [vmem:[%s3851_s23 + $0x78] sm:$0xff]   ;;  %v402_v51 = vadd.f32 %v3870_v18, %v363_v43  ;;  %v3643_v57 = vld [vmem:[%s5208_s3 + $0xa8] sm:$0xff]  }
  0x28   : > { %580 = vst [vmem:[#allocation2 + $0x129] sm:$0xff] %v493_v60  ;;  %559 = vst [vmem:[#allocation2 + $0x31] sm:$0xff] %v472_v20  ;;  %v2963_v59 = vunpack.c.l.bf16 %v3059_v48  ;;  %v3644_v60 = vld [vmem:[%s5208_s3 + $0xe0] sm:$0xff]   ;;  %vm410_vm11 = vcmp.ge.f32.partialorder %v378_v49, 0.0  ;;  %v442_v61 = vmul.f32 0.01, %v378_v49  ;;  %v2964_v4 = vunpack.c.h.bf16 %v3059_v48 }
  0x29   : > { %3090 = vmatpush3.bf16.msra.mxu0 %v3635_v42  ;;  %3610 = vmatpush3.bf16.msra.mxu1 %v3635_v42  ;;  %560 = vst [vmem:[#allocation2 + $0x39] sm:$0xff] %v473_v21  ;;  %583 = vst [vmem:[#allocation2 + $0x151] sm:$0xff] %v496_v32  ;;  %v340_v42 = vmul.f32 %v2912_v34, %v3863_v13  ;;  %v342_v62 = vmul.f32 %v2916_v47, %v3863_v13  ;;  %vm434_vm13 = vcmp.ge.f32.partialorder %v402_v51, 0.0  ;;  %v3646_v8 = vld [vmem:[%s5208_s3 + $0xa0] sm:$0xff]   ;;  %v3651_v47 = vld [vmem:[%s5208_s3 + $0x90] sm:$0xff]  }
  0x2a   : > { %3187 = vmatprep.subr.bf16.mxu1 %v3636_v50  ;;  %3299 = vmatprep.subr.bf16.mxu0 %v3637_v54  ;;  %584 = vst [vmem:[#allocation2 + $0x159] sm:$0xff] %v497_v37  ;;  %v341_v54 = vmul.f32 %v2915_v46, %v3863_v13  ;;  %vm435_vm14 = vcmp.ge.f32.partialorder %v403_v58, 0.0  ;;  %v2920_v32 = vunpack.c.h.bf16 %v3048_v22  ;;  %v343_v37 = vmul.f32 %v2919_v27, %v3863_v13  ;;  %v3657_v27 = vld [vmem:[%s5208_s3 + $0x80] sm:$0xff]  }
  0x2b   : > { %v379_v50 = vadd.f32 %v3870_v18, %v340_v42  ;;  %v381_v21 = vadd.f32 %v3870_v18, %v342_v62  ;;  %v3661_v62 = vld [vmem:[%s5208_s3 + $0x120] sm:$0xff]  }
  0x2c   : > { %v3915_v5 = vld [vmem:[#allocation2 + $0x18] sm:$0xff]  ;;  %v380_v2 = vadd.f32 %v3870_v18, %v341_v54  ;;  %v344_v41 = vmul.f32 %v2920_v32, %v3863_v13  ;;  %v382_v48 = vadd.f32 %v3870_v18, %v343_v37 }
  0x2d   : > { %v3917_v6 = vld [vmem:[#allocation2 + $0x20] sm:$0xff]  ;;  %v3924_v10 = vld [vmem:[#allocation2 + $0x138] sm:$0xff]  ;;  %vm411_vm12 = vcmp.ge.f32.partialorder %v379_v50, 0.0  ;;  %v443_v1 = vmul.f32 0.01, %v379_v50  ;;  %vm413_vm0 = vcmp.ge.f32.partialorder %v381_v21, 0.0 }
  0x2e   : > { %v3922_v9 = vpack.c.bf16 %v3917_v6, %v3915_v5  ;;  %v3926_v11 = vld [vmem:[#allocation2 + $0x140] sm:$0xff]  ;;  %vm412_vm15 = vcmp.ge.f32.partialorder %v380_v2, 0.0  ;;  %v775_v44 = vrot.slane %v3924_v10, 1  ;;  %vm414_vm3 = vcmp.ge.f32.partialorder %v382_v48, 0.0  ;;  %v4110_v32 = vld [vmem:[#allocation2 + $0x28] sm:$0x3] }
  0x2f   : > { %v3933_v14 = vpack.c.bf16 %v3926_v11, %v3924_v10  ;;  %v625_v19 = vld [vmem:[#allocation2 + $0x120] sm:$0xff]  ;;  %v3945_v24 = vld [vmem:[#allocation2 + $0x128] sm:$0xff]  ;;  %v3979_v52 = vld [vmem:[#allocation2 + $0x30] sm:$0xff]  ;;  %v475_v17 = vsel %vm411_vm12, %v379_v50, %v443_v1  ;;  %v5214_v45 = vrot.slane %v3926_v11, 1 }
  0x30   : > { %1620 = vmatprep.mubr.bf16.mxu0 %v3922_v9  ;;  %v770_v25 = vrot.slane %v625_v19, 1  ;;  %v3951_v28 = vpack.c.bf16 %v3945_v24, %v625_v19  ;;  %v5215_v29 = vrot.slane %v3945_v24, 1  ;;  %v3981_v53 = vld [vmem:[#allocation2 + $0x38] sm:$0xff]  ;;  %v4003_v0 = vld [vmem:[#allocation2 + $0x150] sm:$0xff]  ;;  %562 = vst [vmem:[#allocation2 + $0x51] sm:$0xff] %v475_v17  ;;  %v3660_v10 = vld [vmem:[%s5208_s3 + $0x160] sm:$0xff]  }
  0x31   : > { %5223 = vst [vmem:[#allocation3_spill] sm:$0xff] %v3933_v14  ;;  %1716 = vmatprep.mubr.bf16.mxu1 %v3933_v14  ;;  %1621 = vmatmul.mubr.bf16.vlgmr.msra.gmra.mxu0 %v3711_v23  ;;  %v3989_v56 = vpack.c.bf16 %v3981_v53, %v3979_v52  ;;  %v4006_v7 = vld [vmem:[#allocation2 + $0x158] sm:$0xff]  ;;  %v467_v19 = vmul.f32 0.01, %v403_v58  ;;  %v444_v23 = vmul.f32 0.01, %v380_v2 }
  0x32   : > { %3300 = vmatpush3.bf16.msra.mxu0 %v3639_v12  ;;  %1717 = vmatmul.mubr.bf16.vlgmr.msra.gmra.mxu1 %v3951_v28  ;;  %v3965_v39 = vsel %vm709_vm9, %v770_v25, %v5215_v29  ;;  %v474_v12 = vsel %vm410_vm11, %v378_v49, %v442_v61  ;;  %v365_v25 = vmul.f32 %v2963_v59, %v3863_v13  ;;  %v3654_v59 = vld [vmem:[%s5208_s3 + $0x88] sm:$0xff]   ;;  %v591_v61 = vld [vmem:[#allocation2 + $0x10] sm:$0x3] }
  0x33   : > { %3301 = vmatprep.subr.bf16.mxu0 %v3645_v16  ;;  %3188 = vmatpush3.bf16.msra.mxu1 %v3638_v15  ;;  %v466_v15 = vmul.f32 0.01, %v402_v51  ;;  %v4014_v16 = vpack.c.bf16 %v4006_v7, %v4003_v0  ;;  %561 = vst [vmem:[#allocation2 + $0x49] sm:$0xff] %v474_v12  ;;  %v499_v30 = vsel %vm435_vm14, %v403_v58, %v467_v19  ;;  %v3652_v58 = vld [vmem:[%s5208_s3 + $0xc8] sm:$0xff]   ;;  %v5212_v12 = vrot.slane %v4006_v7, 1  ;;  %v3050_v19 = vld [vmem:[%s3851_s23 + $0x30] sm:$0xff]  }
  0x34   : > { %3189 = vmatprep.subr.bf16.mxu1 %v3640_v26  ;;  %1628 = vmatprep.mubr.bf16.mxu0 %v3989_v56  ;;  %v366_v26 = vmul.f32 %v2964_v4, %v3863_v13  ;;  %586 = vst [vmem:[#allocation2 + $0x171] sm:$0xff] %v499_v30  ;;  %v476_v34 = vsel %vm412_vm15, %v380_v2, %v444_v23  ;;  %v3049_v2 = vld [vmem:[%s3851_s23 + $0x28] sm:$0xff]   ;;  %v713_v23 = vrot.slane %v591_v61, 1  ;;  %v3666_v61 = vld [vmem:[%s5208_s3 + $0x150] sm:$0xff]  }
  0x35   : > { %5224 = vst [vmem:[#allocation4_spill] sm:$0xff] %v4014_v16  ;;  %v498_v20 = vsel %vm434_vm13, %v402_v51, %v466_v15  ;;  %1724 = vmatprep.mubr.bf16.mxu1 %v4014_v16  ;;  %v404_v35 = vadd.f32 %v3870_v18, %v365_v25  ;;  %563 = vst [vmem:[#allocation2 + $0x61] sm:$0xff] %v476_v34  ;;  %v383_v49 = vadd.f32 %v3870_v18, %v344_v41 }
  0x36   : > { %3302 = vmatpush3.bf16.msra.mxu0 %v3647_v31  ;;  %585 = vst [vmem:[#allocation2 + $0x169] sm:$0xff] %v498_v20  ;;  %v445_v31 = vmul.f32 0.01, %v381_v21  ;;  %v4075_v4 = vsel %vm709_vm9, %v775_v44, %v5214_v45  ;;  %v4089_v20 = vrot.slane %v3710_v3, 1  ;;  %v2923_v25 = vunpack.c.l.bf16 %v3049_v2  ;;  %v4369_v45 = vld [vmem:[#allocation2 + $0x160] sm:$0x3] }
  0x37   : > { %3190 = vmatpush3.bf16.msra.mxu1 %v3641_v36  ;;  %3303 = vmatprep.subr.bf16.mxu0 %v3653_v55  ;;  %v405_v36 = vadd.f32 %v3870_v18, %v366_v26  ;;  %vm436_vm1 = vcmp.ge.f32.partialorder %v404_v35, 0.0  ;;  %v468_v42 = vmul.f32 0.01, %v404_v35  ;;  %vm415_vm4 = vcmp.ge.f32.partialorder %v383_v49, 0.0  ;;  %v3662_v26 = vld [vmem:[%s5208_s3 + $0x158] sm:$0xff]  }
  0x38   : > { %3191 = vmatprep.subr.bf16.mxu1 %v3642_v40  ;;  %v477_v40 = vsel %vm413_vm0, %v381_v21, %v445_v31  ;;  %v447_v1 = vmul.f32 0.01, %v383_v49  ;;  %v2924_v30 = vunpack.c.h.bf16 %v3049_v2  ;;  %v345_v31 = vmul.f32 %v2923_v25, %v3863_v13 }
  0x39   : > { %1629 = vmatmul.mubr.bf16.gmra.mxu0 %v3922_v9  ;;  %v3648_v9 = vld [vmem:[%s5208_s3 + $0xd8] sm:$0xff]   ;;  %564 = vst [vmem:[#allocation2 + $0x69] sm:$0xff] %v477_v40  ;;  %vm437_vm2 = vcmp.ge.f32.partialorder %v405_v36, 0.0  ;;  %v469_v43 = vmul.f32 0.01, %v405_v36  ;;  %v500_v51 = vsel %vm436_vm1, %v404_v35, %v468_v42  ;;  %v2928_v34 = vunpack.c.h.bf16 %v3050_v19 }
  0x3a   : > { %3304 = vmatpush3.bf16.msra.mxu0 %v3655_v63  ;;  %1725 = vmatmul.mubr.bf16.gmra.mxu1 %v3933_v14  ;;  %v4041_v46 = vld [vmem:[#allocation2 + $0x48] sm:$0xff]  ;;  %v4048_v50 = vld [vmem:[#allocation2 + $0x50] sm:$0xff]  ;;  %587 = vst [vmem:[#allocation2 + $0x181] sm:$0xff] %v500_v51  ;;  %v479_v22 = vsel %vm415_vm4, %v383_v49, %v447_v1  ;;  %v346_v37 = vmul.f32 %v2924_v30, %v3863_v13  ;;  %v3658_v42 = vld [vmem:[%s5208_s3 + $0x1f8] sm:$0xff]   ;;  %v715_v44 = vrot.slane %v3915_v5, 1  ;;  %v718_v51 = vrot.slane %v4110_v32, 1 }
  0x3b   : > { %3192 = vmatpush3.bf16.msra.mxu1 %v3643_v57  ;;  %v501_v54 = vsel %vm437_vm2, %v405_v36, %v469_v43  ;;  %v4055_v55 = vpack.c.bf16 %v4048_v50, %v4041_v46  ;;  %3305 = vmatprep.subr.bf16.mxu0 %v3660_v10  ;;  %566 = vst [vmem:[#allocation2 + $0x81] sm:$0xff] %v479_v22  ;;  %v3664_v43 = vld [vmem:[%s5208_s3 + $0x118] sm:$0xff]   ;;  %v4167_v30 = vld [vmem:[#allocation2 + $0x40] sm:$0x3]  ;;  %vm860_vm2 = vcmask 1045504  }
  0x3c   : > { %3193 = vmatprep.subr.bf16.mxu1 %v3644_v60  ;;  %588 = vst [vmem:[#allocation2 + $0x189] sm:$0xff] %v501_v54  ;;  %v446_v60 = vmul.f32 0.01, %v382_v48  ;;  %v4084_v17 = vld [vmem:[#allocation2 + $0x60] sm:$0xff]  ;;  %v714_v41 = vsel %vm709_vm9, %v4089_v20, %v713_v23  ;;  %v385_v49 = vadd.f32 %v3870_v18, %v346_v37  ;;  %v348_v10 = vmul.f32 %v2928_v34, %v3863_v13 }
  0x3d   : > { %v4057_v57 = vld [vmem:[#allocation2 + $0x168] sm:$0xff]  ;;  %1636 = vmatprep.mubr.bf16.mxu0 %v4055_v55  ;;  %v4069_v63 = vld [vmem:[#allocation2 + $0x170] sm:$0xff] }
  0x3e   : > { %v4081_v15 = vpack.c.bf16 %v4069_v63, %v4057_v57  ;;  %3306 = vmatpush3.bf16.msra.mxu0 %v3661_v62  ;;  %vm417_vm6 = vcmp.ge.f32.partialorder %v385_v49, 0.0  ;;  %v449_v1 = vmul.f32 0.01, %v385_v49  ;;  %v387_v23 = vadd.f32 %v3870_v18, %v348_v10 }
  0x3f   : > { %3194 = vmatpush3.bf16.msra.mxu1 %v3646_v8  ;;  %v780_v8 = vrot.slane %v4003_v0, 1  ;;  %v3656_v0 = vld [vmem:[%s5208_s3 + $0xc0] sm:$0xff]   ;;  %3307 = vmatprep.subr.bf16.mxu0 %v3662_v26 }
  0x40   : > { %3195 = vmatprep.subr.bf16.mxu1 %v3648_v9  ;;  %5225 = vst [vmem:[#allocation5_spill] sm:$0xff] %v4081_v15  ;;  %v478_v9 = vsel %vm414_vm3, %v382_v48, %v446_v60  ;;  %v4091_v21 = vld [vmem:[#allocation2 + $0x68] sm:$0xff]  ;;  %1732 = vmatprep.mubr.bf16.mxu1 %v4081_v15  ;;  %v384_v48 = vadd.f32 %v3870_v18, %v345_v31  ;;  %v3052_v26 = vld [vmem:[%s3851_s23 + $0x40] sm:$0xff]   ;;  %vm419_vm8 = vcmp.ge.f32.partialorder %v387_v23, 0.0  ;;  %v451_v37 = vmul.f32 0.01, %v387_v23 }
  0x41   : > { %1637 = vmatmul.mubr.bf16.gmra.mxu0 %v3989_v56  ;;  %565 = vst [vmem:[#allocation2 + $0x79] sm:$0xff] %v478_v9  ;;  %v4103_v3 = vpack.c.bf16 %v4091_v21, %v4084_v17  ;;  %v4113_v35 = vld [vmem:[#allocation2 + $0x180] sm:$0xff]  ;;  %v3667_v9 = vld [vmem:[%s5208_s3 + $0x110] sm:$0xff]   ;;  %v481_v22 = vsel %vm417_vm6, %v385_v49, %v449_v1  ;;  %v2935_v34 = vunpack.c.l.bf16 %v3052_v26  ;;  %v721_v49 = vrot.slane %v3981_v53, 1 }
  0x42   : > { %1733 = vmatmul.mubr.bf16.gmra.mxu1 %v4014_v16  ;;  %vm416_vm5 = vcmp.ge.f32.partialorder %v384_v48, 0.0  ;;  %v448_v60 = vmul.f32 0.01, %v384_v48  ;;  %3308 = vmatpush3.bf16.msra.mxu0 %v3664_v43  ;;  %568 = vst [vmem:[#allocation2 + $0x99] sm:$0xff] %v481_v22 }
  0x43   : > { %3196 = vmatpush3.bf16.msra.mxu1 %v3649_v33  ;;  %v2927_v33 = vunpack.c.l.bf16 %v3050_v19  ;;  %1644 = vmatprep.mubr.bf16.mxu0 %v4103_v3  ;;  %v4115_v36 = vld [vmem:[#allocation2 + $0x188] sm:$0xff] }
  0x44   : > { %3197 = vmatprep.subr.bf16.mxu1 %v3650_v38  ;;  %v4121_v38 = vsel %vm709_vm9, %v780_v8, %v5212_v12  ;;  %v4125_v40 = vpack.c.bf16 %v4115_v36, %v4113_v35  ;;  %v3051_v8 = vld [vmem:[%s3851_s23 + $0x38] sm:$0xff]   ;;  %3309 = vmatprep.subr.bf16.mxu0 %v3666_v61 }
  0x45   : > { %v347_v54 = vmul.f32 %v2927_v33, %v3863_v13  ;;  %v2931_v31 = vunpack.c.l.bf16 %v3051_v8  ;;  %v2932_v33 = vunpack.c.h.bf16 %v3051_v8  ;;  %v3670_v8 = vld [vmem:[%s5208_s3 + $0x148] sm:$0xff]  }
  0x46   : > { %5226 = vst [vmem:[#allocation6_spill] sm:$0xff] %v4125_v40  ;;  %1740 = vmatprep.mubr.bf16.mxu1 %v4125_v40  ;;  %3310 = vmatpush3.bf16.msra.mxu0 %v3667_v9  ;;  %v723_v9 = vrot.slane %v4167_v30, 1 }
  0x47   : > { %3198 = vmatpush3.bf16.msra.mxu1 %v3651_v47  ;;  %v716_v47 = vrot.slane %v3917_v6, 1  ;;  %v386_v2 = vadd.f32 %v3870_v18, %v347_v54  ;;  %v349_v43 = vmul.f32 %v2931_v31, %v3863_v13  ;;  %v483_v54 = vsel %vm419_vm8, %v387_v23, %v451_v37  ;;  %v3671_v23 = vld [vmem:[%s5208_s3 + $0x108] sm:$0xff]   ;;  %3311 = vmatprep.subr.bf16.mxu0 %v3670_v8 }
  0x48   : > { %3199 = vmatprep.subr.bf16.mxu1 %v3652_v58  ;;  %v4144_v58 = vld [vmem:[#allocation2 + $0x78] sm:$0xff]  ;;  %v4150_v62 = vld [vmem:[#allocation2 + $0x80] sm:$0xff]  ;;  %570 = vst [vmem:[#allocation2 + $0xb1] sm:$0xff] %v483_v54  ;;  %v3668_v54 = vld [vmem:[%s5208_s3 + $0x1e8] sm:$0xff]  }
  0x49   : > { %1645 = vmatmul.mubr.bf16.gmra.mxu0 %v4055_v55  ;;  %v4159_v19 = vpack.c.bf16 %v4150_v62, %v4144_v58  ;;  %vm418_vm7 = vcmp.ge.f32.partialorder %v386_v2, 0.0  ;;  %v450_v25 = vmul.f32 0.01, %v386_v2  ;;  %v388_v61 = vadd.f32 %v3870_v18, %v349_v43 }
  0x4a   : > { %1741 = vmatmul.mubr.bf16.gmra.mxu1 %v4081_v15  ;;  %3312 = vmatpush3.bf16.msra.mxu0 %v3671_v23 }
  0x4b   : > { %3200 = vmatpush3.bf16.msra.mxu1 %v3654_v59  ;;  %v822_v59 = vpack.c.bf16 %v714_v41, %v4089_v20  ;;  %v480_v20 = vsel %vm416_vm5, %v384_v48, %v448_v60  ;;  %1652 = vmatprep.mubr.bf16.mxu0 %v4159_v19  ;;  %v482_v41 = vsel %vm418_vm7, %v386_v2, %v450_v25  ;;  %vm420_vm10 = vcmp.ge.f32.partialorder %v388_v61, 0.0 }
  0x4c   : > { %3201 = vmatprep.subr.bf16.mxu1 %v3656_v0  ;;  %v717_v0 = vsel %vm709_vm9, %v715_v44, %v716_v47  ;;  %567 = vst [vmem:[#allocation2 + $0x91] sm:$0xff] %v480_v20  ;;  %569 = vst [vmem:[#allocation2 + $0xa9] sm:$0xff] %v482_v41  ;;  %v350_v44 = vmul.f32 %v2932_v33, %v3863_v13  ;;  %v351_v48 = vmul.f32 %v2935_v34, %v3863_v13  ;;  %v3663_v20 = vld [vmem:[%s5208_s3 + $0x1f0] sm:$0xff]  }
  0x4d   : > { %1781 = vmatprep.mubr.bf16.mxu1 %v822_v59  ;;  %v3053_v59 = vld [vmem:[%s3851_s23 + $0x48] sm:$0xff]   ;;  %v3665_v41 = vld [vmem:[%s5208_s3 + $0x1b0] sm:$0xff]  }
  0x4e   : > { %v389_v1 = vadd.f32 %v3870_v18, %v350_v44  ;;  %v390_v2 = vadd.f32 %v3870_v18, %v351_v48  ;;  %v2939_v22 = vunpack.c.l.bf16 %v3053_v59  ;;  %v724_v44 = vsel %vm709_vm9, %v721_v49, %v723_v9 }
  0x4f   : > { %3202 = vmatpush3.bf16.msra.mxu1 %v3657_v27  ;;  %v719_v27 = vsel %vm709_vm9, %v716_v47, %v718_v51  ;;  %v720_v47 = vrot.slane %v3979_v52, 1  ;;  %v3659_v51 = vld [vmem:[%s5208_s3 + $0x1b8] sm:$0xff]  }
  0x50   : > { %3411 = vmatprep.subr.bf16.mxu1 %v3658_v42  ;;  %v2936_v42 = vunpack.c.h.bf16 %v3052_v26  ;;  %v4180_v60 = vpack.c.bf16 %v719_v27, %v717_v0  ;;  %vm421_vm11 = vcmp.ge.f32.partialorder %v389_v1, 0.0  ;;  %v452_v26 = vmul.f32 0.01, %v388_v61 }
  0x51   : > { %1653 = vmatmul.mubr.bf16.gmra.mxu0 %v4103_v3  ;;  %v2940_v27 = vunpack.c.h.bf16 %v3053_v59  ;;  %v722_v33 = vsel %vm709_vm9, %v720_v47, %v721_v49  ;;  %v453_v34 = vmul.f32 0.01, %v389_v1  ;;  %vm422_vm12 = vcmp.ge.f32.partialorder %v390_v2, 0.0 }
  0x52   : > { %v352_v10 = vmul.f32 %v2936_v42, %v3863_v13  ;;  %1782 = vmatmul.mubr.bf16.vlgmr.msra.gmra.mxu1 %v3989_v56  ;;  %v484_v42 = vsel %vm420_vm10, %v388_v61, %v452_v26  ;;  %v3054_v56 = vld [vmem:[%s3851_s23 + $0x50] sm:$0xff]   ;;  %v454_v47 = vmul.f32 0.01, %v390_v2  ;;  %v353_v59 = vmul.f32 %v2939_v22, %v3863_v13 }
  0x53   : > { %v4196_v25 = vld [vmem:[#allocation2 + $0x90] sm:$0xff]  ;;  %v4199_v31 = vld [vmem:[#allocation2 + $0x98] sm:$0xff]  ;;  %3412 = vmatpush3.bf16.msra.mxu1 %v3659_v51  ;;  %1789 = vmatprep.mubr.bf16.mxu1 %v4180_v60  ;;  %v4211_v43 = vld [vmem:[#allocation2 + $0xa8] sm:$0xff]  ;;  %v485_v48 = vsel %vm421_vm11, %v389_v1, %v453_v34  ;;  %571 = vst [vmem:[#allocation2 + $0xc1] sm:$0xff] %v484_v42  ;;  %v354_v61 = vmul.f32 %v2940_v27, %v3863_v13  ;;  %v725_v49 = vrot.slane %v4041_v46, 1  ;;  %v2943_v23 = vunpack.c.l.bf16 %v3054_v56 }
  0x54   : > { %v391_v0 = vadd.f32 %v3870_v18, %v352_v10  ;;  %v4204_v37 = vpack.c.bf16 %v4199_v31, %v4196_v25  ;;  %3413 = vmatprep.subr.bf16.mxu1 %v3663_v20  ;;  %572 = vst [vmem:[#allocation2 + $0xc9] sm:$0xff] %v485_v48  ;;  %v4219_v10 = vld [vmem:[#allocation2 + $0x58] sm:$0x3]  ;;  %v4224_v8 = vld [vmem:[#allocation2 + $0xb0] sm:$0xff]  ;;  %v486_v1 = vsel %vm422_vm12, %v390_v2, %v454_v47  ;;  %v3669_v20 = vld [vmem:[%s5208_s3 + $0x1a8] sm:$0xff]   ;;  %v726_v26 = vrot.slane %v4048_v50, 1 }
  0x55   : > { %v4235_v22 = vpack.c.bf16 %v4224_v8, %v4211_v43  ;;  %v4237_v27 = vpack.c.bf16 %v724_v44, %v722_v33  ;;  %573 = vst [vmem:[#allocation2 + $0xd9] sm:$0xff] %v486_v1  ;;  %v392_v2 = vadd.f32 %v3870_v18, %v353_v59  ;;  %v728_v34 = vrot.slane %v4219_v10, 1  ;;  %v3674_v33 = vld [vmem:[%s5208_s3 + $0x140] sm:$0xff]  }
  0x56   : > { %vm423_vm13 = vcmp.ge.f32.partialorder %v391_v0, 0.0  ;;  %v455_v51 = vmul.f32 0.01, %v391_v0  ;;  %1660 = vmatprep.mubr.bf16.mxu0 %v4204_v37  ;;  %v393_v42 = vadd.f32 %v3870_v18, %v354_v61  ;;  %v2944_v48 = vunpack.c.h.bf16 %v3054_v56  ;;  %v3675_v44 = vld [vmem:[%s5208_s3 + $0x100] sm:$0xff]   ;;  %3313 = vmatprep.subr.bf16.mxu0 %v3674_v33  ;;  %v4310_v61 = vld [vmem:[#allocation2 + $0x88] sm:$0x3] }
  0x57   : > { %3414 = vmatpush3.bf16.msra.mxu1 %v3665_v41  ;;  %v355_v47 = vmul.f32 %v2943_v23, %v3863_v13  ;;  %vm424_vm14 = vcmp.ge.f32.partialorder %v392_v2, 0.0  ;;  %v456_v41 = vmul.f32 0.01, %v392_v2  ;;  %v3673_v59 = vld [vmem:[%s5208_s3 + $0x1a0] sm:$0xff]   ;;  %3314 = vmatpush3.bf16.msra.mxu0 %v3675_v44  ;;  %v731_v44 = vrot.slane %v4091_v21, 1 }
  0x58   : > { %v487_v9 = vsel %vm423_vm13, %v391_v0, %v455_v51  ;;  %v3672_v0 = vld [vmem:[%s5208_s3 + $0x1e0] sm:$0xff]   ;;  %3415 = vmatprep.subr.bf16.mxu1 %v3668_v54  ;;  %vm425_vm15 = vcmp.ge.f32.partialorder %v393_v42, 0.0  ;;  %v457_v51 = vmul.f32 0.01, %v393_v42  ;;  %v356_v56 = vmul.f32 %v2944_v48, %v3863_v13  ;;  %v4267_v13 = vld [vmem:[%s5208_s3 + $0x238] sm:$0xff]  }
  0x59   : > { %1661 = vmatmul.mubr.bf16.gmra.mxu0 %v4159_v19  ;;  %574 = vst [vmem:[#allocation2 + $0xe1] sm:$0xff] %v487_v9  ;;  %v394_v54 = vadd.f32 %v3870_v18, %v355_v47  ;;  %v727_v9 = vsel %vm709_vm9, %v725_v49, %v726_v26  ;;  %v729_v47 = vsel %vm709_vm9, %v726_v26, %v728_v34  ;;  %v3676_v49 = vld [vmem:[%s5208_s3 + $0x1d8] sm:$0xff]   ;;  %v785_v26 = vrot.slane %v4057_v57, 1  ;;  %v3685_v23 = vld [vmem:[%s5208_s3 + $0x1c0] sm:$0xff]  }
  0x5a   : > { %1668 = vmatprep.mubr.bf16.mxu0 %v4235_v22  ;;  %1790 = vmatmul.mubr.bf16.gmra.mxu1 %v4055_v55  ;;  %v4261_v1 = vld [vmem:[#allocation2 + $0xc0] sm:$0xff]  ;;  %v488_v55 = vsel %vm424_vm14, %v392_v2, %v456_v41  ;;  %v489_v33 = vsel %vm425_vm15, %v393_v42, %v457_v51  ;;  %v395_v12 = vadd.f32 %v3870_v18, %v356_v56  ;;  %v4283_v41 = vld [vmem:[#allocation2 + $0x70] sm:$0x3]  ;;  %v730_v42 = vrot.slane %v4084_v17, 1  ;;  %v3678_v56 = vld [vmem:[%s5208_s3 + $0x198] sm:$0xff]  }
  0x5b   : > { %1797 = vmatprep.mubr.bf16.mxu1 %v4237_v27  ;;  %3416 = vmatpush3.bf16.msra.mxu1 %v3669_v20  ;;  %v4270_v48 = vld [vmem:[#allocation2 + $0xc8] sm:$0xff]  ;;  %575 = vst [vmem:[#allocation2 + $0xf1] sm:$0xff] %v488_v55  ;;  %576 = vst [vmem:[#allocation2 + $0xf9] sm:$0xff] %v489_v33  ;;  %vm426_vm0 = vcmp.ge.f32.partialorder %v394_v54, 0.0  ;;  %v458_v34 = vmul.f32 0.01, %v394_v54  ;;  %v4292_v51 = vpack.c.bf16 %v729_v47, %v727_v9 }
  0x5c   : > { %3417 = vmatprep.subr.bf16.mxu1 %v3672_v0  ;;  %v4281_v2 = vpack.c.bf16 %v4270_v48, %v4261_v1  ;;  %3547 = vmatprep.subr.bf16.mxu0 %v4267_v13  ;;  %v5213_v0 = vrot.slane %v4069_v63, 1  ;;  %vm427_vm1 = vcmp.ge.f32.partialorder %v395_v12, 0.0  ;;  %v733_v57 = vrot.slane %v4283_v41, 1  ;;  %v3679_v20 = vld [vmem:[%s5208_s3 + $0x1d0] sm:$0xff]   ;;  %v4305_v47 = vld [vmem:[#allocation2 + $0xd8] sm:$0xff] }
  0x5d   : > { %v459_v55 = vmul.f32 0.01, %v395_v12  ;;  %v490_v33 = vsel %vm426_vm0, %v394_v54, %v458_v34  ;;  %v736_v34 = vrot.slane %v4150_v62, 1  ;;  %v4338_v9 = vld [vmem:[#allocation2 + $0x130] sm:$0x3]  ;;  %v740_v40 = vrot.slane %v4196_v25, 1 }
  0x5e   : > { %577 = vst [vmem:[#allocation2 + $0x109] sm:$0xff] %v490_v33  ;;  %v3681_v33 = vld [vmem:[%s5208_s3 + $0x190] sm:$0xff]   ;;  %v741_v16 = vrot.slane %v4199_v31, 1 }
  0x5f   : > { %3418 = vmatpush3.bf16.msra.mxu1 %v3673_v59  ;;  %v491_v54 = vsel %vm427_vm1, %v395_v12, %v459_v55  ;;  %v732_v55 = vsel %vm709_vm9, %v730_v42, %v731_v44  ;;  %v3684_v42 = vld [vmem:[%s5208_s3 + $0x188] sm:$0xff]   ;;  %v886_v59 = vrot.slane %v4144_v58, 2 }
  0x60   : > { %3419 = vmatprep.subr.bf16.mxu1 %v3676_v49  ;;  %v4307_v18 = vld [vmem:[#allocation2 + $0xe0] sm:$0xff]  ;;  %v4316_v49 = vsel %vm709_vm9, %v785_v26, %v5213_v0  ;;  %578 = vst [vmem:[#allocation2 + $0x111] sm:$0xff] %v491_v54  ;;  %v734_v26 = vsel %vm709_vm9, %v731_v44, %v733_v57  ;;  %v3682_v54 = vld [vmem:[%s5208_s3 + $0x1c8] sm:$0xff]   ;;  %v738_v0 = vrot.slane %v4310_v61, 1  ;;  %v773_v57 = vrot.slane %v4338_v9, 1 }
  0x61   : > { %1669 = vmatmul.mubr.bf16.gmra.mxu0 %v4204_v37  ;;  %v4326_v12 = vpack.c.bf16 %v4307_v18, %v4305_v47 }
  0x62   : > { %1676 = vmatprep.mubr.bf16.mxu0 %v4281_v2  ;;  %1798 = vmatmul.mubr.bf16.gmra.mxu1 %v4103_v3  ;;  %v4336_v3 = vld [vmem:[#allocation2 + $0xa0] sm:$0x3]  ;;  %v4346_v44 = vld [vmem:[#allocation2 + $0xf0] sm:$0xff]  ;;  %v4355_v29 = vld [vmem:[#allocation2 + $0xf8] sm:$0xff] }
  0x63   : > { %1805 = vmatprep.mubr.bf16.mxu1 %v4292_v51  ;;  %3420 = vmatpush3.bf16.msra.mxu1 %v3678_v56  ;;  %v735_v56 = vrot.slane %v4144_v58, 1 }
  0x64   : > { %3421 = vmatprep.subr.bf16.mxu1 %v3679_v20  ;;  %v4344_v20 = vpack.c.bf16 %v734_v26, %v732_v55  ;;  %v5227_v55 = vrot.slane %v3945_v24, 1  ;;  %v891_v24 = vrot.slane %v4196_v25, 2  ;;  %v783_v25 = vrot.slane %v4369_v45, 1 }
  0x65   : > { %v737_v58 = vsel %vm709_vm9, %v735_v56, %v736_v34  ;;  %v5230_v56 = vrot.slane %v3926_v11, 1  ;;  %v5233_v11 = vrot.slane %v4006_v7, 1  ;;  %v5235_v7 = vrot.slane %v3979_v52, 2 }
  0x66   : > { %v774_v26 = vsel %vm709_vm9, %v5227_v55, %v773_v57  ;;  %v739_v57 = vsel %vm709_vm9, %v736_v34, %v738_v0  ;;  %v743_v55 = vrot.slane %v4336_v3, 1  ;;  %v5231_v34 = vrot.slane %v3917_v6, 2 }
  0x67   : > { %3422 = vmatpush3.bf16.msra.mxu1 %v3681_v33  ;;  %v4360_v33 = vld [vmem:[#allocation2 + $0x148] sm:$0x3]  ;;  %v4396_v14 = vpack.c.bf16 %v739_v57, %v737_v58  ;;  %v5234_v58 = vrot.slane %v3981_v53, 2  ;;  %v879_v6 = vrot.slane %v4219_v10, 2 }
  0x68   : > { %3423 = vmatprep.subr.bf16.mxu1 %v3682_v54  ;;  %5228 = vst [vmem:[#allocation7_spill] sm:$0xff] %v4360_v33  ;;  %v4366_v54 = vpack.c.bf16 %v774_v26, %v3965_v39  ;;  %v778_v15 = vrot.slane %v4360_v33, 1  ;;  %v3687_v39 = vld [vmem:[%s5208_s3 + $0x180] sm:$0xff]  }
  0x69   : > { %1677 = vmatmul.mubr.bf16.gmra.mxu0 %v4235_v22  ;;  %v873_v57 = vsel %vm860_vm2, %v5235_v7, %v5234_v58 }
  0x6a   : > { %1684 = vmatprep.mubr.bf16.mxu0 %v4326_v12  ;;  %1806 = vmatmul.mubr.bf16.gmra.mxu1 %v4159_v19  ;;  %5229 = vst [vmem:[#allocation8_spill] sm:$0xff] %v4366_v54  ;;  %v4381_v19 = vpack.c.bf16 %v4355_v29, %v4346_v44  ;;  %v779_v26 = vsel %vm709_vm9, %v5230_v56, %v778_v15  ;;  %v892_v54 = vrot.slane %v4199_v31, 2  ;;  %v4401_v56 = vld [vmem:[#allocation2 + $0x178] sm:$0x3] }
  0x6b   : > { %1813 = vmatprep.mubr.bf16.mxu1 %v4344_v20  ;;  %3424 = vmatpush3.bf16.msra.mxu1 %v3684_v42  ;;  %v4388_v0 = vpack.c.bf16 %v779_v26, %v4075_v4  ;;  %v5232_v42 = vrot.slane %v3915_v5, 2  ;;  %v784_v15 = vsel %vm709_vm9, %v5233_v11, %v783_v25  ;;  %v742_v4 = vsel %vm709_vm9, %v740_v40, %v741_v16  ;;  %v4416_v26 = vld [vmem:[#allocation2 + $0x108] sm:$0xff] }
  0x6c   : > { %3425 = vmatprep.subr.bf16.mxu1 %v3685_v23  ;;  %v869_v23 = vrot.slane %v4110_v32, 2  ;;  %v4407_v5 = vpack.c.bf16 %v784_v15, %v4121_v38  ;;  %v788_v31 = vrot.slane %v4401_v56, 1  ;;  %v744_v32 = vsel %vm709_vm9, %v741_v16, %v743_v55 }
  0x6d   : > { %v868_v33 = vsel %vm860_vm2, %v5232_v42, %v5231_v34  ;;  %v5236_v40 = vmov %v5231_v34  ;;  %v5237_v25 = vrot.slane %v4048_v50, 2  ;;  %v5238_v34 = vrot.slane %v4041_v46, 2  ;;  %v4428_v42 = vld [vmem:[#allocation2 + $0x110] sm:$0xff] }
  0x6e   : > { %v870_v38 = vsel %vm860_vm2, %v5236_v40, %v869_v23  ;;  %v5239_v11 = vrot.slane %v4069_v63, 1  ;;  %v5240_v16 = vrot.slane %v4091_v21, 2  ;;  %v5242_v23 = vrot.slane %v3981_v53, 2 }
  0x6f   : > { %3426 = vmatpush3.bf16.msra.mxu1 %v3687_v39  ;;  %v874_v39 = vrot.slane %v4167_v30, 2  ;;  %v878_v52 = vsel %vm860_vm2, %v5238_v34, %v5237_v25  ;;  %v4433_v58 = vpack.c.bf16 %v870_v38, %v868_v33  ;;  %v5241_v30 = vrot.slane %v4084_v17, 2 }
  0x70   : > { %v789_v15 = vsel %vm709_vm9, %v5239_v11, %v788_v31  ;;  %v884_v33 = vrot.slane %v4283_v41, 2  ;;  %v5243_v31 = vrot.slane %v4150_v62, 2  ;;  %v5244_v7 = vmov %v5237_v25 }
  0x71   : > { %1685 = vmatmul.mubr.bf16.gmra.mxu0 %v4281_v2  ;;  %v883_v55 = vsel %vm860_vm2, %v5241_v30, %v5240_v16  ;;  %v4443_v46 = vpack.c.bf16 %v789_v15, %v4316_v49  ;;  %v875_v63 = vsel %vm860_vm2, %v5242_v23, %v874_v39  ;;  %v889_v49 = vrot.slane %v4310_v61, 2  ;;  %v612_v39 = vld [vmem:[#allocation2 + $0xb8] sm:$0x3] }
  0x72   : > { %1692 = vmatprep.mubr.bf16.mxu0 %v4381_v19  ;;  %1814 = vmatmul.mubr.bf16.gmra.mxu1 %v4204_v37  ;;  %v888_v10 = vsel %vm860_vm2, %v886_v59, %v5243_v31  ;;  %v4453_v17 = vpack.c.bf16 %v875_v63, %v873_v57  ;;  %v880_v37 = vsel %vm860_vm2, %v5244_v7, %v879_v6  ;;  %v894_v57 = vrot.slane %v4336_v3, 2  ;;  %v615_v63 = vld [vmem:[#allocation2 + $0xd0] sm:$0x3] }
  0x73   : > { %1821 = vmatprep.mubr.bf16.mxu1 %v4396_v14  ;;  %v893_v53 = vsel %vm860_vm2, %v891_v24, %v892_v54  ;;  %v4462_v40 = vpack.c.bf16 %v4428_v42, %v4416_v26  ;;  %v4464_v41 = vpack.c.bf16 %v880_v37, %v878_v52  ;;  %v5245_v59 = vmov %v5240_v16 }
  0x74   : > { %v885_v38 = vsel %vm860_vm2, %v5245_v59, %v884_v33  ;;  %v5246_v25 = vmov %v5243_v31  ;;  %v895_v34 = vsel %vm860_vm2, %v892_v54, %v894_v57  ;;  %v4479_v52 = vpack.c.bf16 %v744_v32, %v742_v4  ;;  %v4492_v4 = vld [vmem:[#allocation2 + $0x190] sm:$0x3] }
  0x75   : > { %v4470_v50 = vpack.c.bf16 %v885_v38, %v883_v55  ;;  %v890_v61 = vsel %vm860_vm2, %v5246_v25, %v889_v49  ;;  %v4481_v21 = vpack.c.bf16 %v895_v34, %v893_v53  ;;  %v745_v11 = vrot.slane %v4211_v43, 1 }
  0x76   : > { %v4475_v24 = vpack.c.bf16 %v890_v61, %v888_v10  ;;  %v746_v3 = vrot.slane %v4224_v8, 1  ;;  %v748_v15 = vrot.slane %v612_v39, 1  ;;  %v841_v62 = vrot.slane %v4113_v35, 1  ;;  %v618_v61 = vld [vmem:[#allocation2 + $0xe8] sm:$0x3] }
  0x77   : > { %v842_v6 = vrot.slane %v4115_v36, 1  ;;  %v896_v16 = vrot.slane %v4211_v43, 2  ;;  %v897_v54 = vrot.slane %v4224_v8, 2  ;;  %v844_v55 = vrot.slane %v4492_v4, 1 }
  0x78   : > { %v747_v32 = vsel %vm709_vm9, %v745_v11, %v746_v3  ;;  %v749_v30 = vsel %vm709_vm9, %v746_v3, %v748_v15  ;;  %v899_v23 = vrot.slane %v612_v39, 2  ;;  %v750_v37 = vrot.slane %v4261_v1, 1 }
  0x79   : > { %1693 = vmatmul.mubr.bf16.gmra.mxu0 %v4326_v12  ;;  %v843_v33 = vsel %vm709_vm9, %v841_v62, %v842_v6  ;;  %v845_v43 = vsel %vm709_vm9, %v842_v6, %v844_v55  ;;  %v898_v8 = vsel %vm860_vm2, %v896_v16, %v897_v54  ;;  %v4502_v31 = vpack.c.bf16 %v749_v30, %v747_v32  ;;  %v621_v30 = vld [vmem:[#allocation2 + $0x100] sm:$0x3]  ;;  %v3680_v55 = vld [vmem:[%s5208_s3 + $0x230] sm:$0xff]  }
  0x7a   : > { %1700 = vmatprep.mubr.bf16.mxu0 %v4462_v40  ;;  %1822 = vmatmul.mubr.bf16.gmra.mxu1 %v4235_v22  ;;  %v900_v22 = vsel %vm860_vm2, %v897_v54, %v899_v23  ;;  %v4504_v10 = vpack.c.bf16 %v845_v43, %v843_v33  ;;  %v751_v49 = vrot.slane %v4270_v48, 1  ;;  %v753_v53 = vrot.slane %v615_v63, 1 }
  0x7b   : > { %1829 = vmatprep.mubr.bf16.mxu1 %v4479_v52  ;;  %v4506_v7 = vpack.c.bf16 %v900_v22, %v898_v8  ;;  %v901_v59 = vrot.slane %v4261_v1, 2  ;;  %v902_v38 = vrot.slane %v4270_v48, 2  ;;  %v904_v25 = vrot.slane %v615_v63, 2  ;;  %v3683_v8 = vld [vmem:[%s5208_s3 + $0x228] sm:$0xff]  }
  0x7c   : > { %v752_v57 = vsel %vm709_vm9, %v750_v37, %v751_v49  ;;  %v754_v39 = vsel %vm709_vm9, %v751_v49, %v753_v53  ;;  %v755_v48 = vrot.slane %v4305_v47, 1  ;;  %v758_v15 = vrot.slane %v618_v61, 1  ;;  %v624_v53 = vld [vmem:[#allocation2 + $0x118] sm:$0x3] }
  0x7d   : > { %v903_v34 = vsel %vm860_vm2, %v901_v59, %v902_v38  ;;  %v905_v11 = vsel %vm860_vm2, %v902_v38, %v904_v25  ;;  %v4520_v3 = vpack.c.bf16 %v754_v39, %v752_v57  ;;  %v906_v62 = vrot.slane %v4305_v47, 2  ;;  %v3686_v59 = vld [vmem:[%s5208_s3 + $0x220] sm:$0xff]  }
  0x7e   : > { %v4522_v1 = vpack.c.bf16 %v905_v11, %v903_v34  ;;  %v907_v6 = vrot.slane %v4307_v18, 2  ;;  %v909_v32 = vrot.slane %v618_v61, 2  ;;  %v760_v63 = vrot.slane %v4346_v44, 1  ;;  %v3688_v61 = vld [vmem:[%s5208_s3 + $0x218] sm:$0xff]  }
  0x7f   : > { %v761_v33 = vrot.slane %v4355_v29, 1  ;;  %v763_v43 = vrot.slane %v621_v30, 1  ;;  %v912_v22 = vrot.slane %v4355_v29, 2  ;;  %v914_v49 = vrot.slane %v621_v30, 2 }
  0x80   : > { %v908_v23 = vsel %vm860_vm2, %v906_v62, %v907_v6  ;;  %v910_v47 = vsel %vm860_vm2, %v907_v6, %v909_v32  ;;  %v765_v57 = vrot.slane %v4416_v26, 1  ;;  %v766_v39 = vrot.slane %v4428_v42, 1  ;;  %v3690_v6 = vld [vmem:[%s5208_s3 + $0x208] sm:$0xff]  }
  0x81   : > { %1701 = vmatmul.mubr.bf16.gmra.mxu0 %v4381_v19  ;;  %v762_v37 = vsel %vm709_vm9, %v760_v63, %v761_v33  ;;  %v915_v29 = vsel %vm860_vm2, %v912_v22, %v914_v49  ;;  %v768_v25 = vrot.slane %v624_v53, 1  ;;  %v916_v34 = vrot.slane %v4416_v26, 2  ;;  %v3693_v32 = vld [vmem:[#allocation2 + $0x128] sm:$0xff] }
  0x82   : > { %1708 = vmatprep.mubr.bf16.mxu0 %v3951_v28  ;;  %1830 = vmatmul.mubr.bf16.gmra.mxu1 %v4281_v2  ;;  %v756_v2 = vrot.slane %v4307_v18, 1  ;;  %v767_v11 = vsel %vm709_vm9, %v765_v57, %v766_v39  ;;  %v922_v30 = vrot.slane %v3693_v32, 2  ;;  %v5250_v57 = vld [vmem:[#allocation4_spill] sm:$0xff] }
  0x83   : > { %1837 = vmatprep.mubr.bf16.mxu1 %v4502_v31 }
  0x84   : > { %v757_v16 = vsel %vm709_vm9, %v755_v48, %v756_v2  ;;  %v759_v54 = vsel %vm709_vm9, %v756_v2, %v758_v15  ;;  %v769_v48 = vsel %vm709_vm9, %v766_v39, %v768_v25  ;;  %v919_v2 = vrot.slane %v624_v53, 2  ;;  %v3689_v15 = vld [vmem:[%s5208_s3 + $0x210] sm:$0xff]  }
  0x85   : > { %v4539_v18 = vpack.c.bf16 %v759_v54, %v757_v16  ;;  %v3692_v16 = vld [vmem:[#allocation2 + $0x120] sm:$0xff]  ;;  %v3696_v53 = vld [vmem:[#allocation2 + $0x150] sm:$0xff]  ;;  %v934_v39 = vrot.slane %v4369_v45, 2  ;;  %v939_v45 = vrot.slane %v4401_v56, 2  ;;  %v992_v56 = vrot.slane %v4492_v4, 2 }
  0x86   : > { %v921_v54 = vrot.slane %v3692_v16, 2  ;;  %v5252_v16 = vld [vmem:[#allocation6_spill] sm:$0xff] }
  0x89   : > { %1709 = vmatmul.mubr.bf16.gmra.mxu0 %v4462_v40 }
  0x8a   : > { %1942 = vmatprep.mubr.bf16.mxu0 %v4237_v27  ;;  %1838 = vmatmul.mubr.bf16.gmra.mxu1 %v4326_v12  ;;  %v4541_v12 = vpack.c.bf16 %v910_v47, %v908_v23  ;;  %v923_v23 = vsel %vm860_vm2, %v921_v54, %v922_v30  ;;  %v4636_v54 = vld [vmem:[#allocation2] sm:$0xff] }
  0x8b   : > { %1845 = vmatprep.mubr.bf16.mxu1 %v4520_v3  ;;  %v660_v32 = vpack.c.bf16 %v4636_v54, %v4636_v54 }
  0x91   : > { %1943 = vmatmul.mubr.bf16.vlgmr.msra.gmra.mxu0 %v4180_v60  ;;  %v911_v60 = vrot.slane %v4346_v44, 2 }
  0x92   : > { %3548 = vmatpush3.bf16.msra.mxu0 %v4267_v13  ;;  %1950 = vmatprep.mubr.bf16.mxu0 %v4292_v51  ;;  %v764_v13 = vsel %vm709_vm9, %v761_v33, %v763_v43 }
  0x93   : > { %3549 = vmatprep.subr.bf16.mxu0 %v3680_v55  ;;  %1846 = vmatmul.mubr.bf16.gmra.mxu1 %v4381_v19  ;;  %v913_v44 = vsel %vm860_vm2, %v911_v60, %v912_v22  ;;  %v4562_v19 = vpack.c.bf16 %v764_v13, %v762_v37  ;;  %v5248_v60 = vld [vmem:[#allocation8_spill] sm:$0xff]  ;;  %v5249_v22 = vld [vmem:[#allocation7_spill] sm:$0xff] }
  0x94   : > { %1853 = vmatprep.mubr.bf16.mxu1 %v4539_v18  ;;  %v4564_v38 = vpack.c.bf16 %v915_v29, %v913_v44  ;;  %v929_v37 = vrot.slane %v5249_v22, 2  ;;  %v3697_v44 = vld [vmem:[#allocation2 + $0x158] sm:$0xff] }
  0x95   : > { %v932_v29 = vrot.slane %v3697_v44, 2 }
  0x96   : > { %3550 = vmatpush3.bf16.msra.mxu0 %v3680_v55  ;;  %v3691_v55 = vld [vmem:[%s5208_s3 + $0x200] sm:$0xff]  }
  0x97   : > { %3551 = vmatprep.subr.bf16.mxu0 %v3683_v8 }
  0x99   : > { %1951 = vmatmul.mubr.bf16.gmra.mxu0 %v4237_v27  ;;  %v917_v27 = vrot.slane %v4428_v42, 2  ;;  %v4584_v42 = vpack.c.bf16 %v769_v48, %v767_v11  ;;  %v3699_v11 = vld [vmem:[#allocation2 + $0x170] sm:$0xff] }
  0x9a   : > { %1958 = vmatprep.mubr.bf16.mxu0 %v4344_v20  ;;  %3552 = vmatpush3.bf16.msra.mxu0 %v3683_v8  ;;  %v5247_v8 = vld [vmem:[#allocation3_spill] sm:$0xff]  ;;  %v937_v48 = vrot.slane %v3699_v11, 2 }
  0x9b   : > { %3553 = vmatprep.subr.bf16.mxu0 %v3686_v59  ;;  %1854 = vmatmul.mubr.bf16.gmra.mxu1 %v4462_v40  ;;  %v918_v62 = vsel %vm860_vm2, %v916_v34, %v917_v27  ;;  %v920_v26 = vsel %vm860_vm2, %v917_v27, %v919_v2  ;;  %v3698_v34 = vld [vmem:[#allocation2 + $0x168] sm:$0xff]  ;;  %v5251_v2 = vld [vmem:[#allocation5_spill] sm:$0xff] }
  0x9c   : > { %1861 = vmatprep.mubr.bf16.mxu1 %v4562_v19  ;;  %v4586_v40 = vpack.c.bf16 %v920_v26, %v918_v62  ;;  %v936_v27 = vrot.slane %v3698_v34, 2  ;;  %v940_v62 = vsel %vm860_vm2, %v937_v48, %v939_v45  ;;  %v989_v26 = vrot.slane %v4113_v35, 2  ;;  %v3701_v35 = vld [vmem:[#allocation2 + $0x10] sm:$0x3] }
  0x9e   : > { %3554 = vmatpush3.bf16.msra.mxu0 %v3686_v59  ;;  %v931_v59 = vrot.slane %v3696_v53, 2 }
  0x9f   : > { %3555 = vmatprep.subr.bf16.mxu0 %v3688_v61 }
  0xa0   : > { %v933_v25 = vsel %vm860_vm2, %v931_v59, %v932_v29 }
  0xa1   : > { %1959 = vmatmul.mubr.bf16.gmra.mxu0 %v4292_v51  ;;  %v924_v51 = vrot.slane %v4338_v9, 2  ;;  %v3695_v9 = vld [vmem:[#allocation2 + $0x140] sm:$0xff] }
  0xa2   : > { %1966 = vmatprep.mubr.bf16.mxu0 %v4396_v14  ;;  %3556 = vmatpush3.bf16.msra.mxu0 %v3688_v61  ;;  %v927_v43 = vrot.slane %v3695_v9, 2  ;;  %v935_v61 = vsel %vm860_vm2, %v932_v29, %v934_v39 }
  0xa3   : > { %3557 = vmatprep.subr.bf16.mxu0 %v3689_v15  ;;  %1862 = vmatmul.mubr.bf16.gmra.mxu1 %v3951_v28  ;;  %v925_v47 = vsel %vm860_vm2, %v922_v30, %v924_v51  ;;  %v3694_v28 = vld [vmem:[#allocation2 + $0x138] sm:$0xff]  ;;  %v4643_v51 = vrot.slane %v4636_v54, 2 }
  0xa4   : > { %1869 = vmatprep.mubr.bf16.mxu1 %v4584_v42  ;;  %v4601_v63 = vpack.c.bf16 %v925_v47, %v923_v23  ;;  %v926_v33 = vrot.slane %v3694_v28, 2 }
  0xa6   : > { %3558 = vmatpush3.bf16.msra.mxu0 %v3689_v15  ;;  %v928_v13 = vsel %vm860_vm2, %v926_v33, %v927_v43  ;;  %v938_v15 = vsel %vm860_vm2, %v936_v27, %v937_v48 }
  0xa7   : > { %3559 = vmatprep.subr.bf16.mxu0 %v3690_v6 }
  0xa9   : > { %1967 = vmatmul.mubr.bf16.gmra.mxu0 %v4344_v20  ;;  %v930_v20 = vsel %vm860_vm2, %v927_v43, %v929_v37  ;;  %v4679_v37 = vld [vmem:[#allocation2 + $0x1a8] sm:$0x3] }
  0xaa   : > { %1974 = vmatprep.mubr.bf16.mxu0 %v4479_v52  ;;  %3560 = vmatpush3.bf16.msra.mxu0 %v3690_v6  ;;  %v4610_v49 = vpack.c.bf16 %v930_v20, %v928_v13  ;;  %v990_v6 = vrot.slane %v4115_v36, 2  ;;  %v864_v36 = vrot.slane %v3701_v35, 2  ;;  %v852_v20 = vrot.slane %v4636_v54, 1 }
  0xab   : > { %3561 = vmatprep.subr.bf16.mxu0 %v3691_v55  ;;  %1870 = vmatmul.mubr.bf16.gmra.mxu1 %v5247_v8  ;;  %v855_v59 = vrot.slane %v4679_v37, 1 }
  0xac   : > { %1877 = vmatprep.mubr.bf16.mxu1 %v5248_v60  ;;  %v993_v30 = vsel %vm860_vm2, %v990_v6, %v992_v56  ;;  %v865_v4 = vsel %vm860_vm2, %v4643_v51, %v864_v36 }
  0xad   : > { %v973_v23 = vpack.c.bf16 %v865_v4, %v4643_v51 }
  0xae   : > { %3562 = vmatpush3.bf16.msra.mxu0 %v3691_v55 }
  0xb1   : > { %1975 = vmatmul.mubr.bf16.gmra.mxu0 %v4396_v14  ;;  %v4619_v14 = vpack.c.bf16 %v935_v61, %v933_v25  ;;  %v856_v61 = vsel %vm709_vm9, %v852_v20, %v855_v59  ;;  %vm2499_vm9 = vcmask 1040384  }
  0xb2   : > { %1982 = vmatprep.mubr.bf16.mxu0 %v4502_v31  ;;  %v859_v11 = vpack.c.bf16 %v856_v61, %v852_v20 }
  0xb3   : > { %1878 = vmatmul.mubr.bf16.gmra.mxu1 %v5250_v57 }
  0xb4   : > { %1885 = vmatprep.mubr.bf16.mxu1 %v4388_v0 }
  0xb9   : > { %1983 = vmatmul.mubr.bf16.gmra.mxu0 %v4479_v52  ;;  %v4628_v52 = vpack.c.bf16 %v940_v62, %v938_v15 }
  0xba   : > { %1990 = vmatprep.mubr.bf16.mxu0 %v4520_v3 }
  0xbb   : > { %1886 = vmatmul.mubr.bf16.gmra.mxu1 %v5251_v2 }
  0xbc   : > { %1893 = vmatprep.mubr.bf16.mxu1 %v4407_v5 }
  0xc1   : > { %1991 = vmatmul.mubr.bf16.gmra.mxu0 %v4502_v31  ;;  %v991_v31 = vsel %vm860_vm2, %v989_v26, %v990_v6 }
  0xc2   : > { %1998 = vmatprep.mubr.bf16.mxu0 %v4539_v18  ;;  %v4646_v55 = vpack.c.bf16 %v993_v30, %v991_v31 }
  0xc3   : > { %1894 = vmatmul.mubr.bf16.gmra.mxu1 %v5252_v16 }
  0xc4   : > { %1901 = vmatprep.mubr.bf16.mxu1 %v4443_v46 }
  0xc9   : > { %1999 = vmatmul.mubr.bf16.gmra.mxu0 %v4520_v3 }
  0xca   : > { %2006 = vmatprep.mubr.bf16.mxu0 %v4562_v19 }
  0xcb   : > { %1902 = vmatmul.mubr.bf16.gmra.mxu1 %v660_v32 }
  0xcc   : > { %2103 = vmatprep.mubr.bf16.mxu1 %v4433_v58 }
  0xd1   : > { %2007 = vmatmul.mubr.bf16.gmra.mxu0 %v4539_v18 }
  0xd2   : > { %2014 = vmatprep.mubr.bf16.mxu0 %v4584_v42 }
  0xd3   : > { %2104 = vmatmul.mubr.bf16.vlgmr.msra.gmra.mxu1 %v973_v23 }
  0xd4   : > { %2111 = vmatprep.mubr.bf16.mxu1 %v4453_v17 }
  0xd9   : > { %2015 = vmatmul.mubr.bf16.gmra.mxu0 %v4562_v19 }
  0xda   : > { %2022 = vmatprep.mubr.bf16.mxu0 %v5248_v60 }
  0xdb   : > { %2112 = vmatmul.mubr.bf16.gmra.mxu1 %v4433_v58 }
  0xdc   : > { %2119 = vmatprep.mubr.bf16.mxu1 %v4464_v41 }
  0xe1   : > { %2023 = vmatmul.mubr.bf16.gmra.mxu0 %v4584_v42 }
  0xe2   : > { %2030 = vmatprep.mubr.bf16.mxu0 %v4388_v0 }
  0xe3   : > { %2120 = vmatmul.mubr.bf16.gmra.mxu1 %v4453_v17 }
  0xe4   : > { %2127 = vmatprep.mubr.bf16.mxu1 %v4470_v50 }
  0xe9   : > { %2031 = vmatmul.mubr.bf16.gmra.mxu0 %v5248_v60 }
  0xea   : > { %2038 = vmatprep.mubr.bf16.mxu0 %v4407_v5 }
  0xeb   : > { %2128 = vmatmul.mubr.bf16.gmra.mxu1 %v4464_v41 }
  0xec   : > { %2135 = vmatprep.mubr.bf16.mxu1 %v4475_v24 }
  0xf1   : > { %v3091_v3 = vpop.f32.mrf.mxu0  ;;  %2039 = vmatmul.mubr.bf16.gmra.mxu0 %v4388_v0 }
  0xf2   : > { %v3163_v19 = vpop.f32.mrf.mxu1  ;;  %2046 = vmatprep.mubr.bf16.mxu0 %v4443_v46 }
  0xf3   : > { %v3092_v18 = vpop.f32.mrf.mxu0  ;;  %2136 = vmatmul.mubr.bf16.gmra.mxu1 %v4470_v50 }
  0xf4   : > { %v4667_v58 = vadd.f32 %v3092_v18, %v3091_v3  ;;  %v3164_v47 = vpop.f32.mrf.mxu1  ;;  %2143 = vmatprep.mubr.bf16.mxu1 %v4481_v21 }
  0xf5   : > { %v3094_v42 = vpop.f32.mrf.mxu0  ;;  %v4670_v28 = vadd.f32 %v3164_v47, %v3163_v19 }
  0xf6   : > { %v3166_v9 = vpop.f32.mrf.mxu1 }
  0xf7   : > { %v3095_v33 = vpop.f32.mrf.mxu0 }
  0xf8   : > { %v4672_v43 = vadd.f32 %v3095_v33, %v3094_v42  ;;  %v3167_v8 = vpop.f32.mrf.mxu1 }
  0xf9   : > { %v4676_v60 = vadd.f32 %v3167_v8, %v3166_v9  ;;  %v3097_v22 = vpop.f32.mrf.mxu0  ;;  %2047 = vmatmul.mubr.bf16.gmra.mxu0 %v4407_v5  ;;  %v4725_v9 = vld [vmem:[%s5209_s4] ss:$0 sm:$0xff] }
  0xfa   : > { %v3169_v0 = vpop.f32.mrf.mxu1  ;;  %2054 = vmatprep.mubr.bf16.mxu0 %v4504_v10 }
  0xfb   : > { %v3098_v13 = vpop.f32.mrf.mxu0  ;;  %2144 = vmatmul.mubr.bf16.gmra.mxu1 %v4475_v24 }
  0xfc   : > { %v4683_v53 = vadd.f32 %v3098_v13, %v3097_v22  ;;  %v3170_v29 = vpop.f32.mrf.mxu1  ;;  %2151 = vmatprep.mubr.bf16.mxu1 %v4506_v7 }
  0xfd   : > { %v3100_v44 = vpop.f32.mrf.mxu0  ;;  %v4688_v39 = vadd.f32 %v3170_v29, %v3169_v0 }
  0xfe   : > { %v3172_v34 = vpop.f32.mrf.mxu1 }
  0xff   : > { %v3101_v57 = vpop.f32.mrf.mxu0 }
 0x100   : > { %v4690_v25 = vadd.f32 %v3101_v57, %v3100_v44  ;;  %v3173_v27 = vpop.f32.mrf.mxu1 }
 0x101   : > { %v4695_v48 = vadd.f32 %v3173_v27, %v3172_v34  ;;  %v3103_v5 = vpop.f32.mrf.mxu0  ;;  %2055 = vmatmul.mubr.bf16.gmra.mxu0 %v4443_v46  ;;  %v1626_v34 = vadd.f32 %v4672_v43, %v4725_v9 }
 0x102   : > { %2062 = vmatprep.mubr.bf16.mxu0 %v859_v11  ;;  %v3175_v45 = vpop.f32.mrf.mxu1 }
 0x103   : > { %v3104_v2 = vpop.f32.mrf.mxu0  ;;  %2152 = vmatmul.mubr.bf16.gmra.mxu1 %v4481_v21 }
 0x104   : > { %v4699_v15 = vadd.f32 %v3104_v2, %v3103_v5  ;;  %2159 = vmatprep.mubr.bf16.mxu1 %v4522_v1  ;;  %v3176_v26 = vpop.f32.mrf.mxu1 }
 0x105   : > { %v3106_v62 = vpop.f32.mrf.mxu0  ;;  %v4702_v6 = vadd.f32 %v3176_v26, %v3175_v45 }
 0x106   : > { %v3178_v56 = vpop.f32.mrf.mxu1 }
 0x107   : > { %v3107_v16 = vpop.f32.mrf.mxu0 }
 0x108   : > { %v4704_v54 = vadd.f32 %v3107_v16, %v3106_v62  ;;  %v3179_v46 = vpop.f32.mrf.mxu1 }
 0x109   : > { %v3109_v32 = vpop.f32.mrf.mxu0  ;;  %2063 = vmatmul.mubr.bf16.gmra.mxu0 %v4504_v10  ;;  %v4708_v31 = vadd.f32 %v3179_v46, %v3178_v56 }
 0x10a   : > { %3563 = vmatprep.mubr.bf16.mxu0 %v4453_v17  ;;  %v3181_v35 = vpop.f32.mrf.mxu1 }
 0x10b   : > { %v3110_v30 = vpop.f32.mrf.mxu0  ;;  %2160 = vmatmul.mubr.bf16.gmra.mxu1 %v4506_v7 }
 0x10c   : > { %v4711_v36 = vadd.f32 %v3110_v30, %v3109_v32  ;;  %2167 = vmatprep.mubr.bf16.mxu1 %v4541_v12  ;;  %v3182_v23 = vpop.f32.mrf.mxu1  ;;  %v1634_v30 = vadd.f32 %v4690_v25, %v4725_v9 }
 0x10d   : > { %v3112_v4 = vpop.f32.mrf.mxu0  ;;  %v4714_v3 = vadd.f32 %v3182_v23, %v3181_v35 }
 0x10e   : > { %v3184_v19 = vpop.f32.mrf.mxu1 }
 0x10f   : > { %v3113_v18 = vpop.f32.mrf.mxu0 }
 0x110   : > { %v4716_v10 = vadd.f32 %v3113_v18, %v3112_v4  ;;  %v3185_v17 = vpop.f32.mrf.mxu1 }
 0x111   : > { %v3115_v42 = vpop.f32.mrf.mxu0  ;;  %3564 = vmatmul.mubr.bf16.vlgmr.msra.gmra.mxu0 %v4464_v41  ;;  %v4720_v47 = vadd.f32 %v3185_v17, %v3184_v19 }
 0x112   : > { %3567 = vmatprep.mubr.bf16.mxu0 %v4470_v50  ;;  %v3203_v8 = vpop.f32.mrf.mxu1  ;;  %v1623_v50 = vadd.f32 %v4667_v58, %v4725_v9 }
 0x113   : > { %v3116_v33 = vpop.f32.mrf.mxu0  ;;  %2168 = vmatmul.mubr.bf16.gmra.mxu1 %v4522_v1 }
 0x114   : > { %v4728_v22 = vadd.f32 %v3116_v33, %v3115_v42  ;;  %2175 = vmatprep.mubr.bf16.mxu1 %v4564_v38  ;;  %v3204_v41 = vpop.f32.mrf.mxu1 }
 0x115   : > { %v3118_v13 = vpop.f32.mrf.mxu0  ;;  %v3205_v20 = vadd.f32 %v3204_v41, %v3203_v8 }
 0x116   : > { %v3206_v0 = vpop.f32.mrf.mxu1 }
 0x117   : > { %v3119_v59 = vpop.f32.mrf.mxu0  ;;  %v4735_v29 = vadd.f32 %v3205_v20, %v1623_v50  ;;  %v1642_v50 = vadd.f32 %v4704_v54, %v4725_v9 }
 0x118   : > { %v4733_v44 = vadd.f32 %v3119_v59, %v3118_v13  ;;  %v3207_v61 = vpop.f32.mrf.mxu1 }
 0x119   : > { %v3121_v57 = vpop.f32.mrf.mxu0  ;;  %3568 = vmatmul.mubr.bf16.gmra.mxu0 %v4475_v24  ;;  %v3208_v27 = vadd.f32 %v3207_v61, %v3206_v0  ;;  %v1631_v24 = vadd.f32 %v4683_v53, %v4725_v9 }
 0x11a   : > { %3571 = vmatprep.mubr.bf16.mxu0 %v4481_v21  ;;  %v3209_v5 = vpop.f32.mrf.mxu1 }
 0x11b   : > { %v3122_v11 = vpop.f32.mrf.mxu0  ;;  %2176 = vmatmul.mubr.bf16.gmra.mxu1 %v4541_v12  ;;  %v4744_v2 = vadd.f32 %v3208_v27, %v1626_v34 }
 0x11c   : > { %v4742_v58 = vadd.f32 %v3122_v11, %v3121_v57  ;;  %2183 = vmatprep.mubr.bf16.mxu1 %v4586_v40  ;;  %v3210_v62 = vpop.f32.mrf.mxu1 }
 0x11d   : > { %v3124_v45 = vpop.f32.mrf.mxu0  ;;  %v3211_v21 = vadd.f32 %v3210_v62, %v3209_v5 }
 0x11e   : > { %v3212_v16 = vpop.f32.mrf.mxu1 }
 0x11f   : > { %v3125_v26 = vpop.f32.mrf.mxu0  ;;  %v4751_v56 = vadd.f32 %v3211_v21, %v1631_v24  ;;  %v1650_v24 = vadd.f32 %v4716_v10, %v4725_v9 }
 0x120   : > { %v4749_v43 = vadd.f32 %v3125_v26, %v3124_v45  ;;  %v3213_v46 = vpop.f32.mrf.mxu1 }
 0x121   : > { %v3127_v32 = vpop.f32.mrf.mxu0  ;;  %3572 = vmatmul.mubr.bf16.gmra.mxu0 %v4506_v7  ;;  %v3214_v35 = vadd.f32 %v3213_v46, %v3212_v16  ;;  %v1639_v7 = vadd.f32 %v4699_v15, %v4725_v9 }
 0x122   : > { %3575 = vmatprep.mubr.bf16.mxu0 %v4522_v1  ;;  %v3215_v23 = vpop.f32.mrf.mxu1 }
 0x123   : > { %v3128_v4 = vpop.f32.mrf.mxu0  ;;  %2184 = vmatmul.mubr.bf16.gmra.mxu1 %v4564_v38  ;;  %v4760_v18 = vadd.f32 %v3214_v35, %v1634_v30 }
 0x124   : > { %v4758_v53 = vadd.f32 %v3128_v4, %v3127_v32  ;;  %2191 = vmatprep.mubr.bf16.mxu1 %v4601_v63  ;;  %v3216_v42 = vpop.f32.mrf.mxu1 }
 0x125   : > { %v3130_v19 = vpop.f32.mrf.mxu0  ;;  %v3217_v1 = vadd.f32 %v3216_v42, %v3215_v23 }
 0x126   : > { %v3218_v33 = vpop.f32.mrf.mxu1 }
 0x127   : > { %v3131_v17 = vpop.f32.mrf.mxu0  ;;  %v4767_v8 = vadd.f32 %v3217_v1, %v1639_v7  ;;  %v1658_v7 = vadd.f32 %v4733_v44, %v4725_v9 }
 0x128   : > { %v4765_v25 = vadd.f32 %v3131_v17, %v3130_v19  ;;  %v3219_v41 = vpop.f32.mrf.mxu1 }
 0x129   : > { %v3133_v13 = vpop.f32.mrf.mxu0  ;;  %3576 = vmatmul.mubr.bf16.gmra.mxu0 %v4541_v12  ;;  %v3220_v20 = vadd.f32 %v3219_v41, %v3218_v33  ;;  %v1647_v12 = vadd.f32 %v4711_v36, %v4725_v9 }
 0x12a   : > { %3579 = vmatprep.mubr.bf16.mxu0 %v4564_v38  ;;  %v3221_v0 = vpop.f32.mrf.mxu1 }
 0x12b   : > { %v3134_v59 = vpop.f32.mrf.mxu0  ;;  %2192 = vmatmul.mubr.bf16.gmra.mxu1 %v4586_v40  ;;  %v4776_v57 = vadd.f32 %v3220_v20, %v1642_v50  ;;  %v1000_v50 = vrot.slane %v4679_v37, 2 }
 0x12c   : > { %v4774_v15 = vadd.f32 %v3134_v59, %v3133_v13  ;;  %2199 = vmatprep.mubr.bf16.mxu1 %v4610_v49  ;;  %v3222_v34 = vpop.f32.mrf.mxu1  ;;  %v1663_v59 = vadd.f32 %v4742_v58, %v4725_v9 }
 0x12d   : > { %v3136_v61 = vpop.f32.mrf.mxu0  ;;  %v3223_v38 = vadd.f32 %v3222_v34, %v3221_v0  ;;  %v1001_v37 = vsel %vm860_vm2, %v4643_v51, %v1000_v50 }
 0x12e   : > { %v3224_v11 = vpop.f32.mrf.mxu1 }
 0x12f   : > { %v3137_v27 = vpop.f32.mrf.mxu0  ;;  %v4783_v5 = vadd.f32 %v3223_v38, %v1647_v12 }
 0x130   : > { %v4781_v54 = vadd.f32 %v3137_v27, %v3136_v61  ;;  %v3225_v62 = vpop.f32.mrf.mxu1  ;;  %v1666_v27 = vadd.f32 %v4749_v43, %v4725_v9 }
 0x131   : > { %v3139_v45 = vpop.f32.mrf.mxu0  ;;  %3580 = vmatmul.mubr.bf16.gmra.mxu0 %v4586_v40  ;;  %v3226_v21 = vadd.f32 %v3225_v62, %v3224_v11  ;;  %v1655_v40 = vadd.f32 %v4728_v22, %v4725_v9 }
 0x132   : > { %3583 = vmatprep.mubr.bf16.mxu0 %v4601_v63  ;;  %v3227_v16 = vpop.f32.mrf.mxu1 }
 0x133   : > { %v3140_v26 = vpop.f32.mrf.mxu0  ;;  %2200 = vmatmul.mubr.bf16.gmra.mxu1 %v4601_v63  ;;  %v4792_v32 = vadd.f32 %v3226_v21, %v1650_v24 }
 0x134   : > { %v4790_v36 = vadd.f32 %v3140_v26, %v3139_v45  ;;  %2207 = vmatprep.mubr.bf16.mxu1 %v4619_v14  ;;  %v3228_v30 = vpop.f32.mrf.mxu1  ;;  %v1004_v26 = vpack.c.bf16 %v1001_v37, %v4643_v51 }
 0x135   : > { %v3142_v46 = vpop.f32.mrf.mxu0  ;;  %v3229_v35 = vadd.f32 %v3228_v30, %v3227_v16 }
 0x136   : > { %v3230_v23 = vpop.f32.mrf.mxu1 }
 0x137   : > { %v3143_v4 = vpop.f32.mrf.mxu0  ;;  %v4799_v19 = vadd.f32 %v3229_v35, %v1655_v40 }
 0x138   : > { %v4797_v10 = vadd.f32 %v3143_v4, %v3142_v46  ;;  %v3231_v63 = vpop.f32.mrf.mxu1  ;;  %v1671_v46 = vadd.f32 %v4758_v53, %v4725_v9 }
 0x139   : > { %v3145_v42 = vpop.f32.mrf.mxu0  ;;  %3584 = vmatmul.mubr.bf16.gmra.mxu0 %v4610_v49  ;;  %v3232_v1 = vadd.f32 %v3231_v63, %v3230_v23 }
 0x13a   : > { %3587 = vmatprep.mubr.bf16.mxu0 %v4619_v14  ;;  %v3233_v33 = vpop.f32.mrf.mxu1 }
 0x13b   : > { %v3146_v17 = vpop.f32.mrf.mxu0  ;;  %2208 = vmatmul.mubr.bf16.gmra.mxu1 %v4610_v49  ;;  %v4808_v13 = vadd.f32 %v3232_v1, %v1658_v7 }
 0x13c   : > { %v4806_v22 = vadd.f32 %v3146_v17, %v3145_v42  ;;  %2215 = vmatprep.mubr.bf16.mxu1 %v4628_v52  ;;  %v3234_v20 = vpop.f32.mrf.mxu1  ;;  %v1674_v42 = vadd.f32 %v4765_v25, %v4725_v9 }
 0x13d   : > { %v3148_v41 = vpop.f32.mrf.mxu0  ;;  %v3235_v0 = vadd.f32 %v3234_v20, %v3233_v33  ;;  %v1679_v33 = vadd.f32 %v4774_v15, %v4725_v9 }
 0x13e   : > { %v3236_v61 = vpop.f32.mrf.mxu1 }
 0x13f   : > { %v3149_v44 = vpop.f32.mrf.mxu0  ;;  %v4816_v12 = vadd.f32 %v3235_v0, %v1663_v59 }
 0x140   : > { %v4814_v34 = vadd.f32 %v3149_v44, %v3148_v41  ;;  %v3237_v38 = vpop.f32.mrf.mxu1 }
 0x141   : > { %v3151_v49 = vpop.f32.mrf.mxu0  ;;  %3588 = vmatmul.mubr.bf16.gmra.mxu0 %v4628_v52  ;;  %v3238_v58 = vadd.f32 %v3237_v38, %v3236_v61 }
 0x142   : > { %3591 = vmatprep.mubr.bf16.mxu0 %v4646_v55  ;;  %v3239_v45 = vpop.f32.mrf.mxu1 }
 0x143   : > { %v3152_v11 = vpop.f32.mrf.mxu0  ;;  %2216 = vmatmul.mubr.bf16.gmra.mxu1 %v4619_v14  ;;  %v4827_v24 = vadd.f32 %v3238_v58, %v1666_v27 }
 0x144   : > { %v4825_v62 = vadd.f32 %v3152_v11, %v3151_v49  ;;  %2223 = vmatprep.mubr.bf16.mxu1 %v4646_v55  ;;  %v3240_v16 = vpop.f32.mrf.mxu1 }
 0x145   : > { %v3154_v21 = vpop.f32.mrf.mxu0  ;;  %v3241_v30 = vadd.f32 %v3240_v16, %v3239_v45  ;;  %v1687_v45 = vadd.f32 %v4790_v36, %v4725_v9 }
 0x146   : > { %v3242_v40 = vpop.f32.mrf.mxu1 }
 0x147   : > { %v3155_v43 = vpop.f32.mrf.mxu0  ;;  %v4835_v4 = vadd.f32 %v3241_v30, %v1671_v46 }
 0x148   : > { %v4833_v35 = vadd.f32 %v3155_v43, %v3154_v21  ;;  %v3243_v23 = vpop.f32.mrf.mxu1 }
 0x149   : > { %v3157_v14 = vpop.f32.mrf.mxu0  ;;  %3592 = vmatmul.mubr.bf16.gmra.mxu0 %v1004_v26  ;;  %v3244_v55 = vadd.f32 %v3243_v23, %v3242_v40 }
 0x14a   : > { %v3245_v51 = vpop.f32.mrf.mxu1 }
 0x14b   : > { %v3158_v63 = vpop.f32.mrf.mxu0  ;;  %2224 = vmatmul.mubr.bf16.gmra.mxu1 %v4628_v52  ;;  %v4842_v53 = vadd.f32 %v3244_v55, %v1674_v42  ;;  %v1682_v52 = vadd.f32 %v4781_v54, %v4725_v9 }
 0x14c   : > { %v4840_v7 = vadd.f32 %v3158_v63, %v3157_v14  ;;  %v3246_v17 = vpop.f32.mrf.mxu1  ;;  %v1690_v14 = vadd.f32 %v4797_v10, %v4725_v9 }
 0x14d   : > { %v3160_v1 = vpop.f32.mrf.mxu0  ;;  %v3247_v41 = vadd.f32 %v3246_v17, %v3245_v51  ;;  %v1695_v17 = vadd.f32 %v4806_v22, %v4725_v9 }
 0x14e   : > { %v3248_v20 = vpop.f32.mrf.mxu1 }
 0x14f   : > { %v3161_v50 = vpop.f32.mrf.mxu0  ;;  %v4848_v25 = vadd.f32 %v3247_v41, %v1679_v33 }
 0x150   : > { %v4846_v59 = vadd.f32 %v3161_v50, %v3160_v1  ;;  %v3249_v44 = vpop.f32.mrf.mxu1 }
 0x151   : > { %v3315_v0 = vpop.f32.mrf.mxu0  ;;  %v3250_v61 = vadd.f32 %v3249_v44, %v3248_v20 }
 0x153   : > { %v3316_v49 = vpop.f32.mrf.mxu0  ;;  %v3251_v38 = vpop.f32.mrf.mxu1  ;;  %v4852_v27 = vadd.f32 %v3250_v61, %v1682_v52  ;;  %v1698_v52 = vadd.f32 %v4814_v34, %v4725_v9 }
 0x154   : > { %v3317_v37 = vadd.f32 %v3316_v49, %v3315_v0 }
 0x155   : > { %v3318_v58 = vpop.f32.mrf.mxu0  ;;  %v3252_v15 = vpop.f32.mrf.mxu1 }
 0x156   : > { %v4855_v11 = vadd.f32 %v3317_v37, %v4735_v29  ;;  %v3253_v21 = vadd.f32 %v3252_v15, %v3251_v38 }
 0x157   : > { %v3319_v26 = vpop.f32.mrf.mxu0  ;;  %v3254_v16 = vpop.f32.mrf.mxu1 }
 0x158   : > { %v3320_v46 = vadd.f32 %v3319_v26, %v3318_v58  ;;  %v4859_v30 = vadd.f32 %v3253_v21, %v1687_v45  ;;  %v1703_v45 = vadd.f32 %v4825_v62, %v4725_v9 }
 0x159   : > { %v3321_v54 = vpop.f32.mrf.mxu0  ;;  %v3255_v43 = vpop.f32.mrf.mxu1 }
 0x15a   : > { %v4862_v40 = vadd.f32 %v3320_v46, %v4744_v2  ;;  %v3256_v23 = vadd.f32 %v3255_v43, %v3254_v16 }
 0x15b   : > { %v3322_v29 = vpop.f32.mrf.mxu0  ;;  %v3257_v42 = vpop.f32.mrf.mxu1 }
 0x15c   : > { %v3323_v55 = vadd.f32 %v3322_v29, %v3321_v54  ;;  %v4866_v63 = vadd.f32 %v3256_v23, %v1690_v14  ;;  %v1706_v14 = vadd.f32 %v4833_v35, %v4725_v9 }
 0x15d   : > { %v3324_v36 = vpop.f32.mrf.mxu0  ;;  %v3258_v51 = vpop.f32.mrf.mxu1 }
 0x15e   : > { %v4869_v1 = vadd.f32 %v3323_v55, %v4751_v56  ;;  %v3259_v33 = vadd.f32 %v3258_v51, %v3257_v42 }
 0x15f   : > { %v3325_v2 = vpop.f32.mrf.mxu0  ;;  %v3260_v41 = vpop.f32.mrf.mxu1 }
 0x160   : > { %v3326_v50 = vadd.f32 %v3325_v2, %v3324_v36  ;;  %v4873_v20 = vadd.f32 %v3259_v33, %v1695_v17  ;;  %v1711_v17 = vadd.f32 %v4840_v7, %v4725_v9 }
 0x161   : > { %v3327_v10 = vpop.f32.mrf.mxu0  ;;  %v3261_v0 = vpop.f32.mrf.mxu1 }
 0x162   : > { %v4876_v44 = vadd.f32 %v3326_v50, %v4760_v18  ;;  %v3262_v61 = vadd.f32 %v3261_v0, %v3260_v41 }
 0x163   : > { %v3328_v56 = vpop.f32.mrf.mxu0  ;;  %v3263_v49 = vpop.f32.mrf.mxu1 }
 0x164   : > { %v3329_v38 = vadd.f32 %v3328_v56, %v3327_v10  ;;  %v4880_v37 = vadd.f32 %v3262_v61, %v1698_v52  ;;  %v1714_v52 = vadd.f32 %v4846_v59, %v4725_v9 }
 0x165   : > { %v3330_v22 = vpop.f32.mrf.mxu0  ;;  %v3264_v58 = vpop.f32.mrf.mxu1 }
 0x166   : > { %v4883_v15 = vadd.f32 %v3329_v38, %v4767_v8  ;;  %v3265_v21 = vadd.f32 %v3264_v58, %v3263_v49 }
 0x167   : > { %v3331_v18 = vpop.f32.mrf.mxu0  ;;  %v3266_v26 = vpop.f32.mrf.mxu1 }
 0x168   : > { %v3332_v16 = vadd.f32 %v3331_v18, %v3330_v22  ;;  %v4887_v46 = vadd.f32 %v3265_v21, %v1703_v45  ;;  %v1719_v45 = vadd.f32 %v4670_v28, %v4725_v9 }
 0x169   : > { %v3333_v34 = vpop.f32.mrf.mxu0  ;;  %v3267_v54 = vpop.f32.mrf.mxu1 }
 0x16a   : > { %v4890_v43 = vadd.f32 %v3332_v16, %v4776_v57  ;;  %v3268_v23 = vadd.f32 %v3267_v54, %v3266_v26 }
 0x16b   : > { %v3334_v8 = vpop.f32.mrf.mxu0  ;;  %v3269_v29 = vpop.f32.mrf.mxu1 }
 0x16c   : > { %v3335_v42 = vadd.f32 %v3334_v8, %v3333_v34  ;;  %v4894_v55 = vadd.f32 %v3268_v23, %v1706_v14  ;;  %v1722_v14 = vadd.f32 %v4676_v60, %v4725_v9 }
 0x16d   : > { %v3336_v62 = vpop.f32.mrf.mxu0  ;;  %v3270_v36 = vpop.f32.mrf.mxu1 }
 0x16e   : > { %v4897_v51 = vadd.f32 %v3335_v42, %v4783_v5  ;;  %v3271_v33 = vadd.f32 %v3270_v36, %v3269_v29 }
 0x16f   : > { %v3337_v57 = vpop.f32.mrf.mxu0  ;;  %v3272_v2 = vpop.f32.mrf.mxu1 }
 0x170   : > { %v3338_v41 = vadd.f32 %v3337_v57, %v3336_v62  ;;  %v4901_v50 = vadd.f32 %v3271_v33, %v1711_v17  ;;  %v1727_v17 = vadd.f32 %v4688_v39, %v4725_v9 }
 0x171   : > { %v3339_v35 = vpop.f32.mrf.mxu0  ;;  %v3273_v10 = vpop.f32.mrf.mxu1 }
 0x172   : > { %v4904_v0 = vadd.f32 %v3338_v41, %v4792_v32  ;;  %v3274_v61 = vadd.f32 %v3273_v10, %v3272_v2 }
 0x173   : > { %v3340_v5 = vpop.f32.mrf.mxu0  ;;  %v3275_v56 = vpop.f32.mrf.mxu1 }
 0x174   : > { %v3341_v49 = vadd.f32 %v3340_v5, %v3339_v35  ;;  %v4908_v38 = vadd.f32 %v3274_v61, %v1714_v52  ;;  %v1730_v52 = vadd.f32 %v4695_v48, %v4725_v9 }
 0x175   : > { %v3342_v7 = vpop.f32.mrf.mxu0  ;;  %v3276_v22 = vpop.f32.mrf.mxu1 }
 0x176   : > { %v4911_v58 = vadd.f32 %v3341_v49, %v4799_v19  ;;  %v3277_v21 = vadd.f32 %v3276_v22, %v3275_v56 }
 0x177   : > { %v3343_v32 = vpop.f32.mrf.mxu0  ;;  %v3278_v18 = vpop.f32.mrf.mxu1 }
 0x178   : > { %v3344_v26 = vadd.f32 %v3343_v32, %v3342_v7  ;;  %v4915_v16 = vadd.f32 %v3277_v21, %v1719_v45  ;;  %v1735_v45 = vadd.f32 %v4702_v6, %v4725_v9 }
 0x179   : > { %v3345_v59 = vpop.f32.mrf.mxu0  ;;  %v3279_v34 = vpop.f32.mrf.mxu1 }
 0x17a   : > { %v4918_v54 = vadd.f32 %v3344_v26, %v4808_v13  ;;  %v3280_v23 = vadd.f32 %v3279_v34, %v3278_v18 }
 0x17b   : > { %v3346_v19 = vpop.f32.mrf.mxu0  ;;  %v3281_v8 = vpop.f32.mrf.mxu1 }
 0x17c   : > { %v3347_v29 = vadd.f32 %v3346_v19, %v3345_v59  ;;  %v4922_v42 = vadd.f32 %v3280_v23, %v1722_v14  ;;  %v1738_v14 = vadd.f32 %v4708_v31, %v4725_v9 }
 0x17d   : > { %v3348_v28 = vpop.f32.mrf.mxu0  ;;  %v3282_v62 = vpop.f32.mrf.mxu1 }
 0x17e   : > { %v4925_v36 = vadd.f32 %v3347_v29, %v4816_v12  ;;  %v3283_v33 = vadd.f32 %v3282_v62, %v3281_v8 }
 0x17f   : > { %v3349_v13 = vpop.f32.mrf.mxu0  ;;  %v3284_v57 = vpop.f32.mrf.mxu1 }
 0x180   : > { %v3350_v2 = vadd.f32 %v3349_v13, %v3348_v28  ;;  %v4929_v41 = vadd.f32 %v3283_v33, %v1727_v17  ;;  %v1743_v17 = vadd.f32 %v4714_v3, %v4725_v9 }
 0x181   : > { %v3351_v60 = vpop.f32.mrf.mxu0  ;;  %v3285_v35 = vpop.f32.mrf.mxu1 }
 0x182   : > { %v4932_v10 = vadd.f32 %v3350_v2, %v4827_v24  ;;  %v3286_v61 = vadd.f32 %v3285_v35, %v3284_v57 }
 0x183   : > { %v3352_v12 = vpop.f32.mrf.mxu0  ;;  %v3287_v5 = vpop.f32.mrf.mxu1 }
 0x184   : > { %v3353_v56 = vadd.f32 %v3352_v12, %v3351_v60  ;;  %v4936_v49 = vadd.f32 %v3286_v61, %v1730_v52  ;;  %v1746_v52 = vadd.f32 %v4720_v47, %v4725_v9 }
 0x185   : > { %v3354_v39 = vpop.f32.mrf.mxu0  ;;  %v3288_v7 = vpop.f32.mrf.mxu1 }
 0x186   : > { %v4939_v22 = vadd.f32 %v3353_v56, %v4835_v4  ;;  %v3289_v21 = vadd.f32 %v3288_v7, %v3287_v5 }
 0x187   : > { %v3355_v24 = vpop.f32.mrf.mxu0  ;;  %v3290_v32 = vpop.f32.mrf.mxu1 }
 0x188   : > { %v3356_v18 = vadd.f32 %v3355_v24, %v3354_v39  ;;  %v4943_v26 = vadd.f32 %v3289_v21, %v1735_v45 }
 0x189   : > { %v3357_v48 = vpop.f32.mrf.mxu0  ;;  %v3291_v59 = vpop.f32.mrf.mxu1 }
 0x18a   : > { %v4946_v34 = vadd.f32 %v3356_v18, %v4842_v53  ;;  %v3292_v23 = vadd.f32 %v3291_v59, %v3290_v32 }
 0x18b   : > { %v3358_v4 = vpop.f32.mrf.mxu0  ;;  %v3293_v19 = vpop.f32.mrf.mxu1 }
 0x18c   : > { %v3359_v8 = vadd.f32 %v3358_v4, %v3357_v48  ;;  %v4950_v29 = vadd.f32 %v3292_v23, %v1738_v14 }
 0x18d   : > { %v3360_v6 = vpop.f32.mrf.mxu0  ;;  %v3294_v28 = vpop.f32.mrf.mxu1 }
 0x18e   : > { %v4953_v62 = vadd.f32 %v3359_v8, %v4848_v25  ;;  %v3295_v33 = vadd.f32 %v3294_v28, %v3293_v19 }
 0x18f   : > { %v3361_v53 = vpop.f32.mrf.mxu0  ;;  %v3296_v13 = vpop.f32.mrf.mxu1 }
 0x190   : > { %v3362_v57 = vadd.f32 %v3361_v53, %v3360_v6  ;;  %v4957_v2 = vadd.f32 %v3295_v33, %v1743_v17 }
 0x191   : > { %v3363_v31 = vpop.f32.mrf.mxu0  ;;  %v3297_v60 = vpop.f32.mrf.mxu1 }
 0x192   : > { %v4960_v35 = vadd.f32 %v3362_v57, %v4852_v27  ;;  %v3298_v61 = vadd.f32 %v3297_v60, %v3296_v13 }
 0x193   : > { %v3364_v25 = vpop.f32.mrf.mxu0  ;;  %v4964_v12 = vpop.f32.mrf.mxu1 }
 0x194   : > { %v3365_v5 = vadd.f32 %v3364_v25, %v3363_v31  ;;  %v4966_v3 = vadd.f32 %v3298_v61, %v1746_v52 }
 0x195   : > { %v3366_v56 = vpop.f32.mrf.mxu0  ;;  %v4971_v7 = vpop.f32.mrf.mxu1 }
 0x196   : > { %v4969_v39 = vadd.f32 %v3365_v5, %v4859_v30 }
 0x197   : > { %v3367_v45 = vpop.f32.mrf.mxu0  ;;  %v4973_v21 = vpop.f32.mrf.mxu1 }
 0x198   : > { %v3368_v27 = vadd.f32 %v3367_v45, %v3366_v56 }
 0x199   : > { %v3369_v24 = vpop.f32.mrf.mxu0  ;;  %v4978_v9 = vpop.f32.mrf.mxu1 }
 0x19a   : > { %v4976_v47 = vadd.f32 %v3368_v27, %v4866_v63 }
 0x19b   : > { %v3370_v32 = vpop.f32.mrf.mxu0  ;;  %v4980_v18 = vpop.f32.mrf.mxu1 }
 0x19c   : > { %v3371_v48 = vadd.f32 %v3370_v32, %v3369_v24 }
 0x19d   : > { %v3372_v59 = vpop.f32.mrf.mxu0  ;;  %v4985_v14 = vpop.f32.mrf.mxu1 }
 0x19e   : > { %v4983_v30 = vadd.f32 %v3371_v48, %v4873_v20 }
 0x19f   : > { %v3373_v23 = vpop.f32.mrf.mxu0  ;;  %v4987_v4 = vpop.f32.mrf.mxu1 }
 0x1a0   : > { %v3374_v19 = vadd.f32 %v3373_v23, %v3372_v59 }
 0x1a1   : > { %v3375_v8 = vpop.f32.mrf.mxu0  ;;  %v4992_v6 = vpop.f32.mrf.mxu1 }
 0x1a2   : > { %v4990_v63 = vadd.f32 %v3374_v19, %v4880_v37 }
 0x1a3   : > { %v3376_v28 = vpop.f32.mrf.mxu0  ;;  %v4994_v17 = vpop.f32.mrf.mxu1 }
 0x1a4   : > { %v3377_v33 = vadd.f32 %v3376_v28, %v3375_v8 }
 0x1a5   : > { %v3378_v53 = vpop.f32.mrf.mxu0  ;;  %v4999_v13 = vpop.f32.mrf.mxu1 }
 0x1a6   : > { %v4997_v20 = vadd.f32 %v3377_v33, %v4887_v46 }
 0x1a7   : > { %v3379_v57 = vpop.f32.mrf.mxu0  ;;  %v5001_v31 = vpop.f32.mrf.mxu1 }
 0x1a8   : > { %v3380_v60 = vadd.f32 %v3379_v57, %v3378_v53 }
 0x1a9   : > { %v3381_v52 = vpop.f32.mrf.mxu0  ;;  %v5006_v61 = vpop.f32.mrf.mxu1 }
 0x1aa   : > { %v5004_v37 = vadd.f32 %v3380_v60, %v4894_v55 }
 0x1ab   : > { %v3382_v25 = vpop.f32.mrf.mxu0  ;;  %v5008_v5 = vpop.f32.mrf.mxu1 }
 0x1ac   : > { %5253 = vst [vmem:[#allocation3_spill] sm:$0xff] %v5004_v37  ;;  %v3383_v56 = vadd.f32 %v3382_v25, %v3381_v52 }
 0x1ad   : > { %v3384_v45 = vpop.f32.mrf.mxu0  ;;  %v5013_v27 = vpop.f32.mrf.mxu1 }
 0x1ae   : > { %v5011_v46 = vadd.f32 %v3383_v56, %v4901_v50 }
 0x1af   : > { %v3385_v24 = vpop.f32.mrf.mxu0  ;;  %v5015_v32 = vpop.f32.mrf.mxu1 }
 0x1b0   : > { %5254 = vst [vmem:[#allocation8_spill] sm:$0xff] %v5011_v46  ;;  %v3386_v48 = vadd.f32 %v3385_v24, %v3384_v45 }
 0x1b1   : > { %v3387_v59 = vpop.f32.mrf.mxu0  ;;  %v5020_v23 = vpop.f32.mrf.mxu1 }
 0x1b2   : > { %v5018_v55 = vadd.f32 %v3386_v48, %v4908_v38 }
 0x1b3   : > { %v3388_v19 = vpop.f32.mrf.mxu0  ;;  %v5022_v8 = vpop.f32.mrf.mxu1 }
 0x1b4   : > { %5255 = vst [vmem:[#allocation7_spill] sm:$0xff] %v5018_v55  ;;  %v3389_v28 = vadd.f32 %v3388_v19, %v3387_v59 }
 0x1b5   : > { %v3390_v33 = vpop.f32.mrf.mxu0  ;;  %v5027_v53 = vpop.f32.mrf.mxu1 }
 0x1b6   : > { %v5025_v50 = vadd.f32 %v3389_v28, %v4915_v16 }
 0x1b7   : > { %v3391_v57 = vpop.f32.mrf.mxu0  ;;  %v5029_v60 = vpop.f32.mrf.mxu1 }
 0x1b8   : > { %5256 = vst [vmem:[#allocation4_spill] sm:$0xff] %v5025_v50  ;;  %v3392_v52 = vadd.f32 %v3391_v57, %v3390_v33 }
 0x1b9   : > { %v3393_v25 = vpop.f32.mrf.mxu0  ;;  %v5034_v56 = vpop.f32.mrf.mxu1 }
 0x1ba   : > { %v5032_v38 = vadd.f32 %v3392_v52, %v4922_v42 }
 0x1bb   : > { %v3394_v45 = vpop.f32.mrf.mxu0  ;;  %v5036_v24 = vpop.f32.mrf.mxu1 }
 0x1bc   : > { %5257 = vst [vmem:[#allocation5_spill] sm:$0xff] %v5032_v38  ;;  %v3395_v48 = vadd.f32 %v3394_v45, %v3393_v25 }
 0x1bd   : > { %v3396_v59 = vpop.f32.mrf.mxu0  ;;  %v5041_v19 = vpop.f32.mrf.mxu1 }
 0x1be   : > { %v5039_v16 = vadd.f32 %v3395_v48, %v4929_v41 }
 0x1bf   : > { %v3397_v28 = vpop.f32.mrf.mxu0  ;;  %v5043_v50 = vpop.f32.mrf.mxu1 }
 0x1c0   : > { %5258 = vst [vmem:[#allocation6_spill] sm:$0xff] %v5039_v16  ;;  %v3398_v33 = vadd.f32 %v3397_v28, %v3396_v59 }
 0x1c1   : > { %v3399_v57 = vpop.f32.mrf.mxu0  ;;  %v5048_v52 = vpop.f32.mrf.mxu1 }
 0x1c2   : > { %v5046_v42 = vadd.f32 %v3398_v33, %v4936_v49 }
 0x1c3   : > { %v3400_v38 = vpop.f32.mrf.mxu0  ;;  %v5050_v37 = vpop.f32.mrf.mxu1 }
 0x1c4   : > { %5259 = vst [vmem:[#allocation9_spill] sm:$0xff] %v5046_v42  ;;  %v3401_v25 = vadd.f32 %v3400_v38, %v3399_v57 }
 0x1c5   : > { %v3402_v45 = vpop.f32.mrf.mxu0  ;;  %v5055_v48 = vpop.f32.mrf.mxu1 }
 0x1c6   : > { %v5053_v41 = vadd.f32 %v3401_v25, %v4943_v26 }
 0x1c7   : > { %v3403_v16 = vpop.f32.mrf.mxu0  ;;  %v5057_v55 = vpop.f32.mrf.mxu1 }
 0x1c8   : > { %5260 = vst [vmem:[#allocation10_spill] sm:$0xff] %v5053_v41  ;;  %v3404_v59 = vadd.f32 %v3403_v16, %v3402_v45  ;;  %v3429_v16 = vadd.f32 %v4971_v7, %v4964_v12  ;;  %v3438_v45 = vadd.f32 %v4992_v6, %v4987_v4  ;;  %v3441_v6 = vadd.f32 %v4999_v13, %v4994_v17 }
 0x1c9   : > { %v3405_v28 = vpop.f32.mrf.mxu0  ;;  %v5062_v33 = vpop.f32.mrf.mxu1 }
 0x1ca   : > { %v5060_v49 = vadd.f32 %v3404_v59, %v4950_v29  ;;  %v3435_v29 = vadd.f32 %v4985_v14, %v4980_v18  ;;  %v2106_v14 = vadd.f32 %v3429_v16, %v4855_v11  ;;  %v2117_v4 = vadd.f32 %v3438_v45, %v4876_v44 }
 0x1cb   : > { %v3406_v42 = vpop.f32.mrf.mxu0  ;;  %v5064_v46 = vpop.f32.mrf.mxu1  ;;  %v2122_v16 = vadd.f32 %v3441_v6, %v4883_v15  ;;  %v3444_v45 = vadd.f32 %v5006_v61, %v5001_v31  ;;  %v3462_v61 = vadd.f32 %v5048_v52, %v5043_v50 }
 0x1cc   : > { %5261 = vst [vmem:[#allocation11_spill] sm:$0xff] %v5060_v49  ;;  %v3407_v38 = vadd.f32 %v3406_v42, %v3405_v28  ;;  %v2114_v18 = vadd.f32 %v3435_v29, %v4869_v1  ;;  %v3450_v1 = vadd.f32 %v5020_v23, %v5015_v32 }
 0x1cd   : > { %v3408_v57 = vpop.f32.mrf.mxu0  ;;  %v5069_v25 = vpop.f32.mrf.mxu1 }
 0x1ce   : > { %v5067_v26 = vadd.f32 %v3407_v38, %v4957_v2  ;;  %v3432_v2 = vadd.f32 %v4978_v9, %v4973_v21 }
 0x1cf   : > { %v3409_v41 = vpop.f32.mrf.mxu0  ;;  %v5077_v59 = vpop.f32.mrf.mxu1 }
 0x1d0   : > { %v3410_v49 = vadd.f32 %v3409_v41, %v3408_v57  ;;  %v2109_v57 = vadd.f32 %v3432_v2, %v4862_v40 }
 0x1d1   : > { %v3565_v42 = vpop.f32.mrf.mxu0  ;;  %v5084_v38 = vpop.f32.mrf.mxu1 }
 0x1d2   : > { %v5082_v28 = vadd.f32 %v3410_v49, %v4966_v3  ;;  %v2275_v21 = vadd.f32 %v3565_v42, %v2114_v18 }
 0x1d3   : > { %v2266_v12 = vpop.f32.mrf.mxu0  ;;  %v5086_v7 = vpop.f32.mrf.mxu1 }
 0x1d4   : > { %5262 = vst [vmem:[#allocation12_spill] sm:$0xff] %v5082_v28  ;;  %v2267_v3 = vadd.f32 %v2266_v12, %v2106_v14  ;;  %v3447_v28 = vadd.f32 %v5013_v27, %v5008_v5  ;;  %v2133_v12 = vadd.f32 %v3450_v1, %v4904_v0  ;;  %v2432_v18 = vmul.f32 %v2275_v21, %v2275_v21 }
 0x1d5   : > { %v3566_v41 = vpop.f32.mrf.mxu0  ;;  %v5093_v9 = vpop.f32.mrf.mxu1  ;;  %v3459_v0 = vadd.f32 %v5041_v19, %v5036_v24 }
 0x1d6   : > { %v2278_v49 = vadd.f32 %v3566_v41, %v2117_v4  ;;  %v2430_v5 = vmul.f32 %v2267_v3, %v2267_v3  ;;  %v2130_v42 = vadd.f32 %v3447_v28, %v4897_v51  ;;  %v3453_v51 = vadd.f32 %v5027_v53, %v5022_v8 }
 0x1d7   : > { %v2269_v11 = vpop.f32.mrf.mxu0  ;;  %v5107_v44 = vpop.f32.mrf.mxu1  ;;  %v2125_v28 = vadd.f32 %v3444_v45, %v4890_v43  ;;  %v3456_v8 = vadd.f32 %v5034_v56, %v5029_v60 }
 0x1d8   : > { %v2973_v17 = vpack.c.bf16 %v2278_v49, %v2275_v21  ;;  %v2270_v13 = vadd.f32 %v2269_v11, %v2109_v57  ;;  %v2433_v41 = vmul.f32 %v2278_v49, %v2278_v49  ;;  %v2138_v43 = vadd.f32 %v3453_v51, %v4911_v58 }
 0x1d9   : > { %v3569_v40 = vpop.f32.mrf.mxu0  ;;  %v5111_v27 = vpop.f32.mrf.mxu1  ;;  %v3465_v58 = vadd.f32 %v5055_v48, %v5050_v37  ;;  %v3474_v51 = vadd.f32 %v5084_v38, %v5077_v59  ;;  %v3468_v37 = vadd.f32 %v5062_v33, %v5057_v55 }
 0x1da   : > { %3060 = vst [vmem:[%s5105_s11 + $0x8] sm:$0xff] %v2973_v17   ;;  %v2393_v32 = vadd.f32 %v2270_v13, %v2267_v3  ;;  %v2431_v23 = vmul.f32 %v2270_v13, %v2270_v13  ;;  %v2968_v29 = vpack.c.bf16 %v2270_v13, %v2267_v3  ;;  %v2291_v17 = vadd.f32 %v3569_v40, %v2130_v42 }
 0x1db   : > { %v2282_v2 = vpop.f32.mrf.mxu0  ;;  %v5118_v15 = vpop.f32.mrf.mxu1  ;;  %v2146_v42 = vadd.f32 %v3459_v0, %v4925_v36  ;;  %v2154_v59 = vadd.f32 %v3465_v58, %v4939_v22  ;;  %v3477_v22 = vadd.f32 %v5093_v9, %v5086_v7  ;;  %v3480_v7 = vadd.f32 %v5111_v27, %v5107_v44 }
 0x1dc   : > { %v2394_v14 = vadd.f32 %v2393_v32, %v2275_v21  ;;  %v2462_v4 = vadd.f32 %v2431_v23, %v2430_v5  ;;  %2969 = vst [vmem:[%s5105_s11] sm:$0xff] %v2968_v29   ;;  %v2283_v6 = vadd.f32 %v2282_v2, %v2122_v16  ;;  %v2149_v2 = vadd.f32 %v3462_v61, %v4932_v10 }
 0x1dd   : > { %v3570_v57 = vpop.f32.mrf.mxu0  ;;  %v5120_v3 = vpop.f32.mrf.mxu1 }
 0x1de   : > { %v2463_v11 = vadd.f32 %v2462_v4, %v2432_v18  ;;  %v2395_v13 = vadd.f32 %v2394_v14, %v2278_v49  ;;  %v2294_v31 = vadd.f32 %v3570_v57, %v2133_v12  ;;  %v2434_v16 = vmul.f32 %v2283_v6, %v2283_v6 }
 0x1df   : > { %v2285_v21 = vpop.f32.mrf.mxu0  ;;  %v5129_v5 = vpop.f32.mrf.mxu1  ;;  %v2436_v12 = vmul.f32 %v2291_v17, %v2291_v17 }
 0x1e0   : > { %v2396_v1 = vadd.f32 %v2395_v13, %v2283_v6  ;;  %v2464_v40 = vadd.f32 %v2463_v11, %v2433_v41  ;;  %v2983_v49 = vpack.c.bf16 %v2294_v31, %v2291_v17  ;;  %v2286_v32 = vadd.f32 %v2285_v21, %v2125_v28 }
 0x1e1   : > { %v3573_v23 = vpop.f32.mrf.mxu0  ;;  %v3485_v24 = vpop.f32.mrf.mxu1  ;;  %v2437_v11 = vmul.f32 %v2294_v31, %v2294_v31 }
 0x1e2   : > { %v2465_v53 = vadd.f32 %v2464_v40, %v2434_v16  ;;  %3062 = vst [vmem:[%s5105_s11 + $0x18] sm:$0xff] %v2983_v49   ;;  %v2397_v19 = vadd.f32 %v2396_v1, %v2286_v32  ;;  %v2435_v50 = vmul.f32 %v2286_v32, %v2286_v32  ;;  %v2978_v52 = vpack.c.bf16 %v2286_v32, %v2283_v6 }
 0x1e3   : > { %v2298_v29 = vpop.f32.mrf.mxu0  ;;  %v5135_v45 = vpop.f32.mrf.mxu1  ;;  %v2307_v4 = vadd.f32 %v3573_v23, %v2146_v42  ;;  %v2141_v6 = vadd.f32 %v3456_v8, %v4918_v54  ;;  %v2165_v23 = vadd.f32 %v3474_v51, %v4960_v35  ;;  %v3483_v35 = vadd.f32 %v5120_v3, %v5118_v15 }
 0x1e4   : > { %v2398_v18 = vadd.f32 %v2397_v19, %v2291_v17  ;;  %v2466_v14 = vadd.f32 %v2465_v53, %v2435_v50  ;;  %3061 = vst [vmem:[%s5105_s11 + $0x10] sm:$0xff] %v2978_v52   ;;  %v2299_v60 = vadd.f32 %v2298_v29, %v2138_v43  ;;  %v3471_v17 = vadd.f32 %v5069_v25, %v5064_v46 }
 0x1e5   : > { %v3574_v56 = vpop.f32.mrf.mxu0  ;;  %v5140_v41 = vpop.f32.mrf.mxu1  ;;  %v2440_v8 = vmul.f32 %v2307_v4, %v2307_v4  ;;  %v2157_v29 = vadd.f32 %v3468_v37, %v4946_v34  ;;  %v2170_v15 = vadd.f32 %v3477_v22, %v4969_v39 }
 0x1e6   : > { %v2310_v57 = vadd.f32 %v3574_v56, %v2149_v2  ;;  %v2467_v36 = vadd.f32 %v2466_v14, %v2436_v12  ;;  %v2399_v13 = vadd.f32 %v2398_v18, %v2294_v31  ;;  %v2438_v21 = vmul.f32 %v2299_v60, %v2299_v60 }
 0x1e7   : > { %v2301_v10 = vpop.f32.mrf.mxu0  ;;  %v5149_v0 = vpop.f32.mrf.mxu1  ;;  %v2162_v32 = vadd.f32 %v3471_v17, %v4953_v62  ;;  %v3486_v18 = vadd.f32 %v3485_v24, %v5129_v5  ;;  %v2178_v24 = vadd.f32 %v3483_v35, %v4983_v30  ;;  %v3489_v39 = vadd.f32 %v5140_v41, %v5135_v45 }
 0x1e8   : > { %v2993_v61 = vpack.c.bf16 %v2310_v57, %v2307_v4  ;;  %v2302_v28 = vadd.f32 %v2301_v10, %v2141_v6  ;;  %v2400_v54 = vadd.f32 %v2399_v13, %v2299_v60  ;;  %v2468_v1 = vadd.f32 %v2467_v36, %v2437_v11 }
 0x1e9   : > { %v3577_v16 = vpop.f32.mrf.mxu0  ;;  %v5154_v48 = vpop.f32.mrf.mxu1  ;;  %v2441_v42 = vmul.f32 %v2310_v57, %v2310_v57  ;;  %v2181_v10 = vadd.f32 %v3486_v18, %v4990_v63 }
 0x1ea   : > { %3064 = vst [vmem:[%s5105_s11 + $0x28] sm:$0xff] %v2993_v61   ;;  %v2439_v31 = vmul.f32 %v2302_v28, %v2302_v28  ;;  %v2988_v46 = vpack.c.bf16 %v2302_v28, %v2299_v60  ;;  %v2469_v25 = vadd.f32 %v2468_v1, %v2438_v21  ;;  %v2401_v40 = vadd.f32 %v2400_v54, %v2302_v28 }
 0x1eb   : > { %v2314_v38 = vpop.f32.mrf.mxu0  ;;  %v3493_v49 = vpop.f32.mrf.mxu1  ;;  %v2323_v50 = vadd.f32 %v3577_v16, %v2162_v32  ;;  %v2173_v1 = vadd.f32 %v3480_v7, %v4976_v47  ;;  %v3492_v47 = vadd.f32 %v5154_v48, %v5149_v0 }
 0x1ec   : > { %3063 = vst [vmem:[%s5105_s11 + $0x20] sm:$0xff] %v2988_v46   ;;  %v2402_v53 = vadd.f32 %v2401_v40, %v2307_v4  ;;  %v2470_v19 = vadd.f32 %v2469_v25, %v2439_v31  ;;  %v2315_v55 = vadd.f32 %v2314_v38, %v2154_v59 }
 0x1ed   : > { %v3578_v33 = vpop.f32.mrf.mxu0  ;;  %v3494_v52 = vpop.f32.mrf.mxu1  ;;  %v2444_v17 = vmul.f32 %v2323_v50, %v2323_v50 }
 0x1ee   : > { %v2326_v43 = vadd.f32 %v3578_v33, %v2165_v23  ;;  %v2471_v2 = vadd.f32 %v2470_v19, %v2440_v8  ;;  %v2403_v12 = vadd.f32 %v2402_v53, %v2310_v57  ;;  %v2442_v6 = vmul.f32 %v2315_v55, %v2315_v55 }
 0x1ef   : > { %v2317_v62 = vpop.f32.mrf.mxu0  ;;  %v3496_v14 = vpop.f32.mrf.mxu1  ;;  %v3495_v46 = vadd.f32 %v3494_v52, %v3493_v49  ;;  %v2186_v49 = vadd.f32 %v3489_v39, %v4997_v20  ;;  %v5263_v52 = vld [vmem:[#allocation8_spill] sm:$0xff] }
 0x1f0   : > { %v3003_v60 = vpack.c.bf16 %v2326_v43, %v2323_v50  ;;  %v2318_v56 = vadd.f32 %v2317_v62, %v2157_v29  ;;  %v2404_v4 = vadd.f32 %v2403_v12, %v2315_v55  ;;  %v2472_v34 = vadd.f32 %v2471_v2, %v2441_v42  ;;  %v5264_v29 = vld [vmem:[#allocation7_spill] sm:$0xff] }
 0x1f1   : > { %v3581_v58 = vpop.f32.mrf.mxu0  ;;  %v3497_v9 = vpop.f32.mrf.mxu1  ;;  %v2445_v16 = vmul.f32 %v2326_v43, %v2326_v43 }
 0x1f2   : > { %3066 = vst [vmem:[%s5105_s11 + $0x38] sm:$0xff] %v3003_v60   ;;  %v2443_v57 = vmul.f32 %v2318_v56, %v2318_v56  ;;  %v2998_v11 = vpack.c.bf16 %v2318_v56, %v2315_v55  ;;  %v2473_v36 = vadd.f32 %v2472_v34, %v2442_v6  ;;  %v2405_v13 = vadd.f32 %v2404_v4, %v2318_v56 }
 0x1f3   : > { %v2330_v3 = vpop.f32.mrf.mxu0  ;;  %v3499_v5 = vpop.f32.mrf.mxu1  ;;  %v2339_v27 = vadd.f32 %v3581_v58, %v2178_v24  ;;  %v3498_v63 = vadd.f32 %v3497_v9, %v3496_v14  ;;  %v5265_v14 = vld [vmem:[#allocation3_spill] sm:$0xff] }
 0x1f4   : > { %3065 = vst [vmem:[%s5105_s11 + $0x30] sm:$0xff] %v2998_v11   ;;  %v2406_v51 = vadd.f32 %v2405_v13, %v2323_v50  ;;  %v2474_v61 = vadd.f32 %v2473_v36, %v2443_v57  ;;  %v2331_v28 = vadd.f32 %v2330_v3, %v2170_v15  ;;  %v2189_v60 = vadd.f32 %v3492_v47, %v5265_v14 }
 0x1f5   : > { %v3582_v44 = vpop.f32.mrf.mxu0  ;;  %v3500_v54 = vpop.f32.mrf.mxu1  ;;  %v2197_v22 = vadd.f32 %v3498_v63, %v5264_v29  ;;  %v2448_v42 = vmul.f32 %v2339_v27, %v2339_v27 }
 0x1f6   : > { %v2342_v21 = vadd.f32 %v3582_v44, %v2181_v10  ;;  %v2475_v37 = vadd.f32 %v2474_v61, %v2444_v17  ;;  %v2407_v31 = vadd.f32 %v2406_v51, %v2326_v43  ;;  %v2446_v32 = vmul.f32 %v2331_v28, %v2331_v28 }
 0x1f7   : > { %v2333_v30 = vpop.f32.mrf.mxu0  ;;  %v3502_v25 = vpop.f32.mrf.mxu1  ;;  %v2194_v43 = vadd.f32 %v3495_v46, %v5263_v52  ;;  %v3501_v56 = vadd.f32 %v3500_v54, %v3499_v5 }
 0x1f8   : > { %v3013_v40 = vpack.c.bf16 %v2342_v21, %v2339_v27  ;;  %v2334_v59 = vadd.f32 %v2333_v30, %v2173_v1  ;;  %v2408_v38 = vadd.f32 %v2407_v31, %v2331_v28  ;;  %v2476_v23 = vadd.f32 %v2475_v37, %v2445_v16  ;;  %v5267_v1 = vld [vmem:[#allocation6_spill] sm:$0xff]  ;;  %v5268_v30 = vld [vmem:[#allocation9_spill] sm:$0xff] }
 0x1f9   : > { %v3585_v8 = vpop.f32.mrf.mxu0  ;;  %v3503_v53 = vpop.f32.mrf.mxu1  ;;  %v2449_v20 = vmul.f32 %v2342_v21, %v2342_v21 }
 0x1fa   : > { %3068 = vst [vmem:[%s5105_s11 + $0x48] sm:$0xff] %v3013_v40   ;;  %v2447_v45 = vmul.f32 %v2334_v59, %v2334_v59  ;;  %v3008_v41 = vpack.c.bf16 %v2334_v59, %v2331_v28  ;;  %v2477_v19 = vadd.f32 %v2476_v23, %v2446_v32  ;;  %v2409_v55 = vadd.f32 %v2408_v38, %v2334_v59  ;;  %v5266_v28 = vld [vmem:[#allocation4_spill] sm:$0xff]  ;;  %v5269_v38 = vld [vmem:[#allocation5_spill] sm:$0xff] }
 0x1fb   : > { %v2346_v33 = vpop.f32.mrf.mxu0  ;;  %v3505_v50 = vpop.f32.mrf.mxu1  ;;  %v2355_v48 = vadd.f32 %v3585_v8, %v2194_v43  ;;  %v3504_v3 = vadd.f32 %v3503_v53, %v3502_v25  ;;  %v2202_v44 = vadd.f32 %v3501_v56, %v5266_v28 }
 0x1fc   : > { %3067 = vst [vmem:[%s5105_s11 + $0x40] sm:$0xff] %v3008_v41   ;;  %v2410_v2 = vadd.f32 %v2409_v55, %v2339_v27  ;;  %v2478_v12 = vadd.f32 %v2477_v19, %v2447_v45  ;;  %v2347_v62 = vadd.f32 %v2346_v33, %v2186_v49 }
 0x1fd   : > { %v3586_v0 = vpop.f32.mrf.mxu0  ;;  %v3506_v35 = vpop.f32.mrf.mxu1  ;;  %v2452_v54 = vmul.f32 %v2355_v48, %v2355_v48  ;;  %v2205_v32 = vadd.f32 %v3504_v3, %v5269_v38 }
 0x1fe   : > { %v2358_v18 = vadd.f32 %v3586_v0, %v2197_v22  ;;  %v2479_v4 = vadd.f32 %v2478_v12, %v2448_v42  ;;  %v2411_v6 = vadd.f32 %v2410_v2, %v2342_v21  ;;  %v3507_v58 = vadd.f32 %v3506_v35, %v3505_v50 }
 0x1ff   : > { %v2349_v34 = vpop.f32.mrf.mxu0  ;;  %v3508_v7 = vpop.f32.mrf.mxu1  ;;  %v2450_v36 = vmul.f32 %v2347_v62, %v2347_v62 }
 0x200   : > { %v3023_v9 = vpack.c.bf16 %v2358_v18, %v2355_v48  ;;  %v2350_v57 = vadd.f32 %v2349_v34, %v2189_v60  ;;  %v2412_v11 = vadd.f32 %v2411_v6, %v2347_v62  ;;  %v2480_v13 = vadd.f32 %v2479_v4, %v2449_v20  ;;  %v5271_v6 = vld [vmem:[#allocation11_spill] sm:$0xff] }
 0x201   : > { %v3589_v15 = vpop.f32.mrf.mxu0  ;;  %v3509_v24 = vpop.f32.mrf.mxu1  ;;  %v2210_v39 = vadd.f32 %v3507_v58, %v5267_v1  ;;  %v2453_v25 = vmul.f32 %v2358_v18, %v2358_v18 }
 0x202   : > { %3070 = vst [vmem:[%s5105_s11 + $0x58] sm:$0xff] %v3023_v9   ;;  %v2451_v10 = vmul.f32 %v2350_v57, %v2350_v57  ;;  %v3018_v17 = vpack.c.bf16 %v2350_v57, %v2347_v62  ;;  %v2481_v51 = vadd.f32 %v2480_v13, %v2450_v36  ;;  %v3510_v5 = vadd.f32 %v3509_v24, %v3508_v7  ;;  %v5270_v62 = vld [vmem:[#allocation10_spill] sm:$0xff] }
 0x203   : > { %v2413_v61 = vadd.f32 %v2412_v11, %v2350_v57  ;;  %v2362_v27 = vpop.f32.mrf.mxu0  ;;  %v3511_v21 = vpop.f32.mrf.mxu1  ;;  %v2371_v40 = vadd.f32 %v3589_v15, %v2210_v39 }
 0x204   : > { %3069 = vst [vmem:[%s5105_s11 + $0x50] sm:$0xff] %v3018_v17   ;;  %v2482_v37 = vadd.f32 %v2481_v51, %v2451_v10  ;;  %v2363_v31 = vadd.f32 %v2362_v27, %v2202_v44  ;;  %v2213_v46 = vadd.f32 %v3510_v5, %v5268_v30 }
 0x205   : > { %v2414_v16 = vadd.f32 %v2413_v61, %v2355_v48  ;;  %v3590_v63 = vpop.f32.mrf.mxu0  ;;  %v3512_v59 = vpop.f32.mrf.mxu1 }
 0x206   : > { %v2483_v23 = vadd.f32 %v2482_v37, %v2452_v54  ;;  %v3513_v8 = vadd.f32 %v3512_v59, %v3511_v21  ;;  %v2374_v53 = vadd.f32 %v3590_v63, %v2213_v46  ;;  %v2454_v49 = vmul.f32 %v2363_v31, %v2363_v31  ;;  %v5272_v21 = vld [vmem:[#allocation12_spill] sm:$0xff] }
 0x207   : > { %v2415_v47 = vadd.f32 %v2414_v16, %v2358_v18  ;;  %v2365_v45 = vpop.f32.mrf.mxu0  ;;  %v3514_v41 = vpop.f32.mrf.mxu1  ;;  %v2456_v18 = vmul.f32 %v2371_v40, %v2371_v40 }
 0x208   : > { %v2366_v19 = vadd.f32 %v2365_v45, %v2205_v32  ;;  %v2484_v33 = vadd.f32 %v2483_v23, %v2453_v25  ;;  %v3033_v50 = vpack.c.bf16 %v2374_v53, %v2371_v40  ;;  %v2218_v0 = vadd.f32 %v3513_v8, %v5270_v62 }
 0x209   : > { %v2416_v55 = vadd.f32 %v2415_v47, %v2363_v31  ;;  %v3593_v52 = vpop.f32.mrf.mxu0  ;;  %v3515_v43 = vpop.f32.mrf.mxu1  ;;  %v2457_v58 = vmul.f32 %v2374_v53, %v2374_v53 }
 0x20a   : > { %v2455_v29 = vmul.f32 %v2366_v19, %v2366_v19  ;;  %v3028_v22 = vpack.c.bf16 %v2366_v19, %v2363_v31  ;;  %v2485_v42 = vadd.f32 %v2484_v33, %v2454_v49  ;;  %3072 = vst [vmem:[%s5105_s11 + $0x68] sm:$0xff] %v3033_v50   ;;  %v3516_v2 = vadd.f32 %v3515_v43, %v3514_v41 }
 0x20b   : > { %v2417_v12 = vadd.f32 %v2416_v55, %v2366_v19  ;;  %v2378_v48 = vpop.f32.mrf.mxu0  ;;  %v3517_v35 = vpop.f32.mrf.mxu1 }
 0x20c   : > { %3071 = vst [vmem:[%s5105_s11 + $0x60] sm:$0xff] %v3028_v22   ;;  %v2486_v60 = vadd.f32 %v2485_v42, %v2455_v29  ;;  %v2379_v56 = vadd.f32 %v2378_v48, %v2218_v0  ;;  %v2221_v34 = vadd.f32 %v3516_v2, %v5271_v6 }
 0x20d   : > { %v2418_v14 = vadd.f32 %v2417_v12, %v2371_v40  ;;  %v3594_v20 = vpop.f32.mrf.mxu0  ;;  %v3518_v4 = vpop.f32.mrf.mxu1 }
 0x20e   : > { %v2487_v7 = vadd.f32 %v2486_v60, %v2456_v18  ;;  %v3519_v9 = vadd.f32 %v3518_v4, %v3517_v35  ;;  %v2458_v24 = vmul.f32 %v2379_v56, %v2379_v56 }
 0x20f   : > { %v2419_v57 = vadd.f32 %v2418_v14, %v2374_v53  ;;  %v2381_v11 = vpop.f32.mrf.mxu0  ;;  %v3520_v36 = vpop.f32.mrf.mxu1 }
 0x210   : > { %v2382_v13 = vadd.f32 %v2381_v11, %v2221_v34  ;;  %v2226_v15 = vadd.f32 %v3519_v9, %v5067_v26  ;;  %v2488_v10 = vadd.f32 %v2487_v7, %v2457_v58 }
 0x211   : > { %v2420_v3 = vadd.f32 %v2419_v57, %v2379_v56  ;;  %v3521_v17 = vpop.f32.mrf.mxu1 }
 0x212   : > { %v2459_v51 = vmul.f32 %v2382_v13, %v2382_v13  ;;  %v3038_v5 = vpack.c.bf16 %v2382_v13, %v2379_v56  ;;  %v2387_v61 = vadd.f32 %v3593_v52, %v2226_v15  ;;  %v2489_v28 = vadd.f32 %v2488_v10, %v2458_v24 }
 0x213   : > { %v3522_v44 = vadd.f32 %v3521_v17, %v3520_v36  ;;  %v2421_v27 = vadd.f32 %v2420_v3, %v2382_v13 }
 0x214   : > { %3073 = vst [vmem:[%s5105_s11 + $0x70] sm:$0xff] %v3038_v5   ;;  %v2460_v54 = vmul.f32 %v2387_v61, %v2387_v61  ;;  %v2490_v16 = vadd.f32 %v2489_v28, %v2459_v51 }
 0x215   : > { %v2229_v1 = vadd.f32 %v3522_v44, %v5272_v21  ;;  %v2422_v39 = vadd.f32 %v2421_v27, %v2387_v61 }
 0x216   : > { %v2491_v26 = vadd.f32 %v2490_v16, %v2460_v54 }
 0x217   : > { %v2390_v37 = vadd.f32 %v3594_v20, %v2229_v1 }
 0x219   : > { %v2461_v31 = vmul.f32 %v2390_v37, %v2390_v37  ;;  %v3043_v30 = vpack.c.bf16 %v2390_v37, %v2387_v61  ;;  %v2423_v46 = vadd.f32 %v2422_v39, %v2390_v37 }
 0x21b   : > { %3074 = vst [vmem:[%s5105_s11 + $0x78] sm:$0xff] %v3043_v30   ;;  %v2424_v63 = vrot.slane %v2423_v46, 4  ;;  %v2492_v25 = vadd.f32 %v2491_v26, %v2461_v31 }
 0x21d   : > { %v2425_v40 = vadd.f32 %v2424_v63, %v2423_v46  ;;  %v2493_v59 = vrot.slane %v2492_v25, 4 }
 0x21f   : > { %v2426_v38 = vrot.slane %v2425_v40, 2  ;;  %v2494_v32 = vadd.f32 %v2493_v59, %v2492_v25 }
 0x221   : > { %v2427_v23 = vadd.f32 %v2426_v38, %v2425_v40  ;;  %v2495_v8 = vrot.slane %v2494_v32, 2 }
 0x223   : > { %v2428_v47 = vrot.slane %v2427_v23, 1  ;;  %v2496_v53 = vadd.f32 %v2495_v8, %v2494_v32 }
 0x225   : > { %v2497_v45 = vrot.slane %v2496_v53, 1  ;;  %v2429_v41 = vadd.f32 %v2428_v47, %v2427_v23 }
 0x227   : > { %v2498_v19 = vadd.f32 %v2497_v45, %v2496_v53 }
 0x229   : > { %v2500_v55 = vsel %vm2499_vm9, %v2429_v41, %v2498_v19 }
 0x22a   : > { %2501 = vst [vmem:[%s262_s15] sm:$0x3] %v2500_v55 }
 0x22b PF: > { %s17_s21 = sadd.s32 1, %s3708_s21  }
 0x22c   : > { %p14_p4 = scmp.ge.s32.totalorder %s17_s21, 4  }
 0x22e   :  { %16 = sbr.rel (!%p14_p4) target bundleno = 1 (0x1), region = 83 }

</bundles_post_ra>
